<compile_context>
chip_gen: v7x
topology: tpu7x:2x2x1
jax: 0.10.0
libtpu: 0.0.40
codegen_flags: <defaults>
</compile_context>

<pallas_src>
import functools

import jax
import jax.numpy as jnp
from jax.experimental import pallas as pl
from jax.experimental.pallas import tpu as pltpu


# ---------------------------------------------------------------------------
# Small in-kernel constant builders (iota / where / concat only)
# ---------------------------------------------------------------------------
def _eq_mat(nrows, ncols, fn):
    """0/1 f32 matrix M[r, c] = fn(r, c)."""
    r = jax.lax.broadcasted_iota(jnp.int32, (nrows, ncols), 0)
    c = jax.lax.broadcasted_iota(jnp.int32, (nrows, ncols), 1)
    return jnp.where(fn(r, c), jnp.float32(1.0), jnp.float32(0.0))


def _block_diag(m, nb):
    """Block-diagonal replication of m, nb times (built with concats only)."""
    if nb == 1:
        return m
    a, b = m.shape
    rows = []
    for i in range(nb):
        pieces = []
        if i > 0:
            pieces.append(jnp.zeros((a, i * b), jnp.float32))
        pieces.append(m)
        if i < nb - 1:
            pieces.append(jnp.zeros((a, (nb - 1 - i) * b), jnp.float32))
        rows.append(pieces[0] if len(pieces) == 1 else
                    jnp.concatenate(pieces, axis=1))
    return jnp.concatenate(rows, axis=0)


# ---------------------------------------------------------------------------
# Fused kernel: 4x (conv3x3 s2 p1 + InstanceNorm + LeakyReLU) + 1x1 conv
# ---------------------------------------------------------------------------
def _fused_disc_kernel(x_ref, a1, a2, a3, a4, w5_ref, o_ref, *,
                       layer_dims, nb, hin0, win0):
    f32 = jnp.float32
    a_refs = (a1, a2, a3, a4)

    cur = x_ref[...]                      # (nb*H, W*Cin) stacked NHWC rows
    hin, win = hin0, win0

    for l, (cin, cout) in enumerate(layer_dims):
        hp, wp = hin + 2, win + 2
        ho, wo = hin // 2, win // 2

        # --- zero padding: columns via lane-concat, rows via 0/1 expansion ---
        zc = jnp.zeros((nb * hin, cin), f32)
        xc = jnp.concatenate([zc, cur, zc], axis=1)            # (nb*hin, wp*cin)
        erow = _block_diag(_eq_mat(hp, hin, lambda r, o: r == o + 1), nb)
        xp = jnp.dot(erow, xc, preferred_element_type=f32)     # (nb*hp, wp*cin)

        # --- conv 3x3 / stride 2 (bias omitted: cancelled by InstanceNorm) ---
        y = None
        for kh in range(3):
            sel = _block_diag(
                _eq_mat(ho, hp, lambda o, h: h == 2 * o + kh), nb)
            rk = jnp.dot(sel, xp, preferred_element_type=f32)  # (nb*ho, wp*cin)
            t = jnp.dot(rk, a_refs[l][kh],
                        preferred_element_type=f32)            # (nb*ho, wo*cout)
            y = t if y is None else y + t

        # --- InstanceNorm2d (per sample, per channel, biased var) one-pass ---
        sum_rows = _block_diag(jnp.ones((1, ho), f32), nb)     # (nb, nb*ho)
        bc_rows = _block_diag(jnp.ones((ho, 1), f32), nb)      # (nb*ho, nb)
        rs1 = jnp.dot(sum_rows, y, preferred_element_type=f32)       # (nb, wo*cout)
        rs2 = jnp.dot(sum_rows, y * y, preferred_element_type=f32)
        s1 = jnp.zeros((nb, cout), f32)
        s2 = jnp.zeros((nb, cout), f32)
        for j in range(wo):
            s1 = s1 + rs1[:, j * cout:(j + 1) * cout]
            s2 = s2 + rs2[:, j * cout:(j + 1) * cout]
        inv_n = 1.0 / float(ho * wo)
        mean = s1 * inv_n
        var = s2 * inv_n - mean * mean
        rstd = jax.lax.rsqrt(var + 1e-5)
        mean_b = jnp.concatenate(
            [jnp.dot(bc_rows, mean, preferred_element_type=f32)] * wo, axis=1)
        rstd_b = jnp.concatenate(
            [jnp.dot(bc_rows, rstd, preferred_element_type=f32)] * wo, axis=1)
        yn = (y - mean_b) * rstd_b
        cur = jnp.where(yn >= 0.0, yn, 0.2 * yn)               # LeakyReLU(0.2)

        hin, win = ho, wo

    # --- fused 1x1 conv epilogue (bias folded into augmented weight) ---
    ones_col = jnp.ones((cur.shape[0], 1), f32)
    cur_aug = jnp.concatenate([cur, ones_col], axis=1)
    o_ref[...] = jnp.dot(cur_aug, w5_ref[...], preferred_element_type=f32)


# ---------------------------------------------------------------------------
# Host-side weight expansion (plain JAX, done once)
# ---------------------------------------------------------------------------
def _expand_conv_weight(w, win):
    """w: (3,3,Cin,Cout) HWIO -> (3, (win+2)*Cin, (win//2)*Cout) banded mats."""
    cin, cout = w.shape[2], w.shape[3]
    wp, wo = win + 2, win // 2
    a = jnp.zeros((3, wp, cin, wo, cout), jnp.float32)
    j = jnp.arange(wo)
    for kh in range(3):
        for kw in range(3):
            a = a.at[kh, 2 * j + kw, :, j, :].set(
                jnp.broadcast_to(w[kh, kw], (wo, cin, cout)))
    return a.reshape(3, wp * cin, wo * cout)


def _expand_conv5(w5, b5, wo4):
    """w5: (1,1,128,1), b5: (1,) -> (wo4*128 + 1, wo4) (bias in last row)."""
    c = w5.shape[2]
    w5v = w5.reshape(c, 1)
    big = jnp.kron(jnp.eye(wo4, dtype=jnp.float32), w5v)       # (wo4*c, wo4)
    bias_row = jnp.broadcast_to(b5.reshape(1, 1), (1, wo4))
    return jnp.concatenate([big, bias_row], axis=0)


# ---------------------------------------------------------------------------
# Full Discriminator forward (one fused pallas_call)
# ---------------------------------------------------------------------------
def discriminator_forward(x, params, samples_per_step=2):
    # x: NCHW (or 5D (B, T, C, H, W)); returns NCHW (N, 1, H/16, W/16)
    if x.ndim == 5:
        x = x.reshape((-1,) + x.shape[2:])
    n, cin0, h, w = x.shape
    assert h % 16 == 0 and w % 16 == 0, "H, W must be multiples of 16"
    assert h <= 64 and w <= 64  # TODO(synk): spatial halo tiling for larger inputs

    nb = samples_per_step if n % samples_per_step == 0 else 1
    ho4, wo4 = h // 16, w // 16

    # NCHW -> NHWC -> (groups, nb*H, W*C) stacked rows (free reshapes)
    xh = jnp.transpose(x, (0, 2, 3, 1)).reshape(n // nb, nb * h, w * cin0)

    # expanded banded conv weights (read once into VMEM: constant index_map)
    a_mats = []
    win = w
    for (wgt, _b) in params[:4]:
        a_mats.append(_expand_conv_weight(wgt, win))
        win //= 2
    w5aug = _expand_conv5(params[4][0], params[4][1], wo4)

    layer_dims = tuple((p[0].shape[2], p[0].shape[3]) for p in params[:4])
    kernel = functools.partial(_fused_disc_kernel, layer_dims=layer_dims,
                               nb=nb, hin0=h, win0=w)

    in_specs = [pl.BlockSpec((None, nb * h, w * cin0), lambda i: (i, 0, 0))]
    for a in a_mats:
        in_specs.append(pl.BlockSpec(a.shape, lambda i: (0, 0, 0)))
    in_specs.append(pl.BlockSpec(w5aug.shape, lambda i: (0, 0)))

    out = pl.pallas_call(
        kernel,
        out_shape=jax.ShapeDtypeStruct((n // nb, nb * ho4, wo4), jnp.float32),
        grid=(n // nb,),
        in_specs=in_specs,
        out_specs=pl.BlockSpec((None, nb * ho4, wo4), lambda i: (i, 0, 0)),
        compiler_params=pltpu.CompilerParams(
            dimension_semantics=("parallel",)),
    )(xh, *a_mats, w5aug)

    return out.reshape(n, ho4, wo4)[:, None, :, :]


# ---------------------------------------------------------------------------
# Pure-JAX reference (for correctness check; includes the conv biases)
# ---------------------------------------------------------------------------
def reference_forward(x, params):
    if x.ndim == 5:
        x = x.reshape((-1,) + x.shape[2:])
    y = jnp.transpose(x, (0, 2, 3, 1))
    dn = ("NHWC", "HWIO", "NHWC")
    for (w, b) in params[:4]:
        y = jax.lax.conv_general_dilated(
            y, w, (2, 2), ((1, 1), (1, 1)), dimension_numbers=dn) + b
        mean = jnp.mean(y, axis=(1, 2), keepdims=True)
        var = jnp.mean(jnp.square(y - mean), axis=(1, 2), keepdims=True)
        y = (y - mean) * jax.lax.rsqrt(var + 1e-5)
        y = jnp.where(y >= 0.0, y, 0.2 * y)
    w5, b5 = params[4]
    y = jax.lax.conv_general_dilated(
        y, w5, (1, 1), "VALID", dimension_numbers=dn) + b5
    return jnp.transpose(y, (0, 3, 1, 2))


# ---------------------------------------------------------------------------
# Deterministic parameter init (shapes from DiscriminatorFrame.__init__)
# ---------------------------------------------------------------------------
def init_params(key):
    layer_dims = [(3, 16), (16, 32), (32, 64), (64, 128)]
    params = []
    for (cin, cout) in layer_dims:
        key, kw, kb = jax.random.split(key, 3)
        wgt = jax.random.normal(kw, (3, 3, cin, cout), jnp.float32) * 0.1
        b = jax.random.normal(kb, (cout,), jnp.float32) * 0.1
        params.append((wgt, b))
    key, kw, kb = jax.random.split(key, 3)
    w5 = jax.random.normal(kw, (1, 1, 128, 1), jnp.float32) * 0.1
    b5 = jax.random.normal(kb, (1,), jnp.float32) * 0.1
    params.append((w5, b5))
    return params


if __name__ == "__main__":
    root = jax.random.PRNGKey(0)
    k_in, k_par = jax.random.split(root)
    # 5D input (B, T, C, H, W) exercises the reshape path in Discriminator.forward
    x = jax.random.normal(k_in, (2, 2, 3, 32, 32), jnp.float32)
    params = init_params(k_par)

    fwd = jax.jit(lambda xx: discriminator_forward(xx, params))
    out = jax.block_until_ready(fwd(x))

    ref = jax.block_until_ready(reference_forward(x, params))
    assert out.shape == (4, 1, 2, 2), out.shape
    err = float(jnp.max(jnp.abs(out - ref)))
    assert err < 2e-3, err
    print("KERNEL_OK")
</pallas_src>

<mosaic_0001>
module attributes {stable_mosaic.version = 11 : i64} {
  func.func @_fused_disc_kernel(%arg0: i32, %arg1: memref<1x64x96xf32, #tpu.memory_space<vmem>>, %arg2: memref<3x102x256xf32, #tpu.memory_space<vmem>>, %arg3: memref<3x288x256xf32, #tpu.memory_space<vmem>>, %arg4: memref<3x320x256xf32, #tpu.memory_space<vmem>>, %arg5: memref<3x384x256xf32, #tpu.memory_space<vmem>>, %arg6: memref<257x2xf32, #tpu.memory_space<vmem>>, %arg7: memref<1x4x2xf32, #tpu.memory_space<vmem>>) attributes {dimension_semantics = [#tpu.dimension_semantics<parallel>], iteration_bounds = array<i64: 2>, scalar_prefetch = 0 : i64, scratch_operands = 0 : i64, tpu.core_type = #tpu.core_type<tc>, window_params = [{transform_indices = @transform_0, window_bounds = array<i64: 1, 64, 96>}, {pipeline_mode = #tpu.pipeline_mode<synchronous>, transform_indices = @transform_1, window_bounds = array<i64: 3, 102, 256>}, {pipeline_mode = #tpu.pipeline_mode<synchronous>, transform_indices = @transform_2, window_bounds = array<i64: 3, 288, 256>}, {pipeline_mode = #tpu.pipeline_mode<synchronous>, transform_indices = @transform_3, window_bounds = array<i64: 3, 320, 256>}, {pipeline_mode = #tpu.pipeline_mode<synchronous>, transform_indices = @transform_4, window_bounds = array<i64: 3, 384, 256>}, {pipeline_mode = #tpu.pipeline_mode<synchronous>, transform_indices = @transform_5, window_bounds = array<i64: 257, 2>}, {transform_indices = @transform_6, window_bounds = array<i64: 1, 4, 2>}]} {
    %c0 = arith.constant 0 : index
    %c0_0 = arith.constant 0 : index
    %c0_1 = arith.constant 0 : index
    %0 = vector.load %arg1[%c0, %c0_0, %c0_1] : memref<1x64x96xf32, #tpu.memory_space<vmem>>, vector<1x64x96xf32>
    %1 = vector.shape_cast %0 : vector<1x64x96xf32> to vector<64x96xf32>
    %cst = arith.constant 0.000000e+00 : f32
    %2 = vector.broadcast %cst : f32 to vector<64x3xf32>
    %3 = tpu.concatenate %2, %1, %2 in 1 : vector<64x3xf32>, vector<64x96xf32>, vector<64x3xf32> -> vector<64x102xf32>
    %4 = tpu.iota {dimensions = array<i32: 0>} : vector<34x32xi32>
    %5 = tpu.iota {dimensions = array<i32: 1>} : vector<34x32xi32>
    %c1_i32 = arith.constant 1 : i32
    %6 = vector.broadcast %c1_i32 : i32 to vector<34x32xi32>
    %7 = arith.addi %5, %6 : vector<34x32xi32>
    %8 = arith.cmpi eq, %4, %7 : vector<34x32xi32>
    %cst_2 = arith.constant 1.000000e+00 : f32
    %cst_3 = arith.constant 0.000000e+00 : f32
    %9 = vector.broadcast %cst_2 : f32 to vector<34x32xf32>
    %10 = vector.broadcast %cst_3 : f32 to vector<34x32xf32>
    %11 = arith.select %8, %9, %10 : vector<34x32xi1>, vector<34x32xf32>
    %cst_4 = arith.constant 0.000000e+00 : f32
    %12 = vector.broadcast %cst_4 : f32 to vector<34x32xf32>
    %13 = tpu.concatenate %11, %12 in 1 : vector<34x32xf32>, vector<34x32xf32> -> vector<34x64xf32>
    %cst_5 = arith.constant 0.000000e+00 : f32
    %14 = vector.broadcast %cst_5 : f32 to vector<34x32xf32>
    %15 = tpu.concatenate %14, %11 in 1 : vector<34x32xf32>, vector<34x32xf32> -> vector<34x64xf32>
    %16 = tpu.concatenate %13, %15 in 0 : vector<34x64xf32>, vector<34x64xf32> -> vector<68x64xf32>
    %cst_6 = arith.constant dense<0.000000e+00> : vector<68x102xf32>
    %17 = tpu.matmul %16, %3, %cst_6 {dimension_numbers = #tpu.dot_dimension_numbers<[1], [0], [0], [1], [0, 0, 1, 1], [], []>} : vector<68x64xf32>, vector<64x102xf32>, vector<68x102xf32> -> vector<68x102xf32>
    %18 = tpu.iota {dimensions = array<i32: 0>} : vector<16x34xi32>
    %19 = tpu.iota {dimensions = array<i32: 1>} : vector<16x34xi32>
    %c2_i32 = arith.constant 2 : i32
    %20 = vector.broadcast %c2_i32 : i32 to vector<16x34xi32>
    %21 = arith.muli %20, %18 : vector<16x34xi32>
    %c0_i32 = arith.constant 0 : i32
    %22 = vector.broadcast %c0_i32 : i32 to vector<16x34xi32>
    %23 = arith.addi %21, %22 : vector<16x34xi32>
    %24 = arith.cmpi eq, %19, %23 : vector<16x34xi32>
    %cst_7 = arith.constant 1.000000e+00 : f32
    %cst_8 = arith.constant 0.000000e+00 : f32
    %25 = vector.broadcast %cst_7 : f32 to vector<16x34xf32>
    %26 = vector.broadcast %cst_8 : f32 to vector<16x34xf32>
    %27 = arith.select %24, %25, %26 : vector<16x34xi1>, vector<16x34xf32>
    %cst_9 = arith.constant 0.000000e+00 : f32
    %28 = vector.broadcast %cst_9 : f32 to vector<16x34xf32>
    %29 = tpu.concatenate %27, %28 in 1 : vector<16x34xf32>, vector<16x34xf32> -> vector<16x68xf32>
    %cst_10 = arith.constant 0.000000e+00 : f32
    %30 = vector.broadcast %cst_10 : f32 to vector<16x34xf32>
    %31 = tpu.concatenate %30, %27 in 1 : vector<16x34xf32>, vector<16x34xf32> -> vector<16x68xf32>
    %32 = tpu.concatenate %29, %31 in 0 : vector<16x68xf32>, vector<16x68xf32> -> vector<32x68xf32>
    %cst_11 = arith.constant dense<0.000000e+00> : vector<32x102xf32>
    %33 = tpu.matmul %32, %17, %cst_11 {dimension_numbers = #tpu.dot_dimension_numbers<[1], [0], [0], [1], [0, 0, 1, 1], [], []>} : vector<32x68xf32>, vector<68x102xf32>, vector<32x102xf32> -> vector<32x102xf32>
    %c0_12 = arith.constant 0 : index
    %c0_13 = arith.constant 0 : index
    %c0_14 = arith.constant 0 : index
    %34 = vector.load %arg2[%c0_12, %c0_13, %c0_14] : memref<3x102x256xf32, #tpu.memory_space<vmem>>, vector<1x102x256xf32>
    %35 = vector.shape_cast %34 : vector<1x102x256xf32> to vector<102x256xf32>
    %cst_15 = arith.constant dense<0.000000e+00> : vector<32x256xf32>
    %36 = tpu.matmul %33, %35, %cst_15 {dimension_numbers = #tpu.dot_dimension_numbers<[1], [0], [0], [1], [0, 0, 1, 1], [], []>} : vector<32x102xf32>, vector<102x256xf32>, vector<32x256xf32> -> vector<32x256xf32>
    %37 = tpu.iota {dimensions = array<i32: 0>} : vector<16x34xi32>
    %38 = tpu.iota {dimensions = array<i32: 1>} : vector<16x34xi32>
    %c2_i32_16 = arith.constant 2 : i32
    %39 = vector.broadcast %c2_i32_16 : i32 to vector<16x34xi32>
    %40 = arith.muli %39, %37 : vector<16x34xi32>
    %c1_i32_17 = arith.constant 1 : i32
    %41 = vector.broadcast %c1_i32_17 : i32 to vector<16x34xi32>
    %42 = arith.addi %40, %41 : vector<16x34xi32>
    %43 = arith.cmpi eq, %38, %42 : vector<16x34xi32>
    %cst_18 = arith.constant 1.000000e+00 : f32
    %cst_19 = arith.constant 0.000000e+00 : f32
    %44 = vector.broadcast %cst_18 : f32 to vector<16x34xf32>
    %45 = vector.broadcast %cst_19 : f32 to vector<16x34xf32>
    %46 = arith.select %43, %44, %45 : vector<16x34xi1>, vector<16x34xf32>
    %cst_20 = arith.constant 0.000000e+00 : f32
    %47 = vector.broadcast %cst_20 : f32 to vector<16x34xf32>
    %48 = tpu.concatenate %46, %47 in 1 : vector<16x34xf32>, vector<16x34xf32> -> vector<16x68xf32>
    %cst_21 = arith.constant 0.000000e+00 : f32
    %49 = vector.broadcast %cst_21 : f32 to vector<16x34xf32>
    %50 = tpu.concatenate %49, %46 in 1 : vector<16x34xf32>, vector<16x34xf32> -> vector<16x68xf32>
    %51 = tpu.concatenate %48, %50 in 0 : vector<16x68xf32>, vector<16x68xf32> -> vector<32x68xf32>
    %cst_22 = arith.constant dense<0.000000e+00> : vector<32x102xf32>
    %52 = tpu.matmul %51, %17, %cst_22 {dimension_numbers = #tpu.dot_dimension_numbers<[1], [0], [0], [1], [0, 0, 1, 1], [], []>} : vector<32x68xf32>, vector<68x102xf32>, vector<32x102xf32> -> vector<32x102xf32>
    %c1 = arith.constant 1 : index
    %c0_23 = arith.constant 0 : index
    %c0_24 = arith.constant 0 : index
    %53 = vector.load %arg2[%c1, %c0_23, %c0_24] : memref<3x102x256xf32, #tpu.memory_space<vmem>>, vector<1x102x256xf32>
    %54 = vector.shape_cast %53 : vector<1x102x256xf32> to vector<102x256xf32>
    %cst_25 = arith.constant dense<0.000000e+00> : vector<32x256xf32>
    %55 = tpu.matmul %52, %54, %cst_25 {dimension_numbers = #tpu.dot_dimension_numbers<[1], [0], [0], [1], [0, 0, 1, 1], [], []>} : vector<32x102xf32>, vector<102x256xf32>, vector<32x256xf32> -> vector<32x256xf32>
    %56 = arith.addf %36, %55 : vector<32x256xf32>
    %57 = tpu.iota {dimensions = array<i32: 0>} : vector<16x34xi32>
    %58 = tpu.iota {dimensions = array<i32: 1>} : vector<16x34xi32>
    %c2_i32_26 = arith.constant 2 : i32
    %59 = vector.broadcast %c2_i32_26 : i32 to vector<16x34xi32>
    %60 = arith.muli %59, %57 : vector<16x34xi32>
    %c2_i32_27 = arith.constant 2 : i32
    %61 = vector.broadcast %c2_i32_27 : i32 to vector<16x34xi32>
    %62 = arith.addi %60, %61 : vector<16x34xi32>
    %63 = arith.cmpi eq, %58, %62 : vector<16x34xi32>
    %cst_28 = arith.constant 1.000000e+00 : f32
    %cst_29 = arith.constant 0.000000e+00 : f32
    %64 = vector.broadcast %cst_28 : f32 to vector<16x34xf32>
    %65 = vector.broadcast %cst_29 : f32 to vector<16x34xf32>
    %66 = arith.select %63, %64, %65 : vector<16x34xi1>, vector<16x34xf32>
    %cst_30 = arith.constant 0.000000e+00 : f32
    %67 = vector.broadcast %cst_30 : f32 to vector<16x34xf32>
    %68 = tpu.concatenate %66, %67 in 1 : vector<16x34xf32>, vector<16x34xf32> -> vector<16x68xf32>
    %cst_31 = arith.constant 0.000000e+00 : f32
    %69 = vector.broadcast %cst_31 : f32 to vector<16x34xf32>
    %70 = tpu.concatenate %69, %66 in 1 : vector<16x34xf32>, vector<16x34xf32> -> vector<16x68xf32>
    %71 = tpu.concatenate %68, %70 in 0 : vector<16x68xf32>, vector<16x68xf32> -> vector<32x68xf32>
    %cst_32 = arith.constant dense<0.000000e+00> : vector<32x102xf32>
    %72 = tpu.matmul %71, %17, %cst_32 {dimension_numbers = #tpu.dot_dimension_numbers<[1], [0], [0], [1], [0, 0, 1, 1], [], []>} : vector<32x68xf32>, vector<68x102xf32>, vector<32x102xf32> -> vector<32x102xf32>
    %c2 = arith.constant 2 : index
    %c0_33 = arith.constant 0 : index
    %c0_34 = arith.constant 0 : index
    %73 = vector.load %arg2[%c2, %c0_33, %c0_34] : memref<3x102x256xf32, #tpu.memory_space<vmem>>, vector<1x102x256xf32>
    %74 = vector.shape_cast %73 : vector<1x102x256xf32> to vector<102x256xf32>
    %cst_35 = arith.constant dense<0.000000e+00> : vector<32x256xf32>
    %75 = tpu.matmul %72, %74, %cst_35 {dimension_numbers = #tpu.dot_dimension_numbers<[1], [0], [0], [1], [0, 0, 1, 1], [], []>} : vector<32x102xf32>, vector<102x256xf32>, vector<32x256xf32> -> vector<32x256xf32>
    %76 = arith.addf %56, %75 : vector<32x256xf32>
    %cst_36 = arith.constant 1.000000e+00 : f32
    %77 = vector.broadcast %cst_36 : f32 to vector<1x16xf32>
    %cst_37 = arith.constant 0.000000e+00 : f32
    %78 = vector.broadcast %cst_37 : f32 to vector<1x16xf32>
    %79 = tpu.concatenate %77, %78 in 1 : vector<1x16xf32>, vector<1x16xf32> -> vector<1x32xf32>
    %cst_38 = arith.constant 0.000000e+00 : f32
    %80 = vector.broadcast %cst_38 : f32 to vector<1x16xf32>
    %81 = tpu.concatenate %80, %77 in 1 : vector<1x16xf32>, vector<1x16xf32> -> vector<1x32xf32>
    %82 = tpu.concatenate %79, %81 in 0 : vector<1x32xf32>, vector<1x32xf32> -> vector<2x32xf32>
    %cst_39 = arith.constant 1.000000e+00 : f32
    %83 = vector.broadcast %cst_39 : f32 to vector<16x1xf32>
    %cst_40 = arith.constant 0.000000e+00 : f32
    %84 = vector.broadcast %cst_40 : f32 to vector<16x1xf32>
    %85 = tpu.concatenate %83, %84 in 1 : vector<16x1xf32>, vector<16x1xf32> -> vector<16x2xf32>
    %cst_41 = arith.constant 0.000000e+00 : f32
    %86 = vector.broadcast %cst_41 : f32 to vector<16x1xf32>
    %87 = tpu.concatenate %86, %83 in 1 : vector<16x1xf32>, vector<16x1xf32> -> vector<16x2xf32>
    %88 = tpu.concatenate %85, %87 in 0 : vector<16x2xf32>, vector<16x2xf32> -> vector<32x2xf32>
    %cst_42 = arith.constant dense<0.000000e+00> : vector<2x256xf32>
    %89 = tpu.matmul %82, %76, %cst_42 {dimension_numbers = #tpu.dot_dimension_numbers<[1], [0], [0], [1], [0, 0, 1, 1], [], []>} : vector<2x32xf32>, vector<32x256xf32>, vector<2x256xf32> -> vector<2x256xf32>
    %90 = arith.mulf %76, %76 : vector<32x256xf32>
    %cst_43 = arith.constant dense<0.000000e+00> : vector<2x256xf32>
    %91 = tpu.matmul %82, %90, %cst_43 {dimension_numbers = #tpu.dot_dimension_numbers<[1], [0], [0], [1], [0, 0, 1, 1], [], []>} : vector<2x32xf32>, vector<32x256xf32>, vector<2x256xf32> -> vector<2x256xf32>
    %cst_44 = arith.constant 0.000000e+00 : f32
    %92 = vector.broadcast %cst_44 : f32 to vector<2x16xf32>
    %cst_45 = arith.constant 0.000000e+00 : f32
    %93 = vector.broadcast %cst_45 : f32 to vector<2x16xf32>
    %94 = vector.extract_strided_slice %89 {offsets = [0, 0], sizes = [2, 16], strides = [1, 1]} : vector<2x256xf32> to vector<2x16xf32>
    %95 = arith.addf %92, %94 : vector<2x16xf32>
    %96 = vector.extract_strided_slice %91 {offsets = [0, 0], sizes = [2, 16], strides = [1, 1]} : vector<2x256xf32> to vector<2x16xf32>
    %97 = arith.addf %93, %96 : vector<2x16xf32>
    %98 = vector.extract_strided_slice %89 {offsets = [0, 16], sizes = [2, 16], strides = [1, 1]} : vector<2x256xf32> to vector<2x16xf32>
    %99 = arith.addf %95, %98 : vector<2x16xf32>
    %100 = vector.extract_strided_slice %91 {offsets = [0, 16], sizes = [2, 16], strides = [1, 1]} : vector<2x256xf32> to vector<2x16xf32>
    %101 = arith.addf %97, %100 : vector<2x16xf32>
    %102 = vector.extract_strided_slice %89 {offsets = [0, 32], sizes = [2, 16], strides = [1, 1]} : vector<2x256xf32> to vector<2x16xf32>
    %103 = arith.addf %99, %102 : vector<2x16xf32>
    %104 = vector.extract_strided_slice %91 {offsets = [0, 32], sizes = [2, 16], strides = [1, 1]} : vector<2x256xf32> to vector<2x16xf32>
    %105 = arith.addf %101, %104 : vector<2x16xf32>
    %106 = vector.extract_strided_slice %89 {offsets = [0, 48], sizes = [2, 16], strides = [1, 1]} : vector<2x256xf32> to vector<2x16xf32>
    %107 = arith.addf %103, %106 : vector<2x16xf32>
    %108 = vector.extract_strided_slice %91 {offsets = [0, 48], sizes = [2, 16], strides = [1, 1]} : vector<2x256xf32> to vector<2x16xf32>
    %109 = arith.addf %105, %108 : vector<2x16xf32>
    %110 = vector.extract_strided_slice %89 {offsets = [0, 64], sizes = [2, 16], strides = [1, 1]} : vector<2x256xf32> to vector<2x16xf32>
    %111 = arith.addf %107, %110 : vector<2x16xf32>
    %112 = vector.extract_strided_slice %91 {offsets = [0, 64], sizes = [2, 16], strides = [1, 1]} : vector<2x256xf32> to vector<2x16xf32>
    %113 = arith.addf %109, %112 : vector<2x16xf32>
    %114 = vector.extract_strided_slice %89 {offsets = [0, 80], sizes = [2, 16], strides = [1, 1]} : vector<2x256xf32> to vector<2x16xf32>
    %115 = arith.addf %111, %114 : vector<2x16xf32>
    %116 = vector.extract_strided_slice %91 {offsets = [0, 80], sizes = [2, 16], strides = [1, 1]} : vector<2x256xf32> to vector<2x16xf32>
    %117 = arith.addf %113, %116 : vector<2x16xf32>
    %118 = vector.extract_strided_slice %89 {offsets = [0, 96], sizes = [2, 16], strides = [1, 1]} : vector<2x256xf32> to vector<2x16xf32>
    %119 = arith.addf %115, %118 : vector<2x16xf32>
    %120 = vector.extract_strided_slice %91 {offsets = [0, 96], sizes = [2, 16], strides = [1, 1]} : vector<2x256xf32> to vector<2x16xf32>
    %121 = arith.addf %117, %120 : vector<2x16xf32>
    %122 = vector.extract_strided_slice %89 {offsets = [0, 112], sizes = [2, 16], strides = [1, 1]} : vector<2x256xf32> to vector<2x16xf32>
    %123 = arith.addf %119, %122 : vector<2x16xf32>
    %124 = vector.extract_strided_slice %91 {offsets = [0, 112], sizes = [2, 16], strides = [1, 1]} : vector<2x256xf32> to vector<2x16xf32>
    %125 = arith.addf %121, %124 : vector<2x16xf32>
    %126 = vector.extract_strided_slice %89 {offsets = [0, 128], sizes = [2, 16], strides = [1, 1]} : vector<2x256xf32> to vector<2x16xf32>
    %127 = arith.addf %123, %126 : vector<2x16xf32>
    %128 = vector.extract_strided_slice %91 {offsets = [0, 128], sizes = [2, 16], strides = [1, 1]} : vector<2x256xf32> to vector<2x16xf32>
    %129 = arith.addf %125, %128 : vector<2x16xf32>
    %130 = vector.extract_strided_slice %89 {offsets = [0, 144], sizes = [2, 16], strides = [1, 1]} : vector<2x256xf32> to vector<2x16xf32>
    %131 = arith.addf %127, %130 : vector<2x16xf32>
    %132 = vector.extract_strided_slice %91 {offsets = [0, 144], sizes = [2, 16], strides = [1, 1]} : vector<2x256xf32> to vector<2x16xf32>
    %133 = arith.addf %129, %132 : vector<2x16xf32>
    %134 = vector.extract_strided_slice %89 {offsets = [0, 160], sizes = [2, 16], strides = [1, 1]} : vector<2x256xf32> to vector<2x16xf32>
    %135 = arith.addf %131, %134 : vector<2x16xf32>
    %136 = vector.extract_strided_slice %91 {offsets = [0, 160], sizes = [2, 16], strides = [1, 1]} : vector<2x256xf32> to vector<2x16xf32>
    %137 = arith.addf %133, %136 : vector<2x16xf32>
    %138 = vector.extract_strided_slice %89 {offsets = [0, 176], sizes = [2, 16], strides = [1, 1]} : vector<2x256xf32> to vector<2x16xf32>
    %139 = arith.addf %135, %138 : vector<2x16xf32>
    %140 = vector.extract_strided_slice %91 {offsets = [0, 176], sizes = [2, 16], strides = [1, 1]} : vector<2x256xf32> to vector<2x16xf32>
    %141 = arith.addf %137, %140 : vector<2x16xf32>
    %142 = vector.extract_strided_slice %89 {offsets = [0, 192], sizes = [2, 16], strides = [1, 1]} : vector<2x256xf32> to vector<2x16xf32>
    %143 = arith.addf %139, %142 : vector<2x16xf32>
    %144 = vector.extract_strided_slice %91 {offsets = [0, 192], sizes = [2, 16], strides = [1, 1]} : vector<2x256xf32> to vector<2x16xf32>
    %145 = arith.addf %141, %144 : vector<2x16xf32>
    %146 = vector.extract_strided_slice %89 {offsets = [0, 208], sizes = [2, 16], strides = [1, 1]} : vector<2x256xf32> to vector<2x16xf32>
    %147 = arith.addf %143, %146 : vector<2x16xf32>
    %148 = vector.extract_strided_slice %91 {offsets = [0, 208], sizes = [2, 16], strides = [1, 1]} : vector<2x256xf32> to vector<2x16xf32>
    %149 = arith.addf %145, %148 : vector<2x16xf32>
    %150 = vector.extract_strided_slice %89 {offsets = [0, 224], sizes = [2, 16], strides = [1, 1]} : vector<2x256xf32> to vector<2x16xf32>
    %151 = arith.addf %147, %150 : vector<2x16xf32>
    %152 = vector.extract_strided_slice %91 {offsets = [0, 224], sizes = [2, 16], strides = [1, 1]} : vector<2x256xf32> to vector<2x16xf32>
    %153 = arith.addf %149, %152 : vector<2x16xf32>
    %154 = vector.extract_strided_slice %89 {offsets = [0, 240], sizes = [2, 16], strides = [1, 1]} : vector<2x256xf32> to vector<2x16xf32>
    %155 = arith.addf %151, %154 : vector<2x16xf32>
    %156 = vector.extract_strided_slice %91 {offsets = [0, 240], sizes = [2, 16], strides = [1, 1]} : vector<2x256xf32> to vector<2x16xf32>
    %157 = arith.addf %153, %156 : vector<2x16xf32>
    %cst_46 = arith.constant 3.906250e-03 : f32
    %158 = vector.broadcast %cst_46 : f32 to vector<2x16xf32>
    %159 = arith.mulf %155, %158 : vector<2x16xf32>
    %cst_47 = arith.constant 3.906250e-03 : f32
    %160 = vector.broadcast %cst_47 : f32 to vector<2x16xf32>
    %161 = arith.mulf %157, %160 : vector<2x16xf32>
    %162 = arith.mulf %159, %159 : vector<2x16xf32>
    %163 = arith.subf %161, %162 : vector<2x16xf32>
    %cst_48 = arith.constant 9.99999974E-6 : f32
    %164 = vector.broadcast %cst_48 : f32 to vector<2x16xf32>
    %165 = arith.addf %163, %164 : vector<2x16xf32>
    %166 = math.rsqrt %165 : vector<2x16xf32>
    %cst_49 = arith.constant dense<0.000000e+00> : vector<32x16xf32>
    %167 = tpu.matmul %88, %159, %cst_49 {dimension_numbers = #tpu.dot_dimension_numbers<[1], [0], [0], [1], [0, 0, 1, 1], [], []>} : vector<32x2xf32>, vector<2x16xf32>, vector<32x16xf32> -> vector<32x16xf32>
    %168 = tpu.concatenate %167, %167, %167, %167, %167, %167, %167, %167, %167, %167, %167, %167, %167, %167, %167, %167 in 1 : vector<32x16xf32>, vector<32x16xf32>, vector<32x16xf32>, vector<32x16xf32>, vector<32x16xf32>, vector<32x16xf32>, vector<32x16xf32>, vector<32x16xf32>, vector<32x16xf32>, vector<32x16xf32>, vector<32x16xf32>, vector<32x16xf32>, vector<32x16xf32>, vector<32x16xf32>, vector<32x16xf32>, vector<32x16xf32> -> vector<32x256xf32>
    %cst_50 = arith.constant dense<0.000000e+00> : vector<32x16xf32>
    %169 = tpu.matmul %88, %166, %cst_50 {dimension_numbers = #tpu.dot_dimension_numbers<[1], [0], [0], [1], [0, 0, 1, 1], [], []>} : vector<32x2xf32>, vector<2x16xf32>, vector<32x16xf32> -> vector<32x16xf32>
    %170 = tpu.concatenate %169, %169, %169, %169, %169, %169, %169, %169, %169, %169, %169, %169, %169, %169, %169, %169 in 1 : vector<32x16xf32>, vector<32x16xf32>, vector<32x16xf32>, vector<32x16xf32>, vector<32x16xf32>, vector<32x16xf32>, vector<32x16xf32>, vector<32x16xf32>, vector<32x16xf32>, vector<32x16xf32>, vector<32x16xf32>, vector<32x16xf32>, vector<32x16xf32>, vector<32x16xf32>, vector<32x16xf32>, vector<32x16xf32> -> vector<32x256xf32>
    %171 = arith.subf %76, %168 : vector<32x256xf32>
    %172 = arith.mulf %171, %170 : vector<32x256xf32>
    %cst_51 = arith.constant 0.000000e+00 : f32
    %173 = vector.broadcast %cst_51 : f32 to vector<32x256xf32>
    %174 = arith.cmpf oge, %172, %173 : vector<32x256xf32>
    %cst_52 = arith.constant 2.000000e-01 : f32
    %175 = vector.broadcast %cst_52 : f32 to vector<32x256xf32>
    %176 = arith.mulf %175, %172 : vector<32x256xf32>
    %177 = arith.select %174, %172, %176 : vector<32x256xi1>, vector<32x256xf32>
    %cst_53 = arith.constant 0.000000e+00 : f32
    %178 = vector.broadcast %cst_53 : f32 to vector<32x16xf32>
    %179 = tpu.concatenate %178, %177, %178 in 1 : vector<32x16xf32>, vector<32x256xf32>, vector<32x16xf32> -> vector<32x288xf32>
    %180 = tpu.iota {dimensions = array<i32: 0>} : vector<18x16xi32>
    %181 = tpu.iota {dimensions = array<i32: 1>} : vector<18x16xi32>
    %c1_i32_54 = arith.constant 1 : i32
    %182 = vector.broadcast %c1_i32_54 : i32 to vector<18x16xi32>
    %183 = arith.addi %181, %182 : vector<18x16xi32>
    %184 = arith.cmpi eq, %180, %183 : vector<18x16xi32>
    %cst_55 = arith.constant 1.000000e+00 : f32
    %cst_56 = arith.constant 0.000000e+00 : f32
    %185 = vector.broadcast %cst_55 : f32 to vector<18x16xf32>
    %186 = vector.broadcast %cst_56 : f32 to vector<18x16xf32>
    %187 = arith.select %184, %185, %186 : vector<18x16xi1>, vector<18x16xf32>
    %cst_57 = arith.constant 0.000000e+00 : f32
    %188 = vector.broadcast %cst_57 : f32 to vector<18x16xf32>
    %189 = tpu.concatenate %187, %188 in 1 : vector<18x16xf32>, vector<18x16xf32> -> vector<18x32xf32>
    %cst_58 = arith.constant 0.000000e+00 : f32
    %190 = vector.broadcast %cst_58 : f32 to vector<18x16xf32>
    %191 = tpu.concatenate %190, %187 in 1 : vector<18x16xf32>, vector<18x16xf32> -> vector<18x32xf32>
    %192 = tpu.concatenate %189, %191 in 0 : vector<18x32xf32>, vector<18x32xf32> -> vector<36x32xf32>
    %cst_59 = arith.constant dense<0.000000e+00> : vector<36x288xf32>
    %193 = tpu.matmul %192, %179, %cst_59 {dimension_numbers = #tpu.dot_dimension_numbers<[1], [0], [0], [1], [0, 0, 1, 1], [], []>} : vector<36x32xf32>, vector<32x288xf32>, vector<36x288xf32> -> vector<36x288xf32>
    %194 = tpu.iota {dimensions = array<i32: 0>} : vector<8x18xi32>
    %195 = tpu.iota {dimensions = array<i32: 1>} : vector<8x18xi32>
    %c2_i32_60 = arith.constant 2 : i32
    %196 = vector.broadcast %c2_i32_60 : i32 to vector<8x18xi32>
    %197 = arith.muli %196, %194 : vector<8x18xi32>
    %c0_i32_61 = arith.constant 0 : i32
    %198 = vector.broadcast %c0_i32_61 : i32 to vector<8x18xi32>
    %199 = arith.addi %197, %198 : vector<8x18xi32>
    %200 = arith.cmpi eq, %195, %199 : vector<8x18xi32>
    %cst_62 = arith.constant 1.000000e+00 : f32
    %cst_63 = arith.constant 0.000000e+00 : f32
    %201 = vector.broadcast %cst_62 : f32 to vector<8x18xf32>
    %202 = vector.broadcast %cst_63 : f32 to vector<8x18xf32>
    %203 = arith.select %200, %201, %202 : vector<8x18xi1>, vector<8x18xf32>
    %cst_64 = arith.constant 0.000000e+00 : f32
    %204 = vector.broadcast %cst_64 : f32 to vector<8x18xf32>
    %205 = tpu.concatenate %203, %204 in 1 : vector<8x18xf32>, vector<8x18xf32> -> vector<8x36xf32>
    %cst_65 = arith.constant 0.000000e+00 : f32
    %206 = vector.broadcast %cst_65 : f32 to vector<8x18xf32>
    %207 = tpu.concatenate %206, %203 in 1 : vector<8x18xf32>, vector<8x18xf32> -> vector<8x36xf32>
    %208 = tpu.concatenate %205, %207 in 0 : vector<8x36xf32>, vector<8x36xf32> -> vector<16x36xf32>
    %cst_66 = arith.constant dense<0.000000e+00> : vector<16x288xf32>
    %209 = tpu.matmul %208, %193, %cst_66 {dimension_numbers = #tpu.dot_dimension_numbers<[1], [0], [0], [1], [0, 0, 1, 1], [], []>} : vector<16x36xf32>, vector<36x288xf32>, vector<16x288xf32> -> vector<16x288xf32>
    %c0_67 = arith.constant 0 : index
    %c0_68 = arith.constant 0 : index
    %c0_69 = arith.constant 0 : index
    %210 = vector.load %arg3[%c0_67, %c0_68, %c0_69] : memref<3x288x256xf32, #tpu.memory_space<vmem>>, vector<1x288x256xf32>
    %211 = vector.shape_cast %210 : vector<1x288x256xf32> to vector<288x256xf32>
    %cst_70 = arith.constant dense<0.000000e+00> : vector<16x256xf32>
    %212 = tpu.matmul %209, %211, %cst_70 {dimension_numbers = #tpu.dot_dimension_numbers<[1], [0], [0], [1], [0, 0, 1, 1], [], []>} : vector<16x288xf32>, vector<288x256xf32>, vector<16x256xf32> -> vector<16x256xf32>
    %213 = tpu.iota {dimensions = array<i32: 0>} : vector<8x18xi32>
    %214 = tpu.iota {dimensions = array<i32: 1>} : vector<8x18xi32>
    %c2_i32_71 = arith.constant 2 : i32
    %215 = vector.broadcast %c2_i32_71 : i32 to vector<8x18xi32>
    %216 = arith.muli %215, %213 : vector<8x18xi32>
    %c1_i32_72 = arith.constant 1 : i32
    %217 = vector.broadcast %c1_i32_72 : i32 to vector<8x18xi32>
    %218 = arith.addi %216, %217 : vector<8x18xi32>
    %219 = arith.cmpi eq, %214, %218 : vector<8x18xi32>
    %cst_73 = arith.constant 1.000000e+00 : f32
    %cst_74 = arith.constant 0.000000e+00 : f32
    %220 = vector.broadcast %cst_73 : f32 to vector<8x18xf32>
    %221 = vector.broadcast %cst_74 : f32 to vector<8x18xf32>
    %222 = arith.select %219, %220, %221 : vector<8x18xi1>, vector<8x18xf32>
    %cst_75 = arith.constant 0.000000e+00 : f32
    %223 = vector.broadcast %cst_75 : f32 to vector<8x18xf32>
    %224 = tpu.concatenate %222, %223 in 1 : vector<8x18xf32>, vector<8x18xf32> -> vector<8x36xf32>
    %cst_76 = arith.constant 0.000000e+00 : f32
    %225 = vector.broadcast %cst_76 : f32 to vector<8x18xf32>
    %226 = tpu.concatenate %225, %222 in 1 : vector<8x18xf32>, vector<8x18xf32> -> vector<8x36xf32>
    %227 = tpu.concatenate %224, %226 in 0 : vector<8x36xf32>, vector<8x36xf32> -> vector<16x36xf32>
    %cst_77 = arith.constant dense<0.000000e+00> : vector<16x288xf32>
    %228 = tpu.matmul %227, %193, %cst_77 {dimension_numbers = #tpu.dot_dimension_numbers<[1], [0], [0], [1], [0, 0, 1, 1], [], []>} : vector<16x36xf32>, vector<36x288xf32>, vector<16x288xf32> -> vector<16x288xf32>
    %c1_78 = arith.constant 1 : index
    %c0_79 = arith.constant 0 : index
    %c0_80 = arith.constant 0 : index
    %229 = vector.load %arg3[%c1_78, %c0_79, %c0_80] : memref<3x288x256xf32, #tpu.memory_space<vmem>>, vector<1x288x256xf32>
    %230 = vector.shape_cast %229 : vector<1x288x256xf32> to vector<288x256xf32>
    %cst_81 = arith.constant dense<0.000000e+00> : vector<16x256xf32>
    %231 = tpu.matmul %228, %230, %cst_81 {dimension_numbers = #tpu.dot_dimension_numbers<[1], [0], [0], [1], [0, 0, 1, 1], [], []>} : vector<16x288xf32>, vector<288x256xf32>, vector<16x256xf32> -> vector<16x256xf32>
    %232 = arith.addf %212, %231 : vector<16x256xf32>
    %233 = tpu.iota {dimensions = array<i32: 0>} : vector<8x18xi32>
    %234 = tpu.iota {dimensions = array<i32: 1>} : vector<8x18xi32>
    %c2_i32_82 = arith.constant 2 : i32
    %235 = vector.broadcast %c2_i32_82 : i32 to vector<8x18xi32>
    %236 = arith.muli %235, %233 : vector<8x18xi32>
    %c2_i32_83 = arith.constant 2 : i32
    %237 = vector.broadcast %c2_i32_83 : i32 to vector<8x18xi32>
    %238 = arith.addi %236, %237 : vector<8x18xi32>
    %239 = arith.cmpi eq, %234, %238 : vector<8x18xi32>
    %cst_84 = arith.constant 1.000000e+00 : f32
    %cst_85 = arith.constant 0.000000e+00 : f32
    %240 = vector.broadcast %cst_84 : f32 to vector<8x18xf32>
    %241 = vector.broadcast %cst_85 : f32 to vector<8x18xf32>
    %242 = arith.select %239, %240, %241 : vector<8x18xi1>, vector<8x18xf32>
    %cst_86 = arith.constant 0.000000e+00 : f32
    %243 = vector.broadcast %cst_86 : f32 to vector<8x18xf32>
    %244 = tpu.concatenate %242, %243 in 1 : vector<8x18xf32>, vector<8x18xf32> -> vector<8x36xf32>
    %cst_87 = arith.constant 0.000000e+00 : f32
    %245 = vector.broadcast %cst_87 : f32 to vector<8x18xf32>
    %246 = tpu.concatenate %245, %242 in 1 : vector<8x18xf32>, vector<8x18xf32> -> vector<8x36xf32>
    %247 = tpu.concatenate %244, %246 in 0 : vector<8x36xf32>, vector<8x36xf32> -> vector<16x36xf32>
    %cst_88 = arith.constant dense<0.000000e+00> : vector<16x288xf32>
    %248 = tpu.matmul %247, %193, %cst_88 {dimension_numbers = #tpu.dot_dimension_numbers<[1], [0], [0], [1], [0, 0, 1, 1], [], []>} : vector<16x36xf32>, vector<36x288xf32>, vector<16x288xf32> -> vector<16x288xf32>
    %c2_89 = arith.constant 2 : index
    %c0_90 = arith.constant 0 : index
    %c0_91 = arith.constant 0 : index
    %249 = vector.load %arg3[%c2_89, %c0_90, %c0_91] : memref<3x288x256xf32, #tpu.memory_space<vmem>>, vector<1x288x256xf32>
    %250 = vector.shape_cast %249 : vector<1x288x256xf32> to vector<288x256xf32>
    %cst_92 = arith.constant dense<0.000000e+00> : vector<16x256xf32>
    %251 = tpu.matmul %248, %250, %cst_92 {dimension_numbers = #tpu.dot_dimension_numbers<[1], [0], [0], [1], [0, 0, 1, 1], [], []>} : vector<16x288xf32>, vector<288x256xf32>, vector<16x256xf32> -> vector<16x256xf32>
    %252 = arith.addf %232, %251 : vector<16x256xf32>
    %cst_93 = arith.constant 1.000000e+00 : f32
    %253 = vector.broadcast %cst_93 : f32 to vector<1x8xf32>
    %cst_94 = arith.constant 0.000000e+00 : f32
    %254 = vector.broadcast %cst_94 : f32 to vector<1x8xf32>
    %255 = tpu.concatenate %253, %254 in 1 : vector<1x8xf32>, vector<1x8xf32> -> vector<1x16xf32>
    %cst_95 = arith.constant 0.000000e+00 : f32
    %256 = vector.broadcast %cst_95 : f32 to vector<1x8xf32>
    %257 = tpu.concatenate %256, %253 in 1 : vector<1x8xf32>, vector<1x8xf32> -> vector<1x16xf32>
    %258 = tpu.concatenate %255, %257 in 0 : vector<1x16xf32>, vector<1x16xf32> -> vector<2x16xf32>
    %cst_96 = arith.constant 1.000000e+00 : f32
    %259 = vector.broadcast %cst_96 : f32 to vector<8x1xf32>
    %cst_97 = arith.constant 0.000000e+00 : f32
    %260 = vector.broadcast %cst_97 : f32 to vector<8x1xf32>
    %261 = tpu.concatenate %259, %260 in 1 : vector<8x1xf32>, vector<8x1xf32> -> vector<8x2xf32>
    %cst_98 = arith.constant 0.000000e+00 : f32
    %262 = vector.broadcast %cst_98 : f32 to vector<8x1xf32>
    %263 = tpu.concatenate %262, %259 in 1 : vector<8x1xf32>, vector<8x1xf32> -> vector<8x2xf32>
    %264 = tpu.concatenate %261, %263 in 0 : vector<8x2xf32>, vector<8x2xf32> -> vector<16x2xf32>
    %cst_99 = arith.constant dense<0.000000e+00> : vector<2x256xf32>
    %265 = tpu.matmul %258, %252, %cst_99 {dimension_numbers = #tpu.dot_dimension_numbers<[1], [0], [0], [1], [0, 0, 1, 1], [], []>} : vector<2x16xf32>, vector<16x256xf32>, vector<2x256xf32> -> vector<2x256xf32>
    %266 = arith.mulf %252, %252 : vector<16x256xf32>
    %cst_100 = arith.constant dense<0.000000e+00> : vector<2x256xf32>
    %267 = tpu.matmul %258, %266, %cst_100 {dimension_numbers = #tpu.dot_dimension_numbers<[1], [0], [0], [1], [0, 0, 1, 1], [], []>} : vector<2x16xf32>, vector<16x256xf32>, vector<2x256xf32> -> vector<2x256xf32>
    %cst_101 = arith.constant 0.000000e+00 : f32
    %268 = vector.broadcast %cst_101 : f32 to vector<2x32xf32>
    %cst_102 = arith.constant 0.000000e+00 : f32
    %269 = vector.broadcast %cst_102 : f32 to vector<2x32xf32>
    %270 = vector.extract_strided_slice %265 {offsets = [0, 0], sizes = [2, 32], strides = [1, 1]} : vector<2x256xf32> to vector<2x32xf32>
    %271 = arith.addf %268, %270 : vector<2x32xf32>
    %272 = vector.extract_strided_slice %267 {offsets = [0, 0], sizes = [2, 32], strides = [1, 1]} : vector<2x256xf32> to vector<2x32xf32>
    %273 = arith.addf %269, %272 : vector<2x32xf32>
    %274 = vector.extract_strided_slice %265 {offsets = [0, 32], sizes = [2, 32], strides = [1, 1]} : vector<2x256xf32> to vector<2x32xf32>
    %275 = arith.addf %271, %274 : vector<2x32xf32>
    %276 = vector.extract_strided_slice %267 {offsets = [0, 32], sizes = [2, 32], strides = [1, 1]} : vector<2x256xf32> to vector<2x32xf32>
    %277 = arith.addf %273, %276 : vector<2x32xf32>
    %278 = vector.extract_strided_slice %265 {offsets = [0, 64], sizes = [2, 32], strides = [1, 1]} : vector<2x256xf32> to vector<2x32xf32>
    %279 = arith.addf %275, %278 : vector<2x32xf32>
    %280 = vector.extract_strided_slice %267 {offsets = [0, 64], sizes = [2, 32], strides = [1, 1]} : vector<2x256xf32> to vector<2x32xf32>
    %281 = arith.addf %277, %280 : vector<2x32xf32>
    %282 = vector.extract_strided_slice %265 {offsets = [0, 96], sizes = [2, 32], strides = [1, 1]} : vector<2x256xf32> to vector<2x32xf32>
    %283 = arith.addf %279, %282 : vector<2x32xf32>
    %284 = vector.extract_strided_slice %267 {offsets = [0, 96], sizes = [2, 32], strides = [1, 1]} : vector<2x256xf32> to vector<2x32xf32>
    %285 = arith.addf %281, %284 : vector<2x32xf32>
    %286 = vector.extract_strided_slice %265 {offsets = [0, 128], sizes = [2, 32], strides = [1, 1]} : vector<2x256xf32> to vector<2x32xf32>
    %287 = arith.addf %283, %286 : vector<2x32xf32>
    %288 = vector.extract_strided_slice %267 {offsets = [0, 128], sizes = [2, 32], strides = [1, 1]} : vector<2x256xf32> to vector<2x32xf32>
    %289 = arith.addf %285, %288 : vector<2x32xf32>
    %290 = vector.extract_strided_slice %265 {offsets = [0, 160], sizes = [2, 32], strides = [1, 1]} : vector<2x256xf32> to vector<2x32xf32>
    %291 = arith.addf %287, %290 : vector<2x32xf32>
    %292 = vector.extract_strided_slice %267 {offsets = [0, 160], sizes = [2, 32], strides = [1, 1]} : vector<2x256xf32> to vector<2x32xf32>
    %293 = arith.addf %289, %292 : vector<2x32xf32>
    %294 = vector.extract_strided_slice %265 {offsets = [0, 192], sizes = [2, 32], strides = [1, 1]} : vector<2x256xf32> to vector<2x32xf32>
    %295 = arith.addf %291, %294 : vector<2x32xf32>
    %296 = vector.extract_strided_slice %267 {offsets = [0, 192], sizes = [2, 32], strides = [1, 1]} : vector<2x256xf32> to vector<2x32xf32>
    %297 = arith.addf %293, %296 : vector<2x32xf32>
    %298 = vector.extract_strided_slice %265 {offsets = [0, 224], sizes = [2, 32], strides = [1, 1]} : vector<2x256xf32> to vector<2x32xf32>
    %299 = arith.addf %295, %298 : vector<2x32xf32>
    %300 = vector.extract_strided_slice %267 {offsets = [0, 224], sizes = [2, 32], strides = [1, 1]} : vector<2x256xf32> to vector<2x32xf32>
    %301 = arith.addf %297, %300 : vector<2x32xf32>
    %cst_103 = arith.constant 1.562500e-02 : f32
    %302 = vector.broadcast %cst_103 : f32 to vector<2x32xf32>
    %303 = arith.mulf %299, %302 : vector<2x32xf32>
    %cst_104 = arith.constant 1.562500e-02 : f32
    %304 = vector.broadcast %cst_104 : f32 to vector<2x32xf32>
    %305 = arith.mulf %301, %304 : vector<2x32xf32>
    %306 = arith.mulf %303, %303 : vector<2x32xf32>
    %307 = arith.subf %305, %306 : vector<2x32xf32>
    %cst_105 = arith.constant 9.99999974E-6 : f32
    %308 = vector.broadcast %cst_105 : f32 to vector<2x32xf32>
    %309 = arith.addf %307, %308 : vector<2x32xf32>
    %310 = math.rsqrt %309 : vector<2x32xf32>
    %cst_106 = arith.constant dense<0.000000e+00> : vector<16x32xf32>
    %311 = tpu.matmul %264, %303, %cst_106 {dimension_numbers = #tpu.dot_dimension_numbers<[1], [0], [0], [1], [0, 0, 1, 1], [], []>} : vector<16x2xf32>, vector<2x32xf32>, vector<16x32xf32> -> vector<16x32xf32>
    %312 = tpu.concatenate %311, %311, %311, %311, %311, %311, %311, %311 in 1 : vector<16x32xf32>, vector<16x32xf32>, vector<16x32xf32>, vector<16x32xf32>, vector<16x32xf32>, vector<16x32xf32>, vector<16x32xf32>, vector<16x32xf32> -> vector<16x256xf32>
    %cst_107 = arith.constant dense<0.000000e+00> : vector<16x32xf32>
    %313 = tpu.matmul %264, %310, %cst_107 {dimension_numbers = #tpu.dot_dimension_numbers<[1], [0], [0], [1], [0, 0, 1, 1], [], []>} : vector<16x2xf32>, vector<2x32xf32>, vector<16x32xf32> -> vector<16x32xf32>
    %314 = tpu.concatenate %313, %313, %313, %313, %313, %313, %313, %313 in 1 : vector<16x32xf32>, vector<16x32xf32>, vector<16x32xf32>, vector<16x32xf32>, vector<16x32xf32>, vector<16x32xf32>, vector<16x32xf32>, vector<16x32xf32> -> vector<16x256xf32>
    %315 = arith.subf %252, %312 : vector<16x256xf32>
    %316 = arith.mulf %315, %314 : vector<16x256xf32>
    %cst_108 = arith.constant 0.000000e+00 : f32
    %317 = vector.broadcast %cst_108 : f32 to vector<16x256xf32>
    %318 = arith.cmpf oge, %316, %317 : vector<16x256xf32>
    %cst_109 = arith.constant 2.000000e-01 : f32
    %319 = vector.broadcast %cst_109 : f32 to vector<16x256xf32>
    %320 = arith.mulf %319, %316 : vector<16x256xf32>
    %321 = arith.select %318, %316, %320 : vector<16x256xi1>, vector<16x256xf32>
    %cst_110 = arith.constant 0.000000e+00 : f32
    %322 = vector.broadcast %cst_110 : f32 to vector<16x32xf32>
    %323 = tpu.concatenate %322, %321, %322 in 1 : vector<16x32xf32>, vector<16x256xf32>, vector<16x32xf32> -> vector<16x320xf32>
    %324 = tpu.iota {dimensions = array<i32: 0>} : vector<10x8xi32>
    %325 = tpu.iota {dimensions = array<i32: 1>} : vector<10x8xi32>
    %c1_i32_111 = arith.constant 1 : i32
    %326 = vector.broadcast %c1_i32_111 : i32 to vector<10x8xi32>
    %327 = arith.addi %325, %326 : vector<10x8xi32>
    %328 = arith.cmpi eq, %324, %327 : vector<10x8xi32>
    %cst_112 = arith.constant 1.000000e+00 : f32
    %cst_113 = arith.constant 0.000000e+00 : f32
    %329 = vector.broadcast %cst_112 : f32 to vector<10x8xf32>
    %330 = vector.broadcast %cst_113 : f32 to vector<10x8xf32>
    %331 = arith.select %328, %329, %330 : vector<10x8xi1>, vector<10x8xf32>
    %cst_114 = arith.constant 0.000000e+00 : f32
    %332 = vector.broadcast %cst_114 : f32 to vector<10x8xf32>
    %333 = tpu.concatenate %331, %332 in 1 : vector<10x8xf32>, vector<10x8xf32> -> vector<10x16xf32>
    %cst_115 = arith.constant 0.000000e+00 : f32
    %334 = vector.broadcast %cst_115 : f32 to vector<10x8xf32>
    %335 = tpu.concatenate %334, %331 in 1 : vector<10x8xf32>, vector<10x8xf32> -> vector<10x16xf32>
    %336 = tpu.concatenate %333, %335 in 0 : vector<10x16xf32>, vector<10x16xf32> -> vector<20x16xf32>
    %cst_116 = arith.constant dense<0.000000e+00> : vector<20x320xf32>
    %337 = tpu.matmul %336, %323, %cst_116 {dimension_numbers = #tpu.dot_dimension_numbers<[1], [0], [0], [1], [0, 0, 1, 1], [], []>} : vector<20x16xf32>, vector<16x320xf32>, vector<20x320xf32> -> vector<20x320xf32>
    %338 = tpu.iota {dimensions = array<i32: 0>} : vector<4x10xi32>
    %339 = tpu.iota {dimensions = array<i32: 1>} : vector<4x10xi32>
    %c2_i32_117 = arith.constant 2 : i32
    %340 = vector.broadcast %c2_i32_117 : i32 to vector<4x10xi32>
    %341 = arith.muli %340, %338 : vector<4x10xi32>
    %c0_i32_118 = arith.constant 0 : i32
    %342 = vector.broadcast %c0_i32_118 : i32 to vector<4x10xi32>
    %343 = arith.addi %341, %342 : vector<4x10xi32>
    %344 = arith.cmpi eq, %339, %343 : vector<4x10xi32>
    %cst_119 = arith.constant 1.000000e+00 : f32
    %cst_120 = arith.constant 0.000000e+00 : f32
    %345 = vector.broadcast %cst_119 : f32 to vector<4x10xf32>
    %346 = vector.broadcast %cst_120 : f32 to vector<4x10xf32>
    %347 = arith.select %344, %345, %346 : vector<4x10xi1>, vector<4x10xf32>
    %cst_121 = arith.constant 0.000000e+00 : f32
    %348 = vector.broadcast %cst_121 : f32 to vector<4x10xf32>
    %349 = tpu.concatenate %347, %348 in 1 : vector<4x10xf32>, vector<4x10xf32> -> vector<4x20xf32>
    %cst_122 = arith.constant 0.000000e+00 : f32
    %350 = vector.broadcast %cst_122 : f32 to vector<4x10xf32>
    %351 = tpu.concatenate %350, %347 in 1 : vector<4x10xf32>, vector<4x10xf32> -> vector<4x20xf32>
    %352 = tpu.concatenate %349, %351 in 0 : vector<4x20xf32>, vector<4x20xf32> -> vector<8x20xf32>
    %cst_123 = arith.constant dense<0.000000e+00> : vector<8x320xf32>
    %353 = tpu.matmul %352, %337, %cst_123 {dimension_numbers = #tpu.dot_dimension_numbers<[1], [0], [0], [1], [0, 0, 1, 1], [], []>} : vector<8x20xf32>, vector<20x320xf32>, vector<8x320xf32> -> vector<8x320xf32>
    %c0_124 = arith.constant 0 : index
    %c0_125 = arith.constant 0 : index
    %c0_126 = arith.constant 0 : index
    %354 = vector.load %arg4[%c0_124, %c0_125, %c0_126] : memref<3x320x256xf32, #tpu.memory_space<vmem>>, vector<1x320x256xf32>
    %355 = vector.shape_cast %354 : vector<1x320x256xf32> to vector<320x256xf32>
    %cst_127 = arith.constant dense<0.000000e+00> : vector<8x256xf32>
    %356 = tpu.matmul %353, %355, %cst_127 {dimension_numbers = #tpu.dot_dimension_numbers<[1], [0], [0], [1], [0, 0, 1, 1], [], []>} : vector<8x320xf32>, vector<320x256xf32>, vector<8x256xf32> -> vector<8x256xf32>
    %357 = tpu.iota {dimensions = array<i32: 0>} : vector<4x10xi32>
    %358 = tpu.iota {dimensions = array<i32: 1>} : vector<4x10xi32>
    %c2_i32_128 = arith.constant 2 : i32
    %359 = vector.broadcast %c2_i32_128 : i32 to vector<4x10xi32>
    %360 = arith.muli %359, %357 : vector<4x10xi32>
    %c1_i32_129 = arith.constant 1 : i32
    %361 = vector.broadcast %c1_i32_129 : i32 to vector<4x10xi32>
    %362 = arith.addi %360, %361 : vector<4x10xi32>
    %363 = arith.cmpi eq, %358, %362 : vector<4x10xi32>
    %cst_130 = arith.constant 1.000000e+00 : f32
    %cst_131 = arith.constant 0.000000e+00 : f32
    %364 = vector.broadcast %cst_130 : f32 to vector<4x10xf32>
    %365 = vector.broadcast %cst_131 : f32 to vector<4x10xf32>
    %366 = arith.select %363, %364, %365 : vector<4x10xi1>, vector<4x10xf32>
    %cst_132 = arith.constant 0.000000e+00 : f32
    %367 = vector.broadcast %cst_132 : f32 to vector<4x10xf32>
    %368 = tpu.concatenate %366, %367 in 1 : vector<4x10xf32>, vector<4x10xf32> -> vector<4x20xf32>
    %cst_133 = arith.constant 0.000000e+00 : f32
    %369 = vector.broadcast %cst_133 : f32 to vector<4x10xf32>
    %370 = tpu.concatenate %369, %366 in 1 : vector<4x10xf32>, vector<4x10xf32> -> vector<4x20xf32>
    %371 = tpu.concatenate %368, %370 in 0 : vector<4x20xf32>, vector<4x20xf32> -> vector<8x20xf32>
    %cst_134 = arith.constant dense<0.000000e+00> : vector<8x320xf32>
    %372 = tpu.matmul %371, %337, %cst_134 {dimension_numbers = #tpu.dot_dimension_numbers<[1], [0], [0], [1], [0, 0, 1, 1], [], []>} : vector<8x20xf32>, vector<20x320xf32>, vector<8x320xf32> -> vector<8x320xf32>
    %c1_135 = arith.constant 1 : index
    %c0_136 = arith.constant 0 : index
    %c0_137 = arith.constant 0 : index
    %373 = vector.load %arg4[%c1_135, %c0_136, %c0_137] : memref<3x320x256xf32, #tpu.memory_space<vmem>>, vector<1x320x256xf32>
    %374 = vector.shape_cast %373 : vector<1x320x256xf32> to vector<320x256xf32>
    %cst_138 = arith.constant dense<0.000000e+00> : vector<8x256xf32>
    %375 = tpu.matmul %372, %374, %cst_138 {dimension_numbers = #tpu.dot_dimension_numbers<[1], [0], [0], [1], [0, 0, 1, 1], [], []>} : vector<8x320xf32>, vector<320x256xf32>, vector<8x256xf32> -> vector<8x256xf32>
    %376 = arith.addf %356, %375 : vector<8x256xf32>
    %377 = tpu.iota {dimensions = array<i32: 0>} : vector<4x10xi32>
    %378 = tpu.iota {dimensions = array<i32: 1>} : vector<4x10xi32>
    %c2_i32_139 = arith.constant 2 : i32
    %379 = vector.broadcast %c2_i32_139 : i32 to vector<4x10xi32>
    %380 = arith.muli %379, %377 : vector<4x10xi32>
    %c2_i32_140 = arith.constant 2 : i32
    %381 = vector.broadcast %c2_i32_140 : i32 to vector<4x10xi32>
    %382 = arith.addi %380, %381 : vector<4x10xi32>
    %383 = arith.cmpi eq, %378, %382 : vector<4x10xi32>
    %cst_141 = arith.constant 1.000000e+00 : f32
    %cst_142 = arith.constant 0.000000e+00 : f32
    %384 = vector.broadcast %cst_141 : f32 to vector<4x10xf32>
    %385 = vector.broadcast %cst_142 : f32 to vector<4x10xf32>
    %386 = arith.select %383, %384, %385 : vector<4x10xi1>, vector<4x10xf32>
    %cst_143 = arith.constant 0.000000e+00 : f32
    %387 = vector.broadcast %cst_143 : f32 to vector<4x10xf32>
    %388 = tpu.concatenate %386, %387 in 1 : vector<4x10xf32>, vector<4x10xf32> -> vector<4x20xf32>
    %cst_144 = arith.constant 0.000000e+00 : f32
    %389 = vector.broadcast %cst_144 : f32 to vector<4x10xf32>
    %390 = tpu.concatenate %389, %386 in 1 : vector<4x10xf32>, vector<4x10xf32> -> vector<4x20xf32>
    %391 = tpu.concatenate %388, %390 in 0 : vector<4x20xf32>, vector<4x20xf32> -> vector<8x20xf32>
    %cst_145 = arith.constant dense<0.000000e+00> : vector<8x320xf32>
    %392 = tpu.matmul %391, %337, %cst_145 {dimension_numbers = #tpu.dot_dimension_numbers<[1], [0], [0], [1], [0, 0, 1, 1], [], []>} : vector<8x20xf32>, vector<20x320xf32>, vector<8x320xf32> -> vector<8x320xf32>
    %c2_146 = arith.constant 2 : index
    %c0_147 = arith.constant 0 : index
    %c0_148 = arith.constant 0 : index
    %393 = vector.load %arg4[%c2_146, %c0_147, %c0_148] : memref<3x320x256xf32, #tpu.memory_space<vmem>>, vector<1x320x256xf32>
    %394 = vector.shape_cast %393 : vector<1x320x256xf32> to vector<320x256xf32>
    %cst_149 = arith.constant dense<0.000000e+00> : vector<8x256xf32>
    %395 = tpu.matmul %392, %394, %cst_149 {dimension_numbers = #tpu.dot_dimension_numbers<[1], [0], [0], [1], [0, 0, 1, 1], [], []>} : vector<8x320xf32>, vector<320x256xf32>, vector<8x256xf32> -> vector<8x256xf32>
    %396 = arith.addf %376, %395 : vector<8x256xf32>
    %cst_150 = arith.constant 1.000000e+00 : f32
    %397 = vector.broadcast %cst_150 : f32 to vector<1x4xf32>
    %cst_151 = arith.constant 0.000000e+00 : f32
    %398 = vector.broadcast %cst_151 : f32 to vector<1x4xf32>
    %399 = tpu.concatenate %397, %398 in 1 : vector<1x4xf32>, vector<1x4xf32> -> vector<1x8xf32>
    %cst_152 = arith.constant 0.000000e+00 : f32
    %400 = vector.broadcast %cst_152 : f32 to vector<1x4xf32>
    %401 = tpu.concatenate %400, %397 in 1 : vector<1x4xf32>, vector<1x4xf32> -> vector<1x8xf32>
    %402 = tpu.concatenate %399, %401 in 0 : vector<1x8xf32>, vector<1x8xf32> -> vector<2x8xf32>
    %cst_153 = arith.constant 1.000000e+00 : f32
    %403 = vector.broadcast %cst_153 : f32 to vector<4x1xf32>
    %cst_154 = arith.constant 0.000000e+00 : f32
    %404 = vector.broadcast %cst_154 : f32 to vector<4x1xf32>
    %405 = tpu.concatenate %403, %404 in 1 : vector<4x1xf32>, vector<4x1xf32> -> vector<4x2xf32>
    %cst_155 = arith.constant 0.000000e+00 : f32
    %406 = vector.broadcast %cst_155 : f32 to vector<4x1xf32>
    %407 = tpu.concatenate %406, %403 in 1 : vector<4x1xf32>, vector<4x1xf32> -> vector<4x2xf32>
    %408 = tpu.concatenate %405, %407 in 0 : vector<4x2xf32>, vector<4x2xf32> -> vector<8x2xf32>
    %cst_156 = arith.constant dense<0.000000e+00> : vector<2x256xf32>
    %409 = tpu.matmul %402, %396, %cst_156 {dimension_numbers = #tpu.dot_dimension_numbers<[1], [0], [0], [1], [0, 0, 1, 1], [], []>} : vector<2x8xf32>, vector<8x256xf32>, vector<2x256xf32> -> vector<2x256xf32>
    %410 = arith.mulf %396, %396 : vector<8x256xf32>
    %cst_157 = arith.constant dense<0.000000e+00> : vector<2x256xf32>
    %411 = tpu.matmul %402, %410, %cst_157 {dimension_numbers = #tpu.dot_dimension_numbers<[1], [0], [0], [1], [0, 0, 1, 1], [], []>} : vector<2x8xf32>, vector<8x256xf32>, vector<2x256xf32> -> vector<2x256xf32>
    %cst_158 = arith.constant 0.000000e+00 : f32
    %412 = vector.broadcast %cst_158 : f32 to vector<2x64xf32>
    %cst_159 = arith.constant 0.000000e+00 : f32
    %413 = vector.broadcast %cst_159 : f32 to vector<2x64xf32>
    %414 = vector.extract_strided_slice %409 {offsets = [0, 0], sizes = [2, 64], strides = [1, 1]} : vector<2x256xf32> to vector<2x64xf32>
    %415 = arith.addf %412, %414 : vector<2x64xf32>
    %416 = vector.extract_strided_slice %411 {offsets = [0, 0], sizes = [2, 64], strides = [1, 1]} : vector<2x256xf32> to vector<2x64xf32>
    %417 = arith.addf %413, %416 : vector<2x64xf32>
    %418 = vector.extract_strided_slice %409 {offsets = [0, 64], sizes = [2, 64], strides = [1, 1]} : vector<2x256xf32> to vector<2x64xf32>
    %419 = arith.addf %415, %418 : vector<2x64xf32>
    %420 = vector.extract_strided_slice %411 {offsets = [0, 64], sizes = [2, 64], strides = [1, 1]} : vector<2x256xf32> to vector<2x64xf32>
    %421 = arith.addf %417, %420 : vector<2x64xf32>
    %422 = vector.extract_strided_slice %409 {offsets = [0, 128], sizes = [2, 64], strides = [1, 1]} : vector<2x256xf32> to vector<2x64xf32>
    %423 = arith.addf %419, %422 : vector<2x64xf32>
    %424 = vector.extract_strided_slice %411 {offsets = [0, 128], sizes = [2, 64], strides = [1, 1]} : vector<2x256xf32> to vector<2x64xf32>
    %425 = arith.addf %421, %424 : vector<2x64xf32>
    %426 = vector.extract_strided_slice %409 {offsets = [0, 192], sizes = [2, 64], strides = [1, 1]} : vector<2x256xf32> to vector<2x64xf32>
    %427 = arith.addf %423, %426 : vector<2x64xf32>
    %428 = vector.extract_strided_slice %411 {offsets = [0, 192], sizes = [2, 64], strides = [1, 1]} : vector<2x256xf32> to vector<2x64xf32>
    %429 = arith.addf %425, %428 : vector<2x64xf32>
    %cst_160 = arith.constant 6.250000e-02 : f32
    %430 = vector.broadcast %cst_160 : f32 to vector<2x64xf32>
    %431 = arith.mulf %427, %430 : vector<2x64xf32>
    %cst_161 = arith.constant 6.250000e-02 : f32
    %432 = vector.broadcast %cst_161 : f32 to vector<2x64xf32>
    %433 = arith.mulf %429, %432 : vector<2x64xf32>
    %434 = arith.mulf %431, %431 : vector<2x64xf32>
    %435 = arith.subf %433, %434 : vector<2x64xf32>
    %cst_162 = arith.constant 9.99999974E-6 : f32
    %436 = vector.broadcast %cst_162 : f32 to vector<2x64xf32>
    %437 = arith.addf %435, %436 : vector<2x64xf32>
    %438 = math.rsqrt %437 : vector<2x64xf32>
    %cst_163 = arith.constant dense<0.000000e+00> : vector<8x64xf32>
    %439 = tpu.matmul %408, %431, %cst_163 {dimension_numbers = #tpu.dot_dimension_numbers<[1], [0], [0], [1], [0, 0, 1, 1], [], []>} : vector<8x2xf32>, vector<2x64xf32>, vector<8x64xf32> -> vector<8x64xf32>
    %440 = tpu.concatenate %439, %439, %439, %439 in 1 : vector<8x64xf32>, vector<8x64xf32>, vector<8x64xf32>, vector<8x64xf32> -> vector<8x256xf32>
    %cst_164 = arith.constant dense<0.000000e+00> : vector<8x64xf32>
    %441 = tpu.matmul %408, %438, %cst_164 {dimension_numbers = #tpu.dot_dimension_numbers<[1], [0], [0], [1], [0, 0, 1, 1], [], []>} : vector<8x2xf32>, vector<2x64xf32>, vector<8x64xf32> -> vector<8x64xf32>
    %442 = tpu.concatenate %441, %441, %441, %441 in 1 : vector<8x64xf32>, vector<8x64xf32>, vector<8x64xf32>, vector<8x64xf32> -> vector<8x256xf32>
    %443 = arith.subf %396, %440 : vector<8x256xf32>
    %444 = arith.mulf %443, %442 : vector<8x256xf32>
    %cst_165 = arith.constant 0.000000e+00 : f32
    %445 = vector.broadcast %cst_165 : f32 to vector<8x256xf32>
    %446 = arith.cmpf oge, %444, %445 : vector<8x256xf32>
    %cst_166 = arith.constant 2.000000e-01 : f32
    %447 = vector.broadcast %cst_166 : f32 to vector<8x256xf32>
    %448 = arith.mulf %447, %444 : vector<8x256xf32>
    %449 = arith.select %446, %444, %448 : vector<8x256xi1>, vector<8x256xf32>
    %cst_167 = arith.constant 0.000000e+00 : f32
    %450 = vector.broadcast %cst_167 : f32 to vector<8x64xf32>
    %451 = tpu.concatenate %450, %449, %450 in 1 : vector<8x64xf32>, vector<8x256xf32>, vector<8x64xf32> -> vector<8x384xf32>
    %452 = tpu.iota {dimensions = array<i32: 0>} : vector<6x4xi32>
    %453 = tpu.iota {dimensions = array<i32: 1>} : vector<6x4xi32>
    %c1_i32_168 = arith.constant 1 : i32
    %454 = vector.broadcast %c1_i32_168 : i32 to vector<6x4xi32>
    %455 = arith.addi %453, %454 : vector<6x4xi32>
    %456 = arith.cmpi eq, %452, %455 : vector<6x4xi32>
    %cst_169 = arith.constant 1.000000e+00 : f32
    %cst_170 = arith.constant 0.000000e+00 : f32
    %457 = vector.broadcast %cst_169 : f32 to vector<6x4xf32>
    %458 = vector.broadcast %cst_170 : f32 to vector<6x4xf32>
    %459 = arith.select %456, %457, %458 : vector<6x4xi1>, vector<6x4xf32>
    %cst_171 = arith.constant 0.000000e+00 : f32
    %460 = vector.broadcast %cst_171 : f32 to vector<6x4xf32>
    %461 = tpu.concatenate %459, %460 in 1 : vector<6x4xf32>, vector<6x4xf32> -> vector<6x8xf32>
    %cst_172 = arith.constant 0.000000e+00 : f32
    %462 = vector.broadcast %cst_172 : f32 to vector<6x4xf32>
    %463 = tpu.concatenate %462, %459 in 1 : vector<6x4xf32>, vector<6x4xf32> -> vector<6x8xf32>
    %464 = tpu.concatenate %461, %463 in 0 : vector<6x8xf32>, vector<6x8xf32> -> vector<12x8xf32>
    %cst_173 = arith.constant dense<0.000000e+00> : vector<12x384xf32>
    %465 = tpu.matmul %464, %451, %cst_173 {dimension_numbers = #tpu.dot_dimension_numbers<[1], [0], [0], [1], [0, 0, 1, 1], [], []>} : vector<12x8xf32>, vector<8x384xf32>, vector<12x384xf32> -> vector<12x384xf32>
    %466 = tpu.iota {dimensions = array<i32: 0>} : vector<2x6xi32>
    %467 = tpu.iota {dimensions = array<i32: 1>} : vector<2x6xi32>
    %c2_i32_174 = arith.constant 2 : i32
    %468 = vector.broadcast %c2_i32_174 : i32 to vector<2x6xi32>
    %469 = arith.muli %468, %466 : vector<2x6xi32>
    %c0_i32_175 = arith.constant 0 : i32
    %470 = vector.broadcast %c0_i32_175 : i32 to vector<2x6xi32>
    %471 = arith.addi %469, %470 : vector<2x6xi32>
    %472 = arith.cmpi eq, %467, %471 : vector<2x6xi32>
    %cst_176 = arith.constant 1.000000e+00 : f32
    %cst_177 = arith.constant 0.000000e+00 : f32
    %473 = vector.broadcast %cst_176 : f32 to vector<2x6xf32>
    %474 = vector.broadcast %cst_177 : f32 to vector<2x6xf32>
    %475 = arith.select %472, %473, %474 : vector<2x6xi1>, vector<2x6xf32>
    %cst_178 = arith.constant 0.000000e+00 : f32
    %476 = vector.broadcast %cst_178 : f32 to vector<2x6xf32>
    %477 = tpu.concatenate %475, %476 in 1 : vector<2x6xf32>, vector<2x6xf32> -> vector<2x12xf32>
    %cst_179 = arith.constant 0.000000e+00 : f32
    %478 = vector.broadcast %cst_179 : f32 to vector<2x6xf32>
    %479 = tpu.concatenate %478, %475 in 1 : vector<2x6xf32>, vector<2x6xf32> -> vector<2x12xf32>
    %480 = tpu.concatenate %477, %479 in 0 : vector<2x12xf32>, vector<2x12xf32> -> vector<4x12xf32>
    %cst_180 = arith.constant dense<0.000000e+00> : vector<4x384xf32>
    %481 = tpu.matmul %480, %465, %cst_180 {dimension_numbers = #tpu.dot_dimension_numbers<[1], [0], [0], [1], [0, 0, 1, 1], [], []>} : vector<4x12xf32>, vector<12x384xf32>, vector<4x384xf32> -> vector<4x384xf32>
    %c0_181 = arith.constant 0 : index
    %c0_182 = arith.constant 0 : index
    %c0_183 = arith.constant 0 : index
    %482 = vector.load %arg5[%c0_181, %c0_182, %c0_183] : memref<3x384x256xf32, #tpu.memory_space<vmem>>, vector<1x384x256xf32>
    %483 = vector.shape_cast %482 : vector<1x384x256xf32> to vector<384x256xf32>
    %cst_184 = arith.constant dense<0.000000e+00> : vector<4x256xf32>
    %484 = tpu.matmul %481, %483, %cst_184 {dimension_numbers = #tpu.dot_dimension_numbers<[1], [0], [0], [1], [0, 0, 1, 1], [], []>} : vector<4x384xf32>, vector<384x256xf32>, vector<4x256xf32> -> vector<4x256xf32>
    %485 = tpu.iota {dimensions = array<i32: 0>} : vector<2x6xi32>
    %486 = tpu.iota {dimensions = array<i32: 1>} : vector<2x6xi32>
    %c2_i32_185 = arith.constant 2 : i32
    %487 = vector.broadcast %c2_i32_185 : i32 to vector<2x6xi32>
    %488 = arith.muli %487, %485 : vector<2x6xi32>
    %c1_i32_186 = arith.constant 1 : i32
    %489 = vector.broadcast %c1_i32_186 : i32 to vector<2x6xi32>
    %490 = arith.addi %488, %489 : vector<2x6xi32>
    %491 = arith.cmpi eq, %486, %490 : vector<2x6xi32>
    %cst_187 = arith.constant 1.000000e+00 : f32
    %cst_188 = arith.constant 0.000000e+00 : f32
    %492 = vector.broadcast %cst_187 : f32 to vector<2x6xf32>
    %493 = vector.broadcast %cst_188 : f32 to vector<2x6xf32>
    %494 = arith.select %491, %492, %493 : vector<2x6xi1>, vector<2x6xf32>
    %cst_189 = arith.constant 0.000000e+00 : f32
    %495 = vector.broadcast %cst_189 : f32 to vector<2x6xf32>
    %496 = tpu.concatenate %494, %495 in 1 : vector<2x6xf32>, vector<2x6xf32> -> vector<2x12xf32>
    %cst_190 = arith.constant 0.000000e+00 : f32
    %497 = vector.broadcast %cst_190 : f32 to vector<2x6xf32>
    %498 = tpu.concatenate %497, %494 in 1 : vector<2x6xf32>, vector<2x6xf32> -> vector<2x12xf32>
    %499 = tpu.concatenate %496, %498 in 0 : vector<2x12xf32>, vector<2x12xf32> -> vector<4x12xf32>
    %cst_191 = arith.constant dense<0.000000e+00> : vector<4x384xf32>
    %500 = tpu.matmul %499, %465, %cst_191 {dimension_numbers = #tpu.dot_dimension_numbers<[1], [0], [0], [1], [0, 0, 1, 1], [], []>} : vector<4x12xf32>, vector<12x384xf32>, vector<4x384xf32> -> vector<4x384xf32>
    %c1_192 = arith.constant 1 : index
    %c0_193 = arith.constant 0 : index
    %c0_194 = arith.constant 0 : index
    %501 = vector.load %arg5[%c1_192, %c0_193, %c0_194] : memref<3x384x256xf32, #tpu.memory_space<vmem>>, vector<1x384x256xf32>
    %502 = vector.shape_cast %501 : vector<1x384x256xf32> to vector<384x256xf32>
    %cst_195 = arith.constant dense<0.000000e+00> : vector<4x256xf32>
    %503 = tpu.matmul %500, %502, %cst_195 {dimension_numbers = #tpu.dot_dimension_numbers<[1], [0], [0], [1], [0, 0, 1, 1], [], []>} : vector<4x384xf32>, vector<384x256xf32>, vector<4x256xf32> -> vector<4x256xf32>
    %504 = arith.addf %484, %503 : vector<4x256xf32>
    %505 = tpu.iota {dimensions = array<i32: 0>} : vector<2x6xi32>
    %506 = tpu.iota {dimensions = array<i32: 1>} : vector<2x6xi32>
    %c2_i32_196 = arith.constant 2 : i32
    %507 = vector.broadcast %c2_i32_196 : i32 to vector<2x6xi32>
    %508 = arith.muli %507, %505 : vector<2x6xi32>
    %c2_i32_197 = arith.constant 2 : i32
    %509 = vector.broadcast %c2_i32_197 : i32 to vector<2x6xi32>
    %510 = arith.addi %508, %509 : vector<2x6xi32>
    %511 = arith.cmpi eq, %506, %510 : vector<2x6xi32>
    %cst_198 = arith.constant 1.000000e+00 : f32
    %cst_199 = arith.constant 0.000000e+00 : f32
    %512 = vector.broadcast %cst_198 : f32 to vector<2x6xf32>
    %513 = vector.broadcast %cst_199 : f32 to vector<2x6xf32>
    %514 = arith.select %511, %512, %513 : vector<2x6xi1>, vector<2x6xf32>
    %cst_200 = arith.constant 0.000000e+00 : f32
    %515 = vector.broadcast %cst_200 : f32 to vector<2x6xf32>
    %516 = tpu.concatenate %514, %515 in 1 : vector<2x6xf32>, vector<2x6xf32> -> vector<2x12xf32>
    %cst_201 = arith.constant 0.000000e+00 : f32
    %517 = vector.broadcast %cst_201 : f32 to vector<2x6xf32>
    %518 = tpu.concatenate %517, %514 in 1 : vector<2x6xf32>, vector<2x6xf32> -> vector<2x12xf32>
    %519 = tpu.concatenate %516, %518 in 0 : vector<2x12xf32>, vector<2x12xf32> -> vector<4x12xf32>
    %cst_202 = arith.constant dense<0.000000e+00> : vector<4x384xf32>
    %520 = tpu.matmul %519, %465, %cst_202 {dimension_numbers = #tpu.dot_dimension_numbers<[1], [0], [0], [1], [0, 0, 1, 1], [], []>} : vector<4x12xf32>, vector<12x384xf32>, vector<4x384xf32> -> vector<4x384xf32>
    %c2_203 = arith.constant 2 : index
    %c0_204 = arith.constant 0 : index
    %c0_205 = arith.constant 0 : index
    %521 = vector.load %arg5[%c2_203, %c0_204, %c0_205] : memref<3x384x256xf32, #tpu.memory_space<vmem>>, vector<1x384x256xf32>
    %522 = vector.shape_cast %521 : vector<1x384x256xf32> to vector<384x256xf32>
    %cst_206 = arith.constant dense<0.000000e+00> : vector<4x256xf32>
    %523 = tpu.matmul %520, %522, %cst_206 {dimension_numbers = #tpu.dot_dimension_numbers<[1], [0], [0], [1], [0, 0, 1, 1], [], []>} : vector<4x384xf32>, vector<384x256xf32>, vector<4x256xf32> -> vector<4x256xf32>
    %524 = arith.addf %504, %523 : vector<4x256xf32>
    %cst_207 = arith.constant 1.000000e+00 : f32
    %525 = vector.broadcast %cst_207 : f32 to vector<1x2xf32>
    %cst_208 = arith.constant 0.000000e+00 : f32
    %526 = vector.broadcast %cst_208 : f32 to vector<1x2xf32>
    %527 = tpu.concatenate %525, %526 in 1 : vector<1x2xf32>, vector<1x2xf32> -> vector<1x4xf32>
    %cst_209 = arith.constant 0.000000e+00 : f32
    %528 = vector.broadcast %cst_209 : f32 to vector<1x2xf32>
    %529 = tpu.concatenate %528, %525 in 1 : vector<1x2xf32>, vector<1x2xf32> -> vector<1x4xf32>
    %530 = tpu.concatenate %527, %529 in 0 : vector<1x4xf32>, vector<1x4xf32> -> vector<2x4xf32>
    %cst_210 = arith.constant 1.000000e+00 : f32
    %531 = vector.broadcast %cst_210 : f32 to vector<2x1xf32>
    %cst_211 = arith.constant 0.000000e+00 : f32
    %532 = vector.broadcast %cst_211 : f32 to vector<2x1xf32>
    %533 = tpu.concatenate %531, %532 in 1 : vector<2x1xf32>, vector<2x1xf32> -> vector<2x2xf32>
    %cst_212 = arith.constant 0.000000e+00 : f32
    %534 = vector.broadcast %cst_212 : f32 to vector<2x1xf32>
    %535 = tpu.concatenate %534, %531 in 1 : vector<2x1xf32>, vector<2x1xf32> -> vector<2x2xf32>
    %536 = tpu.concatenate %533, %535 in 0 : vector<2x2xf32>, vector<2x2xf32> -> vector<4x2xf32>
    %cst_213 = arith.constant dense<0.000000e+00> : vector<2x256xf32>
    %537 = tpu.matmul %530, %524, %cst_213 {dimension_numbers = #tpu.dot_dimension_numbers<[1], [0], [0], [1], [0, 0, 1, 1], [], []>} : vector<2x4xf32>, vector<4x256xf32>, vector<2x256xf32> -> vector<2x256xf32>
    %538 = arith.mulf %524, %524 : vector<4x256xf32>
    %cst_214 = arith.constant dense<0.000000e+00> : vector<2x256xf32>
    %539 = tpu.matmul %530, %538, %cst_214 {dimension_numbers = #tpu.dot_dimension_numbers<[1], [0], [0], [1], [0, 0, 1, 1], [], []>} : vector<2x4xf32>, vector<4x256xf32>, vector<2x256xf32> -> vector<2x256xf32>
    %cst_215 = arith.constant 0.000000e+00 : f32
    %540 = vector.broadcast %cst_215 : f32 to vector<2x128xf32>
    %cst_216 = arith.constant 0.000000e+00 : f32
    %541 = vector.broadcast %cst_216 : f32 to vector<2x128xf32>
    %542 = vector.extract_strided_slice %537 {offsets = [0, 0], sizes = [2, 128], strides = [1, 1]} : vector<2x256xf32> to vector<2x128xf32>
    %543 = arith.addf %540, %542 : vector<2x128xf32>
    %544 = vector.extract_strided_slice %539 {offsets = [0, 0], sizes = [2, 128], strides = [1, 1]} : vector<2x256xf32> to vector<2x128xf32>
    %545 = arith.addf %541, %544 : vector<2x128xf32>
    %546 = vector.extract_strided_slice %537 {offsets = [0, 128], sizes = [2, 128], strides = [1, 1]} : vector<2x256xf32> to vector<2x128xf32>
    %547 = arith.addf %543, %546 : vector<2x128xf32>
    %548 = vector.extract_strided_slice %539 {offsets = [0, 128], sizes = [2, 128], strides = [1, 1]} : vector<2x256xf32> to vector<2x128xf32>
    %549 = arith.addf %545, %548 : vector<2x128xf32>
    %cst_217 = arith.constant 2.500000e-01 : f32
    %550 = vector.broadcast %cst_217 : f32 to vector<2x128xf32>
    %551 = arith.mulf %547, %550 : vector<2x128xf32>
    %cst_218 = arith.constant 2.500000e-01 : f32
    %552 = vector.broadcast %cst_218 : f32 to vector<2x128xf32>
    %553 = arith.mulf %549, %552 : vector<2x128xf32>
    %554 = arith.mulf %551, %551 : vector<2x128xf32>
    %555 = arith.subf %553, %554 : vector<2x128xf32>
    %cst_219 = arith.constant 9.99999974E-6 : f32
    %556 = vector.broadcast %cst_219 : f32 to vector<2x128xf32>
    %557 = arith.addf %555, %556 : vector<2x128xf32>
    %558 = math.rsqrt %557 : vector<2x128xf32>
    %cst_220 = arith.constant dense<0.000000e+00> : vector<4x128xf32>
    %559 = tpu.matmul %536, %551, %cst_220 {dimension_numbers = #tpu.dot_dimension_numbers<[1], [0], [0], [1], [0, 0, 1, 1], [], []>} : vector<4x2xf32>, vector<2x128xf32>, vector<4x128xf32> -> vector<4x128xf32>
    %560 = tpu.concatenate %559, %559 in 1 : vector<4x128xf32>, vector<4x128xf32> -> vector<4x256xf32>
    %cst_221 = arith.constant dense<0.000000e+00> : vector<4x128xf32>
    %561 = tpu.matmul %536, %558, %cst_221 {dimension_numbers = #tpu.dot_dimension_numbers<[1], [0], [0], [1], [0, 0, 1, 1], [], []>} : vector<4x2xf32>, vector<2x128xf32>, vector<4x128xf32> -> vector<4x128xf32>
    %562 = tpu.concatenate %561, %561 in 1 : vector<4x128xf32>, vector<4x128xf32> -> vector<4x256xf32>
    %563 = arith.subf %524, %560 : vector<4x256xf32>
    %564 = arith.mulf %563, %562 : vector<4x256xf32>
    %cst_222 = arith.constant 0.000000e+00 : f32
    %565 = vector.broadcast %cst_222 : f32 to vector<4x256xf32>
    %566 = arith.cmpf oge, %564, %565 : vector<4x256xf32>
    %cst_223 = arith.constant 2.000000e-01 : f32
    %567 = vector.broadcast %cst_223 : f32 to vector<4x256xf32>
    %568 = arith.mulf %567, %564 : vector<4x256xf32>
    %569 = arith.select %566, %564, %568 : vector<4x256xi1>, vector<4x256xf32>
    %cst_224 = arith.constant 1.000000e+00 : f32
    %570 = vector.broadcast %cst_224 : f32 to vector<4x1xf32>
    %571 = tpu.concatenate %569, %570 in 1 : vector<4x256xf32>, vector<4x1xf32> -> vector<4x257xf32>
    %c0_225 = arith.constant 0 : index
    %c0_226 = arith.constant 0 : index
    %572 = vector.load %arg6[%c0_225, %c0_226] : memref<257x2xf32, #tpu.memory_space<vmem>>, vector<257x2xf32>
    %cst_227 = arith.constant dense<0.000000e+00> : vector<4x2xf32>
    %573 = tpu.matmul %571, %572, %cst_227 {dimension_numbers = #tpu.dot_dimension_numbers<[1], [0], [0], [1], [0, 0, 1, 1], [], []>} : vector<4x257xf32>, vector<257x2xf32>, vector<4x2xf32> -> vector<4x2xf32>
    %c0_228 = arith.constant 0 : index
    %c0_229 = arith.constant 0 : index
    %c0_230 = arith.constant 0 : index
    %574 = vector.load %arg7[%c0_228, %c0_229, %c0_230] : memref<1x4x2xf32, #tpu.memory_space<vmem>>, vector<1x4x2xf32>
    %575 = vector.shape_cast %574 : vector<1x4x2xf32> to vector<4x2xf32>
    %576 = vector.shape_cast %573 : vector<4x2xf32> to vector<1x4x2xf32>
    tpu.vector_store %arg7[%c0_228, %c0_229, %c0_230], %576 {strides = array<i32>} : memref<1x4x2xf32, #tpu.memory_space<vmem>>, vector<1x4x2xf32>,
    return
  }
  func.func @transform_0(%arg0: i32) -> (i32, i32, i32) {
    %c0_i32 = arith.constant 0 : i32
    %c0_i32_0 = arith.constant 0 : i32
    %c0_i32_1 = arith.constant 0 : i32
    return %arg0, %c0_i32, %c0_i32_0 : i32, i32, i32
  }
  func.func @transform_1(%arg0: i32) -> (i32, i32, i32) {
    %c0_i32 = arith.constant 0 : i32
    %c0_i32_0 = arith.constant 0 : i32
    %c0_i32_1 = arith.constant 0 : i32
    %c0_i32_2 = arith.constant 0 : i32
    return %c0_i32, %c0_i32_0, %c0_i32_1 : i32, i32, i32
  }
  func.func @transform_2(%arg0: i32) -> (i32, i32, i32) {
    %c0_i32 = arith.constant 0 : i32
    %c0_i32_0 = arith.constant 0 : i32
    %c0_i32_1 = arith.constant 0 : i32
    %c0_i32_2 = arith.constant 0 : i32
    return %c0_i32, %c0_i32_0, %c0_i32_1 : i32, i32, i32
  }
  func.func @transform_3(%arg0: i32) -> (i32, i32, i32) {
    %c0_i32 = arith.constant 0 : i32
    %c0_i32_0 = arith.constant 0 : i32
    %c0_i32_1 = arith.constant 0 : i32
    %c0_i32_2 = arith.constant 0 : i32
    return %c0_i32, %c0_i32_0, %c0_i32_1 : i32, i32, i32
  }
  func.func @transform_4(%arg0: i32) -> (i32, i32, i32) {
    %c0_i32 = arith.constant 0 : i32
    %c0_i32_0 = arith.constant 0 : i32
    %c0_i32_1 = arith.constant 0 : i32
    %c0_i32_2 = arith.constant 0 : i32
    return %c0_i32, %c0_i32_0, %c0_i32_1 : i32, i32, i32
  }
  func.func @transform_5(%arg0: i32) -> (i32, i32) {
    %c0_i32 = arith.constant 0 : i32
    %c0_i32_0 = arith.constant 0 : i32
    %c0_i32_1 = arith.constant 0 : i32
    return %c0_i32, %c0_i32_0 : i32, i32
  }
  func.func @transform_6(%arg0: i32) -> (i32, i32, i32) {
    %c0_i32 = arith.constant 0 : i32
    %c0_i32_0 = arith.constant 0 : i32
    %c0_i32_1 = arith.constant 0 : i32
    return %arg0, %c0_i32, %c0_i32_0 : i32, i32, i32
  }
}

</mosaic_0001>

<bundles_post_ra>
// kernel: _lambda_.1
= control target key start
LH: loop header
LB: loop body
LE: loop exit
PB: predicated region body
PF: predicated region fallthrough
CT: control target
= control target key end

     0   :  { %s10091_s21 = smov 0   ;;  %s13815_s0 = inlined_call_operand.vmem [shape: f32[2,64,96], index: 0, kind: input, shape index: {}]   ;;  %s13816_s1 = inlined_call_operand.vmem [shape: f32[3,102,256], index: 1, kind: input, shape index: {}]   ;;  %s13817_s2 = inlined_call_operand.vmem [shape: f32[3,288,256], index: 2, kind: input, shape index: {}]   ;;  %s13818_s3 = inlined_call_operand.vmem [shape: f32[3,320,256], index: 3, kind: input, shape index: {}]   ;;  %s13819_s4 = inlined_call_operand.vmem [shape: f32[3,384,256], index: 4, kind: input, shape index: {}]   ;;  %s13820_s5 = inlined_call_operand.vmem [shape: f32[257,2], index: 5, kind: input, shape index: {}]   ;;  %s13821_s6 = inlined_call_operand.vmem [shape: f32[2,4,2], index: 6, kind: output, shape index: {}]  }
   0x1 LB: > { %s7593_s22 = sadd.s32 4294967295, %s10035_s21   ;;  %p7597_p0 = scmp.ge.s32.totalorder %s10035_s21, 1  ;;  %s10035_s21 = sphi %s10091_s21, %s16_s21  }
   0x2   : > { %p212_p1 = scmp.lt.s32.totalorder %s10035_s21, 3 }
   0x4   : > { %p213_p2 = pnand %p7597_p0, %p212_p1 }
   0x5   : > { %p241_p3 = scmp.lt.s32.totalorder (!%p213_p2), %s7593_s22, 1  ;;  %v308_v0 = vlaneseq (!%p213_p2)  ;;  %v10037_v1 = vmov (!%p213_p2), 0.0|0.0   ;;  %s10038_s27 = smov (!%p213_p2), 3   ;;  %v10039_v20 = vmov (!%p213_p2), 0.0   ;;  %vm10040_vm2 = vmmov (!%p213_p2), 0   ;;  %v7634_v50 = vld [vmem:[%s13816_s1 + $0x100] sm:$0xff] (!%p213_p2) }
   0x6   : > { %216 = sbr.rel (%p213_p2) target bundleno = 6824 (0x1aa8), region = 44  ;;  %8811 = vmatprep.subr.bf16.mxu0 (!%p213_p2), %v10037_v1  ;;  %8533 = vmatprep.mubr.msk.f32.mxu0 (!%p213_p2), %vm10040_vm2, %v10039_v20  ;;  %s10041_s28 = smov (!%p213_p2), 32   ;;  %vm290_vm12 = vcmask (!%p213_p2), 23552   ;;  %vm299_vm13 = vcmask (!%p213_p2), 809984   ;;  %vm327_vm15 = vcmask (!%p213_p2), 261120  }
   0x7   : > { %v10102_v2 = vand.u32 (!%p213_p2), 127, %v308_v0  ;;  %v309_v3 = vshrl.u32 (!%p213_p2), %v308_v0, 7  ;;  %s10042_s29 = smov (!%p213_p2), 34   ;;  %vm10168_vm14 = vmpackc.low (!%p213_p2), %vm299_vm13, %vm299_vm13  ;;  %s10044_s15 = smov (!%p213_p2), 112   ;;  %vm1761_vm13 = vcmask (!%p213_p2), 654336  }
   0x8   : > { %s10045_s16 = smov (!%p213_p2), 96   ;;  %s10046_s17 = smov (!%p213_p2), 80  }
   0x9   : > { %v316_v11 = vadd.s32 (!%p213_p2), 1, %v10102_v2  ;;  %v310_v15 = vadd.s32 (!%p213_p2), 8, %v309_v3  ;;  %v311_v18 = vadd.s32 (!%p213_p2), 16, %v309_v3  ;;  %v312_v19 = vadd.s32 (!%p213_p2), 24, %v309_v3  ;;  %s10047_s18 = smov (!%p213_p2), 64   ;;  %s10048_s19 = smov (!%p213_p2), 48  }
   0xa   : > { %v313_v23 = vadd.s32 (!%p213_p2), 32, %v309_v3  ;;  %v509_v27 = vmul.u32 (!%p213_p2), 2, %v309_v3  ;;  %s10049_s20 = smov (!%p213_p2), 16   ;;  %s10053_s14 = smov (!%p213_p2), 4  }
   0xb   : > { %vm317_vm0 = vcmp.eq.s32.totalorder (!%p213_p2), %v309_v3, %v316_v11  ;;  %vm318_vm1 = vcmp.eq.s32.totalorder (!%p213_p2), %v310_v15, %v316_v11  ;;  %vm319_vm3 = vcmp.eq.s32.totalorder (!%p213_p2), %v311_v18, %v316_v11  ;;  %vm320_vm4 = vcmp.eq.s32.totalorder (!%p213_p2), %v312_v19, %v316_v11 }
   0xc   : > { %v10110_v21 = vsel (!%p213_p2), %vm317_vm0, 1.0, %v10039_v20  ;;  %v10115_v22 = vsel (!%p213_p2), %vm318_vm1, 1.0, %v10039_v20  ;;  %v10122_v24 = vsel (!%p213_p2), %vm319_vm3, 1.0, %v10039_v20  ;;  %v10125_v25 = vsel (!%p213_p2), %vm320_vm4, 1.0, %v10039_v20 }
   0xd   : > { %s13835_s22 = smov (!%p241_p3, %s7593_s22), 1  ;;  %vm321_vm5 = vcmp.eq.s32.totalorder %v313_v23, %v316_v11  ;;  %v510_v28 = vmul.u32 2, %v310_v15  ;;  %vm511_vm6 = vcmp.eq.s32.totalorder %v10102_v2, %v509_v27  ;;  %v656_v29 = vadd.s32 1, %v509_v27 }
   0xe   : > { %s8340_s23 = sshll.u32 %s13835_s22, 6  ;;  %v10132_v26 = vsel %vm321_vm5, 1.0, %v10039_v20  ;;  %v10139_v31 = vsel %vm511_vm6, 1.0, %v10039_v20  ;;  %v1014_v33 = vadd.s32 2, %v509_v27  ;;  %vm375_vm0 = vcmask 523264  }
   0xf   : > { %s245_s26 = scalar_lea.vmem %s13815_s0, %s8340_s23  ;;  %vm512_vm7 = vcmp.eq.s32.totalorder %v10102_v2, %v510_v28  ;;  %v657_v30 = vadd.s32 1, %v510_v28  ;;  %v1015_v34 = vadd.s32 2, %v510_v28  ;;  %vm658_vm8 = vcmp.eq.s32.totalorder %v10102_v2, %v656_v29  ;;  %s10050_s23 = smov 18  }
  0x10   : > { %v250_v4 = vld [vmem:[%s245_s26] sm:$0xff]  ;;  %v251_v5 = vld [vmem:[%s245_s26 + $0x8] sm:$0xff]  ;;  %v252_v6 = vld [vmem:[%s245_s26 + $0x10] sm:$0xff]  ;;  %v10142_v32 = vsel %vm512_vm7, 1.0, %v10039_v20  ;;  %v10149_v36 = vsel %vm658_vm8, 1.0, %v10039_v20  ;;  %vm1016_vm10 = vcmp.eq.s32.totalorder %v10102_v2, %v1014_v33  ;;  %vm363_vm1 = vcmask 1041408  }
  0x11   : > { %v9956_v7 = vpack.i.bf16 %v251_v5, %v250_v4  ;;  %v253_v8 = vld [vmem:[%s245_s26 + $0x18] sm:$0xff]  ;;  %v254_v9 = vld [vmem:[%s245_s26 + $0x20] sm:$0xff]  ;;  %v255_v10 = vld [vmem:[%s245_s26 + $0x28] sm:$0xff]  ;;  %v9976_v35 = vpack.i.bf16 %v10142_v32, %v10139_v31  ;;  %vm659_vm9 = vcmp.eq.s32.totalorder %v10102_v2, %v657_v30  ;;  %vm1017_vm11 = vcmp.eq.s32.totalorder %v10102_v2, %v1015_v34 }
  0x12   : > { %v9966_v12 = vpack.i.bf16 %v255_v10, %v254_v9  ;;  %v256_v13 = vld [vmem:[%s245_s26 + $0x30] sm:$0xff]  ;;  %v257_v14 = vld [vmem:[%s245_s26 + $0x38] sm:$0xff]  ;;  %v9961_v16 = vpack.i.bf16 %v253_v8, %v252_v6  ;;  %v10152_v37 = vsel %vm659_vm9, 1.0, %v10039_v20  ;;  %v10159_v39 = vsel %vm1016_vm10, 1.0, %v10039_v20 }
  0x13   : > { %9957 = vrot.lane.b32.xlu0 %v9956_v7, %s10038_s27  ;;  %v9971_v17 = vpack.i.bf16 %v257_v14, %v256_v13  ;;  %v9981_v38 = vpack.i.bf16 %v10152_v37, %v10149_v36  ;;  %v10162_v40 = vsel %vm1017_vm11, 1.0, %v10039_v20  ;;  %v328_v4 = vsel %vm327_vm15, %v10110_v21, 0.0 }
  0x14   : > { %9967 = vrot.lane.b32.xlu1 %v9966_v12, %s10038_s27  ;;  %v9986_v41 = vpack.i.bf16 %v10162_v40, %v10159_v39  ;;  %v329_v5 = vsel %vm327_vm15, %v10115_v22, 0.0  ;;  %v330_v7 = vsel %vm327_vm15, %v10122_v24, 0.0  ;;  %v331_v9 = vsel %vm327_vm15, %v10125_v25, 0.0 }
  0x15   : > { %v332_v12 = vsel %vm327_vm15, %v10132_v26, 0.0  ;;  %vm515_vm3 = vcmask 277504   ;;  %vm528_vm4 = vcmask 556032   ;;  %vm541_vm5 = vcmask 1043456  }
  0x16   : > { %vm13823_vm6 = vcmask 1045504   ;;  %vm798_vm7 = vcmask 834560   ;;  %vm1271_vm8 = vcmask 130048   ;;  %vm1277_vm9 = vcmask 1040384  }
  0x17   : > { %9962 = vrot.lane.b32.xlu0 %v9961_v16, %s10038_s27  ;;  %vm13822_vm10 = vcmask 7168   ;;  %vm1561_vm11 = vcmask 15360  }
  0x18   : > { %9972 = vrot.lane.b32.xlu1 %v9971_v17, %s10038_s27 }
  0x1b   : > { %338 = vrot.lane.b32.xlu0 %v10110_v21, %s10041_s28 }
  0x1c   : > { %340 = vrot.lane.b32.xlu1 %v10115_v22, %s10041_s28 }
  0x1f   : > { %342 = vrot.lane.b32.xlu0 %v10122_v24, %s10041_s28 }
  0x20   : > { %344 = vrot.lane.b32.xlu1 %v10125_v25, %s10041_s28 }
  0x23   : > { %346 = vrot.lane.b32.xlu0 %v10132_v26, %s10041_s28 }
  0x24   : > { %9977 = vrot.lane.b32.xlu1 %v9976_v35, %s10042_s29  ;;  %v516_v35 = vsel %vm515_vm3, %v10139_v31, 0.0 }
  0x25   : > { %8578 = vmatprep.mubr.msk.f32.mxu1 %vm528_vm4, %v516_v35  ;;  %v7637_v35 = vld [vmem:[%s13816_s1 + $0x118] sm:$0xff] }
  0x27   : > { %9982 = vrot.lane.b32.xlu0 %v9981_v38, %s10042_s29  ;;  %v7629_v38 = vld [vmem:[%s13816_s1 + $0xd8] sm:$0xff] }
  0x28   : > { %9987 = vrot.lane.b32.xlu1 %v9986_v41, %s10042_s29  ;;  %v7631_v41 = vld [vmem:[%s13816_s1 + $0xe8] sm:$0xff] }
  0x85   : > { %v9958_v42 = vpop.permute.xlu0 %9957 }
  0x86   : > { %v9960_v43 = vunpack.i.h.bf16 %v9958_v42  ;;  %v9959_v44 = vunpack.i.l.bf16 %v9958_v42  ;;  %v9968_v45 = vpop.permute.xlu1 %9967  ;;  %v7628_v42 = vld [vmem:[%s13816_s1 + $0xd0] sm:$0xff] }
  0x87   : > { %v9970_v46 = vunpack.i.h.bf16 %v9968_v45  ;;  %v9969_v47 = vunpack.i.l.bf16 %v9968_v45  ;;  %v7633_v45 = vld [vmem:[%s13816_s1 + $0xf8] sm:$0xff] }
  0x88   : > { %v291_v48 = vsel %vm290_vm12, 0.0, %v9959_v44  ;;  %v292_v49 = vsel %vm290_vm12, 0.0, %v9960_v43  ;;  %v8859_v43 = vpack.c.bf16 %v7631_v41, %v7629_v38  ;;  %v7630_v44 = vld [vmem:[%s13816_s1 + $0xe0] sm:$0xff]  ;;  %v7636_v41 = vld [vmem:[%s13816_s1 + $0x110] sm:$0xff] }
  0x89   : > { %v9963_v51 = vpop.permute.xlu0 %9962  ;;  %v8812_v52 = vpack.c.bf16 %v292_v49, %v291_v48  ;;  %v296_v56 = vsel %vm290_vm12, 0.0, %v9970_v46  ;;  %v295_v57 = vsel %vm290_vm12, 0.0, %v9969_v47  ;;  %v7635_v46 = vld [vmem:[%s13816_s1 + $0x108] sm:$0xff]  ;;  %v8861_v47 = vpack.c.bf16 %v7630_v44, %v7628_v42  ;;  %v7632_v49 = vld [vmem:[%s13816_s1 + $0xf0] sm:$0xff]  ;;  %v7638_v42 = vld [vmem:[%s13816_s1 + $0x120] sm:$0xff] }
  0x8a   : > { %v9965_v53 = vunpack.i.h.bf16 %v9963_v51  ;;  %v9964_v54 = vunpack.i.l.bf16 %v9963_v51  ;;  %v9973_v55 = vpop.permute.xlu1 %9972  ;;  %v8820_v63 = vpack.c.bf16 %v296_v56, %v295_v57  ;;  %v8863_v48 = vpack.c.bf16 %v7635_v46, %v7633_v45  ;;  %v7641_v44 = vld [vmem:[%s13816_s1 + $0x138] sm:$0xff]  ;;  %v7643_v45 = vld [vmem:[%s13816_s1 + $0x148] sm:$0xff]  ;;  %v7640_v46 = vld [vmem:[%s13816_s1 + $0x130] sm:$0xff] }
  0x8b   : > { %8814 = vmatpush3.bf16.msk.msra.mxu0 %vm10168_vm14, %v8812_v52  ;;  %v9975_v60 = vunpack.i.h.bf16 %v9973_v55  ;;  %v9974_v61 = vunpack.i.l.bf16 %v9973_v55  ;;  %v8865_v51 = vpack.c.bf16 %v7634_v50, %v7632_v49  ;;  %v7645_v49 = vld [vmem:[%s13816_s1 + $0x158] sm:$0xff]  ;;  %v7647_v50 = vld [vmem:[%s13816_s1 + $0x168] sm:$0xff] }
  0x8c   : > { %v294_v58 = vsel %vm290_vm12, 0.0, %v9965_v53  ;;  %v293_v59 = vsel %vm290_vm12, 0.0, %v9964_v54  ;;  %8815 = vmatprep.subr.bf16.mxu0 %v10037_v1 }
  0x8d   : > { %v8816_v62 = vpack.c.bf16 %v294_v58, %v293_v59  ;;  %v298_v0 = vsel %vm290_vm12, 0.0, %v9975_v60  ;;  %v297_v2 = vsel %vm290_vm12, 0.0, %v9974_v61  ;;  %v339_v6 = vpop.permute.xlu0 %338  ;;  %vm1752_vm12 = vcmask 392192  }
  0x8e   : > { %v8824_v3 = vpack.c.bf16 %v298_v0, %v297_v2  ;;  %v353_v8 = vsel %vm327_vm15, 0.0, %v339_v6  ;;  %v341_v10 = vpop.permute.xlu1 %340 }
  0x8f   : > { %8818 = vmatpush3.bf16.msk.msra.mxu0 %vm10168_vm14, %v8816_v62  ;;  %v364_v11 = vrot.slane %v353_v8, 6  ;;  %v354_v13 = vsel %vm327_vm15, 0.0, %v341_v10 }
  0x90   : > { %8819 = vmatprep.subr.bf16.mxu0 %v10037_v1  ;;  %v365_v16 = vrot.slane %v354_v13, 6  ;;  %v517_v13 = vsel %vm515_vm3, %v10142_v32, 0.0 }
  0x91   : > { %v343_v14 = vpop.permute.xlu0 %342  ;;  %v374_v15 = vsel %vm363_vm1, %v332_v12, %v364_v11 }
  0x92   : > { %v355_v17 = vsel %vm327_vm15, 0.0, %v343_v14  ;;  %v345_v18 = vpop.permute.xlu1 %344  ;;  %v366_v23 = vsel %vm363_vm1, %v364_v11, %v365_v16 }
  0x93   : > { %8822 = vmatpush3.bf16.msk.msra.mxu0 %vm10168_vm14, %v8820_v63  ;;  %v367_v19 = vrot.slane %v355_v17, 6  ;;  %v356_v25 = vsel %vm327_vm15, 0.0, %v345_v18  ;;  %v662_v17 = vsel %vm515_vm3, %v10149_v36, 0.0 }
  0x94   : > { %8823 = vmatprep.subr.bf16.mxu0 %v10037_v1  ;;  %v369_v27 = vrot.slane %v356_v25, 6 }
  0x95   : > { %v347_v26 = vpop.permute.xlu0 %346  ;;  %v368_v28 = vsel %vm363_vm1, %v365_v16, %v367_v19 }
  0x96   : > { %v357_v29 = vsel %vm327_vm15, 0.0, %v347_v26  ;;  %v370_v33 = vsel %vm363_vm1, %v367_v19, %v369_v27  ;;  %v663_v19 = vsel %vm515_vm3, %v10152_v37, 0.0 }
  0x97   : > { %8826 = vmatpush3.bf16.msk.msra.mxu0 %vm10168_vm14, %v8824_v3  ;;  %v371_v30 = vrot.slane %v357_v29, 6  ;;  %v1021_v29 = vsel %vm515_vm3, %v10162_v40, 0.0  ;;  %v7639_v40 = vld [vmem:[%s13816_s1 + $0x128] sm:$0xff]  ;;  %vm1766_vm14 = vcmask 785408  }
  0x98   : > { %8860 = vmatprep.subr.bf16.mxu0 %v8859_v43  ;;  %v8867_v38 = vpack.c.bf16 %v7639_v40, %v7637_v35  ;;  %v8869_v43 = vpack.c.bf16 %v7638_v42, %v7636_v41  ;;  %v644_v35 = vld [vmem:[%s13816_s1 + $0x70] sm:$0xff]  ;;  %v647_v40 = vld [vmem:[%s13816_s1 + $0x88] sm:$0xff] }
  0x99   : > { %v372_v34 = vsel %vm363_vm1, %v369_v27, %v371_v30  ;;  %v9983_v32 = vpop.permute.xlu0 %9982  ;;  %v1020_v27 = vsel %vm515_vm3, %v10159_v39, 0.0 }
  0x9a   : > { %8534 = vmatmul.mubr.msk.f32.vlgmr.msra.gmra.mrb[0].mxu0 %vm375_vm0, %v328_v4  ;;  %v9984_v18 = vunpack.i.l.bf16 %v9983_v32 }
  0x9b   : > { %8536 = vmatprep.mubr.msk.f32.mxu0 %vm10040_vm2, %v10039_v20  ;;  %8862 = vmatpush1.bf16.msra.mxu0 %v8861_v47  ;;  %v8871_v47 = vpack.c.bf16 %v7643_v45, %v7641_v44  ;;  %v648_v44 = vld [vmem:[%s13816_s1 + $0x90] sm:$0xff]  ;;  %v651_v45 = vld [vmem:[%s13816_s1 + $0xa8] sm:$0xff] }
  0x9c   : > { %8864 = vmatprep.subr.bf16.mxu0 %v8863_v48  ;;  %v672_v25 = vsel %vm515_vm3, 0.0, %v9984_v18  ;;  %v7642_v48 = vld [vmem:[%s13816_s1 + $0x140] sm:$0xff]  ;;  %v641_v18 = vld [vmem:[%s13816_s1 + $0x58] sm:$0xff] }
  0x9e   : > { %8537 = vmatmul.mubr.msk.f32.gmra.mrb[2].mxu0 %vm375_vm0, %v329_v5 }
  0x9f   : > { %8539 = vmatprep.mubr.msk.f32.mxu0 %vm10040_vm2, %v10039_v20  ;;  %8866 = vmatpush1.bf16.msra.mxu0 %v8865_v51  ;;  %v8873_v51 = vpack.c.bf16 %v7642_v48, %v7640_v46  ;;  %v653_v46 = vld [vmem:[%s13816_s1 + $0xb8] sm:$0xff] }
  0xa0   : > { %8868 = vmatprep.subr.bf16.mxu0 %v8867_v38  ;;  %v649_v38 = vld [vmem:[%s13816_s1 + $0x98] sm:$0xff]  ;;  %v8903_v48 = vpack.c.bf16 %v653_v46, %v651_v45 }
  0xa1   : > { %v8899_v42 = vpack.c.bf16 %v649_v38, %v647_v40  ;;  %v7695_v40 = vld [vmem:[%s13816_s1 + $0x260] sm:$0x3f] }
  0xa2   : > { %8540 = vmatmul.mubr.msk.f32.gmra.mrb[4].mxu0 %vm375_vm0, %v330_v7  ;;  %v9978_v7 = vpop.permute.xlu1 %9977 }
  0xa3   : > { %8542 = vmatprep.mubr.msk.f32.mxu0 %vm10040_vm2, %v10039_v20  ;;  %v9979_v10 = vunpack.i.l.bf16 %v9978_v7  ;;  %v9980_v14 = vunpack.i.h.bf16 %v9978_v7  ;;  %8870 = vmatpush1.bf16.msra.mxu0 %v8869_v43  ;;  %v646_v43 = vld [vmem:[%s13816_s1 + $0x80] sm:$0xff] }
  0xa4   : > { %8872 = vmatprep.subr.bf16.mxu0 %v8871_v47  ;;  %v8901_v47 = vpack.c.bf16 %v648_v44, %v646_v43 }
  0xa5   : > { %v527_v16 = vsel %vm515_vm3, 0.0, %v9980_v14 }
  0xa6   : > { %8543 = vmatmul.mubr.msk.f32.gmra.mrb[6].mxu0 %vm375_vm0, %v331_v9  ;;  %v9988_v37 = vpop.permute.xlu1 %9987 }
  0xa7   : > { %8545 = vmatprep.mubr.msk.f32.mxu0 %vm10040_vm2, %v10039_v20  ;;  %v9990_v30 = vunpack.i.h.bf16 %v9988_v37  ;;  %8874 = vmatpush1.bf16.msra.mxu0 %v8873_v51 }
  0xaa   : > { %8546 = vmatmul.mubr.msk.f32.gmra.mrb[8].mxu0 %vm375_vm0, %v374_v15  ;;  %v526_v15 = vsel %vm515_vm3, 0.0, %v9979_v10  ;;  %v635_v10 = vld [vmem:[%s13816_s1 + $0x28] sm:$0xff] }
  0xab   : > { %8548 = vmatprep.mubr.msk.f32.mxu0 %vm10040_vm2, %v10039_v20 }
  0xae   : > { %8549 = vmatmul.mubr.msk.f32.gmra.mrb[10].mxu0 %vm375_vm0, %v366_v23  ;;  %v9985_v23 = vunpack.i.h.bf16 %v9983_v32  ;;  %v639_v32 = vld [vmem:[%s13816_s1 + $0x48] sm:$0xff] }
  0xaf   : > { %8551 = vmatprep.mubr.msk.f32.mxu0 %vm10040_vm2, %v10039_v20 }
  0xb0   : > { %v673_v26 = vsel %vm515_vm3, 0.0, %v9985_v23  ;;  %v8891_v23 = vpack.c.bf16 %v641_v18, %v639_v32  ;;  %v7683_v18 = vld [vmem:[%s13816_s1 + $0x200] sm:$0xff] }
  0xb2   : > { %8552 = vmatmul.mubr.msk.f32.gmra.mrb[12].mxu0 %vm375_vm0, %v368_v28  ;;  %v9989_v28 = vunpack.i.l.bf16 %v9988_v37 }
  0xb3   : > { %8554 = vmatprep.mubr.msk.f32.mxu0 %vm10040_vm2, %v10039_v20 }
  0xb6   : > { %8555 = vmatmul.mubr.msk.f32.gmra.mrb[14].mxu0 %vm375_vm0, %v370_v33  ;;  %v1030_v33 = vsel %vm515_vm3, 0.0, %v9989_v28  ;;  %v643_v28 = vld [vmem:[%s13816_s1 + $0x68] sm:$0xff] }
  0xb7   : > { %8557 = vmatprep.mubr.msk.f32.mxu0 %vm10040_vm2, %v10039_v20 }
  0xba   : > { %8558 = vmatmul.mubr.msk.f32.gmra.mrb[16].mxu0 %vm375_vm0, %v372_v34  ;;  %v1031_v34 = vsel %vm515_vm3, 0.0, %v9990_v30  ;;  %vm1771_vm3 = vcmask 916480  }
  0xbb   : > { %882 = vmatprep.mubr.f32.mxu0 %v10039_v20 }
 0x16d   : > { %v465_v52 = vpop.f32.mrb[0].mxu0 }
 0x16e   : > { %v8535_v53 = vpop.f32.mrb[1].mxu0 }
 0x16f   : > { %v7644_v53 = vld [vmem:[%s13816_s1 + $0x150] sm:$0xff] }
 0x171   : > { %v470_v54 = vpop.f32.mrb[2].mxu0 }
 0x172   : > { %v8827_v55 = vpack.c.bf16 %v470_v54, %v465_v52  ;;  %v8538_v56 = vpop.f32.mrb[3].mxu0  ;;  %v8875_v52 = vpack.c.bf16 %v7647_v50, %v7645_v49  ;;  %v7646_v54 = vld [vmem:[%s13816_s1 + $0x160] sm:$0xff]  ;;  %v652_v50 = vld [vmem:[%s13816_s1 + $0xb0] sm:$0xff] }
 0x173   : > { %v7651_v56 = vld [vmem:[%s13816_s1 + $0x188] sm:$0xff]  ;;  %v650_v49 = vld [vmem:[%s13816_s1 + $0xa0] sm:$0xff] }
 0x174   : > { %8828 = vmatprep.subr.bf16.mxu1 %v8827_v55  ;;  %8876 = vmatprep.subr.bf16.mxu0 %v8875_v52  ;;  %v8905_v52 = vpack.c.bf16 %v652_v50, %v650_v49 }
 0x175   : > { %v475_v57 = vpop.f32.mrb[4].mxu0  ;;  %8830 = vmatpush3.bf16.msra.mxu1 %v8827_v55 }
 0x176   : > { %v8541_v58 = vpop.f32.mrb[5].mxu0 }
 0x179   : > { %v480_v59 = vpop.f32.mrb[6].mxu0 }
 0x17a   : > { %v8831_v60 = vpack.c.bf16 %v480_v59, %v475_v57  ;;  %v8544_v61 = vpop.f32.mrb[7].mxu0  ;;  %v8877_v57 = vpack.c.bf16 %v7646_v54, %v7644_v53  ;;  %v7648_v59 = vld [vmem:[%s13816_s1 + $0x170] sm:$0xff]  ;;  %v655_v54 = vld [vmem:[%s13816_s1 + $0xc8] sm:$0x3f] }
 0x17c   : > { %8832 = vmatprep.subr.bf16.mxu1 %v8831_v60  ;;  %8878 = vmatpush1.bf16.msra.mxu0 %v8877_v57  ;;  %v7671_v57 = vld [vmem:[%s13816_s1 + $0x1a0] sm:$0xff] }
 0x17d   : > { %v485_v62 = vpop.f32.mrb[8].mxu0  ;;  %8834 = vmatpush3.bf16.msra.mxu1 %v8831_v60 }
 0x17e   : > { %v8547_v63 = vpop.f32.mrb[9].mxu0 }
 0x17f   : > { %v631_v63 = vld [vmem:[%s13816_s1 + $0x8] sm:$0xff] }
 0x181   : > { %v490_v0 = vpop.f32.mrb[10].mxu0 }
 0x182   : > { %v8835_v2 = vpack.c.bf16 %v490_v0, %v485_v62  ;;  %v8550_v3 = vpop.f32.mrb[11].mxu0  ;;  %v7653_v62 = vld [vmem:[%s13816_s1 + $0x198] sm:$0x3f] }
 0x183   : > { %v633_v0 = vld [vmem:[%s13816_s1 + $0x18] sm:$0xff] }
 0x184   : > { %8836 = vmatprep.subr.bf16.mxu1 %v8835_v2  ;;  %v8883_v3 = vpack.c.bf16 %v633_v0, %v631_v63  ;;  %v654_v63 = vld [vmem:[%s13816_s1 + $0xc0] sm:$0x3f] }
 0x185   : > { %v495_v4 = vpop.f32.mrb[12].mxu0  ;;  %8838 = vmatpush3.bf16.msra.mxu1 %v8835_v2 }
 0x186   : > { %v8553_v5 = vpop.f32.mrb[13].mxu0 }
 0x189   : > { %v500_v6 = vpop.f32.mrb[14].mxu0 }
 0x18a   : > { %v8839_v8 = vpack.c.bf16 %v500_v6, %v495_v4  ;;  %v8556_v9 = vpop.f32.mrb[15].mxu0 }
 0x18b   : > { %v632_v9 = vld [vmem:[%s13816_s1 + $0x10] sm:$0xff] }
 0x18c   : > { %8840 = vmatprep.subr.bf16.mxu1 %v8839_v8 }
 0x18d   : > { %v505_v11 = vpop.f32.mrb[16].mxu0  ;;  %8842 = vmatpush3.bf16.msra.mxu1 %v8839_v8 }
 0x18e   : > { %v8559_v12 = vpop.f32.mrb[17].mxu0  ;;  %8576 = vmatprep.subr.msk.mxu1 %vm541_vm5, %v505_v11 }
 0x191   : > { %8577 = vmatpush3.msk.msra.mxu1 %vm541_vm5, %v505_v11 }
 0x192   : > { %8579 = vmatmul.mubr.msk.f32.vlgmr.msra.gmra.mrb[0].mxu1 %vm528_vm4, %v517_v13  ;;  %8844 = vmatprep.subr.bf16.mxu1 %v8827_v55 }
 0x193   : > { %8846 = vmatpush3.bf16.msra.mxu1 %v8827_v55  ;;  %8581 = vmatprep.mubr.msk.f32.mxu1 %vm528_vm4, %v526_v15  ;;  %v634_v15 = vld [vmem:[%s13816_s1 + $0x20] sm:$0xff] }
 0x194   : > { %8848 = vmatprep.subr.bf16.mxu1 %v8831_v60 }
 0x196   : > { %8582 = vmatmul.mubr.msk.f32.gmra.mrb[2].mxu1 %vm528_vm4, %v527_v16  ;;  %v636_v16 = vld [vmem:[%s13816_s1 + $0x30] sm:$0xff] }
 0x197   : > { %8850 = vmatpush3.bf16.msra.mxu1 %v8831_v60  ;;  %8602 = vmatprep.mubr.msk.f32.mxu1 %vm528_vm4, %v662_v17 }
 0x198   : > { %8852 = vmatprep.subr.bf16.mxu1 %v8835_v2 }
 0x19b   : > { %8854 = vmatpush3.bf16.msra.mxu1 %v8835_v2 }
 0x19c   : > { %8856 = vmatprep.subr.bf16.mxu1 %v8839_v8 }
 0x19f   : > { %8858 = vmatpush3.bf16.msra.mxu1 %v8839_v8 }
 0x1a0   : > { %8600 = vmatprep.subr.msk.mxu1 %vm541_vm5, %v505_v11 }
 0x1a3   : > { %8601 = vmatpush3.msk.msra.mxu1 %vm541_vm5, %v505_v11 }
 0x1a4   : > { %8603 = vmatmul.mubr.msk.f32.vlgmr.msra.gmra.mrb[4].mxu1 %vm528_vm4, %v663_v19  ;;  %8908 = vmatprep.subr.bf16.mxu1 %v8827_v55  ;;  %v8889_v19 = vpack.c.bf16 %v636_v16, %v634_v15  ;;  %v7681_v15 = vld [vmem:[%s13816_s1 + $0x1f0] sm:$0xff]  ;;  %v7684_v16 = vld [vmem:[%s13816_s1 + $0x208] sm:$0xff] }
 0x1a5   : > { %8910 = vmatpush3.bf16.msra.mxu1 %v8827_v55  ;;  %8605 = vmatprep.mubr.msk.f32.mxu1 %vm528_vm4, %v672_v25  ;;  %v7649_v55 = vld [vmem:[%s13816_s1 + $0x178] sm:$0xff]  ;;  %v638_v25 = vld [vmem:[%s13816_s1 + $0x40] sm:$0xff] }
 0x1a6   : > { %8912 = vmatprep.subr.bf16.mxu1 %v8831_v60  ;;  %v8879_v58 = vpack.c.bf16 %v7651_v56, %v7649_v55  ;;  %v7672_v55 = vld [vmem:[%s13816_s1 + $0x1a8] sm:$0xff]  ;;  %v7674_v56 = vld [vmem:[%s13816_s1 + $0x1b8] sm:$0xff] }
 0x1a7   : > { %v8923_v0 = vpack.c.bf16 %v7674_v56, %v7672_v55 }
 0x1a8   : > { %8606 = vmatmul.mubr.msk.f32.gmra.mrb[6].mxu1 %vm528_vm4, %v673_v26  ;;  %8880 = vmatprep.subr.bf16.mxu0 %v8879_v58  ;;  %v640_v26 = vld [vmem:[%s13816_s1 + $0x50] sm:$0xff] }
 0x1a9   : > { %8914 = vmatpush3.bf16.msra.mxu1 %v8831_v60  ;;  %8626 = vmatprep.mubr.msk.f32.mxu1 %vm528_vm4, %v1020_v27  ;;  %v7650_v60 = vld [vmem:[%s13816_s1 + $0x180] sm:$0xff]  ;;  %v8893_v30 = vpack.c.bf16 %v640_v26, %v638_v25  ;;  %v7673_v58 = vld [vmem:[%s13816_s1 + $0x1b0] sm:$0xff] }
 0x1aa   : > { %8916 = vmatprep.subr.bf16.mxu1 %v8835_v2  ;;  %v8881_v61 = vpack.c.bf16 %v7650_v60, %v7648_v59  ;;  %v7676_v60 = vld [vmem:[%s13816_s1 + $0x1c8] sm:$0xff] }
 0x1ac   : > { %8882 = vmatpush1.bf16.msra.mxu0 %v8881_v61  ;;  %v7678_v61 = vld [vmem:[%s13816_s1 + $0x1d8] sm:$0xff] }
 0x1ad   : > { %8918 = vmatpush3.bf16.msra.mxu1 %v8835_v2  ;;  %7654 = vmatprep.subr.msk.mxu0 %vm13823_vm6, %v7653_v62  ;;  %v7652_v2 = vld [vmem:[%s13816_s1 + $0x190] sm:$0x3f] }
 0x1ae   : > { %8920 = vmatprep.subr.bf16.mxu1 %v8839_v8 }
 0x1b0   : > { %7655 = vmatpush1.msk.msra.mxu0 %vm13823_vm6, %v7652_v2  ;;  %v8925_v2 = vpack.c.bf16 %v7673_v58, %v7671_v57 }
 0x1b1   : > { %8922 = vmatpush3.bf16.msra.mxu1 %v8839_v8  ;;  %8884 = vmatprep.subr.bf16.mxu0 %v8883_v3  ;;  %v630_v8 = vld [vmem:[%s13816_s1] sm:$0xff]  ;;  %v8927_v3 = vpack.c.bf16 %v7678_v61, %v7676_v60 }
 0x1b2   : > { %8624 = vmatprep.subr.msk.mxu1 %vm541_vm5, %v505_v11  ;;  %v8885_v12 = vpack.c.bf16 %v632_v9, %v630_v8  ;;  %v7675_v8 = vld [vmem:[%s13816_s1 + $0x1c0] sm:$0xff]  ;;  %v7677_v9 = vld [vmem:[%s13816_s1 + $0x1d0] sm:$0xff] }
 0x1b5   : > { %8625 = vmatpush3.msk.msra.mxu1 %vm541_vm5, %v505_v11  ;;  %v637_v11 = vld [vmem:[%s13816_s1 + $0x38] sm:$0xff] }
 0x1b6   : > { %8627 = vmatmul.mubr.msk.f32.vlgmr.msra.gmra.mrb[8].mxu1 %vm528_vm4, %v1021_v29  ;;  %v8887_v14 = vpack.c.bf16 %v637_v11, %v635_v10  ;;  %v645_v29 = vld [vmem:[%s13816_s1 + $0x78] sm:$0xff]  ;;  %v7680_v10 = vld [vmem:[%s13816_s1 + $0x1e8] sm:$0xff] }
 0x1b7   : > { %8629 = vmatprep.mubr.msk.f32.mxu1 %vm528_vm4, %v1030_v33  ;;  %v8895_v33 = vpack.c.bf16 %v645_v29, %v643_v28  ;;  %v7682_v11 = vld [vmem:[%s13816_s1 + $0x1f8] sm:$0xff]  ;;  %v7692_v28 = vld [vmem:[%s13816_s1 + $0x248] sm:$0xff] }
 0x1ba   : > { %8630 = vmatmul.mubr.msk.f32.gmra.mrb[10].mxu1 %vm528_vm4, %v1031_v34  ;;  %v642_v34 = vld [vmem:[%s13816_s1 + $0x60] sm:$0xff] }
 0x1bb   : > { %1349 = vmatprep.mubr.f32.mxu1 %v10039_v20  ;;  %v8897_v41 = vpack.c.bf16 %v644_v35, %v642_v34  ;;  %v7693_v34 = vld [vmem:[%s13816_s1 + $0x250] sm:$0xff] }
 0x265   : > { %v10358_v4 = vpop.f32.mrb[0].mxu1 }
 0x266   : > { %v10360_v5 = vpop.f32.mrb[1].mxu1 }
 0x269   : > { %v10362_v6 = vpop.f32.mrb[2].mxu1 }
 0x26a   : > { %v10364_v7 = vpop.f32.mrb[3].mxu1 }
 0x277   : > { %v8604_v13 = vpop.f32.mrb[4].mxu1 }
 0x278   : > { %v752_v17 = vpop.f32.mrb[5].mxu1 }
 0x279   : > { %7656 = vmatmul.mubr.msk.f32.vlgmr.msra.gmra.mrb[18].mxu0 %vm798_vm7, %v752_v17 }
 0x27a   : > { %8886 = vmatpush1.bf16.msra.mxu0 %v8885_v12  ;;  %888 = vmatprep.mubr.f32.mxu0 %v10039_v20  ;;  %v8929_v12 = vpack.c.bf16 %v7677_v9, %v7675_v8 }
 0x27b   : > { %8888 = vmatprep.subr.bf16.mxu0 %v8887_v14  ;;  %v8607_v27 = vpop.f32.mrb[6].mxu1  ;;  %v7679_v14 = vld [vmem:[%s13816_s1 + $0x1e0] sm:$0xff] }
 0x27c   : > { %v762_v37 = vpop.f32.mrb[7].mxu1  ;;  %v8933_v17 = vpack.c.bf16 %v7681_v15, %v7679_v14  ;;  %v10631_v14 = vsel %vm13822_vm10, 1.0, %v10039_v20 }
 0x27d   : > { %7657 = vmatmul.mubr.msk.f32.gmra.mrb[20].mxu0 %vm798_vm7, %v8604_v13  ;;  %v8931_v13 = vpack.c.bf16 %v7682_v11, %v7680_v10 }
 0x27e   : > { %8890 = vmatpush1.bf16.msra.mxu0 %v8889_v19  ;;  %894 = vmatprep.mubr.f32.mxu0 %v10039_v20  ;;  %v7685_v19 = vld [vmem:[%s13816_s1 + $0x210] sm:$0xff] }
 0x27f   : > { %8892 = vmatprep.subr.bf16.mxu0 %v8891_v23  ;;  %v7688_v23 = vld [vmem:[%s13816_s1 + $0x228] sm:$0xff]  ;;  %v8937_v25 = vpack.c.bf16 %v7685_v19, %v7683_v18 }
 0x281   : > { %7658 = vmatmul.mubr.msk.f32.gmra.mrb[22].mxu0 %vm798_vm7, %v762_v37  ;;  %v7689_v37 = vld [vmem:[%s13816_s1 + $0x230] sm:$0xff] }
 0x282   : > { %8894 = vmatpush1.bf16.msra.mxu0 %v8893_v30  ;;  %900 = vmatprep.mubr.f32.mxu0 %v10039_v20 }
 0x283   : > { %8896 = vmatprep.subr.bf16.mxu0 %v8895_v33  ;;  %v7691_v33 = vld [vmem:[%s13816_s1 + $0x240] sm:$0xff] }
 0x284   : > { %v8945_v35 = vpack.c.bf16 %v7693_v34, %v7691_v33 }
 0x285   : > { %7659 = vmatmul.mubr.msk.f32.gmra.mrb[24].mxu0 %vm798_vm7, %v8607_v27  ;;  %v7687_v27 = vld [vmem:[%s13816_s1 + $0x220] sm:$0xff] }
 0x286   : > { %8898 = vmatpush1.bf16.msra.mxu0 %v8897_v41  ;;  %989 = vmatprep.mubr.f32.mxu0 %v10039_v20  ;;  %v8941_v29 = vpack.c.bf16 %v7689_v37, %v7687_v27 }
 0x287   : > { %8900 = vmatprep.subr.bf16.mxu0 %v8899_v42 }
 0x289   : > { %v10440_v51 = vpop.f32.mrb[8].mxu1 }
 0x28a   : > { %8902 = vmatpush1.bf16.msra.mxu0 %v8901_v47  ;;  %v10442_v53 = vpop.f32.mrb[9].mxu1 }
 0x28b   : > { %8904 = vmatprep.subr.bf16.mxu0 %v8903_v48 }
 0x28d   : > { %v10459_v59 = vpop.f32.mrb[10].mxu1 }
 0x28e   : > { %8906 = vmatpush1.bf16.msra.mxu0 %v8905_v52  ;;  %v1120_v62 = vpop.f32.mrb[11].mxu1 }
 0x28f   : > { %7660 = vmatprep.subr.msk.mxu0 %vm13823_vm6, %v655_v54  ;;  %v10043_v54 = vmov 1.0  }
 0x290   : > { %v1273_v55 = vsel %vm1271_vm8, 0.0, %v10043_v54 }
 0x291   : > { %v1275_v57 = vrot.slane %v1273_v55, 7 }
 0x292   : > { %7661 = vmatpush1.msk.msra.mxu0 %vm13823_vm6, %v654_v63 }
 0x293   : > { %7662 = vmatmul.mubr.msk.f32.vlgmr.msra.gmra.mrb[18].mxu0 %vm798_vm7, %v10360_v5  ;;  %8924 = vmatprep.subr.bf16.mxu0 %v8923_v0  ;;  %v7686_v5 = vld [vmem:[%s13816_s1 + $0x218] sm:$0xff] }
 0x294   : > { %8926 = vmatpush1.bf16.msra.mxu0 %v8925_v2  ;;  %995 = vmatprep.mubr.f32.mxu0 %v10039_v20  ;;  %v8935_v32 = vpack.c.bf16 %v7686_v5, %v7684_v16 }
 0x295   : > { %8928 = vmatprep.subr.bf16.mxu0 %v8927_v3 }
 0x297   : > { %7663 = vmatmul.mubr.msk.f32.gmra.mrb[20].mxu0 %vm798_vm7, %v10358_v4  ;;  %v7690_v4 = vld [vmem:[%s13816_s1 + $0x238] sm:$0xff] }
 0x298   : > { %8930 = vmatpush1.bf16.msra.mxu0 %v8929_v12  ;;  %1001 = vmatprep.mubr.f32.mxu0 %v10039_v20  ;;  %v8939_v26 = vpack.c.bf16 %v7690_v4, %v7688_v23 }
 0x299   : > { %8932 = vmatprep.subr.bf16.mxu0 %v8931_v13 }
 0x29b   : > { %7664 = vmatmul.mubr.msk.f32.gmra.mrb[22].mxu0 %vm798_vm7, %v10364_v7  ;;  %v7694_v7 = vld [vmem:[%s13816_s1 + $0x258] sm:$0xff] }
 0x29c   : > { %8934 = vmatpush1.bf16.msra.mxu0 %v8933_v17  ;;  %1007 = vmatprep.mubr.f32.mxu0 %v10039_v20  ;;  %v8943_v30 = vpack.c.bf16 %v7694_v7, %v7692_v28 }
 0x29d   : > { %8936 = vmatprep.subr.bf16.mxu0 %v8935_v32 }
 0x29f   : > { %7665 = vmatmul.mubr.msk.f32.gmra.mrb[24].mxu0 %vm798_vm7, %v10362_v6  ;;  %v7696_v6 = vld [vmem:[%s13816_s1 + $0x268] sm:$0x3f] }
 0x2a0   : > { %8938 = vmatpush1.bf16.msra.mxu0 %v8937_v25  ;;  %1238 = vmatprep.mubr.f32.mxu0 %v10039_v20 }
 0x2a1   : > { %8940 = vmatprep.subr.bf16.mxu0 %v8939_v26 }
 0x2a4   : > { %8942 = vmatpush1.bf16.msra.mxu0 %v8941_v29 }
 0x2a5   : > { %8944 = vmatprep.subr.bf16.mxu0 %v8943_v30 }
 0x2a8   : > { %8946 = vmatpush1.bf16.msra.mxu0 %v8945_v35 }
 0x2a9   : > { %7697 = vmatprep.subr.msk.mxu0 %vm13823_vm6, %v7696_v6 }
 0x2ac   : > { %7698 = vmatpush1.msk.msra.mxu0 %vm13823_vm6, %v7695_v40 }
 0x2ad   : > { %7699 = vmatmul.mubr.msk.f32.vlgmr.msra.gmra.mrb[18].mxu0 %vm798_vm7, %v10442_v53 }
 0x2ae   : > { %1244 = vmatprep.mubr.f32.mxu0 %v10039_v20 }
 0x2b1   : > { %7700 = vmatmul.mubr.msk.f32.gmra.mrb[20].mxu0 %vm798_vm7, %v10440_v51 }
 0x2b2   : > { %1250 = vmatprep.mubr.f32.mxu0 %v10039_v20 }
 0x2b5   : > { %7701 = vmatmul.mubr.msk.f32.gmra.mrb[22].mxu0 %vm798_vm7, %v1120_v62  ;;  %v1272_v62 = vsel %vm1271_vm8, 1.0, %v10039_v20 }
 0x2b6   : > { %1256 = vmatprep.mubr.f32.mxu0 %v10039_v20  ;;  %v1278_v9 = vsel %vm1277_vm9, %v1272_v62, %v1275_v57 }
 0x2b9   : > { %7702 = vmatmul.mubr.msk.f32.gmra.mrb[24].mxu0 %vm798_vm7, %v10459_v59 }
 0x2ba   : > { %2170 = vmatprep.mubr.f32.mxu0 %v10039_v20 }
 0x380   : > { %v10557_v38 = vpop.f32.mrb[18].mxu0 }
 0x381   : > { %v10559_v41 = vpop.f32.mrb[19].mxu0  ;;  %v1356_v43 = vmul.f32 %v10557_v38, %v10557_v38 }
 0x382   : > { %v1357_v47 = vmul.f32 %v10559_v41, %v10559_v41 }
 0x384   : > { %v10561_v42 = vpop.f32.mrb[20].mxu0 }
 0x385   : > { %v8949_v44 = vpack.c.bf16 %v10561_v42, %v10557_v38  ;;  %v1358_v45 = vmul.f32 %v10561_v42, %v10561_v42  ;;  %v10569_v46 = vpop.f32.mrb[21].mxu0 }
 0x386   : > { %v8947_v48 = vpack.c.bf16 %v10569_v46, %v10559_v41  ;;  %v1359_v49 = vmul.f32 %v10569_v46, %v10569_v46 }
 0x387   : > { %v8957_v50 = vpack.c.bf16 %v1358_v45, %v1356_v43 }
 0x388   : > { %v10577_v51 = vpop.f32.mrb[22].mxu0  ;;  %8948 = vmatprep.subr.bf16.mxu1 %v8947_v48  ;;  %v8955_v52 = vpack.c.bf16 %v1359_v49, %v1357_v47 }
 0x389   : > { %v10579_v53 = vpop.f32.mrb[23].mxu0  ;;  %8950 = vmatpush1.bf16.msra.mxu1 %v8949_v44  ;;  %v1360_v58 = vmul.f32 %v10577_v51, %v10577_v51 }
 0x38a   : > { %v1361_v63 = vmul.f32 %v10579_v53, %v10579_v53 }
 0x38c   : > { %v10583_v56 = vpop.f32.mrb[24].mxu0 }
 0x38d   : > { %v8953_v59 = vpack.c.bf16 %v10583_v56, %v10577_v51  ;;  %v1362_v60 = vmul.f32 %v10583_v56, %v10583_v56  ;;  %v10591_v61 = vpop.f32.mrb[25].mxu0 }
 0x38e   : > { %v8951_v0 = vpack.c.bf16 %v10591_v61, %v10579_v53  ;;  %v1363_v2 = vmul.f32 %v10591_v61, %v10591_v61 }
 0x38f   : > { %v8961_v3 = vpack.c.bf16 %v1362_v60, %v1360_v58 }
 0x390   : > { %8952 = vmatprep.subr.bf16.mxu1 %v8951_v0  ;;  %v8959_v8 = vpack.c.bf16 %v1363_v2, %v1361_v63 }
 0x391   : > { %8954 = vmatpush1.bf16.msra.mxu1 %v8953_v59 }
 0x392   : > { %8956 = vmatprep.subr.bf16.mxu1 %v8955_v52 }
 0x394   : > { %7703 = vmatmul.mubr.msk.f32.vlgmr.msra.gmra.mrb[12].mxu1 %vm327_vm15, %v1278_v9 }
 0x395   : > { %8958 = vmatpush1.bf16.msra.mxu1 %v8957_v50  ;;  %1428 = vmatprep.mubr.f32.mxu1 %v10039_v20 }
 0x396   : > { %8960 = vmatprep.subr.bf16.mxu1 %v8959_v8 }
 0x399   : > { %8962 = vmatpush1.bf16.msra.mxu1 %v8961_v3 }
 0x39c   : > { %7704 = vmatmul.mubr.msk.f32.vlgmr.msra.gmra.mrb[14].mxu1 %vm327_vm15, %v1278_v9 }
 0x39d   : > { %8634 = vmatprep.mubr.msk.f32.mxu1 %vm1561_vm11, %v10631_v14 }
 0x467   : > { %v1351_v10 = vpop.f32.mrb[12].mxu1 }
 0x468   : > { %1438 = vrot.lane.b32.xlu0 %v1351_v10, %s10044_s15  ;;  %v1353_v11 = vpop.f32.mrb[13].mxu1 }
 0x46c   : > { %1447 = vrot.lane.b32.xlu0 %v1351_v10, %s10045_s16 }
 0x46f   : > { %v1430_v12 = vpop.f32.mrb[14].mxu1 }
 0x470   : > { %1455 = vrot.lane.b32.xlu0 %v1351_v10, %s10046_s17  ;;  %1443 = vrot.lane.b32.xlu1 %v1430_v12, %s10044_s15  ;;  %v10609_v13 = vpop.f32.mrb[15].mxu1 }
 0x474   : > { %1463 = vrot.lane.b32.xlu0 %v1351_v10, %s10047_s18  ;;  %1451 = vrot.lane.b32.xlu1 %v1430_v12, %s10045_s16 }
 0x478   : > { %1471 = vrot.lane.b32.xlu0 %v1351_v10, %s10048_s19  ;;  %1459 = vrot.lane.b32.xlu1 %v1430_v12, %s10046_s17 }
 0x47c   : > { %1479 = vrot.lane.b32.xlu0 %v1351_v10, %s10041_s28  ;;  %1467 = vrot.lane.b32.xlu1 %v1430_v12, %s10047_s18 }
 0x480   : > { %1487 = vrot.lane.b32.xlu0 %v1351_v10, %s10049_s20  ;;  %1475 = vrot.lane.b32.xlu1 %v1430_v12, %s10048_s19 }
 0x484   : > { %1498 = vrot.lane.b32.xlu0 %v1353_v11, %s10044_s15  ;;  %1483 = vrot.lane.b32.xlu1 %v1430_v12, %s10041_s28 }
 0x488   : > { %1507 = vrot.lane.b32.xlu0 %v1353_v11, %s10045_s16  ;;  %1491 = vrot.lane.b32.xlu1 %v1430_v12, %s10049_s20 }
 0x48c   : > { %1515 = vrot.lane.b32.xlu0 %v1353_v11, %s10046_s17  ;;  %1503 = vrot.lane.b32.xlu1 %v10609_v13, %s10044_s15 }
 0x490   : > { %1523 = vrot.lane.b32.xlu0 %v1353_v11, %s10047_s18  ;;  %1511 = vrot.lane.b32.xlu1 %v10609_v13, %s10045_s16 }
 0x494   : > { %1531 = vrot.lane.b32.xlu0 %v1353_v11, %s10048_s19  ;;  %1519 = vrot.lane.b32.xlu1 %v10609_v13, %s10046_s17 }
 0x498   : > { %1539 = vrot.lane.b32.xlu0 %v1353_v11, %s10041_s28  ;;  %1527 = vrot.lane.b32.xlu1 %v10609_v13, %s10047_s18 }
 0x49c   : > { %1547 = vrot.lane.b32.xlu0 %v1353_v11, %s10049_s20  ;;  %1535 = vrot.lane.b32.xlu1 %v10609_v13, %s10048_s19 }
 0x4a0   : > { %1543 = vrot.lane.b32.xlu1 %v10609_v13, %s10041_s28 }
 0x4a4   : > { %1551 = vrot.lane.b32.xlu1 %v10609_v13, %s10049_s20 }
 0x4da   : > { %v1439_v15 = vpop.permute.xlu0 %1438 }
 0x4db   : > { %v1441_v19 = vadd.f32 %v1439_v15, %v1351_v10 }
 0x4de   : > { %v1448_v16 = vpop.permute.xlu0 %1447 }
 0x4df   : > { %v1450_v23 = vadd.f32 %v1448_v16, %v1441_v19 }
 0x4e2   : > { %v1456_v5 = vpop.permute.xlu0 %1455  ;;  %v1444_v17 = vpop.permute.xlu1 %1443 }
 0x4e3   : > { %v1458_v26 = vadd.f32 %v1456_v5, %v1450_v23  ;;  %v1446_v7 = vadd.f32 %v1444_v17, %v1430_v12 }
 0x4e6   : > { %v1464_v32 = vpop.permute.xlu0 %1463  ;;  %v1452_v18 = vpop.permute.xlu1 %1451 }
 0x4e7   : > { %v1466_v27 = vadd.f32 %v1464_v32, %v1458_v26  ;;  %v1454_v30 = vadd.f32 %v1452_v18, %v1446_v7  ;;  %v10652_v26 = vsel %vm13822_vm10, 0.0, %v10043_v54 }
 0x4ea   : > { %v1472_v4 = vpop.permute.xlu0 %1471  ;;  %v1460_v25 = vpop.permute.xlu1 %1459 }
 0x4eb   : > { %v1474_v29 = vadd.f32 %v1472_v4, %v1466_v27  ;;  %v1462_v6 = vadd.f32 %v1460_v25, %v1454_v30 }
 0x4ee   : > { %v1480_v37 = vpop.permute.xlu0 %1479  ;;  %v1468_v28 = vpop.permute.xlu1 %1467 }
 0x4ef   : > { %v1482_v33 = vadd.f32 %v1480_v37, %v1474_v29  ;;  %v1470_v43 = vadd.f32 %v1468_v28, %v1462_v6 }
 0x4f2   : > { %v1488_v34 = vpop.permute.xlu0 %1487  ;;  %v1476_v35 = vpop.permute.xlu1 %1475 }
 0x4f3   : > { %v1490_v40 = vadd.f32 %v1488_v34, %v1482_v33  ;;  %v1478_v48 = vadd.f32 %v1476_v35, %v1470_v43 }
 0x4f5   : > { %v1495_v44 = vadd.f32 %v1490_v40, %v1353_v11 }
 0x4f6   : > { %v1499_v45 = vpop.permute.xlu0 %1498  ;;  %v1484_v47 = vpop.permute.xlu1 %1483 }
 0x4f7   : > { %v1486_v49 = vadd.f32 %v1484_v47, %v1478_v48  ;;  %v1501_v63 = vadd.f32 %v1499_v45, %v1495_v44 }
 0x4fa   : > { %v1508_v50 = vpop.permute.xlu0 %1507  ;;  %v1492_v52 = vpop.permute.xlu1 %1491 }
 0x4fb   : > { %v1494_v55 = vadd.f32 %v1492_v52, %v1486_v49  ;;  %v1510_v0 = vadd.f32 %v1508_v50, %v1501_v63 }
 0x4fd   : > { %v1496_v57 = vadd.f32 %v1494_v55, %v10609_v13 }
 0x4fe   : > { %v1516_v58 = vpop.permute.xlu0 %1515  ;;  %v1504_v59 = vpop.permute.xlu1 %1503 }
 0x4ff   : > { %v1518_v8 = vadd.f32 %v1516_v58, %v1510_v0  ;;  %v1506_v12 = vadd.f32 %v1504_v59, %v1496_v57 }
 0x502   : > { %v1524_v60 = vpop.permute.xlu0 %1523  ;;  %v1512_v62 = vpop.permute.xlu1 %1511 }
 0x503   : > { %v1526_v9 = vadd.f32 %v1524_v60, %v1518_v8  ;;  %v1514_v16 = vadd.f32 %v1512_v62, %v1506_v12 }
 0x506   : > { %v1532_v2 = vpop.permute.xlu0 %1531  ;;  %v1520_v3 = vpop.permute.xlu1 %1519 }
 0x507   : > { %v1534_v15 = vadd.f32 %v1532_v2, %v1526_v9  ;;  %v1522_v18 = vadd.f32 %v1520_v3, %v1514_v16 }
 0x50a   : > { %v1540_v10 = vpop.permute.xlu0 %1539  ;;  %v1528_v11 = vpop.permute.xlu1 %1527 }
 0x50b   : > { %v1542_v5 = vadd.f32 %v1540_v10, %v1534_v15  ;;  %v1530_v19 = vadd.f32 %v1528_v11, %v1522_v18 }
 0x50e   : > { %v1548_v17 = vpop.permute.xlu0 %1547  ;;  %v1536_v32 = vpop.permute.xlu1 %1535 }
 0x50f   : > { %v1550_v13 = vadd.f32 %v1548_v17, %v1542_v5  ;;  %v1538_v25 = vadd.f32 %v1536_v32, %v1530_v19 }
 0x511   : > { %v1555_v23 = vmul.f32 0.00390625, %v1550_v13 }
 0x512   : > { %v1544_v4 = vpop.permute.xlu1 %1543 }
 0x513   : > { %8632 = vmatprep.subr.msk.mxu1 %vm363_vm1, %v1555_v23  ;;  %v1546_v27 = vadd.f32 %v1544_v4, %v1538_v25  ;;  %v1557_v7 = vmul.f32 %v1555_v23, %v1555_v23 }
 0x514   : > { %8633 = vmatpush3.msk.msra.mxu1 %vm363_vm1, %v1555_v23 }
 0x515   : > { %8635 = vmatmul.mubr.msk.f32.vlgmr.msra.gmra.mrb[16].mxu1 %vm1561_vm11, %v10631_v14 }
 0x516   : > { %v1552_v37 = vpop.permute.xlu1 %1551  ;;  %8637 = vmatprep.mubr.msk.f32.mxu1 %vm1561_vm11, %v10652_v26 }
 0x517   : > { %v1554_v28 = vadd.f32 %v1552_v37, %v1546_v27 }
 0x519   : > { %v1556_v29 = vmul.f32 0.00390625, %v1554_v28  ;;  %8638 = vmatmul.mubr.msk.f32.gmra.mrb[18].mxu1 %vm1561_vm11, %v10652_v26 }
 0x51a   : > { %8642 = vmatprep.mubr.msk.f32.mxu1 %vm1561_vm11, %v10631_v14 }
 0x51b   : > { %v1558_v30 = vsub.f32 %v1556_v29, %v1557_v7 }
 0x51d   : > { %v1559_v33 = vadd.f32 1e-05, %v1558_v30 }
 0x51f   : > { %10021 = vrsqrt.f32 %v1559_v33 }
 0x529   : > { %v10022_v34 = vpop.eup %10021 }
 0x52a   : > { %8640 = vmatprep.subr.msk.mxu1 %vm363_vm1, %v10022_v34 }
 0x52b   : > { %8641 = vmatpush3.msk.msra.mxu1 %vm363_vm1, %v10022_v34 }
 0x52c   : > { %8643 = vmatmul.mubr.msk.f32.vlgmr.msra.gmra.mrb[20].mxu1 %vm1561_vm11, %v10631_v14  ;;  %8973 = vmatprep.subr.bf16.mxu1 %v10037_v1 }
 0x52d   : > { %8645 = vmatprep.mubr.msk.f32.mxu1 %vm1561_vm11, %v10652_v26 }
 0x530   : > { %8646 = vmatmul.mubr.msk.f32.gmra.mrb[22].mxu1 %vm1561_vm11, %v10652_v26 }
 0x531   : > { %8656 = vmatprep.mubr.msk.f32.mxu1 %vm10040_vm2, %v10039_v20 }
 0x5e8   : > { %v10674_v35 = vpop.f32.mrb[16].mxu1 }
 0x5e9   : > { %1662 = vrot.lane.b32.xlu1 %v10674_v35, %s10049_s20  ;;  %v10678_v6 = vpop.f32.mrb[17].mxu1 }
 0x5ea   : > { %1660 = vrot.lane.b32.xlu0 %v10678_v6, %s10049_s20 }
 0x5ec   : > { %v10682_v40 = vpop.f32.mrb[18].mxu1 }
 0x5ed   : > { %1674 = vrot.lane.b32.xlu1 %v10674_v35, %s10041_s28  ;;  %v10686_v43 = vpop.f32.mrb[19].mxu1 }
 0x5ee   : > { %1672 = vrot.lane.b32.xlu0 %v10678_v6, %s10041_s28 }
 0x5f1   : > { %1686 = vrot.lane.b32.xlu1 %v10674_v35, %s10048_s19 }
 0x5f2   : > { %1684 = vrot.lane.b32.xlu0 %v10678_v6, %s10048_s19 }
 0x5f5   : > { %1698 = vrot.lane.b32.xlu1 %v10674_v35, %s10047_s18 }
 0x5f6   : > { %1696 = vrot.lane.b32.xlu0 %v10678_v6, %s10047_s18 }
 0x5f9   : > { %1710 = vrot.lane.b32.xlu1 %v10674_v35, %s10046_s17 }
 0x5fa   : > { %1708 = vrot.lane.b32.xlu0 %v10678_v6, %s10046_s17 }
 0x5fd   : > { %1722 = vrot.lane.b32.xlu1 %v10674_v35, %s10045_s16 }
 0x5fe   : > { %1720 = vrot.lane.b32.xlu0 %v10678_v6, %s10045_s16 }
 0x5ff   : > { %v10706_v44 = vpop.f32.mrb[20].mxu1 }
 0x600   : > { %v10708_v45 = vpop.f32.mrb[21].mxu1 }
 0x601   : > { %1734 = vrot.lane.b32.xlu1 %v10674_v35, %s10044_s15 }
 0x602   : > { %1732 = vrot.lane.b32.xlu0 %v10678_v6, %s10044_s15 }
 0x603   : > { %v10714_v47 = vpop.f32.mrb[22].mxu1 }
 0x604   : > { %v10716_v48 = vpop.f32.mrb[23].mxu1 }
 0x605   : > { %1666 = vrot.lane.b32.xlu1 %v10682_v40, %s10049_s20 }
 0x606   : > { %1664 = vrot.lane.b32.xlu0 %v10686_v43, %s10049_s20 }
 0x609   : > { %1678 = vrot.lane.b32.xlu1 %v10682_v40, %s10041_s28 }
 0x60a   : > { %1676 = vrot.lane.b32.xlu0 %v10686_v43, %s10041_s28 }
 0x60d   : > { %1690 = vrot.lane.b32.xlu1 %v10682_v40, %s10048_s19 }
 0x60e   : > { %1688 = vrot.lane.b32.xlu0 %v10686_v43, %s10048_s19 }
 0x611   : > { %1702 = vrot.lane.b32.xlu1 %v10682_v40, %s10047_s18 }
 0x612   : > { %1700 = vrot.lane.b32.xlu0 %v10686_v43, %s10047_s18 }
 0x615   : > { %1714 = vrot.lane.b32.xlu1 %v10682_v40, %s10046_s17 }
 0x616   : > { %1712 = vrot.lane.b32.xlu0 %v10686_v43, %s10046_s17 }
 0x619   : > { %1726 = vrot.lane.b32.xlu1 %v10682_v40, %s10045_s16 }
 0x61a   : > { %1724 = vrot.lane.b32.xlu0 %v10686_v43, %s10045_s16 }
 0x61d   : > { %1738 = vrot.lane.b32.xlu1 %v10682_v40, %s10044_s15 }
 0x61e   : > { %1736 = vrot.lane.b32.xlu0 %v10686_v43, %s10044_s15 }
 0x621   : > { %1870 = vrot.lane.b32.xlu1 %v10706_v44, %s10049_s20 }
 0x622   : > { %1868 = vrot.lane.b32.xlu0 %v10708_v45, %s10049_s20 }
 0x625   : > { %1882 = vrot.lane.b32.xlu1 %v10706_v44, %s10041_s28 }
 0x626   : > { %1880 = vrot.lane.b32.xlu0 %v10708_v45, %s10041_s28 }
 0x629   : > { %1894 = vrot.lane.b32.xlu1 %v10706_v44, %s10048_s19 }
 0x62a   : > { %1892 = vrot.lane.b32.xlu0 %v10708_v45, %s10048_s19 }
 0x62d   : > { %1906 = vrot.lane.b32.xlu1 %v10706_v44, %s10047_s18 }
 0x62e   : > { %1904 = vrot.lane.b32.xlu0 %v10708_v45, %s10047_s18 }
 0x631   : > { %1918 = vrot.lane.b32.xlu1 %v10706_v44, %s10046_s17 }
 0x632   : > { %1916 = vrot.lane.b32.xlu0 %v10708_v45, %s10046_s17 }
 0x635   : > { %1930 = vrot.lane.b32.xlu1 %v10706_v44, %s10045_s16 }
 0x636   : > { %1928 = vrot.lane.b32.xlu0 %v10708_v45, %s10045_s16 }
 0x639   : > { %1942 = vrot.lane.b32.xlu1 %v10706_v44, %s10044_s15 }
 0x63a   : > { %1940 = vrot.lane.b32.xlu0 %v10708_v45, %s10044_s15 }
 0x63d   : > { %1874 = vrot.lane.b32.xlu1 %v10714_v47, %s10049_s20 }
 0x63e   : > { %1872 = vrot.lane.b32.xlu0 %v10716_v48, %s10049_s20 }
 0x641   : > { %1886 = vrot.lane.b32.xlu1 %v10714_v47, %s10041_s28 }
 0x642   : > { %1884 = vrot.lane.b32.xlu0 %v10716_v48, %s10041_s28 }
 0x645   : > { %1898 = vrot.lane.b32.xlu1 %v10714_v47, %s10048_s19 }
 0x646   : > { %1896 = vrot.lane.b32.xlu0 %v10716_v48, %s10048_s19  ;;  %s7600_s19 = sshll.u32 %s13835_s22, 2 }
 0x647   : > { %s249_s24 = scalar_lea.vmem %s13821_s6, %s7600_s19 }
 0x649   : > { %1910 = vrot.lane.b32.xlu1 %v10714_v47, %s10047_s18 }
 0x64a   : > { %1908 = vrot.lane.b32.xlu0 %v10716_v48, %s10047_s18 }
 0x64d   : > { %1922 = vrot.lane.b32.xlu1 %v10714_v47, %s10046_s17 }
 0x64e   : > { %1920 = vrot.lane.b32.xlu0 %v10716_v48, %s10046_s17 }
 0x651   : > { %1934 = vrot.lane.b32.xlu1 %v10714_v47, %s10045_s16 }
 0x652   : > { %1932 = vrot.lane.b32.xlu0 %v10716_v48, %s10045_s16 }
 0x655   : > { %1946 = vrot.lane.b32.xlu1 %v10714_v47, %s10044_s15 }
 0x656   : > { %1944 = vrot.lane.b32.xlu0 %v10716_v48, %s10044_s15  ;;  %s10052_s15 = smov 10  }
 0x65b   : > { %v1663_v49 = vpop.permute.xlu1 %1662 }
 0x65c   : > { %v1661_v50 = vpop.permute.xlu0 %1660  ;;  %v1745_v0 = vsel %vm1271_vm8, %v10674_v35, %v1663_v49 }
 0x65d   : > { %v1744_v2 = vsel %vm1271_vm8, %v10678_v6, %v1661_v50 }
 0x65f   : > { %v1675_v52 = vpop.permute.xlu1 %1674 }
 0x660   : > { %v1673_v55 = vpop.permute.xlu0 %1672  ;;  %v1749_v3 = vsel %vm327_vm15, %v1745_v0, %v1675_v52 }
 0x661   : > { %v1748_v9 = vsel %vm327_vm15, %v1744_v2, %v1673_v55 }
 0x663   : > { %v1687_v57 = vpop.permute.xlu1 %1686 }
 0x664   : > { %v1685_v58 = vpop.permute.xlu0 %1684  ;;  %v1754_v10 = vsel %vm1752_vm12, %v1749_v3, %v1687_v57 }
 0x665   : > { %v1753_v12 = vsel %vm1752_vm12, %v1748_v9, %v1685_v58 }
 0x667   : > { %v1699_v59 = vpop.permute.xlu1 %1698 }
 0x668   : > { %v1697_v60 = vpop.permute.xlu0 %1696  ;;  %v1758_v15 = vsel %vm375_vm0, %v1754_v10, %v1699_v59 }
 0x669   : > { %v1757_v16 = vsel %vm375_vm0, %v1753_v12, %v1697_v60 }
 0x66b   : > { %v1711_v62 = vpop.permute.xlu1 %1710 }
 0x66c   : > { %v1709_v63 = vpop.permute.xlu0 %1708  ;;  %v1763_v5 = vsel %vm1761_vm13, %v1758_v15, %v1711_v62 }
 0x66d   : > { %v1762_v17 = vsel %vm1761_vm13, %v1757_v16, %v1709_v63 }
 0x66f   : > { %v1723_v8 = vpop.permute.xlu1 %1722 }
 0x670   : > { %v1721_v11 = vpop.permute.xlu0 %1720  ;;  %v1768_v32 = vsel %vm1766_vm14, %v1763_v5, %v1723_v8 }
 0x671   : > { %v1767_v13 = vsel %vm1766_vm14, %v1762_v17, %v1721_v11 }
 0x673   : > { %v1735_v18 = vpop.permute.xlu1 %1734 }
 0x674   : > { %v10817_v19 = vsel %vm1771_vm3, %v1768_v32, %v1735_v18  ;;  %v1733_v23 = vpop.permute.xlu0 %1732 }
 0x675   : > { %v1982_v4 = vsub.f32 %v10561_v42, %v10817_v19  ;;  %v1983_v25 = vsub.f32 %v10569_v46, %v10817_v19  ;;  %v10824_v27 = vsel %vm1771_vm3, %v1767_v13, %v1733_v23 }
 0x676   : > { %v1980_v37 = vsub.f32 %v10557_v38, %v10824_v27  ;;  %v1981_v28 = vsub.f32 %v10559_v41, %v10824_v27 }
 0x677   : > { %v1667_v7 = vpop.permute.xlu1 %1666 }
 0x678   : > { %v1747_v29 = vsel %vm1271_vm8, %v10682_v40, %v1667_v7  ;;  %v1665_v30 = vpop.permute.xlu0 %1664 }
 0x679   : > { %v1746_v33 = vsel %vm1271_vm8, %v10686_v43, %v1665_v30 }
 0x67b   : > { %v1679_v34 = vpop.permute.xlu1 %1678 }
 0x67c   : > { %v1751_v35 = vsel %vm327_vm15, %v1747_v29, %v1679_v34  ;;  %v1677_v6 = vpop.permute.xlu0 %1676 }
 0x67d   : > { %v1750_v49 = vsel %vm327_vm15, %v1746_v33, %v1677_v6 }
 0x67f   : > { %v1691_v50 = vpop.permute.xlu1 %1690 }
 0x680   : > { %v1756_v52 = vsel %vm1752_vm12, %v1751_v35, %v1691_v50  ;;  %v1689_v55 = vpop.permute.xlu0 %1688 }
 0x681   : > { %v1755_v57 = vsel %vm1752_vm12, %v1750_v49, %v1689_v55 }
 0x683   : > { %v1703_v58 = vpop.permute.xlu1 %1702 }
 0x684   : > { %v1701_v59 = vpop.permute.xlu0 %1700  ;;  %v1760_v43 = vsel %vm375_vm0, %v1756_v52, %v1703_v58 }
 0x685   : > { %v1759_v0 = vsel %vm375_vm0, %v1755_v57, %v1701_v59 }
 0x687   : > { %v1715_v60 = vpop.permute.xlu1 %1714 }
 0x688   : > { %v1713_v40 = vpop.permute.xlu0 %1712  ;;  %v1765_v2 = vsel %vm1761_vm13, %v1760_v43, %v1715_v60 }
 0x689   : > { %v1764_v3 = vsel %vm1761_vm13, %v1759_v0, %v1713_v40 }
 0x68b   : > { %v1727_v62 = vpop.permute.xlu1 %1726 }
 0x68c   : > { %v1725_v63 = vpop.permute.xlu0 %1724  ;;  %v1770_v8 = vsel %vm1766_vm14, %v1765_v2, %v1727_v62 }
 0x68d   : > { %v1769_v10 = vsel %vm1766_vm14, %v1764_v3, %v1725_v63 }
 0x68f   : > { %v1739_v9 = vpop.permute.xlu1 %1738 }
 0x690   : > { %v10845_v11 = vsel %vm1771_vm3, %v1770_v8, %v1739_v9  ;;  %v1737_v12 = vpop.permute.xlu0 %1736 }
 0x691   : > { %v1986_v15 = vsub.f32 %v10583_v56, %v10845_v11  ;;  %v1987_v16 = vsub.f32 %v10591_v61, %v10845_v11  ;;  %v10852_v5 = vsel %vm1771_vm3, %v1769_v10, %v1737_v12 }
 0x692   : > { %v1984_v17 = vsub.f32 %v10577_v51, %v10852_v5  ;;  %v1985_v32 = vsub.f32 %v10579_v53, %v10852_v5 }
 0x693   : > { %v1871_v18 = vpop.permute.xlu1 %1870 }
 0x694   : > { %v1869_v13 = vpop.permute.xlu0 %1868  ;;  %v1953_v49 = vsel %vm1271_vm8, %v10706_v44, %v1871_v18 }
 0x695   : > { %v1952_v50 = vsel %vm1271_vm8, %v10708_v45, %v1869_v13 }
 0x697   : > { %v1883_v23 = vpop.permute.xlu1 %1882 }
 0x698   : > { %v1881_v7 = vpop.permute.xlu0 %1880  ;;  %v1957_v52 = vsel %vm327_vm15, %v1953_v49, %v1883_v23 }
 0x699   : > { %v1956_v57 = vsel %vm327_vm15, %v1952_v50, %v1881_v7 }
 0x69b   : > { %v1895_v29 = vpop.permute.xlu1 %1894 }
 0x69c   : > { %v1893_v30 = vpop.permute.xlu0 %1892  ;;  %v1961_v58 = vsel %vm1752_vm12, %v1957_v52, %v1895_v29 }
 0x69d   : > { %v1960_v60 = vsel %vm1752_vm12, %v1956_v57, %v1893_v30 }
 0x69f   : > { %v1907_v33 = vpop.permute.xlu1 %1906 }
 0x6a0   : > { %v1905_v34 = vpop.permute.xlu0 %1904  ;;  %v1965_v40 = vsel %vm375_vm0, %v1961_v58, %v1907_v33 }
 0x6a1   : > { %v1964_v62 = vsel %vm375_vm0, %v1960_v60, %v1905_v34 }
 0x6a3   : > { %v1919_v35 = vpop.permute.xlu1 %1918 }
 0x6a4   : > { %v1917_v6 = vpop.permute.xlu0 %1916  ;;  %v1969_v63 = vsel %vm1761_vm13, %v1965_v40, %v1919_v35 }
 0x6a5   : > { %v1968_v44 = vsel %vm1761_vm13, %v1964_v62, %v1917_v6 }
 0x6a7   : > { %v1931_v55 = vpop.permute.xlu1 %1930 }
 0x6a8   : > { %v1929_v59 = vpop.permute.xlu0 %1928  ;;  %v1973_v45 = vsel %vm1766_vm14, %v1969_v63, %v1931_v55 }
 0x6a9   : > { %v1972_v0 = vsel %vm1766_vm14, %v1968_v44, %v1929_v59 }
 0x6ab   : > { %v1943_v43 = vpop.permute.xlu1 %1942 }
 0x6ac   : > { %v1977_v2 = vsel %vm1771_vm3, %v1973_v45, %v1943_v43  ;;  %v1941_v3 = vpop.permute.xlu0 %1940 }
 0x6ad   : > { %v1990_v8 = vmul.f32 %v1982_v4, %v1977_v2  ;;  %v1991_v9 = vmul.f32 %v1983_v25, %v1977_v2  ;;  %v1976_v10 = vsel %vm1771_vm3, %v1972_v0, %v1941_v3 }
 0x6ae   : > { %v1988_v12 = vmul.f32 %v1980_v37, %v1976_v10  ;;  %v1989_v18 = vmul.f32 %v1981_v28, %v1976_v10 }
 0x6af   : > { %v2006_v13 = vmul.f32 0.2, %v1990_v8  ;;  %v2007_v23 = vmul.f32 0.2, %v1991_v9  ;;  %v1875_v7 = vpop.permute.xlu1 %1874  ;;  %vm1998_vm4 = vcmp.ge.f32.partialorder %v1990_v8, 0.0  ;;  %vm1999_vm7 = vcmp.ge.f32.partialorder %v1991_v9, 0.0 }
 0x6b0   : > { %v2004_v42 = vmul.f32 0.2, %v1988_v12  ;;  %v2005_v4 = vmul.f32 0.2, %v1989_v18  ;;  %v1873_v29 = vpop.permute.xlu0 %1872  ;;  %vm1996_vm10 = vcmp.ge.f32.partialorder %v1988_v12, 0.0  ;;  %vm1997_vm6 = vcmp.ge.f32.partialorder %v1989_v18, 0.0 }
 0x6b1   : > { %v2014_v46 = vsel %vm1998_vm4, %v1990_v8, %v2006_v13  ;;  %v2015_v19 = vsel %vm1999_vm7, %v1991_v9, %v2007_v23  ;;  %v1955_v50 = vsel %vm1271_vm8, %v10714_v47, %v1875_v7  ;;  %v1954_v52 = vsel %vm1271_vm8, %v10716_v48, %v1873_v29  ;;  %vm10934_vm4 = vmpackc.low %vm1271_vm8, %vm1271_vm8 }
 0x6b2   : > { %v9991_v25 = vpack.i.bf16 %v2015_v19, %v2014_v46  ;;  %v2012_v30 = vsel %vm1996_vm10, %v1988_v12, %v2004_v42  ;;  %v2013_v38 = vsel %vm1997_vm6, %v1989_v18, %v2005_v4 }
 0x6b3   : > { %v1887_v37 = vpop.permute.xlu1 %1886  ;;  %v9996_v33 = vpack.i.bf16 %v2013_v38, %v2012_v30 }
 0x6b4   : > { %9992 = vrot.lane.b32.xlu1 %v9991_v25, %s10049_s20  ;;  %v1885_v41 = vpop.permute.xlu0 %1884  ;;  %v1959_v55 = vsel %vm327_vm15, %v1955_v50, %v1887_v37 }
 0x6b5   : > { %9997 = vrot.lane.b32.xlu0 %v9996_v33, %s10049_s20  ;;  %v1958_v58 = vsel %vm327_vm15, %v1954_v52, %v1885_v41 }
 0x6b7   : > { %v1899_v27 = vpop.permute.xlu1 %1898 }
 0x6b8   : > { %v1897_v28 = vpop.permute.xlu0 %1896  ;;  %v1963_v59 = vsel %vm1752_vm12, %v1959_v55, %v1899_v27 }
 0x6b9   : > { %v1962_v40 = vsel %vm1752_vm12, %v1958_v58, %v1897_v28  ;;  %v2068_v58 = vsel %vm1271_vm8, %v10110_v21, 0.0 }
 0x6bb   : > { %v1911_v34 = vpop.permute.xlu1 %1910 }
 0x6bc   : > { %v1909_v35 = vpop.permute.xlu0 %1908  ;;  %v1967_v62 = vsel %vm375_vm0, %v1963_v59, %v1911_v34 }
 0x6bd   : > { %v1966_v63 = vsel %vm375_vm0, %v1962_v40, %v1909_v35  ;;  %v2069_v40 = vsel %vm1271_vm8, %v10115_v22, 0.0 }
 0x6bf   : > { %v1923_v6 = vpop.permute.xlu1 %1922 }
 0x6c0   : > { %v1921_v49 = vpop.permute.xlu0 %1920  ;;  %v1971_v44 = vsel %vm1761_vm13, %v1967_v62, %v1923_v6 }
 0x6c1   : > { %v1970_v47 = vsel %vm1761_vm13, %v1966_v63, %v1921_v49  ;;  %v2070_v63 = vsel %vm1271_vm8, %v10122_v24, 0.0 }
 0x6c3   : > { %v1935_v57 = vpop.permute.xlu1 %1934 }
 0x6c4   : > { %v1933_v60 = vpop.permute.xlu0 %1932  ;;  %v1975_v48 = vsel %vm1766_vm14, %v1971_v44, %v1935_v57 }
 0x6c5   : > { %v1974_v43 = vsel %vm1766_vm14, %v1970_v47, %v1933_v60 }
 0x6c7   : > { %v1947_v45 = vpop.permute.xlu1 %1946 }
 0x6c8   : > { %v1979_v0 = vsel %vm1771_vm3, %v1975_v48, %v1947_v45  ;;  %v1945_v2 = vpop.permute.xlu0 %1944 }
 0x6c9   : > { %v1994_v3 = vmul.f32 %v1986_v15, %v1979_v0  ;;  %v1995_v8 = vmul.f32 %v1987_v16, %v1979_v0  ;;  %v1978_v9 = vsel %vm1771_vm3, %v1974_v43, %v1945_v2  ;;  %vm10928_vm3 = vmneg %vm1271_vm8 }
 0x6ca   : > { %v1992_v10 = vmul.f32 %v1984_v17, %v1978_v9  ;;  %v1993_v12 = vmul.f32 %v1985_v32, %v1978_v9  ;;  %vm8966_vm7 = vmpackc.low %vm10928_vm3, %vm10928_vm3 }
 0x6cb   : > { %vm2002_vm6 = vcmp.ge.f32.partialorder %v1994_v3, 0.0  ;;  %vm2003_vm10 = vcmp.ge.f32.partialorder %v1995_v8, 0.0  ;;  %v2010_v18 = vmul.f32 0.2, %v1994_v3  ;;  %v2011_v13 = vmul.f32 0.2, %v1995_v8 }
 0x6cc   : > { %vm2000_vm12 = vcmp.ge.f32.partialorder %v1992_v10, 0.0  ;;  %vm2001_vm13 = vcmp.ge.f32.partialorder %v1993_v12, 0.0  ;;  %v2008_v56 = vmul.f32 0.2, %v1992_v10  ;;  %v2009_v15 = vmul.f32 0.2, %v1993_v12 }
 0x6cd   : > { %v2018_v61 = vsel %vm2002_vm6, %v1994_v3, %v2010_v18  ;;  %v2019_v11 = vsel %vm2003_vm10, %v1995_v8, %v2011_v13  ;;  %vm2291_vm6 = vcmask 146432   ;;  %vm2297_vm10 = vcmask 293888  }
 0x6ce   : > { %v2016_v16 = vsel %vm2000_vm12, %v1992_v10, %v2008_v56  ;;  %v2017_v23 = vsel %vm2001_vm13, %v1993_v12, %v2009_v15  ;;  %v10006_v7 = vpack.i.bf16 %v2019_v11, %v2018_v61  ;;  %vm3493_vm12 = vcmask 64512  }
 0x6cf   : > { %v10001_v42 = vpack.i.bf16 %v2017_v23, %v2016_v16 }
 0x6d0   : > { %10007 = vrot.lane.b32.xlu1 %v10006_v7, %s10049_s20 }
 0x6d1   : > { %10002 = vrot.lane.b32.xlu0 %v10001_v42, %s10049_s20 }
 0x6d4   : > { %2073 = vrot.lane.b32.xlu1 %v10115_v22, %s10049_s20 }
 0x6d5   : > { %2071 = vrot.lane.b32.xlu0 %v10110_v21, %s10049_s20 }
 0x6d8   : > { %2538 = vrot.lane.b32.xlu1 %v10149_v36, %s10050_s23 }
 0x6d9   : > { %2075 = vrot.lane.b32.xlu0 %v10122_v24, %s10049_s20 }
 0x6dc   : > { %3094 = vrot.lane.b32.xlu1 %v10159_v39, %s10050_s23 }
 0x6dd   : > { %2293 = vrot.lane.b32.xlu0 %v10139_v31, %s10050_s23 }
 0x726   : > { %v9993_v51 = vpop.permute.xlu1 %9992 }
 0x727   : > { %v9995_v53 = vunpack.i.h.bf16 %v9993_v51  ;;  %v9994_v5 = vunpack.i.l.bf16 %v9993_v51  ;;  %v9998_v17 = vpop.permute.xlu0 %9997 }
 0x728   : > { %v10000_v32 = vunpack.i.h.bf16 %v9998_v17  ;;  %v9999_v4 = vunpack.i.l.bf16 %v9998_v17 }
 0x729   : > { %v2045_v19 = vsel %vm1271_vm8, %v9994_v5, %v9995_v53 }
 0x72a   : > { %v8974_v25 = vpack.c.bf16 %v9995_v53, %v10000_v32  ;;  %v2044_v30 = vsel %vm1271_vm8, %v9999_v4, %v10000_v32  ;;  %v8965_v37 = vpack.c.bf16 %v9994_v5, %v9999_v4 }
 0x72b   : > { %v8963_v38 = vpack.c.bf16 %v2045_v19, %v2044_v30 }
 0x72c   : > { %8976 = vmatpush3.bf16.msk.msra.mxu1 %vm10934_vm4, %v8974_v25 }
 0x72d   : > { %8964 = vmatprep.subr.bf16.mxu0 %v8963_v38  ;;  %8977 = vmatprep.subr.bf16.mxu1 %v10037_v1  ;;  %v2537_v38 = vsel %vm2291_vm6, %v10149_v36, 0.0 }
 0x72e   : > { %8967 = vmatpush1.bf16.msk.msra.mxu0 %vm8966_vm7, %v8965_v37  ;;  %v2292_v37 = vsel %vm2291_vm6, %v10139_v31, 0.0 }
 0x742   : > { %v10008_v33 = vpop.permute.xlu1 %10007 }
 0x743   : > { %v10010_v41 = vunpack.i.h.bf16 %v10008_v33  ;;  %v10009_v27 = vunpack.i.l.bf16 %v10008_v33  ;;  %v10003_v28 = vpop.permute.xlu0 %10002 }
 0x744   : > { %v10005_v34 = vunpack.i.h.bf16 %v10003_v28  ;;  %v10004_v35 = vunpack.i.l.bf16 %v10003_v28 }
 0x745   : > { %v2047_v6 = vsel %vm1271_vm8, %v10009_v27, %v10010_v41 }
 0x746   : > { %v8978_v49 = vpack.c.bf16 %v10010_v41, %v10005_v34  ;;  %v2046_v50 = vsel %vm1271_vm8, %v10004_v35, %v10005_v34  ;;  %v8970_v57 = vpack.c.bf16 %v10009_v27, %v10004_v35  ;;  %v2074_v62 = vpop.permute.xlu1 %2073  ;;  %v7752_v34 = vld [vmem:[%s13817_s2 + $0x248] sm:$0xff]  ;;  %v7754_v35 = vld [vmem:[%s13817_s2 + $0x258] sm:$0xff] }
 0x747   : > { %v8968_v52 = vpack.c.bf16 %v2047_v6, %v2046_v50  ;;  %v2072_v55 = vpop.permute.xlu0 %2071  ;;  %v2081_v44 = vsel %vm1271_vm8, 0.0, %v2074_v62  ;;  %v7751_v6 = vld [vmem:[%s13817_s2 + $0x240] sm:$0xff]  ;;  %v7756_v50 = vld [vmem:[%s13817_s2 + $0x268] sm:$0xff]  ;;  %v7762_v62 = vld [vmem:[%s13817_s2 + $0x298] sm:$0xff] }
 0x748   : > { %8980 = vmatpush3.bf16.msk.msra.mxu1 %vm10934_vm4, %v8978_v49  ;;  %v2080_v59 = vsel %vm1271_vm8, 0.0, %v2072_v55  ;;  %v2087_v45 = vrot.slane %v2081_v44, 6  ;;  %v7753_v49 = vld [vmem:[%s13817_s2 + $0x250] sm:$0xff]  ;;  %v9013_v55 = vpack.c.bf16 %v7754_v35, %v7752_v34  ;;  %v7779_v34 = vld [vmem:[%s13817_s2 + $0x320] sm:$0xff] }
 0x749   : > { %8969 = vmatprep.subr.bf16.mxu0 %v8968_v52  ;;  %v2086_v60 = vrot.slane %v2080_v59, 6  ;;  %v7758_v52 = vld [vmem:[%s13817_s2 + $0x278] sm:$0xff]  ;;  %v7755_v59 = vld [vmem:[%s13817_s2 + $0x260] sm:$0xff]  ;;  %v7781_v35 = vld [vmem:[%s13817_s2 + $0x330] sm:$0xff] }
 0x74a   : > { %8972 = vmatpush1.bf16.msk.msra.mxu0 %vm8966_vm7, %v8970_v57  ;;  %v2539_v33 = vpop.permute.xlu1 %2538  ;;  %v9015_v57 = vpack.c.bf16 %v7753_v49, %v7751_v6  ;;  %v7784_v6 = vld [vmem:[%s13817_s2 + $0x348] sm:$0xff]  ;;  %v7786_v49 = vld [vmem:[%s13817_s2 + $0x358] sm:$0xff] }
 0x74b   : > { %8657 = vmatmul.mubr.msk.f32.vlgmr.msra.gmra.mrb[24].mxu1 %vm327_vm15, %v2068_v58  ;;  %v2092_v47 = vsel %vm363_vm1, %v2070_v63, %v2086_v60  ;;  %v2076_v48 = vpop.permute.xlu0 %2075  ;;  %v2088_v0 = vsel %vm363_vm1, %v2086_v60, %v2087_v45  ;;  %v2541_v27 = vsel %vm2291_vm6, 0.0, %v2539_v33  ;;  %v7757_v60 = vld [vmem:[%s13817_s2 + $0x270] sm:$0xff]  ;;  %v7780_v33 = vld [vmem:[%s13817_s2 + $0x328] sm:$0xff] }
 0x74c   : > { %8659 = vmatprep.mubr.msk.f32.mxu1 %vm10040_vm2, %v10039_v20  ;;  %v2082_v24 = vsel %vm1271_vm8, 0.0, %v2076_v48  ;;  %v9019_v63 = vpack.c.bf16 %v7757_v60, %v7755_v59  ;;  %v7761_v48 = vld [vmem:[%s13817_s2 + $0x290] sm:$0xff]  ;;  %v7790_v59 = vld [vmem:[%s13817_s2 + $0x378] sm:$0xff] }
 0x74d   : > { %7723 = vmatmul.mubr.msk.f32.vlgmr.msra.gmra.mrb[26].mxu0 %vm327_vm15, %v2068_v58  ;;  %v2089_v43 = vrot.slane %v2082_v24, 6  ;;  %v9017_v58 = vpack.c.bf16 %v7758_v52, %v7756_v50  ;;  %v7766_v24 = vld [vmem:[%s13817_s2 + $0x2b8] sm:$0xff]  ;;  %v9043_v50 = vpack.c.bf16 %v7781_v35, %v7779_v34  ;;  %v9045_v52 = vpack.c.bf16 %v7786_v49, %v7784_v6  ;;  %v7811_v49 = vld [vmem:[%s13817_s2 + $0x420] sm:$0xff] }
 0x74e   : > { %2176 = vmatprep.mubr.f32.mxu0 %v10039_v20  ;;  %v7814_v34 = vld [vmem:[%s13817_s2 + $0x438] sm:$0xff] }
 0x74f   : > { %8660 = vmatmul.mubr.msk.f32.gmra.mrb[26].mxu1 %vm327_vm15, %v2069_v40  ;;  %v2090_v2 = vsel %vm363_vm1, %v2087_v45, %v2089_v43  ;;  %v2294_v41 = vpop.permute.xlu0 %2293  ;;  %v7764_v45 = vld [vmem:[%s13817_s2 + $0x2a8] sm:$0xff] }
 0x750   : > { %8662 = vmatprep.mubr.msk.f32.mxu1 %vm10040_vm2, %v10039_v20  ;;  %v2296_v28 = vsel %vm2291_vm6, 0.0, %v2294_v41  ;;  %v7782_v41 = vld [vmem:[%s13817_s2 + $0x338] sm:$0xff] }
 0x751   : > { %7724 = vmatmul.mubr.msk.f32.gmra.mrb[28].mxu0 %vm327_vm15, %v2069_v40  ;;  %v7760_v40 = vld [vmem:[%s13817_s2 + $0x288] sm:$0xff] }
 0x752   : > { %2182 = vmatprep.mubr.f32.mxu0 %v10039_v20  ;;  %v9021_v44 = vpack.c.bf16 %v7762_v62, %v7760_v40  ;;  %v7787_v62 = vld [vmem:[%s13817_s2 + $0x360] sm:$0xff] }
 0x753   : > { %8663 = vmatmul.mubr.msk.f32.gmra.mrb[28].mxu1 %vm327_vm15, %v2092_v47 }
 0x754   : > { %8665 = vmatprep.mubr.msk.f32.mxu1 %vm10040_vm2, %v10039_v20 }
 0x755   : > { %7725 = vmatmul.mubr.msk.f32.gmra.mrb[30].mxu0 %vm327_vm15, %v2092_v47  ;;  %v7759_v47 = vld [vmem:[%s13817_s2 + $0x280] sm:$0xff] }
 0x756   : > { %2188 = vmatprep.mubr.f32.mxu0 %v10039_v20  ;;  %v9023_v43 = vpack.c.bf16 %v7761_v48, %v7759_v47  ;;  %v7794_v47 = vld [vmem:[%s13817_s2 + $0x398] sm:$0xff] }
 0x757   : > { %8666 = vmatmul.mubr.msk.f32.gmra.mrb[30].mxu1 %vm327_vm15, %v2088_v0 }
 0x758   : > { %8668 = vmatprep.mubr.msk.f32.mxu1 %vm10040_vm2, %v10039_v20 }
 0x759   : > { %7726 = vmatmul.mubr.msk.f32.gmra.mrb[32].mxu0 %vm327_vm15, %v2088_v0  ;;  %v9025_v0 = vpack.c.bf16 %v7766_v24, %v7764_v45  ;;  %v7791_v24 = vld [vmem:[%s13817_s2 + $0x380] sm:$0xff] }
 0x75a   : > { %2194 = vmatprep.mubr.f32.mxu0 %v10039_v20 }
 0x75b   : > { %8669 = vmatmul.mubr.msk.f32.gmra.mrb[32].mxu1 %vm327_vm15, %v2090_v2 }
 0x75c   : > { %2612 = vmatprep.mubr.f32.mxu1 %v10039_v20 }
 0x75d   : > { %7727 = vmatmul.mubr.msk.f32.gmra.mrb[34].mxu0 %vm327_vm15, %v2090_v2  ;;  %v7763_v2 = vld [vmem:[%s13817_s2 + $0x2a0] sm:$0xff] }
 0x75e   : > { %2377 = vmatprep.mubr.f32.mxu0 %v10039_v20 }
 0x81e   : > { %v2267_v3 = vpop.f32.mrb[24].mxu1 }
 0x81f   : > { %v8658_v8 = vpop.f32.mrb[25].mxu1 }
 0x820   : > { %v2172_v9 = vpop.f32.mrb[26].mxu0  ;;  %v7768_v8 = vld [vmem:[%s13817_s2 + $0x2c8] sm:$0xff] }
 0x821   : > { %v2174_v10 = vpop.f32.mrb[27].mxu0 }
 0x822   : > { %v2272_v12 = vpop.f32.mrb[26].mxu1 }
 0x823   : > { %v10996_v18 = vpack.c.bf16 %v2272_v12, %v2267_v3  ;;  %v8661_v13 = vpop.f32.mrb[27].mxu1  ;;  %v7765_v3 = vld [vmem:[%s13817_s2 + $0x2b0] sm:$0xff] }
 0x824   : > { %v2178_v56 = vpop.f32.mrb[28].mxu0  ;;  %v7767_v13 = vld [vmem:[%s13817_s2 + $0x2c0] sm:$0xff] }
 0x825   : > { %v10998_v15 = vpack.c.bf16 %v2178_v56, %v2172_v9  ;;  %v2180_v61 = vpop.f32.mrb[29].mxu0  ;;  %v7770_v9 = vld [vmem:[%s13817_s2 + $0x2d8] sm:$0xff]  ;;  %v7769_v56 = vld [vmem:[%s13817_s2 + $0x2d0] sm:$0xff] }
 0x826   : > { %v11000_v11 = vpack.c.bf16 %v2180_v61, %v2174_v10  ;;  %v2277_v16 = vpop.f32.mrb[28].mxu1  ;;  %v9027_v10 = vpack.c.bf16 %v7765_v3, %v7763_v2  ;;  %v9029_v12 = vpack.c.bf16 %v7770_v9, %v7768_v8  ;;  %v7772_v61 = vld [vmem:[%s13817_s2 + $0x2e8] sm:$0xff]  ;;  %v7798_v2 = vld [vmem:[%s13817_s2 + $0x3b8] sm:$0xff]  ;;  %v7795_v9 = vld [vmem:[%s13817_s2 + $0x3a0] sm:$0xff] }
 0x827   : > { %v8664_v23 = vpop.f32.mrb[29].mxu1 }
 0x828   : > { %v2184_v7 = vpop.f32.mrb[30].mxu0  ;;  %8982 = vmatprep.subr.bf16.mxu0 %v11000_v11  ;;  %8998 = vmatprep.subr.bf16.mxu1 %v11000_v11  ;;  %v9031_v23 = vpack.c.bf16 %v7769_v56, %v7767_v13  ;;  %v7802_v13 = vld [vmem:[%s13817_s2 + $0x3d8] sm:$0xff] }
 0x829   : > { %v2186_v42 = vpop.f32.mrb[31].mxu0  ;;  %8984 = vmatpush1.bf16.msra.mxu0 %v10998_v15  ;;  %9000 = vmatpush1.bf16.msra.mxu1 %v10998_v15 }
 0x82a   : > { %v2282_v51 = vpop.f32.mrb[30].mxu1 }
 0x82b   : > { %v11006_v53 = vpack.c.bf16 %v2282_v51, %v2277_v16  ;;  %v8667_v5 = vpop.f32.mrb[31].mxu1  ;;  %v7774_v16 = vld [vmem:[%s13817_s2 + $0x2f8] sm:$0xff]  ;;  %v7773_v51 = vld [vmem:[%s13817_s2 + $0x2f0] sm:$0xff] }
 0x82c   : > { %v2190_v17 = vpop.f32.mrb[32].mxu0  ;;  %v7776_v5 = vld [vmem:[%s13817_s2 + $0x308] sm:$0xff] }
 0x82d   : > { %v11008_v32 = vpack.c.bf16 %v2190_v17, %v2184_v7  ;;  %v2192_v4 = vpop.f32.mrb[33].mxu0  ;;  %v9033_v7 = vpack.c.bf16 %v7774_v16, %v7772_v61  ;;  %v7778_v17 = vld [vmem:[%s13817_s2 + $0x318] sm:$0xff]  ;;  %v7799_v16 = vld [vmem:[%s13817_s2 + $0x3c0] sm:$0xff] }
 0x82e   : > { %v11010_v29 = vpack.c.bf16 %v2192_v4, %v2186_v42  ;;  %v11012_v46 = vpop.f32.mrb[32].mxu1  ;;  %v7771_v42 = vld [vmem:[%s13817_s2 + $0x2e0] sm:$0xff] }
 0x82f   : > { %v8670_v19 = vpop.f32.mrb[33].mxu1  ;;  %v9035_v4 = vpack.c.bf16 %v7773_v51, %v7771_v42  ;;  %v7806_v42 = vld [vmem:[%s13817_s2 + $0x3f8] sm:$0xff] }
 0x830   : > { %v11014_v25 = vpop.f32.mrb[34].mxu0  ;;  %8986 = vmatprep.subr.bf16.mxu0 %v11010_v29  ;;  %9002 = vmatprep.subr.bf16.mxu1 %v11010_v29  ;;  %v9037_v19 = vpack.c.bf16 %v7778_v17, %v7776_v5  ;;  %v7803_v17 = vld [vmem:[%s13817_s2 + $0x3e0] sm:$0xff] }
 0x831   : > { %v11018_v30 = vpop.f32.mrb[35].mxu0  ;;  %8988 = vmatpush1.bf16.msra.mxu0 %v11008_v32  ;;  %9004 = vmatpush1.bf16.msra.mxu1 %v11008_v32 }
 0x832   : > { %7737 = vmatprep.subr.msk.mxu0 %vm541_vm5, %v11018_v30  ;;  %7744 = vmatprep.subr.msk.mxu1 %vm541_vm5, %v11018_v30 }
 0x835   : > { %7738 = vmatpush1.msk.msra.mxu0 %vm541_vm5, %v11014_v25  ;;  %7745 = vmatpush1.msk.msra.mxu1 %vm541_vm5, %v11014_v25 }
 0x836   : > { %8990 = vmatprep.subr.bf16.mxu0 %v10996_v18  ;;  %7746 = vmatmul.mubr.msk.f32.vlgmr.msra.gmra.mrb[34].mxu1 %vm2297_vm10, %v2537_v38 }
 0x837   : > { %7739 = vmatmul.mubr.msk.f32.vlgmr.msra.gmra.mrb[36].mxu0 %vm2297_vm10, %v2292_v37  ;;  %2618 = vmatprep.mubr.f32.mxu1 %v10039_v20 }
 0x838   : > { %8992 = vmatpush3.bf16.msra.mxu0 %v10996_v18  ;;  %2383 = vmatprep.mubr.f32.mxu0 %v10039_v20 }
 0x839   : > { %8994 = vmatprep.subr.bf16.mxu0 %v11006_v53 }
 0x83a   : > { %7747 = vmatmul.mubr.msk.f32.gmra.mrb[36].mxu1 %vm2297_vm10, %v2541_v27 }
 0x83b   : > { %7740 = vmatmul.mubr.msk.f32.gmra.mrb[38].mxu0 %vm2297_vm10, %v2296_v28  ;;  %2920 = vmatprep.mubr.f32.mxu1 %v10039_v20 }
 0x83c   : > { %8996 = vmatpush3.bf16.msra.mxu0 %v11006_v53  ;;  %8681 = vmatprep.mubr.msk.f32.mxu0 %vm2297_vm10, %v2292_v37  ;;  %v7777_v37 = vld [vmem:[%s13817_s2 + $0x310] sm:$0xff] }
 0x83d   : > { %8679 = vmatprep.subr.msk.mxu0 %vm541_vm5, %v11012_v46 }
 0x840   : > { %8680 = vmatpush3.msk.msra.mxu0 %vm541_vm5, %v11012_v46 }
 0x841   : > { %9006 = vmatprep.subr.bf16.mxu0 %v10996_v18  ;;  %8682 = vmatmul.mubr.msk.f32.vlgmr.msra.gmra.mrb[40].mxu0 %vm2297_vm10, %v2296_v28  ;;  %v9041_v28 = vpack.c.bf16 %v7782_v41, %v7780_v33  ;;  %v7807_v41 = vld [vmem:[%s13817_s2 + $0x400] sm:$0xff] }
 0x842   : > { %9008 = vmatpush3.bf16.msra.mxu0 %v10996_v18  ;;  %8694 = vmatprep.mubr.msk.f32.mxu0 %vm2297_vm10, %v2537_v38  ;;  %v7775_v38 = vld [vmem:[%s13817_s2 + $0x300] sm:$0xff] }
 0x843   : > { %9010 = vmatprep.subr.bf16.mxu0 %v11006_v53 }
 0x846   : > { %9012 = vmatpush3.bf16.msra.mxu0 %v11006_v53 }
 0x847   : > { %8692 = vmatprep.subr.msk.mxu0 %vm541_vm5, %v11012_v46 }
 0x84a   : > { %8693 = vmatpush3.msk.msra.mxu0 %vm541_vm5, %v11012_v46 }
 0x84b   : > { %8695 = vmatmul.mubr.msk.f32.vlgmr.msra.gmra.mrb[42].mxu0 %vm2297_vm10, %v2541_v27  ;;  %9014 = vmatprep.subr.bf16.mxu0 %v9013_v55  ;;  %v9039_v27 = vpack.c.bf16 %v7777_v37, %v7775_v38  ;;  %v7783_v55 = vld [vmem:[%s13817_s2 + $0x340] sm:$0xff]  ;;  %v7810_v38 = vld [vmem:[%s13817_s2 + $0x418] sm:$0xff] }
 0x84c   : > { %9016 = vmatpush1.bf16.msra.mxu0 %v9015_v57  ;;  %v7785_v57 = vld [vmem:[%s13817_s2 + $0x350] sm:$0xff] }
 0x84d   : > { %9018 = vmatprep.subr.bf16.mxu0 %v9017_v58  ;;  %v7788_v58 = vld [vmem:[%s13817_s2 + $0x368] sm:$0xff]  ;;  %v9047_v60 = vpack.c.bf16 %v7785_v57, %v7783_v55  ;;  %v7818_v57 = vld [vmem:[%s13817_s2 + $0x458] sm:$0xff] }
 0x84e   : > { %v9049_v40 = vpack.c.bf16 %v7790_v59, %v7788_v58  ;;  %v7816_v55 = vld [vmem:[%s13817_s2 + $0x448] sm:$0xff]  ;;  %v7815_v59 = vld [vmem:[%s13817_s2 + $0x440] sm:$0xff] }
 0x84f   : > { %v9077_v58 = vpack.c.bf16 %v7818_v57, %v7816_v55  ;;  %v2481_v55 = vld [vmem:[%s13817_s2 + $0x80] sm:$0xff]  ;;  %v2483_v57 = vld [vmem:[%s13817_s2 + $0x90] sm:$0xff] }
 0x850   : > { %9020 = vmatpush1.bf16.msra.mxu0 %v9019_v63  ;;  %v7789_v63 = vld [vmem:[%s13817_s2 + $0x370] sm:$0xff] }
 0x851   : > { %9022 = vmatprep.subr.bf16.mxu0 %v9021_v44  ;;  %v7792_v44 = vld [vmem:[%s13817_s2 + $0x388] sm:$0xff]  ;;  %v9051_v48 = vpack.c.bf16 %v7789_v63, %v7787_v62  ;;  %9078 = vmatprep.subr.bf16.mxu1 %v9077_v58  ;;  %v7822_v62 = vld [vmem:[%s13817_s2 + $0x478] sm:$0xff] }
 0x852   : > { %v9053_v45 = vpack.c.bf16 %v7794_v47, %v7792_v44  ;;  %v7819_v44 = vld [vmem:[%s13817_s2 + $0x460] sm:$0xff]  ;;  %v7821_v47 = vld [vmem:[%s13817_s2 + $0x470] sm:$0xff]  ;;  %v2486_v58 = vld [vmem:[%s13817_s2 + $0xa8] sm:$0xff] }
 0x854   : > { %9024 = vmatpush1.bf16.msra.mxu0 %v9023_v43  ;;  %v7793_v43 = vld [vmem:[%s13817_s2 + $0x390] sm:$0xff] }
 0x855   : > { %9026 = vmatprep.subr.bf16.mxu0 %v9025_v0  ;;  %v7796_v0 = vld [vmem:[%s13817_s2 + $0x3a8] sm:$0xff]  ;;  %v9055_v3 = vpack.c.bf16 %v7793_v43, %v7791_v24  ;;  %v2468_v24 = vld [vmem:[%s13817_s2 + $0x18] sm:$0xff] }
 0x856   : > { %v9057_v8 = vpack.c.bf16 %v7798_v2, %v7796_v0 }
 0x858   : > { %9028 = vmatpush1.bf16.msra.mxu0 %v9027_v10  ;;  %v7797_v10 = vld [vmem:[%s13817_s2 + $0x3b0] sm:$0xff] }
 0x859   : > { %9030 = vmatprep.subr.bf16.mxu0 %v9029_v12  ;;  %v7800_v12 = vld [vmem:[%s13817_s2 + $0x3c8] sm:$0xff]  ;;  %v9059_v56 = vpack.c.bf16 %v7797_v10, %v7795_v9 }
 0x85a   : > { %v9061_v61 = vpack.c.bf16 %v7802_v13, %v7800_v12 }
 0x85c   : > { %9032 = vmatpush1.bf16.msra.mxu0 %v9031_v23  ;;  %v7801_v23 = vld [vmem:[%s13817_s2 + $0x3d0] sm:$0xff] }
 0x85d   : > { %9034 = vmatprep.subr.bf16.mxu0 %v9033_v7  ;;  %v7804_v7 = vld [vmem:[%s13817_s2 + $0x3e8] sm:$0xff]  ;;  %v9063_v51 = vpack.c.bf16 %v7801_v23, %v7799_v16  ;;  %v2472_v16 = vld [vmem:[%s13817_s2 + $0x38] sm:$0xff] }
 0x85e   : > { %v9065_v5 = vpack.c.bf16 %v7806_v42, %v7804_v7 }
 0x860   : > { %9036 = vmatpush1.bf16.msra.mxu0 %v9035_v4  ;;  %v7805_v4 = vld [vmem:[%s13817_s2 + $0x3f0] sm:$0xff] }
 0x861   : > { %9038 = vmatprep.subr.bf16.mxu0 %v9037_v19  ;;  %v7808_v19 = vld [vmem:[%s13817_s2 + $0x408] sm:$0xff]  ;;  %v9067_v37 = vpack.c.bf16 %v7805_v4, %v7803_v17  ;;  %v2476_v4 = vld [vmem:[%s13817_s2 + $0x58] sm:$0xff] }
 0x862   : > { %v9069_v33 = vpack.c.bf16 %v7810_v38, %v7808_v19  ;;  %v2474_v17 = vld [vmem:[%s13817_s2 + $0x48] sm:$0xff] }
 0x863   : > { %v9093_v38 = vpack.c.bf16 %v2476_v4, %v2474_v17  ;;  %v2508_v17 = vld [vmem:[%s13817_s2 + $0x158] sm:$0xff] }
 0x864   : > { %9040 = vmatpush1.bf16.msra.mxu0 %v9039_v27  ;;  %v7809_v27 = vld [vmem:[%s13817_s2 + $0x410] sm:$0xff] }
 0x865   : > { %9042 = vmatprep.subr.bf16.mxu0 %v9041_v28  ;;  %v7812_v28 = vld [vmem:[%s13817_s2 + $0x428] sm:$0xff]  ;;  %v9071_v35 = vpack.c.bf16 %v7809_v27, %v7807_v41  ;;  %v2480_v41 = vld [vmem:[%s13817_s2 + $0x78] sm:$0xff] }
 0x866   : > { %v9073_v6 = vpack.c.bf16 %v7814_v34, %v7812_v28  ;;  %v2477_v34 = vld [vmem:[%s13817_s2 + $0x60] sm:$0xff] }
 0x868   : > { %9044 = vmatpush1.bf16.msra.mxu0 %v9043_v50  ;;  %v7813_v50 = vld [vmem:[%s13817_s2 + $0x430] sm:$0xff] }
 0x869   : > { %9046 = vmatprep.subr.bf16.mxu0 %v9045_v52  ;;  %v9075_v52 = vpack.c.bf16 %v7813_v50, %v7811_v49  ;;  %v2484_v49 = vld [vmem:[%s13817_s2 + $0x98] sm:$0xff] }
 0x86c   : > { %9048 = vmatpush1.bf16.msra.mxu0 %v9047_v60  ;;  %v7817_v60 = vld [vmem:[%s13817_s2 + $0x450] sm:$0xff] }
 0x86d   : > { %9050 = vmatprep.subr.bf16.mxu0 %v9049_v40  ;;  %v9079_v40 = vpack.c.bf16 %v7817_v60, %v7815_v59  ;;  %v2488_v59 = vld [vmem:[%s13817_s2 + $0xb8] sm:$0xff]  ;;  %v9103_v60 = vpack.c.bf16 %v2483_v57, %v2481_v55  ;;  %v2515_v55 = vld [vmem:[%s13817_s2 + $0x190] sm:$0xff]  ;;  %v2518_v57 = vld [vmem:[%s13817_s2 + $0x1a8] sm:$0xff] }
 0x86f   : > { %9080 = vmatpush1.bf16.msra.mxu1 %v9079_v40  ;;  %v9105_v40 = vpack.c.bf16 %v2488_v59, %v2486_v58  ;;  %v2520_v58 = vld [vmem:[%s13817_s2 + $0x1b8] sm:$0xff] }
 0x870   : > { %9052 = vmatpush1.bf16.msra.mxu0 %v9051_v48  ;;  %v9083_v48 = vpack.c.bf16 %v7821_v47, %v7819_v44  ;;  %v2492_v44 = vld [vmem:[%s13817_s2 + $0xd8] sm:$0xff] }
 0x871   : > { %9054 = vmatprep.subr.bf16.mxu0 %v9053_v45  ;;  %v2466_v45 = vld [vmem:[%s13817_s2 + $0x8] sm:$0xff] }
 0x872   : > { %v9085_v43 = vpack.c.bf16 %v2468_v24, %v2466_v45  ;;  %v2489_v45 = vld [vmem:[%s13817_s2 + $0xc0] sm:$0xff]  ;;  %v2491_v24 = vld [vmem:[%s13817_s2 + $0xd0] sm:$0xff] }
 0x874   : > { %9056 = vmatpush1.bf16.msra.mxu0 %v9055_v3 }
 0x875   : > { %9058 = vmatprep.subr.bf16.mxu0 %v9057_v8 }
 0x878   : > { %9060 = vmatpush1.bf16.msra.mxu0 %v9059_v56  ;;  %v3095_v56 = vpop.permute.xlu1 %3094 }
 0x879   : > { %9062 = vmatprep.subr.bf16.mxu0 %v9061_v61 }
 0x87c   : > { %9064 = vmatpush1.bf16.msra.mxu0 %v9063_v51  ;;  %v2471_v51 = vld [vmem:[%s13817_s2 + $0x30] sm:$0xff] }
 0x87d   : > { %9066 = vmatprep.subr.bf16.mxu0 %v9065_v5 }
 0x880   : > { %9068 = vmatpush1.bf16.msra.mxu0 %v9067_v37  ;;  %v2475_v37 = vld [vmem:[%s13817_s2 + $0x50] sm:$0xff] }
 0x881   : > { %9070 = vmatprep.subr.bf16.mxu0 %v9069_v33  ;;  %v2478_v33 = vld [vmem:[%s13817_s2 + $0x68] sm:$0xff] }
 0x882   : > { %v9097_v28 = vpack.c.bf16 %v2480_v41, %v2478_v33  ;;  %v2512_v33 = vld [vmem:[%s13817_s2 + $0x178] sm:$0xff] }
 0x884   : > { %9072 = vmatpush1.bf16.msra.mxu0 %v9071_v35  ;;  %v2479_v35 = vld [vmem:[%s13817_s2 + $0x70] sm:$0xff] }
 0x885   : > { %9074 = vmatprep.subr.bf16.mxu0 %v9073_v6  ;;  %v2482_v6 = vld [vmem:[%s13817_s2 + $0x88] sm:$0xff]  ;;  %v9099_v50 = vpack.c.bf16 %v2479_v35, %v2477_v34  ;;  %v2511_v34 = vld [vmem:[%s13817_s2 + $0x170] sm:$0xff] }
 0x886   : > { %v2514_v35 = vld [vmem:[%s13817_s2 + $0x188] sm:$0xff] }
 0x888   : > { %9076 = vmatpush1.bf16.msra.mxu0 %v9075_v52  ;;  %v9101_v52 = vpack.c.bf16 %v2484_v49, %v2482_v6  ;;  %v2516_v6 = vld [vmem:[%s13817_s2 + $0x198] sm:$0xff] }
 0x889   : > { %9158 = vmatprep.subr.bf16.mxu0 %v11000_v11  ;;  %v7820_v11 = vld [vmem:[%s13817_s2 + $0x468] sm:$0xff] }
 0x88a   : > { %v9081_v63 = vpack.c.bf16 %v7822_v62, %v7820_v11  ;;  %v2485_v11 = vld [vmem:[%s13817_s2 + $0xa0] sm:$0xff]  ;;  %v2487_v62 = vld [vmem:[%s13817_s2 + $0xb0] sm:$0xff] }
 0x88b   : > { %v9107_v47 = vpack.c.bf16 %v2487_v62, %v2485_v11  ;;  %v2519_v11 = vld [vmem:[%s13817_s2 + $0x1b0] sm:$0xff]  ;;  %v2522_v62 = vld [vmem:[%s13817_s2 + $0x1c8] sm:$0xff] }
 0x88c   : > { %9082 = vmatprep.subr.bf16.mxu1 %v9081_v63  ;;  %v2490_v63 = vld [vmem:[%s13817_s2 + $0xc8] sm:$0xff] }
 0x88d   : > { %9084 = vmatpush1.bf16.msra.mxu1 %v9083_v48  ;;  %v9109_v48 = vpack.c.bf16 %v2492_v44, %v2490_v63  ;;  %v2524_v63 = vld [vmem:[%s13817_s2 + $0x1d8] sm:$0xff] }
 0x88e   : > { %9086 = vmatprep.subr.bf16.mxu1 %v9085_v43  ;;  %v2494_v43 = vld [vmem:[%s13817_s2 + $0xe8] sm:$0xff] }
 0x909   : > { %v2614_v0 = vpop.f32.mrb[34].mxu1 }
 0x90a   : > { %v2616_v2 = vpop.f32.mrb[35].mxu1  ;;  %v11286_v3 = vpop.f32.mrb[36].mxu0 }
 0x90b   : > { %2843 = vmatprep.mubr.f32.mxu0 %v2616_v2  ;;  %v2381_v8 = vpop.f32.mrb[37].mxu0  ;;  %v9111_v2 = vpack.c.bf16 %v2491_v24, %v2489_v45  ;;  %v2523_v45 = vld [vmem:[%s13817_s2 + $0x1d0] sm:$0xff]  ;;  %v2526_v24 = vld [vmem:[%s13817_s2 + $0x1e8] sm:$0xff] }
 0x90c   : > { %2844 = vmatmul.mubr.f32.vlgmr.msra.gmra.mrb[44].mxu0 %v2614_v0  ;;  %v2496_v0 = vld [vmem:[%s13817_s2 + $0xf8] sm:$0xff] }
 0x90d   : > { %9160 = vmatpush1.bf16.msra.mxu0 %v10998_v15  ;;  %v2620_v9 = vpop.f32.mrb[36].mxu1  ;;  %v3093_v15 = vsel %vm2291_vm6, %v10159_v39, 0.0 }
 0x90e   : > { %9162 = vmatprep.subr.bf16.mxu0 %v11010_v29  ;;  %v2622_v10 = vpop.f32.mrb[37].mxu1  ;;  %v11290_v12 = vpop.f32.mrb[38].mxu0 }
 0x90f   : > { %2849 = vmatprep.mubr.f32.mxu0 %v2622_v10  ;;  %v11292_v13 = vpop.f32.mrb[39].mxu0  ;;  %v2495_v10 = vld [vmem:[%s13817_s2 + $0xf0] sm:$0xff] }
 0x910   : > { %2850 = vmatmul.mubr.f32.gmra.mrb[46].mxu0 %v2620_v9  ;;  %v2493_v9 = vld [vmem:[%s13817_s2 + $0xe0] sm:$0xff] }
 0x911   : > { %9164 = vmatpush1.bf16.msra.mxu0 %v11008_v32  ;;  %3168 = vmatprep.mubr.f32.mxu0 %v10039_v20  ;;  %v3097_v32 = vsel %vm2291_vm6, 0.0, %v3095_v56  ;;  %v2500_v56 = vld [vmem:[%s13817_s2 + $0x118] sm:$0xff] }
 0x912   : > { %7827 = vmatprep.subr.msk.mxu0 %vm541_vm5, %v11018_v30  ;;  %v2467_v30 = vld [vmem:[%s13817_s2 + $0x10] sm:$0xff] }
 0x914   : > { %v11300_v61 = vpop.f32.mrb[40].mxu0 }
 0x915   : > { %7828 = vmatpush1.msk.msra.mxu0 %vm541_vm5, %v11014_v25  ;;  %v11304_v29 = vpop.f32.mrb[41].mxu0  ;;  %v2465_v25 = vld [vmem:[%s13817_s2] sm:$0xff] }
 0x916   : > { %9166 = vmatprep.subr.bf16.mxu0 %v10996_v18  ;;  %7829 = vmatmul.mubr.msk.f32.vlgmr.msra.gmra.mrb[48].mxu0 %vm2297_vm10, %v3093_v15  ;;  %v9087_v23 = vpack.c.bf16 %v2467_v30, %v2465_v25  ;;  %v2497_v30 = vld [vmem:[%s13817_s2 + $0x100] sm:$0xff] }
 0x917   : > { %9168 = vmatpush3.bf16.msra.mxu0 %v10996_v18  ;;  %3174 = vmatprep.mubr.f32.mxu0 %v10039_v20  ;;  %v2470_v18 = vld [vmem:[%s13817_s2 + $0x28] sm:$0xff] }
 0x918   : > { %9170 = vmatprep.subr.bf16.mxu0 %v11006_v53  ;;  %v9089_v42 = vpack.c.bf16 %v2472_v16, %v2470_v18  ;;  %v2499_v18 = vld [vmem:[%s13817_s2 + $0x110] sm:$0xff]  ;;  %v2502_v16 = vld [vmem:[%s13817_s2 + $0x128] sm:$0xff] }
 0x91a   : > { %7830 = vmatmul.mubr.msk.f32.gmra.mrb[50].mxu0 %vm2297_vm10, %v3097_v32 }
 0x91b   : > { %9172 = vmatpush3.bf16.msra.mxu0 %v11006_v53  ;;  %8707 = vmatprep.mubr.msk.f32.mxu0 %vm2297_vm10, %v3093_v15  ;;  %v2469_v53 = vld [vmem:[%s13817_s2 + $0x20] sm:$0xff]  ;;  %v2498_v15 = vld [vmem:[%s13817_s2 + $0x108] sm:$0xff] }
 0x91c   : > { %8705 = vmatprep.subr.msk.mxu0 %vm541_vm5, %v11012_v46  ;;  %v9091_v19 = vpack.c.bf16 %v2471_v51, %v2469_v53  ;;  %v9117_v25 = vpack.c.bf16 %v2500_v56, %v2498_v15  ;;  %v2501_v53 = vld [vmem:[%s13817_s2 + $0x120] sm:$0xff]  ;;  %v2503_v51 = vld [vmem:[%s13817_s2 + $0x130] sm:$0xff]  ;;  %v2532_v15 = vld [vmem:[%s13817_s2 + $0x218] sm:$0xff] }
 0x91d   : > { %v9123_v4 = vpack.c.bf16 %v2503_v51, %v2501_v53  ;;  %v2535_v53 = vld [vmem:[%s13817_s2 + $0x230] sm:$0xff]  ;;  %v7835_v51 = vld [vmem:[%s13817_s2 + $0x488] sm:$0xff] }
 0x91e   : > { %v8696_v7 = vpop.f32.mrb[42].mxu0 }
 0x91f   : > { %v2691_v5 = vpop.f32.mrb[43].mxu0  ;;  %8706 = vmatpush3.msk.msra.mxu0 %vm541_vm5, %v11012_v46  ;;  %v2473_v46 = vld [vmem:[%s13817_s2 + $0x40] sm:$0xff] }
 0x920   : > { %7823 = vmatmul.mubr.msk.f32.vlgmr.msra.gmra.mrb[38].mxu1 %vm327_vm15, %v2691_v5  ;;  %8708 = vmatmul.mubr.msk.f32.vlgmr.msra.gmra.mrb[52].mxu0 %vm2297_vm10, %v3097_v32  ;;  %v9095_v27 = vpack.c.bf16 %v2475_v37, %v2473_v46  ;;  %v9115_v32 = vpack.c.bf16 %v2495_v10, %v2493_v9  ;;  %v2506_v5 = vld [vmem:[%s13817_s2 + $0x148] sm:$0xff]  ;;  %v2507_v46 = vld [vmem:[%s13817_s2 + $0x150] sm:$0xff]  ;;  %vm9260_vm10 = vmpackc.low %vm327_vm15, %vm327_vm15 }
 0x921   : > { %9088 = vmatpush1.bf16.msra.mxu1 %v9087_v23  ;;  %2926 = vmatprep.mubr.f32.mxu1 %v10039_v20  ;;  %v2504_v23 = vld [vmem:[%s13817_s2 + $0x138] sm:$0xff]  ;;  %v2510_v37 = vld [vmem:[%s13817_s2 + $0x168] sm:$0xff]  ;;  %v2527_v9 = vld [vmem:[%s13817_s2 + $0x1f0] sm:$0xff] }
 0x922   : > { %9090 = vmatprep.subr.bf16.mxu1 %v9089_v42  ;;  %3567 = vmatprep.mubr.f32.mxu0 %v10039_v20  ;;  %v9121_v42 = vpack.c.bf16 %v2504_v23, %v2502_v16  ;;  %v2530_v10 = vld [vmem:[%s13817_s2 + $0x208] sm:$0xff]  ;;  %v2536_v16 = vld [vmem:[%s13817_s2 + $0x238] sm:$0xff] }
 0x924   : > { %7824 = vmatmul.mubr.msk.f32.gmra.mrb[40].mxu1 %vm327_vm15, %v8696_v7  ;;  %v9119_v7 = vpack.c.bf16 %v2499_v18, %v2497_v30  ;;  %v2531_v30 = vld [vmem:[%s13817_s2 + $0x210] sm:$0xff]  ;;  %v2534_v18 = vld [vmem:[%s13817_s2 + $0x228] sm:$0xff] }
 0x925   : > { %9092 = vmatpush1.bf16.msra.mxu1 %v9091_v19  ;;  %3003 = vmatprep.mubr.f32.mxu1 %v2381_v8  ;;  %v9113_v8 = vpack.c.bf16 %v2496_v0, %v2494_v43  ;;  %v9125_v19 = vpack.c.bf16 %v2508_v17, %v2506_v5  ;;  %v2528_v43 = vld [vmem:[%s13817_s2 + $0x1f8] sm:$0xff] }
 0x926   : > { %9094 = vmatprep.subr.bf16.mxu1 %v9093_v38  ;;  %v2505_v38 = vld [vmem:[%s13817_s2 + $0x140] sm:$0xff]  ;;  %v7837_v5 = vld [vmem:[%s13817_s2 + $0x498] sm:$0xff] }
 0x927   : > { %v9127_v41 = vpack.c.bf16 %v2507_v46, %v2505_v38  ;;  %v7836_v38 = vld [vmem:[%s13817_s2 + $0x490] sm:$0xff]  ;;  %v7839_v46 = vld [vmem:[%s13817_s2 + $0x4a8] sm:$0xff] }
 0x929   : > { %9096 = vmatpush1.bf16.msra.mxu1 %v9095_v27  ;;  %v9129_v27 = vpack.c.bf16 %v2512_v33, %v2510_v37  ;;  %v7838_v33 = vld [vmem:[%s13817_s2 + $0x4a0] sm:$0xff] }
 0x92a   : > { %9098 = vmatprep.subr.bf16.mxu1 %v9097_v28  ;;  %v2509_v28 = vld [vmem:[%s13817_s2 + $0x160] sm:$0xff] }
 0x92b   : > { %v9131_v49 = vpack.c.bf16 %v2511_v34, %v2509_v28 }
 0x92d   : > { %9100 = vmatpush1.bf16.msra.mxu1 %v9099_v50  ;;  %v9133_v50 = vpack.c.bf16 %v2516_v6, %v2514_v35  ;;  %v7842_v35 = vld [vmem:[%s13817_s2 + $0x4c0] sm:$0xff]  ;;  %v7844_v6 = vld [vmem:[%s13817_s2 + $0x4d0] sm:$0xff] }
 0x92e   : > { %9102 = vmatprep.subr.bf16.mxu1 %v9101_v52  ;;  %v2513_v52 = vld [vmem:[%s13817_s2 + $0x180] sm:$0xff] }
 0x92f   : > { %v9135_v59 = vpack.c.bf16 %v2515_v55, %v2513_v52  ;;  %v7846_v55 = vld [vmem:[%s13817_s2 + $0x4e0] sm:$0xff] }
 0x931   : > { %9104 = vmatpush1.bf16.msra.mxu1 %v9103_v60  ;;  %v9137_v60 = vpack.c.bf16 %v2520_v58, %v2518_v57  ;;  %v7848_v57 = vld [vmem:[%s13817_s2 + $0x4f0] sm:$0xff]  ;;  %v7851_v58 = vld [vmem:[%s13817_s2 + $0x508] sm:$0xff] }
 0x932   : > { %9106 = vmatprep.subr.bf16.mxu1 %v9105_v40  ;;  %v2517_v40 = vld [vmem:[%s13817_s2 + $0x1a0] sm:$0xff] }
 0x933   : > { %v9139_v44 = vpack.c.bf16 %v2519_v11, %v2517_v40  ;;  %v7850_v40 = vld [vmem:[%s13817_s2 + $0x500] sm:$0xff]  ;;  %v7852_v11 = vld [vmem:[%s13817_s2 + $0x510] sm:$0xff] }
 0x935   : > { %9108 = vmatpush1.bf16.msra.mxu1 %v9107_v47  ;;  %v9141_v47 = vpack.c.bf16 %v2524_v63, %v2522_v62  ;;  %v7855_v62 = vld [vmem:[%s13817_s2 + $0x528] sm:$0xff]  ;;  %v7857_v63 = vld [vmem:[%s13817_s2 + $0x538] sm:$0xff] }
 0x936   : > { %9110 = vmatprep.subr.bf16.mxu1 %v9109_v48  ;;  %v2521_v48 = vld [vmem:[%s13817_s2 + $0x1c0] sm:$0xff] }
 0x937   : > { %v9143_v0 = vpack.c.bf16 %v2523_v45, %v2521_v48  ;;  %v7854_v48 = vld [vmem:[%s13817_s2 + $0x520] sm:$0xff]  ;;  %v7856_v45 = vld [vmem:[%s13817_s2 + $0x530] sm:$0xff] }
 0x939   : > { %9112 = vmatpush1.bf16.msra.mxu1 %v9111_v2  ;;  %v9145_v2 = vpack.c.bf16 %v2528_v43, %v2526_v24  ;;  %v7859_v24 = vld [vmem:[%s13817_s2 + $0x548] sm:$0xff]  ;;  %v7861_v43 = vld [vmem:[%s13817_s2 + $0x558] sm:$0xff] }
 0x93a   : > { %9114 = vmatprep.subr.bf16.mxu1 %v9113_v8  ;;  %v2525_v8 = vld [vmem:[%s13817_s2 + $0x1e0] sm:$0xff] }
 0x93b   : > { %v9147_v56 = vpack.c.bf16 %v2527_v9, %v2525_v8  ;;  %v7858_v8 = vld [vmem:[%s13817_s2 + $0x540] sm:$0xff]  ;;  %v7860_v9 = vld [vmem:[%s13817_s2 + $0x550] sm:$0xff] }
 0x93d   : > { %9116 = vmatpush1.bf16.msra.mxu1 %v9115_v32  ;;  %v9149_v32 = vpack.c.bf16 %v2532_v15, %v2530_v10  ;;  %v7863_v10 = vld [vmem:[%s13817_s2 + $0x568] sm:$0xff]  ;;  %v7865_v15 = vld [vmem:[%s13817_s2 + $0x578] sm:$0xff] }
 0x93e   : > { %9118 = vmatprep.subr.bf16.mxu1 %v9117_v25  ;;  %v2529_v25 = vld [vmem:[%s13817_s2 + $0x200] sm:$0xff] }
 0x93f   : > { %v9151_v23 = vpack.c.bf16 %v2531_v30, %v2529_v25  ;;  %v7862_v25 = vld [vmem:[%s13817_s2 + $0x560] sm:$0xff]  ;;  %v7864_v30 = vld [vmem:[%s13817_s2 + $0x570] sm:$0xff] }
 0x941   : > { %9120 = vmatpush1.bf16.msra.mxu1 %v9119_v7  ;;  %v9153_v7 = vpack.c.bf16 %v2536_v16, %v2534_v18  ;;  %v7867_v18 = vld [vmem:[%s13817_s2 + $0x588] sm:$0xff]  ;;  %v7869_v16 = vld [vmem:[%s13817_s2 + $0x598] sm:$0xff] }
 0x942   : > { %9122 = vmatprep.subr.bf16.mxu1 %v9121_v42  ;;  %v2533_v42 = vld [vmem:[%s13817_s2 + $0x220] sm:$0xff] }
 0x943   : > { %v9155_v17 = vpack.c.bf16 %v2535_v53, %v2533_v42  ;;  %v7866_v42 = vld [vmem:[%s13817_s2 + $0x580] sm:$0xff]  ;;  %v7868_v53 = vld [vmem:[%s13817_s2 + $0x590] sm:$0xff] }
 0x945   : > { %9124 = vmatpush1.bf16.msra.mxu1 %v9123_v4  ;;  %v9173_v4 = vpack.c.bf16 %v7837_v5, %v7835_v51  ;;  %v7871_v51 = vld [vmem:[%s13817_s2 + $0x5a8] sm:$0xff]  ;;  %v7873_v5 = vld [vmem:[%s13817_s2 + $0x5b8] sm:$0xff] }
 0x946   : > { %9126 = vmatprep.subr.bf16.mxu1 %v9125_v19  ;;  %v7834_v19 = vld [vmem:[%s13817_s2 + $0x480] sm:$0xff] }
 0x949   : > { %9128 = vmatpush1.bf16.msra.mxu1 %v9127_v41  ;;  %v7840_v41 = vld [vmem:[%s13817_s2 + $0x4b0] sm:$0xff] }
 0x94a   : > { %9130 = vmatprep.subr.bf16.mxu1 %v9129_v27  ;;  %v7843_v27 = vld [vmem:[%s13817_s2 + $0x4c8] sm:$0xff]  ;;  %v9179_v28 = vpack.c.bf16 %v7840_v41, %v7838_v33  ;;  %v7874_v33 = vld [vmem:[%s13817_s2 + $0x5c0] sm:$0xff]  ;;  %v7876_v41 = vld [vmem:[%s13817_s2 + $0x5d0] sm:$0xff] }
 0x94d   : > { %9132 = vmatpush1.bf16.msra.mxu1 %v9131_v49  ;;  %v7847_v49 = vld [vmem:[%s13817_s2 + $0x4e8] sm:$0xff] }
 0x94e   : > { %9134 = vmatprep.subr.bf16.mxu1 %v9133_v50  ;;  %v9183_v50 = vpack.c.bf16 %v7844_v6, %v7842_v35  ;;  %v7878_v35 = vld [vmem:[%s13817_s2 + $0x5e0] sm:$0xff]  ;;  %v7880_v6 = vld [vmem:[%s13817_s2 + $0x5f0] sm:$0xff] }
 0x951   : > { %9136 = vmatpush1.bf16.msra.mxu1 %v9135_v59  ;;  %v9187_v59 = vpack.c.bf16 %v7848_v57, %v7846_v55  ;;  %v7882_v55 = vld [vmem:[%s13817_s2 + $0x600] sm:$0xff]  ;;  %v7884_v57 = vld [vmem:[%s13817_s2 + $0x610] sm:$0xff] }
 0x952   : > { %9138 = vmatprep.subr.bf16.mxu1 %v9137_v60 }
 0x955   : > { %9140 = vmatpush1.bf16.msra.mxu1 %v9139_v44  ;;  %v9191_v44 = vpack.c.bf16 %v7852_v11, %v7850_v40  ;;  %v7886_v40 = vld [vmem:[%s13817_s2 + $0x620] sm:$0xff]  ;;  %v7888_v11 = vld [vmem:[%s13817_s2 + $0x630] sm:$0xff] }
 0x956   : > { %9142 = vmatprep.subr.bf16.mxu1 %v9141_v47  ;;  %v9193_v47 = vpack.c.bf16 %v7857_v63, %v7855_v62  ;;  %v7891_v62 = vld [vmem:[%s13817_s2 + $0x648] sm:$0xff]  ;;  %v7893_v63 = vld [vmem:[%s13817_s2 + $0x658] sm:$0xff] }
 0x959   : > { %9144 = vmatpush1.bf16.msra.mxu1 %v9143_v0  ;;  %v9195_v0 = vpack.c.bf16 %v7856_v45, %v7854_v48  ;;  %v7890_v48 = vld [vmem:[%s13817_s2 + $0x640] sm:$0xff]  ;;  %v7892_v45 = vld [vmem:[%s13817_s2 + $0x650] sm:$0xff] }
 0x95a   : > { %9146 = vmatprep.subr.bf16.mxu1 %v9145_v2  ;;  %v9197_v2 = vpack.c.bf16 %v7861_v43, %v7859_v24  ;;  %v7895_v24 = vld [vmem:[%s13817_s2 + $0x668] sm:$0xff]  ;;  %v7897_v43 = vld [vmem:[%s13817_s2 + $0x678] sm:$0xff] }
 0x95d   : > { %9148 = vmatpush1.bf16.msra.mxu1 %v9147_v56  ;;  %v9199_v56 = vpack.c.bf16 %v7860_v9, %v7858_v8  ;;  %v7894_v8 = vld [vmem:[%s13817_s2 + $0x660] sm:$0xff]  ;;  %v7896_v9 = vld [vmem:[%s13817_s2 + $0x670] sm:$0xff] }
 0x95e   : > { %9150 = vmatprep.subr.bf16.mxu1 %v9149_v32  ;;  %v9201_v32 = vpack.c.bf16 %v7865_v15, %v7863_v10  ;;  %v7899_v10 = vld [vmem:[%s13817_s2 + $0x688] sm:$0xff]  ;;  %v7901_v15 = vld [vmem:[%s13817_s2 + $0x698] sm:$0xff] }
 0x960   : > { %3004 = vmatmul.mubr.f32.vlgmr.msra.gmra.mrb[38].mxu1 %v11286_v3  ;;  %v7841_v3 = vld [vmem:[%s13817_s2 + $0x4b8] sm:$0xff] }
 0x961   : > { %3009 = vmatprep.mubr.f32.mxu1 %v11292_v13  ;;  %9152 = vmatpush1.bf16.msra.mxu1 %v9151_v23  ;;  %v9175_v13 = vpack.c.bf16 %v7836_v38, %v7834_v19  ;;  %v9177_v37 = vpack.c.bf16 %v7841_v3, %v7839_v46  ;;  %v9203_v23 = vpack.c.bf16 %v7864_v30, %v7862_v25  ;;  %v7870_v19 = vld [vmem:[%s13817_s2 + $0x5a0] sm:$0xff]  ;;  %v7872_v38 = vld [vmem:[%s13817_s2 + $0x5b0] sm:$0xff]  ;;  %v7875_v46 = vld [vmem:[%s13817_s2 + $0x5c8] sm:$0xff] }
 0x962   : > { %9154 = vmatprep.subr.bf16.mxu1 %v9153_v7  ;;  %v9205_v7 = vpack.c.bf16 %v7869_v16, %v7867_v18  ;;  %v7877_v3 = vld [vmem:[%s13817_s2 + $0x5d8] sm:$0xff] }
 0x964   : > { %3010 = vmatmul.mubr.f32.gmra.mrb[40].mxu1 %v11290_v12  ;;  %v7845_v12 = vld [vmem:[%s13817_s2 + $0x4d8] sm:$0xff] }
 0x965   : > { %9156 = vmatpush1.bf16.msra.mxu1 %v9155_v17  ;;  %3080 = vmatprep.mubr.f32.mxu1 %v10039_v20  ;;  %v9181_v34 = vpack.c.bf16 %v7845_v12, %v7843_v27  ;;  %v9207_v17 = vpack.c.bf16 %v7868_v53, %v7866_v42  ;;  %v7879_v27 = vld [vmem:[%s13817_s2 + $0x5e8] sm:$0xff]  ;;  %v7881_v12 = vld [vmem:[%s13817_s2 + $0x5f8] sm:$0xff] }
 0x966   : > { %9174 = vmatprep.subr.bf16.mxu1 %v9173_v4  ;;  %v9209_v4 = vpack.c.bf16 %v7873_v5, %v7871_v51  ;;  %v7903_v42 = vld [vmem:[%s13817_s2 + $0x6a8] sm:$0xff]  ;;  %v7905_v53 = vld [vmem:[%s13817_s2 + $0x6b8] sm:$0xff] }
 0x968   : > { %7825 = vmatmul.mubr.msk.f32.vlgmr.msra.gmra.mrb[38].mxu1 %vm327_vm15, %v11304_v29  ;;  %v7849_v29 = vld [vmem:[%s13817_s2 + $0x4f8] sm:$0xff] }
 0x969   : > { %3086 = vmatprep.mubr.f32.mxu1 %v10039_v20  ;;  %9176 = vmatpush1.bf16.msra.mxu1 %v9175_v13  ;;  %v9185_v52 = vpack.c.bf16 %v7849_v29, %v7847_v49  ;;  %v9211_v13 = vpack.c.bf16 %v7872_v38, %v7870_v19  ;;  %v7883_v49 = vld [vmem:[%s13817_s2 + $0x608] sm:$0xff]  ;;  %v7885_v29 = vld [vmem:[%s13817_s2 + $0x618] sm:$0xff]  ;;  %v7902_v19 = vld [vmem:[%s13817_s2 + $0x6a0] sm:$0xff] }
 0x96a   : > { %9178 = vmatprep.subr.bf16.mxu1 %v9177_v37  ;;  %v9213_v37 = vpack.c.bf16 %v7877_v3, %v7875_v46  ;;  %v7904_v38 = vld [vmem:[%s13817_s2 + $0x6b0] sm:$0xff] }
 0x96b   : > { %v9243_v3 = vpack.c.bf16 %v7904_v38, %v7902_v19 }
 0x96c   : > { %7826 = vmatmul.mubr.msk.f32.gmra.mrb[40].mxu1 %vm327_vm15, %v11300_v61  ;;  %v7853_v61 = vld [vmem:[%s13817_s2 + $0x518] sm:$0xff] }
 0x96d   : > { %9180 = vmatpush1.bf16.msra.mxu1 %v9179_v28  ;;  %v9189_v60 = vpack.c.bf16 %v7853_v61, %v7851_v58  ;;  %v9215_v28 = vpack.c.bf16 %v7876_v41, %v7874_v33  ;;  %v7887_v58 = vld [vmem:[%s13817_s2 + $0x628] sm:$0xff]  ;;  %v7889_v61 = vld [vmem:[%s13817_s2 + $0x638] sm:$0xff] }
 0x96e   : > { %9182 = vmatprep.subr.bf16.mxu1 %v9181_v34  ;;  %v9217_v34 = vpack.c.bf16 %v7881_v12, %v7879_v27 }
 0x971   : > { %9184 = vmatpush1.bf16.msra.mxu1 %v9183_v50  ;;  %v9219_v50 = vpack.c.bf16 %v7880_v6, %v7878_v35  ;;  %v3495_v35 = vsel %vm3493_vm12, 0.0, %v10043_v54 }
 0x972   : > { %9186 = vmatprep.subr.bf16.mxu1 %v9185_v52  ;;  %v9221_v52 = vpack.c.bf16 %v7885_v29, %v7883_v49 }
 0x975   : > { %9188 = vmatpush1.bf16.msra.mxu1 %v9187_v59  ;;  %v9223_v59 = vpack.c.bf16 %v7884_v57, %v7882_v55 }
 0x976   : > { %9190 = vmatprep.subr.bf16.mxu1 %v9189_v60  ;;  %v9225_v60 = vpack.c.bf16 %v7889_v61, %v7887_v58  ;;  %v3494_v58 = vsel %vm3493_vm12, 1.0, %v10039_v20 }
 0x979   : > { %9192 = vmatpush1.bf16.msra.mxu1 %v9191_v44  ;;  %v9227_v44 = vpack.c.bf16 %v7888_v11, %v7886_v40 }
 0x97a   : > { %9194 = vmatprep.subr.bf16.mxu1 %v9193_v47  ;;  %v9229_v47 = vpack.c.bf16 %v7893_v63, %v7891_v62 }
 0x97d   : > { %9196 = vmatpush1.bf16.msra.mxu1 %v9195_v0  ;;  %v9231_v0 = vpack.c.bf16 %v7892_v45, %v7890_v48 }
 0x97e   : > { %9198 = vmatprep.subr.bf16.mxu1 %v9197_v2  ;;  %v9233_v2 = vpack.c.bf16 %v7897_v43, %v7895_v24 }
 0x981   : > { %9200 = vmatpush1.bf16.msra.mxu1 %v9199_v56  ;;  %v9235_v56 = vpack.c.bf16 %v7896_v9, %v7894_v8 }
 0x982   : > { %9202 = vmatprep.subr.bf16.mxu1 %v9201_v32  ;;  %v9237_v32 = vpack.c.bf16 %v7901_v15, %v7899_v10 }
 0x985   : > { %9204 = vmatpush1.bf16.msra.mxu1 %v9203_v23  ;;  %v7898_v23 = vld [vmem:[%s13817_s2 + $0x680] sm:$0xff] }
 0x986   : > { %9206 = vmatprep.subr.bf16.mxu1 %v9205_v7  ;;  %v7900_v7 = vld [vmem:[%s13817_s2 + $0x690] sm:$0xff] }
 0x987   : > { %v9239_v5 = vpack.c.bf16 %v7900_v7, %v7898_v23 }
 0x989   : > { %9208 = vmatpush1.bf16.msra.mxu1 %v9207_v17 }
 0x98a   : > { %9210 = vmatprep.subr.bf16.mxu1 %v9209_v4  ;;  %v9241_v4 = vpack.c.bf16 %v7905_v53, %v7903_v42 }
 0x98d   : > { %9212 = vmatpush1.bf16.msra.mxu1 %v9211_v13 }
 0x98e   : > { %9214 = vmatprep.subr.bf16.mxu1 %v9213_v37 }
 0x991   : > { %9216 = vmatpush1.bf16.msra.mxu1 %v9215_v28 }
 0x992   : > { %9218 = vmatprep.subr.bf16.mxu1 %v9217_v34 }
 0x995   : > { %9220 = vmatpush1.bf16.msra.mxu1 %v9219_v50  ;;  %v3497_v50 = vrot.slane %v3495_v35, 7 }
 0x996   : > { %9222 = vmatprep.subr.bf16.mxu1 %v9221_v52 }
 0x997   : > { %v3499_v11 = vsel %vm1277_vm9, %v3494_v58, %v3497_v50 }
 0x999   : > { %9224 = vmatpush1.bf16.msra.mxu1 %v9223_v59 }
 0x99a   : > { %9226 = vmatprep.subr.bf16.mxu1 %v9225_v60 }
 0x99d   : > { %9228 = vmatpush1.bf16.msra.mxu1 %v9227_v44 }
 0x99e   : > { %9230 = vmatprep.subr.bf16.mxu1 %v9229_v47 }
 0x9a1   : > { %9232 = vmatpush1.bf16.msra.mxu1 %v9231_v0 }
 0x9a2   : > { %9234 = vmatprep.subr.bf16.mxu1 %v9233_v2 }
 0x9a5   : > { %9236 = vmatpush1.bf16.msra.mxu1 %v9235_v56 }
 0x9a6   : > { %9238 = vmatprep.subr.bf16.mxu1 %v9237_v32 }
 0x9df   : > { %v2845_v25 = vpop.f32.mrb[44].mxu0 }
 0x9e0   : > { %v2847_v30 = vpop.f32.mrb[45].mxu0 }
 0x9e3   : > { %v2851_v18 = vpop.f32.mrb[46].mxu0 }
 0x9e4   : > { %v2853_v16 = vpop.f32.mrb[47].mxu0 }
 0x9e9   : > { %v3170_v51 = vpop.f32.mrb[48].mxu0 }
 0x9ea   : > { %v3172_v17 = vpop.f32.mrb[49].mxu0 }
 0x9eb   : > { %3399 = vmatprep.mubr.f32.mxu1 %v3172_v17 }
 0x9ec   : > { %3400 = vmatmul.mubr.f32.vlgmr.msra.gmra.mrb[38].mxu1 %v3170_v51 }
 0x9ed   : > { %v3176_v46 = vpop.f32.mrb[50].mxu0  ;;  %9240 = vmatpush1.bf16.msra.mxu1 %v9239_v5 }
 0x9ee   : > { %v3178_v13 = vpop.f32.mrb[51].mxu0  ;;  %9242 = vmatprep.subr.bf16.mxu1 %v9241_v4 }
 0x9ef   : > { %3405 = vmatprep.mubr.f32.mxu1 %v3178_v13 }
 0x9f0   : > { %3406 = vmatmul.mubr.f32.gmra.mrb[40].mxu1 %v3176_v46 }
 0x9f1   : > { %9244 = vmatpush1.bf16.msra.mxu1 %v9243_v3  ;;  %3476 = vmatprep.mubr.f32.mxu1 %v10039_v20 }
 0x9f3   : > { %v8709_v37 = vpop.f32.mrb[52].mxu0 }
 0x9f4   : > { %v3247_v33 = vpop.f32.mrb[53].mxu0 }
 0x9f5   : > { %7906 = vmatmul.mubr.msk.f32.vlgmr.msra.gmra.mrb[38].mxu1 %vm327_vm15, %v3247_v33 }
 0x9f6   : > { %3482 = vmatprep.mubr.f32.mxu1 %v10039_v20 }
 0x9f9   : > { %7907 = vmatmul.mubr.msk.f32.gmra.mrb[40].mxu1 %vm327_vm15, %v8709_v37 }
 0x9fa   : > { %4995 = vmatprep.mubr.f32.mxu1 %v10039_v20 }
 0xac8   : > { %v3478_v41 = vpop.f32.mrb[38].mxu1 }
 0xac9   : > { %v11764_v27 = vadd.f32 %v3478_v41, %v2845_v25  ;;  %v3480_v12 = vpop.f32.mrb[39].mxu1 }
 0xaca   : > { %v11766_v28 = vadd.f32 %v3480_v12, %v2847_v30 }
 0xacb   : > { %v3574_v40 = vmul.f32 %v11764_v27, %v11764_v27 }
 0xacc   : > { %v3484_v34 = vpop.f32.mrb[40].mxu1  ;;  %v3575_v52 = vmul.f32 %v11766_v28, %v11766_v28 }
 0xacd   : > { %v11770_v6 = vadd.f32 %v3484_v34, %v2851_v18  ;;  %v3486_v49 = vpop.f32.mrb[41].mxu1 }
 0xace   : > { %v11772_v29 = vadd.f32 %v3486_v49, %v2853_v16 }
 0xacf   : > { %v9247_v61 = vpack.c.bf16 %v11770_v6, %v11764_v27  ;;  %v3576_v59 = vmul.f32 %v11770_v6, %v11770_v6 }
 0xad0   : > { %v3577_v55 = vmul.f32 %v11772_v29, %v11772_v29  ;;  %v9245_v57 = vpack.c.bf16 %v11772_v29, %v11766_v28 }
 0xad1   : > { %v9251_v62 = vpack.c.bf16 %v3576_v59, %v3574_v40 }
 0xad2   : > { %9246 = vmatprep.subr.bf16.mxu0 %v9245_v57  ;;  %v9249_v60 = vpack.c.bf16 %v3577_v55, %v3575_v52 }
 0xad3   : > { %9248 = vmatpush1.bf16.msra.mxu0 %v9247_v61 }
 0xad4   : > { %9250 = vmatprep.subr.bf16.mxu0 %v9249_v60 }
 0xad6   : > { %7908 = vmatmul.mubr.msk.f32.vlgmr.msra.gmra.mrb[54].mxu0 %vm1271_vm8, %v3499_v11 }
 0xad7   : > { %9252 = vmatpush1.bf16.msra.mxu0 %v9251_v62  ;;  %3642 = vmatprep.mubr.f32.mxu0 %v10039_v20 }
 0xada   : > { %7909 = vmatmul.mubr.msk.f32.vlgmr.msra.gmra.mrb[56].mxu0 %vm1271_vm8, %v3499_v11 }
 0xadb   : > { %8712 = vmatprep.mubr.msk.f32.mxu0 %vm1561_vm11, %v10631_v14 }
 0xba9   : > { %v3569_v63 = vpop.f32.mrb[54].mxu0 }
 0xbaa   : > { %3652 = vrot.lane.b32.xlu0 %v3569_v63, %s10045_s16  ;;  %v3571_v44 = vpop.f32.mrb[55].mxu0 }
 0xbad   : > { %v3644_v47 = vpop.f32.mrb[56].mxu0 }
 0xbae   : > { %3661 = vrot.lane.b32.xlu0 %v3569_v63, %s10047_s18  ;;  %3657 = vrot.lane.b32.xlu1 %v3644_v47, %s10045_s16  ;;  %v3646_v48 = vpop.f32.mrb[57].mxu0 }
 0xbb2   : > { %3669 = vrot.lane.b32.xlu0 %v3569_v63, %s10041_s28  ;;  %3665 = vrot.lane.b32.xlu1 %v3644_v47, %s10047_s18 }
 0xbb6   : > { %3680 = vrot.lane.b32.xlu0 %v3571_v44, %s10045_s16  ;;  %3673 = vrot.lane.b32.xlu1 %v3644_v47, %s10041_s28 }
 0xbba   : > { %3689 = vrot.lane.b32.xlu0 %v3571_v44, %s10047_s18  ;;  %3685 = vrot.lane.b32.xlu1 %v3646_v48, %s10045_s16 }
 0xbbe   : > { %3697 = vrot.lane.b32.xlu0 %v3571_v44, %s10041_s28  ;;  %3693 = vrot.lane.b32.xlu1 %v3646_v48, %s10047_s18 }
 0xbc2   : > { %3701 = vrot.lane.b32.xlu1 %v3646_v48, %s10041_s28 }
 0xc1c   : > { %v3653_v45 = vpop.permute.xlu0 %3652 }
 0xc1d   : > { %v3655_v0 = vadd.f32 %v3653_v45, %v3569_v63 }
 0xc20   : > { %v3662_v24 = vpop.permute.xlu0 %3661  ;;  %v3658_v43 = vpop.permute.xlu1 %3657 }
 0xc21   : > { %v3664_v2 = vadd.f32 %v3662_v24, %v3655_v0  ;;  %v3660_v10 = vadd.f32 %v3658_v43, %v3644_v47 }
 0xc24   : > { %v3670_v8 = vpop.permute.xlu0 %3669  ;;  %v3666_v9 = vpop.permute.xlu1 %3665 }
 0xc25   : > { %v3672_v15 = vadd.f32 %v3670_v8, %v3664_v2  ;;  %v3668_v56 = vadd.f32 %v3666_v9, %v3660_v10 }
 0xc27   : > { %v3677_v32 = vadd.f32 %v3672_v15, %v3571_v44 }
 0xc28   : > { %v3681_v25 = vpop.permute.xlu0 %3680  ;;  %v3674_v30 = vpop.permute.xlu1 %3673 }
 0xc29   : > { %v3676_v18 = vadd.f32 %v3674_v30, %v3668_v56  ;;  %v3683_v42 = vadd.f32 %v3681_v25, %v3677_v32 }
 0xc2b   : > { %v3678_v16 = vadd.f32 %v3676_v18, %v3646_v48 }
 0xc2c   : > { %v3690_v23 = vpop.permute.xlu0 %3689  ;;  %v3686_v7 = vpop.permute.xlu1 %3685 }
 0xc2d   : > { %v3692_v53 = vadd.f32 %v3690_v23, %v3683_v42  ;;  %v3688_v17 = vadd.f32 %v3686_v7, %v3678_v16 }
 0xc30   : > { %v3698_v51 = vpop.permute.xlu0 %3697  ;;  %v3694_v5 = vpop.permute.xlu1 %3693 }
 0xc31   : > { %v3700_v4 = vadd.f32 %v3698_v51, %v3692_v53  ;;  %v3696_v38 = vadd.f32 %v3694_v5, %v3688_v17 }
 0xc33   : > { %v3705_v19 = vmul.f32 0.015625, %v3700_v4 }
 0xc34   : > { %v3702_v46 = vpop.permute.xlu1 %3701 }
 0xc35   : > { %v3704_v3 = vadd.f32 %v3702_v46, %v3696_v38  ;;  %8710 = vmatprep.subr.msk.mxu0 %vm363_vm1, %v3705_v19  ;;  %v3707_v13 = vmul.f32 %v3705_v19, %v3705_v19 }
 0xc36   : > { %8711 = vmatpush3.msk.msra.mxu0 %vm363_vm1, %v3705_v19 }
 0xc37   : > { %v3706_v37 = vmul.f32 0.015625, %v3704_v3  ;;  %8713 = vmatmul.mubr.msk.f32.vlgmr.msra.gmra.mrb[58].mxu0 %vm1561_vm11, %v10652_v26 }
 0xc38   : > { %8717 = vmatprep.mubr.msk.f32.mxu0 %vm1561_vm11, %v10631_v14 }
 0xc39   : > { %v3708_v33 = vsub.f32 %v3706_v37, %v3707_v13 }
 0xc3b   : > { %v3709_v41 = vadd.f32 1e-05, %v3708_v33 }
 0xc3d   : > { %10023 = vrsqrt.f32 %v3709_v41 }
 0xc47   : > { %v10024_v12 = vpop.eup %10023 }
 0xc48   : > { %8715 = vmatprep.subr.msk.mxu0 %vm363_vm1, %v10024_v12 }
 0xc49   : > { %8716 = vmatpush3.msk.msra.mxu0 %vm363_vm1, %v10024_v12 }
 0xc4a   : > { %8718 = vmatmul.mubr.msk.f32.vlgmr.msra.gmra.mrb[60].mxu0 %vm1561_vm11, %v10652_v26 }
 0xc4b   : > { %4052 = vmatprep.mubr.f32.mxu0 %v10039_v20 }
 0xd0a   : > { %v8714_v34 = vpop.f32.mrb[58].mxu0 }
 0xd0b   : > { %3793 = vrot.lane.b32.xlu1 %v8714_v34, %s10041_s28  ;;  %v3780_v35 = vpop.f32.mrb[59].mxu0 }
 0xd0c   : > { %3791 = vrot.lane.b32.xlu0 %v3780_v35, %s10041_s28 }
 0xd0f   : > { %3799 = vrot.lane.b32.xlu1 %v8714_v34, %s10047_s18 }
 0xd10   : > { %3797 = vrot.lane.b32.xlu0 %v3780_v35, %s10047_s18 }
 0xd13   : > { %3805 = vrot.lane.b32.xlu1 %v8714_v34, %s10045_s16 }
 0xd14   : > { %3803 = vrot.lane.b32.xlu0 %v3780_v35, %s10045_s16 }
 0xd1d   : > { %v8719_v49 = vpop.f32.mrb[60].mxu0 }
 0xd1e   : > { %3897 = vrot.lane.b32.xlu1 %v8719_v49, %s10041_s28  ;;  %v3884_v50 = vpop.f32.mrb[61].mxu0 }
 0xd1f   : > { %3895 = vrot.lane.b32.xlu0 %v3884_v50, %s10041_s28 }
 0xd22   : > { %3903 = vrot.lane.b32.xlu1 %v8719_v49, %s10047_s18 }
 0xd23   : > { %3901 = vrot.lane.b32.xlu0 %v3884_v50, %s10047_s18 }
 0xd26   : > { %3909 = vrot.lane.b32.xlu1 %v8719_v49, %s10045_s16 }
 0xd27   : > { %3907 = vrot.lane.b32.xlu0 %v3884_v50, %s10045_s16  ;;  %s10051_s16 = smov 8  }
 0xd7d   : > { %v3794_v52 = vpop.permute.xlu1 %3793 }
 0xd7e   : > { %v3792_v55 = vpop.permute.xlu0 %3791  ;;  %v3810_v11 = vsel %vm327_vm15, %v8714_v34, %v3794_v52 }
 0xd7f   : > { %v3809_v62 = vsel %vm327_vm15, %v3780_v35, %v3792_v55  ;;  %v3963_v55 = vsel %vm3493_vm12, %v10110_v21, 0.0 }
 0xd81   : > { %v3800_v57 = vpop.permute.xlu1 %3799 }
 0xd82   : > { %v3798_v58 = vpop.permute.xlu0 %3797  ;;  %v3812_v63 = vsel %vm375_vm0, %v3810_v11, %v3800_v57 }
 0xd83   : > { %v3811_v47 = vsel %vm375_vm0, %v3809_v62, %v3798_v58  ;;  %v3964_v58 = vsel %vm3493_vm12, %v10115_v22, 0.0 }
 0xd85   : > { %v3806_v61 = vpop.permute.xlu1 %3805 }
 0xd86   : > { %v3804_v59 = vpop.permute.xlu0 %3803  ;;  %v3814_v48 = vsel %vm1766_vm14, %v3812_v63, %v3806_v61 }
 0xd87   : > { %v3813_v24 = vsel %vm1766_vm14, %v3811_v47, %v3804_v59  ;;  %v3921_v0 = vsub.f32 %v11770_v6, %v3814_v48  ;;  %v3922_v2 = vsub.f32 %v11772_v29, %v3814_v48 }
 0xd88   : > { %v3919_v15 = vsub.f32 %v11764_v27, %v3813_v24  ;;  %v3920_v56 = vsub.f32 %v11766_v28, %v3813_v24 }
 0xd90   : > { %v3898_v60 = vpop.permute.xlu1 %3897 }
 0xd91   : > { %v3896_v40 = vpop.permute.xlu0 %3895  ;;  %v3914_v43 = vsel %vm327_vm15, %v8719_v49, %v3898_v60 }
 0xd92   : > { %v3913_v8 = vsel %vm327_vm15, %v3884_v50, %v3896_v40 }
 0xd94   : > { %v3904_v44 = vpop.permute.xlu1 %3903 }
 0xd95   : > { %v3902_v45 = vpop.permute.xlu0 %3901  ;;  %v3916_v9 = vsel %vm375_vm0, %v3914_v43, %v3904_v44 }
 0xd96   : > { %v3915_v32 = vsel %vm375_vm0, %v3913_v8, %v3902_v45 }
 0xd98   : > { %v3910_v10 = vpop.permute.xlu1 %3909 }
 0xd99   : > { %v3918_v25 = vsel %vm1766_vm14, %v3916_v9, %v3910_v10  ;;  %v3908_v30 = vpop.permute.xlu0 %3907 }
 0xd9a   : > { %v3925_v18 = vmul.f32 %v3921_v0, %v3918_v25  ;;  %v3926_v16 = vmul.f32 %v3922_v2, %v3918_v25  ;;  %v3917_v6 = vsel %vm1766_vm14, %v3915_v32, %v3908_v30  ;;  %vm7916_vm14 = vmneg %vm327_vm15 }
 0xd9b   : > { %v3923_v23 = vmul.f32 %v3919_v15, %v3917_v6  ;;  %v3924_v29 = vmul.f32 %v3920_v56, %v3917_v6  ;;  %vm9256_vm6 = vmpackc.low %vm7916_vm14, %vm7916_vm14  ;;  %vm13830_vm14 = vcmask 1045504  }
 0xd9c   : > { %vm3929_vm13 = vcmp.ge.f32.partialorder %v3925_v18, 0.0  ;;  %vm3930_vm3 = vcmp.ge.f32.partialorder %v3926_v16, 0.0  ;;  %v3933_v7 = vmul.f32 0.2, %v3925_v18  ;;  %v3934_v42 = vmul.f32 0.2, %v3926_v16 }
 0xd9d   : > { %vm3927_vm4 = vcmp.ge.f32.partialorder %v3923_v23, 0.0  ;;  %vm3928_vm7 = vcmp.ge.f32.partialorder %v3924_v29, 0.0  ;;  %v3931_v27 = vmul.f32 0.2, %v3923_v23  ;;  %v3932_v53 = vmul.f32 0.2, %v3924_v29 }
 0xd9e   : > { %v3937_v28 = vsel %vm3929_vm13, %v3925_v18, %v3933_v7  ;;  %v3938_v51 = vsel %vm3930_vm3, %v3926_v16, %v3934_v42  ;;  %vm5300_vm13 = vcmask 31744  }
 0xd9f   : > { %v3935_v5 = vsel %vm3927_vm4, %v3923_v23, %v3931_v27  ;;  %v3936_v17 = vsel %vm3928_vm7, %v3924_v29, %v3932_v53  ;;  %v10016_v4 = vpack.i.bf16 %v3938_v51, %v3937_v28  ;;  %vm8112_vm7 = vmneg %vm375_vm0 }
 0xda0   : > { %v10011_v19 = vpack.i.bf16 %v3936_v17, %v3935_v5  ;;  %v7939_v5 = vld [vmem:[%s13818_s3 + $0x288] sm:$0xff]  ;;  %v7941_v17 = vld [vmem:[%s13818_s3 + $0x298] sm:$0xff] }
 0xda1   : > { %10017 = vrot.lane.b32.xlu1 %v10016_v4, %s10041_s28  ;;  %v7938_v4 = vld [vmem:[%s13818_s3 + $0x280] sm:$0xff] }
 0xda2   : > { %10012 = vrot.lane.b32.xlu0 %v10011_v19, %s10041_s28  ;;  %v7940_v19 = vld [vmem:[%s13818_s3 + $0x290] sm:$0xff] }
 0xda5   : > { %3967 = vrot.lane.b32.xlu1 %v10115_v22, %s10051_s16 }
 0xda6   : > { %3965 = vrot.lane.b32.xlu0 %v10110_v21, %s10051_s16  ;;  %s10054_s16 = smov 6  }
 0xda9   : > { %4396 = vrot.lane.b32.xlu1 %v10149_v36, %s10052_s15 }
 0xdaa   : > { %4153 = vrot.lane.b32.xlu0 %v10139_v31, %s10052_s15 }
 0xdae   : > { %4920 = vrot.lane.b32.xlu0 %v10159_v39, %s10052_s15 }
 0xe13   : > { %v10018_v38 = vpop.permute.xlu1 %10017 }
 0xe14   : > { %v10020_v46 = vunpack.i.h.bf16 %v10018_v38  ;;  %v10019_v3 = vunpack.i.l.bf16 %v10018_v38  ;;  %v10013_v13 = vpop.permute.xlu0 %10012  ;;  %v7943_v38 = vld [vmem:[%s13818_s3 + $0x2a8] sm:$0xff] }
 0xe15   : > { %v10015_v37 = vunpack.i.h.bf16 %v10013_v13  ;;  %v10014_v33 = vunpack.i.l.bf16 %v10013_v13  ;;  %v9278_v13 = vpack.c.bf16 %v7940_v19, %v7938_v4  ;;  %v7974_v4 = vld [vmem:[%s13818_s3 + $0x3a0] sm:$0xff]  ;;  %v7976_v19 = vld [vmem:[%s13818_s3 + $0x3b0] sm:$0xff] }
 0xe16   : > { %v3952_v41 = vsel %vm327_vm15, %v10019_v3, %v10020_v46 }
 0xe17   : > { %v3951_v12 = vsel %vm327_vm15, %v10014_v33, %v10015_v37  ;;  %v9255_v49 = vpack.c.bf16 %v10019_v3, %v10014_v33  ;;  %v3968_v57 = vpop.permute.xlu1 %3967  ;;  %v9259_v61 = vpack.c.bf16 %v10020_v46, %v10015_v37  ;;  %vm4151_vm15 = vcmask 80896   ;;  %v7945_v46 = vld [vmem:[%s13818_s3 + $0x2b8] sm:$0xff]  ;;  %v7942_v33 = vld [vmem:[%s13818_s3 + $0x2a0] sm:$0xff] }
 0xe18   : > { %v9253_v34 = vpack.c.bf16 %v3952_v41, %v3951_v12  ;;  %v3966_v35 = vpop.permute.xlu0 %3965  ;;  %v3972_v59 = vsel %vm3493_vm12, 0.0, %v3968_v57  ;;  %v4152_v15 = vsel %vm4151_vm15, %v10139_v31, 0.0  ;;  %v4919_v56 = vsel %vm4151_vm15, %v10159_v39, 0.0  ;;  %v7944_v41 = vld [vmem:[%s13818_s3 + $0x2b0] sm:$0xff]  ;;  %v7947_v12 = vld [vmem:[%s13818_s3 + $0x2c8] sm:$0xff]  ;;  %v7953_v57 = vld [vmem:[%s13818_s3 + $0x2f8] sm:$0xff] }
 0xe19   : > { %v3971_v50 = vsel %vm3493_vm12, 0.0, %v3966_v35  ;;  %v3976_v40 = vrot.slane %v3972_v59, 6  ;;  %v4395_v28 = vsel %vm4151_vm15, %v10149_v36, 0.0  ;;  %v9276_v3 = vpack.c.bf16 %v7941_v17, %v7939_v5  ;;  %v7950_v59 = vld [vmem:[%s13818_s3 + $0x2e0] sm:$0xff] }
 0xe1a   : > { %9254 = vmatprep.subr.bf16.mxu0 %v9253_v34  ;;  %v3975_v52 = vrot.slane %v3971_v50, 6  ;;  %v9280_v37 = vpack.c.bf16 %v7945_v46, %v7943_v38  ;;  %v7949_v34 = vld [vmem:[%s13818_s3 + $0x2d8] sm:$0xff]  ;;  %v9282_v35 = vpack.c.bf16 %v7944_v41, %v7942_v33  ;;  %v7946_v50 = vld [vmem:[%s13818_s3 + $0x2c0] sm:$0xff]  ;;  %v7979_v38 = vld [vmem:[%s13818_s3 + $0x3c8] sm:$0xff] }
 0xe1b   : > { %9257 = vmatpush1.bf16.msk.msra.mxu0 %vm9256_vm6, %v9255_v49  ;;  %v4397_v29 = vpop.permute.xlu1 %4396  ;;  %v9284_v49 = vpack.c.bf16 %v7949_v34, %v7947_v12  ;;  %v7981_v46 = vld [vmem:[%s13818_s3 + $0x3d8] sm:$0xff]  ;;  %v7980_v33 = vld [vmem:[%s13818_s3 + $0x3d0] sm:$0xff]  ;;  %v7983_v41 = vld [vmem:[%s13818_s3 + $0x3e8] sm:$0xff]  ;;  %vm5834_vm6 = vcmask 48128  }
 0xe1c   : > { %9258 = vmatprep.subr.bf16.mxu0 %v10037_v1  ;;  %v3979_v60 = vsel %vm363_vm1, %v3964_v58, %v3975_v52  ;;  %v3977_v11 = vsel %vm363_vm1, %v3975_v52, %v3976_v40  ;;  %v4154_v22 = vpop.permute.xlu0 %4153  ;;  %v4399_v42 = vsel %vm4151_vm15, 0.0, %v4397_v29  ;;  %v7948_v52 = vld [vmem:[%s13818_s3 + $0x2d0] sm:$0xff]  ;;  %v7955_v40 = vld [vmem:[%s13818_s3 + $0x308] sm:$0xff]  ;;  %v7973_v29 = vld [vmem:[%s13818_s3 + $0x398] sm:$0xff] }
 0xe1d   : > { %v4156_v24 = vsel %vm4151_vm15, 0.0, %v4154_v22  ;;  %v4401_v53 = vrot.slane %v4399_v42, 4  ;;  %v9286_v58 = vpack.c.bf16 %v7948_v52, %v7946_v50  ;;  %v7985_v12 = vld [vmem:[%s13818_s3 + $0x3f8] sm:$0xff]  ;;  %v7984_v50 = vld [vmem:[%s13818_s3 + $0x3f0] sm:$0xff]  ;;  %v7987_v52 = vld [vmem:[%s13818_s3 + $0x408] sm:$0xff] }
 0xe1e   : > { %7920 = vmatmul.mubr.msk.f32.vlgmr.msra.gmra.mrb[62].mxu0 %vm1271_vm8, %v3963_v55  ;;  %v4158_v8 = vrot.slane %v4156_v24, 4 }
 0xe1f   : > { %9261 = vmatpush3.bf16.msk.msra.mxu0 %vm9260_vm10, %v9259_v61  ;;  %4058 = vmatprep.mubr.f32.mxu0 %v10039_v20  ;;  %v4403_v51 = vsel %vm541_vm5, %v4395_v28, %v4401_v53  ;;  %v7972_v53 = vld [vmem:[%s13818_s3 + $0x390] sm:$0xff]  ;;  %v7975_v28 = vld [vmem:[%s13818_s3 + $0x3a8] sm:$0xff] }
 0xe20   : > { %v4921_v44 = vpop.permute.xlu0 %4920  ;;  %v4160_v32 = vsel %vm541_vm5, %v4152_v15, %v4158_v8  ;;  %v7965_v8 = vld [vmem:[%s13818_s3 + $0x358] sm:$0xff]  ;;  %v7962_v15 = vld [vmem:[%s13818_s3 + $0x340] sm:$0xff] }
 0xe21   : > { %v4923_v43 = vsel %vm4151_vm15, 0.0, %v4921_v44  ;;  %v7956_v44 = vld [vmem:[%s13818_s3 + $0x310] sm:$0xff]  ;;  %vm7538_vm15 = vcmask 11264  }
 0xe22   : > { %7921 = vmatmul.mubr.msk.f32.gmra.mrb[64].mxu0 %vm1271_vm8, %v3979_v60  ;;  %v4925_v9 = vrot.slane %v4923_v43, 4  ;;  %v7958_v43 = vld [vmem:[%s13818_s3 + $0x320] sm:$0xff] }
 0xe23   : > { %4064 = vmatprep.mubr.f32.mxu0 %v10039_v20 }
 0xe24   : > { %v4927_v25 = vsel %vm541_vm5, %v4919_v56, %v4925_v9  ;;  %v7964_v56 = vld [vmem:[%s13818_s3 + $0x350] sm:$0xff] }
 0xe26   : > { %7922 = vmatmul.mubr.msk.f32.gmra.mrb[66].mxu0 %vm1271_vm8, %v3977_v11 }
 0xe27   : > { %8724 = vmatprep.mubr.msk.f32.mxu0 %vm10040_vm2, %v10039_v20 }
 0xe2a   : > { %8725 = vmatmul.mubr.msk.f32.vlgmr.msra.gmra.mrb[68].mxu0 %vm1271_vm8, %v3963_v55  ;;  %v7951_v55 = vld [vmem:[%s13818_s3 + $0x2e8] sm:$0xff] }
 0xe2b   : > { %8727 = vmatprep.mubr.msk.f32.mxu0 %vm10040_vm2, %v10039_v20  ;;  %v9288_v61 = vpack.c.bf16 %v7953_v57, %v7951_v55  ;;  %v7989_v55 = vld [vmem:[%s13818_s3 + $0x418] sm:$0xff] }
 0xe2e   : > { %8728 = vmatmul.mubr.msk.f32.gmra.mrb[70].mxu0 %vm1271_vm8, %v3979_v60  ;;  %v7952_v60 = vld [vmem:[%s13818_s3 + $0x2f0] sm:$0xff] }
 0xe2f   : > { %8730 = vmatprep.mubr.msk.f32.mxu0 %vm10040_vm2, %v10039_v20  ;;  %v9290_v22 = vpack.c.bf16 %v7952_v60, %v7950_v59  ;;  %v7988_v59 = vld [vmem:[%s13818_s3 + $0x410] sm:$0xff]  ;;  %v7991_v60 = vld [vmem:[%s13818_s3 + $0x428] sm:$0xff] }
 0xe32   : > { %8731 = vmatmul.mubr.msk.f32.gmra.mrb[72].mxu0 %vm1271_vm8, %v3977_v11  ;;  %vm4161_vm8 = vcmask 162816   ;;  %v7957_v11 = vld [vmem:[%s13818_s3 + $0x318] sm:$0xff] }
 0xe33   : > { %4238 = vmatprep.mubr.f32.mxu0 %v10039_v20 }
 0xef1   : > { %v4054_v62 = vpop.f32.mrb[62].mxu0 }
 0xef2   : > { %v4056_v63 = vpop.f32.mrb[63].mxu0 }
 0xef5   : > { %v4060_v47 = vpop.f32.mrb[64].mxu0 }
 0xef6   : > { %v9264_v48 = vpack.c.bf16 %v4060_v47, %v4054_v62  ;;  %v4062_v45 = vpop.f32.mrb[65].mxu0  ;;  %v9292_v62 = vpack.c.bf16 %v7957_v11, %v7955_v40  ;;  %v7959_v47 = vld [vmem:[%s13818_s3 + $0x328] sm:$0xff]  ;;  %v7993_v40 = vld [vmem:[%s13818_s3 + $0x438] sm:$0xff] }
 0xef7   : > { %v9262_v0 = vpack.c.bf16 %v4062_v45, %v4056_v63  ;;  %v7954_v63 = vld [vmem:[%s13818_s3 + $0x300] sm:$0xff] }
 0xef8   : > { %v9294_v45 = vpack.c.bf16 %v7956_v44, %v7954_v63  ;;  %v7992_v63 = vld [vmem:[%s13818_s3 + $0x430] sm:$0xff] }
 0xef9   : > { %v4066_v2 = vpop.f32.mrb[66].mxu0  ;;  %9263 = vmatprep.subr.bf16.mxu0 %v9262_v0  ;;  %9437 = vmatprep.subr.bf16.mxu1 %v9262_v0 }
 0xefa   : > { %v4068_v10 = vpop.f32.mrb[67].mxu0  ;;  %9265 = vmatpush1.bf16.msra.mxu0 %v9264_v48  ;;  %9439 = vmatpush1.bf16.msra.mxu1 %v9264_v48 }
 0xefb   : > { %7928 = vmatprep.subr.msk.mxu0 %vm541_vm5, %v4068_v10  ;;  %8020 = vmatprep.subr.msk.mxu1 %vm541_vm5, %v4068_v10 }
 0xefd   : > { %v4137_v30 = vpop.f32.mrb[68].mxu0 }
 0xefe   : > { %7929 = vmatpush1.msk.msra.mxu0 %vm541_vm5, %v4066_v2  ;;  %8021 = vmatpush1.msk.msra.mxu1 %vm541_vm5, %v4066_v2  ;;  %v8726_v18 = vpop.f32.mrb[69].mxu0 }
 0xeff   : > { %9266 = vmatprep.subr.bf16.mxu0 %v10037_v1  ;;  %9440 = vmatprep.subr.bf16.mxu1 %v10037_v1 }
 0xf00   : > { %7930 = vmatmul.mubr.msk.f32.vlgmr.msra.gmra.mrb[74].mxu0 %vm4161_vm8, %v4160_v32  ;;  %8022 = vmatmul.mubr.msk.f32.vlgmr.msra.gmra.mrb[42].mxu1 %vm4161_vm8, %v4927_v25 }
 0xf01   : > { %v4142_v16 = vpop.f32.mrb[70].mxu0  ;;  %8739 = vmatprep.mubr.msk.f32.mxu0 %vm10040_vm2, %v10039_v20  ;;  %8757 = vmatprep.mubr.msk.f32.mxu1 %vm10040_vm2, %v10039_v20 }
 0xf02   : > { %v9267_v6 = vpack.c.bf16 %v4142_v16, %v4137_v30  ;;  %v8729_v23 = vpop.f32.mrb[71].mxu0  ;;  %v9302_v30 = vpack.c.bf16 %v7964_v56, %v7962_v15  ;;  %v7966_v16 = vld [vmem:[%s13818_s3 + $0x360] sm:$0xff]  ;;  %v8000_v15 = vld [vmem:[%s13818_s3 + $0x470] sm:$0xff] }
 0xf03   : > { %v7971_v23 = vld [vmem:[%s13818_s3 + $0x388] sm:$0xff] }
 0xf04   : > { %9268 = vmatpush3.bf16.msra.mxu0 %v9267_v6  ;;  %9442 = vmatpush3.bf16.msra.mxu1 %v9267_v6  ;;  %v9308_v42 = vpack.c.bf16 %v7973_v29, %v7971_v23  ;;  %v8002_v29 = vld [vmem:[%s13818_s3 + $0x480] sm:$0xff] }
 0xf05   : > { %v4147_v7 = vpop.f32.mrb[72].mxu0  ;;  %8737 = vmatprep.subr.mxu0 %v10039_v20  ;;  %8755 = vmatprep.subr.mxu1 %v10039_v20 }
 0xf06   : > { %v8732_v27 = vpop.f32.mrb[73].mxu0 }
 0xf07   : > { %v7970_v27 = vld [vmem:[%s13818_s3 + $0x380] sm:$0xff] }
 0xf08   : > { %8738 = vmatpush3.msk.msra.mxu0 %vm541_vm5, %v4147_v7  ;;  %8756 = vmatpush3.msk.msra.mxu1 %vm541_vm5, %v4147_v7  ;;  %v9310_v5 = vpack.c.bf16 %v7972_v53, %v7970_v27  ;;  %v8009_v27 = vld [vmem:[%s13818_s3 + $0x4b8] sm:$0xff] }
 0xf09   : > { %8740 = vmatmul.mubr.msk.f32.vlgmr.msra.gmra.mrb[76].mxu0 %vm4161_vm8, %v4160_v32  ;;  %9270 = vmatprep.subr.bf16.mxu0 %v9262_v0  ;;  %v7960_v0 = vld [vmem:[%s13818_s3 + $0x330] sm:$0xff]  ;;  %v7967_v32 = vld [vmem:[%s13818_s3 + $0x368] sm:$0xff] }
 0xf0a   : > { %9272 = vmatpush1.bf16.msra.mxu0 %v9264_v48  ;;  %4471 = vmatprep.mubr.f32.mxu0 %v10039_v20  ;;  %v7961_v48 = vld [vmem:[%s13818_s3 + $0x338] sm:$0xff]  ;;  %v9298_v9 = vpack.c.bf16 %v7960_v0, %v7958_v43  ;;  %v7996_v43 = vld [vmem:[%s13818_s3 + $0x450] sm:$0xff] }
 0xf0b   : > { %7933 = vmatprep.subr.msk.mxu0 %vm541_vm5, %v4068_v10  ;;  %8758 = vmatmul.mubr.msk.f32.vlgmr.msra.gmra.mrb[44].mxu1 %vm4161_vm8, %v4927_v25  ;;  %v9296_v24 = vpack.c.bf16 %v7961_v48, %v7959_v47  ;;  %v7969_v25 = vld [vmem:[%s13818_s3 + $0x378] sm:$0xff]  ;;  %v7995_v47 = vld [vmem:[%s13818_s3 + $0x448] sm:$0xff] }
 0xf0c   : > { %5377 = vmatprep.mubr.f32.mxu1 %v10039_v20  ;;  %v9304_v18 = vpack.c.bf16 %v7969_v25, %v7967_v32  ;;  %v7997_v48 = vld [vmem:[%s13818_s3 + $0x458] sm:$0xff]  ;;  %v8003_v32 = vld [vmem:[%s13818_s3 + $0x488] sm:$0xff] }
 0xf0d   : > { %v8005_v25 = vld [vmem:[%s13818_s3 + $0x498] sm:$0xff] }
 0xf0e   : > { %7934 = vmatpush1.msk.msra.mxu0 %vm541_vm5, %v4066_v2  ;;  %v7963_v2 = vld [vmem:[%s13818_s3 + $0x348] sm:$0xff] }
 0xf0f   : > { %7935 = vmatmul.mubr.msk.f32.vlgmr.msra.gmra.mrb[78].mxu0 %vm4161_vm8, %v4403_v51  ;;  %9273 = vmatprep.subr.bf16.mxu0 %v10037_v1  ;;  %v9300_v10 = vpack.c.bf16 %v7965_v8, %v7963_v2  ;;  %v7999_v2 = vld [vmem:[%s13818_s3 + $0x468] sm:$0xff]  ;;  %v8001_v8 = vld [vmem:[%s13818_s3 + $0x478] sm:$0xff] }
 0xf10   : > { %9275 = vmatpush3.bf16.msra.mxu0 %v9267_v6  ;;  %8748 = vmatprep.mubr.msk.f32.mxu0 %vm10040_vm2, %v10039_v20  ;;  %v7968_v6 = vld [vmem:[%s13818_s3 + $0x370] sm:$0xff] }
 0xf11   : > { %8746 = vmatprep.subr.mxu0 %v10039_v20 }
 0xf14   : > { %8747 = vmatpush3.msk.msra.mxu0 %vm541_vm5, %v4147_v7  ;;  %v9306_v7 = vpack.c.bf16 %v7968_v6, %v7966_v16 }
 0xf15   : > { %8749 = vmatmul.mubr.msk.f32.vlgmr.msra.gmra.mrb[80].mxu0 %vm4161_vm8, %v4403_v51  ;;  %9277 = vmatprep.subr.bf16.mxu0 %v9276_v3  ;;  %v7977_v51 = vld [vmem:[%s13818_s3 + $0x3b8] sm:$0xff]  ;;  %v9314_v3 = vpack.c.bf16 %v7976_v19, %v7974_v4  ;;  %v8008_v4 = vld [vmem:[%s13818_s3 + $0x4b0] sm:$0xff]  ;;  %v8011_v19 = vld [vmem:[%s13818_s3 + $0x4c8] sm:$0xff] }
 0xf16   : > { %9279 = vmatpush1.bf16.msra.mxu0 %v9278_v13  ;;  %v9312_v17 = vpack.c.bf16 %v7977_v51, %v7975_v28  ;;  %v9316_v13 = vpack.c.bf16 %v7981_v46, %v7979_v38  ;;  %v8013_v38 = vld [vmem:[%s13818_s3 + $0x4d8] sm:$0xff] }
 0xf17   : > { %9281 = vmatprep.subr.bf16.mxu0 %v9280_v37  ;;  %v7978_v37 = vld [vmem:[%s13818_s3 + $0x3c0] sm:$0xff] }
 0xf18   : > { %v9318_v34 = vpack.c.bf16 %v7980_v33, %v7978_v37  ;;  %v8012_v37 = vld [vmem:[%s13818_s3 + $0x4d0] sm:$0xff] }
 0xf1a   : > { %9283 = vmatpush1.bf16.msra.mxu0 %v9282_v35  ;;  %v9320_v35 = vpack.c.bf16 %v7985_v12, %v7983_v41  ;;  %v8015_v41 = vld [vmem:[%s13818_s3 + $0x4e8] sm:$0xff]  ;;  %v8017_v12 = vld [vmem:[%s13818_s3 + $0x4f8] sm:$0xff] }
 0xf1b   : > { %9285 = vmatprep.subr.bf16.mxu0 %v9284_v49  ;;  %v7982_v49 = vld [vmem:[%s13818_s3 + $0x3e0] sm:$0xff] }
 0xf1c   : > { %v9322_v57 = vpack.c.bf16 %v7984_v50, %v7982_v49  ;;  %v9352_v49 = vpack.c.bf16 %v8017_v12, %v8015_v41  ;;  %v8014_v50 = vld [vmem:[%s13818_s3 + $0x4e0] sm:$0xff]  ;;  %v4344_v41 = vld [vmem:[%s13818_s3 + $0xe8] sm:$0xff]  ;;  %v4346_v12 = vld [vmem:[%s13818_s3 + $0xf8] sm:$0xff] }
 0xf1e   : > { %9287 = vmatpush1.bf16.msra.mxu0 %v9286_v58  ;;  %v9324_v58 = vpack.c.bf16 %v7989_v55, %v7987_v52  ;;  %v8016_v52 = vld [vmem:[%s13818_s3 + $0x4f0] sm:$0xff]  ;;  %v4316_v55 = vld [vmem:[%s13818_s3 + $0x8] sm:$0xff] }
 0xf1f   : > { %9289 = vmatprep.subr.bf16.mxu0 %v9288_v61  ;;  %v7986_v61 = vld [vmem:[%s13818_s3 + $0x400] sm:$0xff] }
 0xf20   : > { %v9326_v11 = vpack.c.bf16 %v7988_v59, %v7986_v61  ;;  %v4315_v59 = vld [vmem:[%s13818_s3] sm:$0xff] }
 0xf22   : > { %9291 = vmatpush1.bf16.msra.mxu0 %v9290_v22  ;;  %v9328_v22 = vpack.c.bf16 %v7993_v40, %v7991_v60  ;;  %v4317_v60 = vld [vmem:[%s13818_s3 + $0x10] sm:$0xff]  ;;  %v4320_v40 = vld [vmem:[%s13818_s3 + $0x28] sm:$0xff] }
 0xf23   : > { %9293 = vmatprep.subr.bf16.mxu0 %v9292_v62  ;;  %v7990_v62 = vld [vmem:[%s13818_s3 + $0x420] sm:$0xff] }
 0xf24   : > { %v9330_v44 = vpack.c.bf16 %v7992_v63, %v7990_v62  ;;  %v4319_v63 = vld [vmem:[%s13818_s3 + $0x20] sm:$0xff] }
 0xf26   : > { %9295 = vmatpush1.bf16.msra.mxu0 %v9294_v45  ;;  %v9332_v45 = vpack.c.bf16 %v7997_v48, %v7995_v47  ;;  %v4324_v47 = vld [vmem:[%s13818_s3 + $0x48] sm:$0xff]  ;;  %v4326_v48 = vld [vmem:[%s13818_s3 + $0x58] sm:$0xff] }
 0xf27   : > { %9297 = vmatprep.subr.bf16.mxu0 %v9296_v24  ;;  %v7994_v24 = vld [vmem:[%s13818_s3 + $0x440] sm:$0xff] }
 0xf28   : > { %v9334_v0 = vpack.c.bf16 %v7996_v43, %v7994_v24  ;;  %v9364_v24 = vpack.c.bf16 %v4326_v48, %v4324_v47  ;;  %v4323_v43 = vld [vmem:[%s13818_s3 + $0x40] sm:$0xff]  ;;  %v4358_v47 = vld [vmem:[%s13818_s3 + $0x158] sm:$0xff] }
 0xf2a   : > { %9299 = vmatpush1.bf16.msra.mxu0 %v9298_v9  ;;  %v7998_v9 = vld [vmem:[%s13818_s3 + $0x460] sm:$0xff] }
 0xf2b   : > { %9301 = vmatprep.subr.bf16.mxu0 %v9300_v10  ;;  %v9336_v10 = vpack.c.bf16 %v8001_v8, %v7999_v2  ;;  %v9338_v56 = vpack.c.bf16 %v8000_v15, %v7998_v9  ;;  %v4328_v2 = vld [vmem:[%s13818_s3 + $0x68] sm:$0xff]  ;;  %v4330_v8 = vld [vmem:[%s13818_s3 + $0x78] sm:$0xff]  ;;  %v4327_v15 = vld [vmem:[%s13818_s3 + $0x60] sm:$0xff] }
 0xf2e   : > { %9303 = vmatpush1.bf16.msra.mxu0 %v9302_v30  ;;  %v9340_v30 = vpack.c.bf16 %v8005_v25, %v8003_v32  ;;  %v4332_v32 = vld [vmem:[%s13818_s3 + $0x88] sm:$0xff]  ;;  %v4334_v25 = vld [vmem:[%s13818_s3 + $0x98] sm:$0xff] }
 0xf2f   : > { %9305 = vmatprep.subr.bf16.mxu0 %v9304_v18 }
 0xf32   : > { %9307 = vmatpush1.bf16.msra.mxu0 %v9306_v7  ;;  %v8004_v7 = vld [vmem:[%s13818_s3 + $0x490] sm:$0xff] }
 0xf33   : > { %9309 = vmatprep.subr.bf16.mxu0 %v9308_v42  ;;  %v8007_v42 = vld [vmem:[%s13818_s3 + $0x4a8] sm:$0xff]  ;;  %v9342_v28 = vpack.c.bf16 %v8004_v7, %v8002_v29  ;;  %v4333_v29 = vld [vmem:[%s13818_s3 + $0x90] sm:$0xff] }
 0xf34   : > { %v4336_v7 = vld [vmem:[%s13818_s3 + $0xa8] sm:$0xff] }
 0xf36   : > { %9311 = vmatpush1.bf16.msra.mxu0 %v9310_v5  ;;  %v9344_v5 = vpack.c.bf16 %v8009_v27, %v8007_v42  ;;  %v4338_v42 = vld [vmem:[%s13818_s3 + $0xb8] sm:$0xff] }
 0xf37   : > { %9313 = vmatprep.subr.bf16.mxu0 %v9312_v17  ;;  %v8006_v17 = vld [vmem:[%s13818_s3 + $0x4a0] sm:$0xff] }
 0xf38   : > { %v9346_v46 = vpack.c.bf16 %v8008_v4, %v8006_v17  ;;  %v4335_v17 = vld [vmem:[%s13818_s3 + $0xa0] sm:$0xff]  ;;  %v4337_v4 = vld [vmem:[%s13818_s3 + $0xb0] sm:$0xff] }
 0xf3a   : > { %9315 = vmatpush1.bf16.msra.mxu0 %v9314_v3  ;;  %v9348_v3 = vpack.c.bf16 %v8013_v38, %v8011_v19  ;;  %v4340_v38 = vld [vmem:[%s13818_s3 + $0xc8] sm:$0xff] }
 0xf3b   : > { %9317 = vmatprep.subr.bf16.mxu0 %v9316_v13  ;;  %v8010_v13 = vld [vmem:[%s13818_s3 + $0x4c0] sm:$0xff] }
 0xf3e   : > { %9319 = vmatpush1.bf16.msra.mxu0 %v9318_v34 }
 0xf3f   : > { %9321 = vmatprep.subr.bf16.mxu0 %v9320_v35  ;;  %v9350_v35 = vpack.c.bf16 %v8012_v37, %v8010_v13  ;;  %v4339_v37 = vld [vmem:[%s13818_s3 + $0xc0] sm:$0xff] }
 0xf42   : > { %9323 = vmatpush1.bf16.msra.mxu0 %v9322_v57  ;;  %v4318_v57 = vld [vmem:[%s13818_s3 + $0x18] sm:$0xff] }
 0xf43   : > { %9325 = vmatprep.subr.bf16.mxu0 %v9324_v58  ;;  %v9354_v58 = vpack.c.bf16 %v8016_v52, %v8014_v50  ;;  %v9356_v61 = vpack.c.bf16 %v4318_v57, %v4316_v55  ;;  %v4345_v50 = vld [vmem:[%s13818_s3 + $0xf0] sm:$0xff]  ;;  %v4348_v52 = vld [vmem:[%s13818_s3 + $0x108] sm:$0xff]  ;;  %v4350_v55 = vld [vmem:[%s13818_s3 + $0x118] sm:$0xff] }
 0xf46   : > { %9327 = vmatpush1.bf16.msra.mxu0 %v9326_v11  ;;  %v4322_v11 = vld [vmem:[%s13818_s3 + $0x38] sm:$0xff] }
 0xf47   : > { %9329 = vmatprep.subr.bf16.mxu0 %v9328_v22  ;;  %v9358_v22 = vpack.c.bf16 %v4317_v60, %v4315_v59  ;;  %v9360_v62 = vpack.c.bf16 %v4322_v11, %v4320_v40  ;;  %v4349_v59 = vld [vmem:[%s13818_s3 + $0x110] sm:$0xff]  ;;  %v4352_v60 = vld [vmem:[%s13818_s3 + $0x128] sm:$0xff]  ;;  %v4354_v40 = vld [vmem:[%s13818_s3 + $0x138] sm:$0xff] }
 0xf4a   : > { %9331 = vmatpush1.bf16.msra.mxu0 %v9330_v44  ;;  %v4321_v44 = vld [vmem:[%s13818_s3 + $0x30] sm:$0xff] }
 0xf4b   : > { %9333 = vmatprep.subr.bf16.mxu0 %v9332_v45  ;;  %v9362_v45 = vpack.c.bf16 %v4321_v44, %v4319_v63  ;;  %v4353_v63 = vld [vmem:[%s13818_s3 + $0x130] sm:$0xff]  ;;  %v4356_v44 = vld [vmem:[%s13818_s3 + $0x148] sm:$0xff] }
 0xf4e   : > { %9335 = vmatpush1.bf16.msra.mxu0 %v9334_v0  ;;  %v4325_v0 = vld [vmem:[%s13818_s3 + $0x50] sm:$0xff] }
 0xf4f   : > { %9337 = vmatprep.subr.bf16.mxu0 %v9336_v10  ;;  %v9366_v9 = vpack.c.bf16 %v4325_v0, %v4323_v43  ;;  %v9368_v10 = vpack.c.bf16 %v4330_v8, %v4328_v2  ;;  %v4357_v43 = vld [vmem:[%s13818_s3 + $0x150] sm:$0xff]  ;;  %v4360_v0 = vld [vmem:[%s13818_s3 + $0x168] sm:$0xff]  ;;  %v4362_v2 = vld [vmem:[%s13818_s3 + $0x178] sm:$0xff] }
 0xf52   : > { %9339 = vmatpush1.bf16.msra.mxu0 %v9338_v56  ;;  %v4329_v56 = vld [vmem:[%s13818_s3 + $0x70] sm:$0xff] }
 0xf53   : > { %9341 = vmatprep.subr.bf16.mxu0 %v9340_v30  ;;  %v9370_v30 = vpack.c.bf16 %v4329_v56, %v4327_v15  ;;  %v4361_v15 = vld [vmem:[%s13818_s3 + $0x170] sm:$0xff]  ;;  %v4364_v56 = vld [vmem:[%s13818_s3 + $0x188] sm:$0xff] }
 0xfd3   : > { %v12120_v18 = vpop.f32.mrb[74].mxu0  ;;  %v12234_v27 = vpop.f32.mrb[42].mxu1 }
 0xfd4   : > { %v4242_v16 = vpop.f32.mrb[75].mxu0 }
 0xfdc   : > { %v12122_v6 = vpop.f32.mrb[76].mxu0 }
 0xfdd   : > { %v8741_v23 = vpop.f32.mrb[77].mxu0 }
 0xfde   : > { %v4331_v23 = vld [vmem:[%s13818_s3 + $0x80] sm:$0xff] }
 0xfe2   : > { %v4473_v53 = vpop.f32.mrb[78].mxu0 }
 0xfe3   : > { %v4475_v51 = vpop.f32.mrb[79].mxu0 }
 0xfe4   : > { %4696 = vmatprep.mubr.f32.mxu0 %v4475_v51 }
 0xfe5   : > { %4697 = vmatmul.mubr.f32.vlgmr.msra.gmra.mrb[82].mxu0 %v4473_v53  ;;  %v12236_v53 = vpop.f32.mrb[43].mxu1 }
 0xfe6   : > { %9343 = vmatpush1.bf16.msra.mxu0 %v9342_v28  ;;  %4767 = vmatprep.mubr.f32.mxu0 %v10039_v20  ;;  %v9374_v28 = vpack.c.bf16 %v4333_v29, %v4331_v23  ;;  %v12238_v51 = vpop.f32.mrb[44].mxu1  ;;  %v4365_v23 = vld [vmem:[%s13818_s3 + $0x190] sm:$0xff]  ;;  %v4368_v29 = vld [vmem:[%s13818_s3 + $0x1a8] sm:$0xff] }
 0xfe7   : > { %9345 = vmatprep.subr.bf16.mxu0 %v9344_v5  ;;  %v9376_v5 = vpack.c.bf16 %v4338_v42, %v4336_v7  ;;  %v8759_v19 = vpop.f32.mrb[45].mxu1  ;;  %v4370_v7 = vld [vmem:[%s13818_s3 + $0x1b8] sm:$0xff] }
 0xfe8   : > { %v4544_v33 = vpop.f32.mrb[80].mxu0  ;;  %v4374_v19 = vld [vmem:[%s13818_s3 + $0x1d8] sm:$0xff] }
 0xfe9   : > { %v8750_v34 = vpop.f32.mrb[81].mxu0 }
 0xfea   : > { %9347 = vmatpush1.bf16.msra.mxu0 %v9346_v46  ;;  %v4342_v46 = vld [vmem:[%s13818_s3 + $0xd8] sm:$0xff] }
 0xfeb   : > { %9349 = vmatprep.subr.bf16.mxu0 %v9348_v3  ;;  %v9378_v3 = vpack.c.bf16 %v4337_v4, %v4335_v17  ;;  %v9380_v13 = vpack.c.bf16 %v4342_v46, %v4340_v38  ;;  %v4369_v17 = vld [vmem:[%s13818_s3 + $0x1b0] sm:$0xff]  ;;  %v4372_v4 = vld [vmem:[%s13818_s3 + $0x1c8] sm:$0xff] }
 0xfec   : > { %v9412_v46 = vpack.c.bf16 %v4374_v19, %v4372_v4  ;;  %v8033_v19 = vld [vmem:[%s13818_s3 + $0x540] sm:$0xff] }
 0xfee   : > { %9351 = vmatpush1.bf16.msra.mxu0 %v9350_v35  ;;  %v9384_v35 = vpack.c.bf16 %v4346_v12, %v4344_v41 }
 0xfef   : > { %9353 = vmatprep.subr.bf16.mxu0 %v9352_v49  ;;  %v4343_v49 = vld [vmem:[%s13818_s3 + $0xe0] sm:$0xff] }
 0xff0   : > { %v9386_v57 = vpack.c.bf16 %v4345_v50, %v4343_v49  ;;  %v4380_v49 = vld [vmem:[%s13818_s3 + $0x208] sm:$0xff]  ;;  %v4382_v50 = vld [vmem:[%s13818_s3 + $0x218] sm:$0xff] }
 0xff2   : > { %9355 = vmatpush1.bf16.msra.mxu0 %v9354_v58  ;;  %v9388_v58 = vpack.c.bf16 %v4350_v55, %v4348_v52  ;;  %v9420_v55 = vpack.c.bf16 %v4382_v50, %v4380_v49  ;;  %v8043_v49 = vld [vmem:[%s13818_s3 + $0x590] sm:$0xff]  ;;  %v8046_v50 = vld [vmem:[%s13818_s3 + $0x5a8] sm:$0xff] }
 0xff3   : > { %9357 = vmatprep.subr.bf16.mxu0 %v9356_v61  ;;  %v4347_v61 = vld [vmem:[%s13818_s3 + $0x100] sm:$0xff] }
 0xff4   : > { %v9390_v11 = vpack.c.bf16 %v4349_v59, %v4347_v61  ;;  %v4384_v61 = vld [vmem:[%s13818_s3 + $0x228] sm:$0xff]  ;;  %v4386_v59 = vld [vmem:[%s13818_s3 + $0x238] sm:$0xff] }
 0xff5   : > { %8018 = vmatmul.mubr.msk.f32.vlgmr.msra.gmra.mrb[82].mxu0 %vm375_vm0, %v4544_v33  ;;  %v4341_v33 = vld [vmem:[%s13818_s3 + $0xd0] sm:$0xff] }
 0xff6   : > { %9359 = vmatpush1.bf16.msra.mxu0 %v9358_v22  ;;  %4841 = vmatprep.mubr.f32.mxu0 %v4242_v16  ;;  %v9372_v16 = vpack.c.bf16 %v4334_v25, %v4332_v32  ;;  %v9382_v34 = vpack.c.bf16 %v4341_v33, %v4339_v37  ;;  %v9392_v22 = vpack.c.bf16 %v4354_v40, %v4352_v60  ;;  %v4366_v32 = vld [vmem:[%s13818_s3 + $0x198] sm:$0xff]  ;;  %v4376_v37 = vld [vmem:[%s13818_s3 + $0x1e8] sm:$0xff] }
 0xff7   : > { %9361 = vmatprep.subr.bf16.mxu0 %v9360_v62  ;;  %v4351_v62 = vld [vmem:[%s13818_s3 + $0x120] sm:$0xff]  ;;  %v4378_v33 = vld [vmem:[%s13818_s3 + $0x1f8] sm:$0xff]  ;;  %v9424_v40 = vpack.c.bf16 %v4386_v59, %v4384_v61  ;;  %v8047_v61 = vld [vmem:[%s13818_s3 + $0x5b0] sm:$0xff] }
 0xff8   : > { %v9394_v48 = vpack.c.bf16 %v4353_v63, %v4351_v62  ;;  %v9416_v12 = vpack.c.bf16 %v4378_v33, %v4376_v37  ;;  %v4388_v62 = vld [vmem:[%s13818_s3 + $0x248] sm:$0xff]  ;;  %v4390_v63 = vld [vmem:[%s13818_s3 + $0x258] sm:$0xff]  ;;  %v8039_v37 = vld [vmem:[%s13818_s3 + $0x570] sm:$0xff] }
 0xff9   : > { %v8042_v33 = vld [vmem:[%s13818_s3 + $0x588] sm:$0xff] }
 0xffa   : > { %9363 = vmatpush1.bf16.msra.mxu0 %v9362_v45  ;;  %v9396_v45 = vpack.c.bf16 %v4358_v47, %v4356_v44  ;;  %v9428_v47 = vpack.c.bf16 %v4390_v63, %v4388_v62  ;;  %v8050_v59 = vld [vmem:[%s13818_s3 + $0x5c8] sm:$0xff]  ;;  %v8051_v62 = vld [vmem:[%s13818_s3 + $0x5d0] sm:$0xff] }
 0xffb   : > { %9365 = vmatprep.subr.bf16.mxu0 %v9364_v24  ;;  %v4355_v24 = vld [vmem:[%s13818_s3 + $0x140] sm:$0xff]  ;;  %v8054_v63 = vld [vmem:[%s13818_s3 + $0x5e8] sm:$0xff] }
 0xffc   : > { %v9398_v8 = vpack.c.bf16 %v4357_v43, %v4355_v24  ;;  %v4392_v24 = vld [vmem:[%s13818_s3 + $0x268] sm:$0xff] }
 0xffe   : > { %9367 = vmatpush1.bf16.msra.mxu0 %v9366_v9  ;;  %v9400_v9 = vpack.c.bf16 %v4362_v2, %v4360_v0  ;;  %v4391_v2 = vld [vmem:[%s13818_s3 + $0x260] sm:$0xff] }
 0xfff   : > { %9369 = vmatprep.subr.bf16.mxu0 %v9368_v10  ;;  %v4359_v10 = vld [vmem:[%s13818_s3 + $0x160] sm:$0xff] }
0x1000   : > { %v9402_v25 = vpack.c.bf16 %v4361_v15, %v4359_v10  ;;  %v8028_v10 = vld [vmem:[%s13818_s3 + $0x518] sm:$0xff] }
0x1002   : > { %9371 = vmatpush1.bf16.msra.mxu0 %v9370_v30  ;;  %v9404_v30 = vpack.c.bf16 %v4366_v32, %v4364_v56  ;;  %v8025_v32 = vld [vmem:[%s13818_s3 + $0x500] sm:$0xff] }
0x1003   : > { %9373 = vmatprep.subr.bf16.mxu0 %v9372_v16  ;;  %v4363_v16 = vld [vmem:[%s13818_s3 + $0x180] sm:$0xff] }
0x1004   : > { %v9406_v42 = vpack.c.bf16 %v4365_v23, %v4363_v16  ;;  %v8032_v16 = vld [vmem:[%s13818_s3 + $0x538] sm:$0xff] }
0x1006   : > { %9375 = vmatpush1.bf16.msra.mxu0 %v9374_v28  ;;  %v9408_v28 = vpack.c.bf16 %v4370_v7, %v4368_v29  ;;  %v8029_v7 = vld [vmem:[%s13818_s3 + $0x520] sm:$0xff] }
0x1007   : > { %9377 = vmatprep.subr.bf16.mxu0 %v9376_v5  ;;  %v4367_v5 = vld [vmem:[%s13818_s3 + $0x1a0] sm:$0xff] }
0x1008   : > { %v9410_v38 = vpack.c.bf16 %v4369_v17, %v4367_v5  ;;  %v8036_v5 = vld [vmem:[%s13818_s3 + $0x558] sm:$0xff] }
0x100a   : > { %9379 = vmatpush1.bf16.msra.mxu0 %v9378_v3  ;;  %v4371_v3 = vld [vmem:[%s13818_s3 + $0x1c0] sm:$0xff] }
0x100b   : > { %9381 = vmatprep.subr.bf16.mxu0 %v9380_v13  ;;  %v4373_v13 = vld [vmem:[%s13818_s3 + $0x1d0] sm:$0xff] }
0x100c   : > { %v9414_v41 = vpack.c.bf16 %v4373_v13, %v4371_v3  ;;  %v8037_v13 = vld [vmem:[%s13818_s3 + $0x560] sm:$0xff] }
0x100e   : > { %9383 = vmatpush1.bf16.msra.mxu0 %v9382_v34  ;;  %v4375_v34 = vld [vmem:[%s13818_s3 + $0x1e0] sm:$0xff] }
0x100f   : > { %9385 = vmatprep.subr.bf16.mxu0 %v9384_v35  ;;  %v4377_v35 = vld [vmem:[%s13818_s3 + $0x1f0] sm:$0xff] }
0x1010   : > { %v9418_v52 = vpack.c.bf16 %v4377_v35, %v4375_v34  ;;  %v8041_v35 = vld [vmem:[%s13818_s3 + $0x580] sm:$0xff] }
0x1012   : > { %9387 = vmatpush1.bf16.msra.mxu0 %v9386_v57  ;;  %v4379_v57 = vld [vmem:[%s13818_s3 + $0x200] sm:$0xff] }
0x1013   : > { %9389 = vmatprep.subr.bf16.mxu0 %v9388_v58  ;;  %v4381_v58 = vld [vmem:[%s13818_s3 + $0x210] sm:$0xff] }
0x1014   : > { %v9422_v60 = vpack.c.bf16 %v4381_v58, %v4379_v57  ;;  %v8045_v58 = vld [vmem:[%s13818_s3 + $0x5a0] sm:$0xff] }
0x1016   : > { %9391 = vmatpush1.bf16.msra.mxu0 %v9390_v11  ;;  %v4383_v11 = vld [vmem:[%s13818_s3 + $0x220] sm:$0xff] }
0x1017   : > { %9393 = vmatprep.subr.bf16.mxu0 %v9392_v22  ;;  %v4385_v22 = vld [vmem:[%s13818_s3 + $0x230] sm:$0xff] }
0x1018   : > { %v9426_v44 = vpack.c.bf16 %v4385_v22, %v4383_v11  ;;  %v8049_v22 = vld [vmem:[%s13818_s3 + $0x5c0] sm:$0xff] }
0x101a   : > { %9395 = vmatpush1.bf16.msra.mxu0 %v9394_v48  ;;  %v4387_v48 = vld [vmem:[%s13818_s3 + $0x240] sm:$0xff] }
0x101b   : > { %9397 = vmatprep.subr.bf16.mxu0 %v9396_v45  ;;  %v4389_v45 = vld [vmem:[%s13818_s3 + $0x250] sm:$0xff] }
0x101c   : > { %v9430_v43 = vpack.c.bf16 %v4389_v45, %v4387_v48  ;;  %v8053_v45 = vld [vmem:[%s13818_s3 + $0x5e0] sm:$0xff] }
0x101e   : > { %9399 = vmatpush1.bf16.msra.mxu0 %v9398_v8  ;;  %v4393_v8 = vld [vmem:[%s13818_s3 + $0x270] sm:$0xff] }
0x101f   : > { %9401 = vmatprep.subr.bf16.mxu0 %v9400_v9  ;;  %v8026_v9 = vld [vmem:[%s13818_s3 + $0x508] sm:$0xff]  ;;  %v9434_v15 = vpack.c.bf16 %v4393_v8, %v4391_v2  ;;  %v8057_v8 = vld [vmem:[%s13818_s3 + $0x600] sm:$0xff] }
0x1020   : > { %v9443_v56 = vpack.c.bf16 %v8028_v10, %v8026_v9  ;;  %v8059_v9 = vld [vmem:[%s13818_s3 + $0x610] sm:$0xff]  ;;  %v8062_v10 = vld [vmem:[%s13818_s3 + $0x628] sm:$0xff] }
0x1022   : > { %9403 = vmatpush1.bf16.msra.mxu0 %v9402_v25  ;;  %v8027_v25 = vld [vmem:[%s13818_s3 + $0x510] sm:$0xff] }
0x1023   : > { %9405 = vmatprep.subr.bf16.mxu0 %v9404_v30  ;;  %v8030_v30 = vld [vmem:[%s13818_s3 + $0x528] sm:$0xff]  ;;  %v9445_v23 = vpack.c.bf16 %v8027_v25, %v8025_v32  ;;  %v8061_v25 = vld [vmem:[%s13818_s3 + $0x620] sm:$0xff] }
0x1024   : > { %v9447_v29 = vpack.c.bf16 %v8032_v16, %v8030_v30  ;;  %v8063_v30 = vld [vmem:[%s13818_s3 + $0x630] sm:$0xff]  ;;  %v8066_v16 = vld [vmem:[%s13818_s3 + $0x648] sm:$0xff] }
0x1026   : > { %9407 = vmatpush1.bf16.msra.mxu0 %v9406_v42  ;;  %v8031_v42 = vld [vmem:[%s13818_s3 + $0x530] sm:$0xff] }
0x1027   : > { %9409 = vmatprep.subr.bf16.mxu0 %v9408_v28  ;;  %v8034_v28 = vld [vmem:[%s13818_s3 + $0x548] sm:$0xff]  ;;  %v9449_v17 = vpack.c.bf16 %v8031_v42, %v8029_v7  ;;  %v8065_v42 = vld [vmem:[%s13818_s3 + $0x640] sm:$0xff] }
0x1028   : > { %v9451_v4 = vpack.c.bf16 %v8036_v5, %v8034_v28  ;;  %v8067_v28 = vld [vmem:[%s13818_s3 + $0x650] sm:$0xff]  ;;  %v8070_v5 = vld [vmem:[%s13818_s3 + $0x668] sm:$0xff] }
0x102a   : > { %9411 = vmatpush1.bf16.msra.mxu0 %v9410_v38  ;;  %v8035_v38 = vld [vmem:[%s13818_s3 + $0x550] sm:$0xff] }
0x102b   : > { %9413 = vmatprep.subr.bf16.mxu0 %v9412_v46  ;;  %v8038_v46 = vld [vmem:[%s13818_s3 + $0x568] sm:$0xff] }
0x102e   : > { %9415 = vmatpush1.bf16.msra.mxu0 %v9414_v41  ;;  %v8044_v41 = vld [vmem:[%s13818_s3 + $0x598] sm:$0xff] }
0x102f   : > { %9417 = vmatprep.subr.bf16.mxu0 %v9416_v12  ;;  %v9457_v12 = vpack.c.bf16 %v8039_v37, %v8037_v13  ;;  %v9459_v34 = vpack.c.bf16 %v8044_v41, %v8042_v33  ;;  %v8073_v37 = vld [vmem:[%s13818_s3 + $0x680] sm:$0xff]  ;;  %v8075_v33 = vld [vmem:[%s13818_s3 + $0x690] sm:$0xff]  ;;  %v8078_v41 = vld [vmem:[%s13818_s3 + $0x6a8] sm:$0xff] }
0x1032   : > { %9419 = vmatpush1.bf16.msra.mxu0 %v9418_v52  ;;  %v8048_v52 = vld [vmem:[%s13818_s3 + $0x5b8] sm:$0xff] }
0x1033   : > { %9421 = vmatprep.subr.bf16.mxu0 %v9420_v55  ;;  %v9461_v55 = vpack.c.bf16 %v8043_v49, %v8041_v35  ;;  %v9463_v57 = vpack.c.bf16 %v8048_v52, %v8046_v50  ;;  %v8077_v49 = vld [vmem:[%s13818_s3 + $0x6a0] sm:$0xff]  ;;  %v8079_v50 = vld [vmem:[%s13818_s3 + $0x6b0] sm:$0xff]  ;;  %v8082_v52 = vld [vmem:[%s13818_s3 + $0x6c8] sm:$0xff] }
0x1035   : > { %4842 = vmatmul.mubr.f32.vlgmr.msra.gmra.mrb[82].mxu0 %v12120_v18  ;;  %v4394_v18 = vld [vmem:[%s13818_s3 + $0x278] sm:$0xff] }
0x1036   : > { %9423 = vmatpush1.bf16.msra.mxu0 %v9422_v60  ;;  %4912 = vmatprep.mubr.f32.mxu0 %v10039_v20  ;;  %v9432_v0 = vpack.c.bf16 %v4394_v18, %v4392_v24  ;;  %v8052_v60 = vld [vmem:[%s13818_s3 + $0x5d8] sm:$0xff]  ;;  %v8055_v24 = vld [vmem:[%s13818_s3 + $0x5f0] sm:$0xff]  ;;  %v8058_v18 = vld [vmem:[%s13818_s3 + $0x608] sm:$0xff] }
0x1037   : > { %9425 = vmatprep.subr.bf16.mxu0 %v9424_v40  ;;  %v9465_v40 = vpack.c.bf16 %v8047_v61, %v8045_v58  ;;  %v9467_v11 = vpack.c.bf16 %v8052_v60, %v8050_v59  ;;  %v8081_v61 = vld [vmem:[%s13818_s3 + $0x6c0] sm:$0xff]  ;;  %v8083_v59 = vld [vmem:[%s13818_s3 + $0x6d0] sm:$0xff]  ;;  %v8086_v60 = vld [vmem:[%s13818_s3 + $0x6e8] sm:$0xff] }
0x103a   : > { %9427 = vmatpush1.bf16.msra.mxu0 %v9426_v44  ;;  %v8056_v44 = vld [vmem:[%s13818_s3 + $0x5f8] sm:$0xff] }
0x103b   : > { %9429 = vmatprep.subr.bf16.mxu0 %v9428_v47  ;;  %v9469_v47 = vpack.c.bf16 %v8051_v62, %v8049_v22  ;;  %v9471_v48 = vpack.c.bf16 %v8056_v44, %v8054_v63  ;;  %v8085_v62 = vld [vmem:[%s13818_s3 + $0x6e0] sm:$0xff]  ;;  %v8087_v63 = vld [vmem:[%s13818_s3 + $0x6f0] sm:$0xff]  ;;  %v8090_v44 = vld [vmem:[%s13818_s3 + $0x708] sm:$0xff] }
0x103e   : > { %9431 = vmatpush1.bf16.msra.mxu0 %v9430_v43  ;;  %v8060_v43 = vld [vmem:[%s13818_s3 + $0x618] sm:$0xff] }
0x103f   : > { %9433 = vmatprep.subr.bf16.mxu0 %v9432_v0  ;;  %v9473_v0 = vpack.c.bf16 %v8055_v24, %v8053_v45  ;;  %v9475_v2 = vpack.c.bf16 %v8060_v43, %v8058_v18  ;;  %v8089_v24 = vld [vmem:[%s13818_s3 + $0x700] sm:$0xff]  ;;  %v8091_v18 = vld [vmem:[%s13818_s3 + $0x710] sm:$0xff]  ;;  %v8094_v43 = vld [vmem:[%s13818_s3 + $0x728] sm:$0xff] }
0x1042   : > { %9435 = vmatpush1.bf16.msra.mxu0 %v9434_v15  ;;  %v8064_v15 = vld [vmem:[%s13818_s3 + $0x638] sm:$0xff] }
0x1043   : > { %9444 = vmatprep.subr.bf16.mxu0 %v9443_v56  ;;  %v9477_v56 = vpack.c.bf16 %v8059_v9, %v8057_v8  ;;  %v9479_v32 = vpack.c.bf16 %v8064_v15, %v8062_v10  ;;  %v8093_v9 = vld [vmem:[%s13818_s3 + $0x720] sm:$0xff]  ;;  %v8095_v10 = vld [vmem:[%s13818_s3 + $0x730] sm:$0xff]  ;;  %v8098_v15 = vld [vmem:[%s13818_s3 + $0x748] sm:$0xff] }
0x1045   : > { %8019 = vmatmul.mubr.msk.f32.vlgmr.msra.gmra.mrb[82].mxu0 %vm375_vm0, %v12122_v6  ;;  %v8040_v6 = vld [vmem:[%s13818_s3 + $0x578] sm:$0xff] }
0x1046   : > { %9446 = vmatpush1.bf16.msra.mxu0 %v9445_v23  ;;  %5220 = vmatprep.mubr.f32.mxu0 %v12236_v53  ;;  %v9453_v53 = vpack.c.bf16 %v8035_v38, %v8033_v19  ;;  %v9455_v3 = vpack.c.bf16 %v8040_v6, %v8038_v46  ;;  %v8068_v23 = vld [vmem:[%s13818_s3 + $0x658] sm:$0xff]  ;;  %v8069_v38 = vld [vmem:[%s13818_s3 + $0x660] sm:$0xff]  ;;  %v8071_v46 = vld [vmem:[%s13818_s3 + $0x670] sm:$0xff] }
0x1047   : > { %9448 = vmatprep.subr.bf16.mxu0 %v9447_v29  ;;  %v9481_v29 = vpack.c.bf16 %v8063_v30, %v8061_v25  ;;  %v9483_v7 = vpack.c.bf16 %v8068_v23, %v8066_v16  ;;  %v8074_v6 = vld [vmem:[%s13818_s3 + $0x688] sm:$0xff]  ;;  %v8097_v30 = vld [vmem:[%s13818_s3 + $0x740] sm:$0xff]  ;;  %v8099_v16 = vld [vmem:[%s13818_s3 + $0x750] sm:$0xff] }
0x1048   : > { %v8102_v23 = vld [vmem:[%s13818_s3 + $0x768] sm:$0xff] }
0x104a   : > { %9450 = vmatpush1.bf16.msra.mxu0 %v9449_v17  ;;  %v8072_v17 = vld [vmem:[%s13818_s3 + $0x678] sm:$0xff] }
0x104b   : > { %9452 = vmatprep.subr.bf16.mxu0 %v9451_v4  ;;  %v9485_v4 = vpack.c.bf16 %v8067_v28, %v8065_v42  ;;  %v9487_v19 = vpack.c.bf16 %v8072_v17, %v8070_v5  ;;  %v8101_v42 = vld [vmem:[%s13818_s3 + $0x760] sm:$0xff]  ;;  %v8103_v28 = vld [vmem:[%s13818_s3 + $0x770] sm:$0xff]  ;;  %v5302_v17 = vsel %vm5300_vm13, 0.0, %v10043_v54 }
0x104c   : > { %v9521_v5 = vpack.c.bf16 %v8103_v28, %v8101_v42 }
0x104e   : > { %9454 = vmatpush1.bf16.msra.mxu0 %v9453_v53  ;;  %v8076_v53 = vld [vmem:[%s13818_s3 + $0x698] sm:$0xff] }
0x104f   : > { %9456 = vmatprep.subr.bf16.mxu0 %v9455_v3  ;;  %v9489_v3 = vpack.c.bf16 %v8071_v46, %v8069_v38  ;;  %v9491_v13 = vpack.c.bf16 %v8076_v53, %v8074_v6 }
0x1052   : > { %9458 = vmatpush1.bf16.msra.mxu0 %v9457_v12  ;;  %v8080_v12 = vld [vmem:[%s13818_s3 + $0x6b8] sm:$0xff] }
0x1053   : > { %9460 = vmatprep.subr.bf16.mxu0 %v9459_v34  ;;  %v9493_v34 = vpack.c.bf16 %v8075_v33, %v8073_v37  ;;  %v9495_v35 = vpack.c.bf16 %v8080_v12, %v8078_v41 }
0x1056   : > { %9462 = vmatpush1.bf16.msra.mxu0 %v9461_v55  ;;  %v8084_v55 = vld [vmem:[%s13818_s3 + $0x6d8] sm:$0xff] }
0x1057   : > { %9464 = vmatprep.subr.bf16.mxu0 %v9463_v57  ;;  %v9497_v57 = vpack.c.bf16 %v8079_v50, %v8077_v49  ;;  %v9499_v58 = vpack.c.bf16 %v8084_v55, %v8082_v52 }
0x105a   : > { %9466 = vmatpush1.bf16.msra.mxu0 %v9465_v40  ;;  %v8088_v40 = vld [vmem:[%s13818_s3 + $0x6f8] sm:$0xff] }
0x105b   : > { %9468 = vmatprep.subr.bf16.mxu0 %v9467_v11  ;;  %v9501_v11 = vpack.c.bf16 %v8083_v59, %v8081_v61  ;;  %v9503_v22 = vpack.c.bf16 %v8088_v40, %v8086_v60 }
0x105e   : > { %9470 = vmatpush1.bf16.msra.mxu0 %v9469_v47  ;;  %v8092_v47 = vld [vmem:[%s13818_s3 + $0x718] sm:$0xff] }
0x105f   : > { %9472 = vmatprep.subr.bf16.mxu0 %v9471_v48  ;;  %v9505_v48 = vpack.c.bf16 %v8087_v63, %v8085_v62  ;;  %v9507_v45 = vpack.c.bf16 %v8092_v47, %v8090_v44 }
0x1062   : > { %9474 = vmatpush1.bf16.msra.mxu0 %v9473_v0  ;;  %v8096_v0 = vld [vmem:[%s13818_s3 + $0x738] sm:$0xff] }
0x1063   : > { %9476 = vmatprep.subr.bf16.mxu0 %v9475_v2  ;;  %v9509_v2 = vpack.c.bf16 %v8091_v18, %v8089_v24  ;;  %v9511_v8 = vpack.c.bf16 %v8096_v0, %v8094_v43 }
0x1066   : > { %9478 = vmatpush1.bf16.msra.mxu0 %v9477_v56  ;;  %v8100_v56 = vld [vmem:[%s13818_s3 + $0x758] sm:$0xff] }
0x1067   : > { %9480 = vmatprep.subr.bf16.mxu0 %v9479_v32  ;;  %v9513_v32 = vpack.c.bf16 %v8095_v10, %v8093_v9  ;;  %v9515_v25 = vpack.c.bf16 %v8100_v56, %v8098_v15 }
0x106a   : > { %9482 = vmatpush1.bf16.msra.mxu0 %v9481_v29  ;;  %v9517_v29 = vpack.c.bf16 %v8099_v16, %v8097_v30 }
0x106b   : > { %9484 = vmatprep.subr.bf16.mxu0 %v9483_v7 }
0x106e   : > { %9486 = vmatpush1.bf16.msra.mxu0 %v9485_v4  ;;  %v5304_v4 = vrot.slane %v5302_v17, 7 }
0x106f   : > { %9488 = vmatprep.subr.bf16.mxu0 %v9487_v19  ;;  %v5301_v19 = vsel %vm5300_vm13, 1.0, %v10039_v20 }
0x1070   : > { %v5306_v6 = vsel %vm1277_vm9, %v5301_v19, %v5304_v4 }
0x1072   : > { %9490 = vmatpush1.bf16.msra.mxu0 %v9489_v3 }
0x1073   : > { %9492 = vmatprep.subr.bf16.mxu0 %v9491_v13 }
0x1076   : > { %9494 = vmatpush1.bf16.msra.mxu0 %v9493_v34 }
0x1077   : > { %9496 = vmatprep.subr.bf16.mxu0 %v9495_v35  ;;  %v5307_v35 = vrot.slane %v10652_v26, 4 }
0x1079   : > { %v5309_v61 = vsel %vm541_vm5, %v10631_v14, %v5307_v35 }
0x107a   : > { %9498 = vmatpush1.bf16.msra.mxu0 %v9497_v57 }
0x107b   : > { %9500 = vmatprep.subr.bf16.mxu0 %v9499_v58 }
0x107e   : > { %9502 = vmatpush1.bf16.msra.mxu0 %v9501_v11 }
0x107f   : > { %9504 = vmatprep.subr.bf16.mxu0 %v9503_v22 }
0x1082   : > { %9506 = vmatpush1.bf16.msra.mxu0 %v9505_v48 }
0x1083   : > { %9508 = vmatprep.subr.bf16.mxu0 %v9507_v45 }
0x1085   : > { %5221 = vmatmul.mubr.f32.vlgmr.msra.gmra.mrb[82].mxu0 %v12234_v27  ;;  %v8104_v27 = vld [vmem:[%s13818_s3 + $0x778] sm:$0xff] }
0x1086   : > { %9510 = vmatpush1.bf16.msra.mxu0 %v9509_v2  ;;  %5291 = vmatprep.mubr.f32.mxu0 %v10039_v20  ;;  %v9519_v7 = vpack.c.bf16 %v8104_v27, %v8102_v23  ;;  %v5668_v27 = vsel %vm5300_vm13, %v10110_v21, 0.0 }
0x1087   : > { %9512 = vmatprep.subr.bf16.mxu0 %v9511_v8 }
0x108a   : > { %9514 = vmatpush1.bf16.msra.mxu0 %v9513_v32 }
0x108b   : > { %9516 = vmatprep.subr.bf16.mxu0 %v9515_v25 }
0x108e   : > { %9518 = vmatpush1.bf16.msra.mxu0 %v9517_v29 }
0x108f   : > { %9520 = vmatprep.subr.bf16.mxu0 %v9519_v7 }
0x1092   : > { %9522 = vmatpush1.bf16.msra.mxu0 %v9521_v5 }
0x1095   : > { %8105 = vmatmul.mubr.msk.f32.vlgmr.msra.gmra.mrb[82].mxu0 %vm375_vm0, %v12238_v51 }
0x1096   : > { %6704 = vmatprep.mubr.f32.mxu0 %v10039_v20 }
0x1168   : > { %v12668_v38 = vpop.f32.mrb[82].mxu0 }
0x1169   : > { %v12670_v46 = vpop.f32.mrb[83].mxu0  ;;  %v5384_v51 = vmul.f32 %v12668_v38, %v12668_v38 }
0x116a   : > { %v5385_v53 = vmul.f32 %v12670_v46, %v12670_v46  ;;  %5313 = vmatprep.subr.mxu1 %v12670_v46 }
0x116b   : > { %5314 = vmatpush1.msra.mxu1 %v12668_v38 }
0x116c   : > { %8106 = vmatmul.mubr.msk.f32.vlgmr.msra.gmra.mrb[46].mxu1 %vm3493_vm12, %v5306_v6  ;;  %5386 = vmatprep.subr.mxu1 %v5385_v53 }
0x116d   : > { %5387 = vmatpush1.msra.mxu1 %v5384_v51  ;;  %5450 = vmatprep.mubr.f32.mxu1 %v10039_v20 }
0x116e   : > { %8760 = vmatprep.subr.mxu1 %v10039_v20 }
0x1170   : > { %8107 = vmatmul.mubr.msk.f32.vlgmr.msra.gmra.mrb[48].mxu1 %vm3493_vm12, %v5306_v6 }
0x1171   : > { %8762 = vmatprep.mubr.msk.f32.mxu1 %vm10040_vm2, %v10039_v20 }
0x123f   : > { %v5379_v3 = vpop.f32.mrb[46].mxu1 }
0x1240   : > { %5460 = vrot.lane.b32.xlu1 %v5379_v3, %s10047_s18  ;;  %v5381_v13 = vpop.f32.mrb[47].mxu1 }
0x1243   : > { %v5452_v37 = vpop.f32.mrb[48].mxu1 }
0x1244   : > { %5472 = vrot.lane.b32.xlu1 %v5381_v13, %s10047_s18  ;;  %5465 = vrot.lane.b32.xlu0 %v5452_v37, %s10047_s18  ;;  %v5454_v33 = vpop.f32.mrb[49].mxu1 }
0x1248   : > { %5477 = vrot.lane.b32.xlu0 %v5454_v33, %s10047_s18 }
0x12b2   : > { %v5461_v41 = vpop.permute.xlu1 %5460 }
0x12b3   : > { %v5463_v12 = vadd.f32 %v5461_v41, %v5379_v3  ;;  %v6628_v41 = vsel %vm5834_vm6, %v10159_v39, 0.0 }
0x12b5   : > { %v5469_v34 = vadd.f32 %v5463_v12, %v5381_v13  ;;  %v8159_v13 = vld [vmem:[%s13819_s4 + $0x3f0] sm:$0xff] }
0x12b6   : > { %v5473_v49 = vpop.permute.xlu1 %5472  ;;  %v5466_v50 = vpop.permute.xlu0 %5465 }
0x12b7   : > { %v5475_v52 = vadd.f32 %v5473_v49, %v5469_v34  ;;  %v5468_v55 = vadd.f32 %v5466_v50, %v5452_v37  ;;  %v5835_v37 = vsel %vm5834_vm6, %v10139_v31, 0.0 }
0x12b9   : > { %v5481_v57 = vmul.f32 0.0625, %v5475_v52  ;;  %v5470_v58 = vadd.f32 %v5468_v55, %v5454_v33  ;;  %v6094_v55 = vsel %vm5834_vm6, %v10149_v36, 0.0 }
0x12ba   : > { %v5478_v59 = vpop.permute.xlu0 %5477 }
0x12bb   : > { %v5480_v60 = vadd.f32 %v5478_v59, %v5470_v58  ;;  %8761 = vmatpush3.msk.msra.mxu1 %vm363_vm1, %v5481_v57  ;;  %v5483_v40 = vmul.f32 %v5481_v57, %v5481_v57  ;;  %v8130_v57 = vld [vmem:[%s13819_s4 + $0x308] sm:$0xff]  ;;  %v8132_v58 = vld [vmem:[%s13819_s4 + $0x318] sm:$0xff]  ;;  %v8129_v59 = vld [vmem:[%s13819_s4 + $0x300] sm:$0xff] }
0x12bc   : > { %8763 = vmatmul.mubr.msk.f32.vlgmr.msra.gmra.mrb[50].mxu1 %vm1561_vm11, %v5309_v61  ;;  %8765 = vmatprep.subr.mxu1 %v10039_v20 }
0x12bd   : > { %v5482_v11 = vmul.f32 0.0625, %v5480_v60  ;;  %8767 = vmatprep.mubr.msk.f32.mxu1 %vm10040_vm2, %v10039_v20  ;;  %v8131_v60 = vld [vmem:[%s13819_s4 + $0x310] sm:$0xff] }
0x12bf   : > { %v5484_v22 = vsub.f32 %v5482_v11, %v5483_v40  ;;  %v8134_v40 = vld [vmem:[%s13819_s4 + $0x328] sm:$0xff]  ;;  %v8136_v11 = vld [vmem:[%s13819_s4 + $0x338] sm:$0xff] }
0x12c1   : > { %v5485_v62 = vadd.f32 1e-05, %v5484_v22  ;;  %v9547_v22 = vpack.c.bf16 %v8136_v11, %v8134_v40  ;;  %v8174_v40 = vld [vmem:[%s13819_s4 + $0x468] sm:$0xff]  ;;  %v8176_v11 = vld [vmem:[%s13819_s4 + $0x478] sm:$0xff] }
0x12c3   : > { %10025 = vrsqrt.f32 %v5485_v62  ;;  %v8133_v62 = vld [vmem:[%s13819_s4 + $0x320] sm:$0xff] }
0x12cd   : > { %v10026_v63 = vpop.eup %10025 }
0x12ce   : > { %8766 = vmatpush3.msk.msra.mxu1 %vm363_vm1, %v10026_v63  ;;  %v8135_v63 = vld [vmem:[%s13819_s4 + $0x330] sm:$0xff] }
0x12cf   : > { %8768 = vmatmul.mubr.msk.f32.vlgmr.msra.gmra.mrb[52].mxu1 %vm1561_vm11, %v5309_v61  ;;  %v9543_v61 = vpack.c.bf16 %v8132_v58, %v8130_v57  ;;  %v8170_v57 = vld [vmem:[%s13819_s4 + $0x448] sm:$0xff]  ;;  %v8172_v58 = vld [vmem:[%s13819_s4 + $0x458] sm:$0xff] }
0x12d0   : > { %5746 = vmatprep.mubr.f32.mxu1 %v10039_v20 }
0x138f   : > { %v5559_v44 = vpop.f32.mrb[50].mxu1 }
0x1390   : > { %5564 = vrot.lane.b32.xlu1 %v5559_v44, %s10047_s18  ;;  %v8764_v47 = vpop.f32.mrb[51].mxu1 }
0x1391   : > { %v8140_v47 = vld [vmem:[%s13819_s4 + $0x358] sm:$0xff] }
0x1394   : > { %5669 = vrot.lane.b32.xlu1 %v10110_v21, %s10053_s14 }
0x13a2   : > { %v5637_v48 = vpop.f32.mrb[52].mxu1 }
0x13a3   : > { %5642 = vrot.lane.b32.xlu0 %v5637_v48, %s10047_s18  ;;  %v8769_v45 = vpop.f32.mrb[53].mxu1 }
0x1402   : > { %v5565_v24 = vpop.permute.xlu1 %5564 }
0x1403   : > { %v5567_v18 = vsel %vm375_vm0, %v5559_v44, %v5565_v24  ;;  %v8138_v44 = vld [vmem:[%s13819_s4 + $0x348] sm:$0xff]  ;;  %v8137_v24 = vld [vmem:[%s13819_s4 + $0x340] sm:$0xff] }
0x1404   : > { %v5646_v43 = vsub.f32 %v12668_v38, %v5567_v18  ;;  %v5647_v0 = vsub.f32 %v12670_v46, %v5567_v18  ;;  %v9551_v45 = vpack.c.bf16 %v8140_v47, %v8138_v44  ;;  %v8139_v18 = vld [vmem:[%s13819_s4 + $0x350] sm:$0xff]  ;;  %v8178_v44 = vld [vmem:[%s13819_s4 + $0x488] sm:$0xff]  ;;  %v8180_v47 = vld [vmem:[%s13819_s4 + $0x498] sm:$0xff] }
0x1406   : > { %v5670_v30 = vpop.permute.xlu1 %5669 }
0x1407   : > { %v5672_v16 = vsel %vm5300_vm13, 0.0, %v5670_v30  ;;  %v8145_v30 = vld [vmem:[%s13819_s4 + $0x380] sm:$0xff] }
0x1408   : > { %v5674_v23 = vrot.slane %v5672_v16, 2  ;;  %v8147_v16 = vld [vmem:[%s13819_s4 + $0x390] sm:$0xff] }
0x140a   : > { %v5676_v28 = vsel %vm13830_vm14, %v5668_v27, %v5674_v23  ;;  %v8152_v27 = vld [vmem:[%s13819_s4 + $0x3b8] sm:$0xff] }
0x1415   : > { %v5643_v2 = vpop.permute.xlu0 %5642 }
0x1416   : > { %v5645_v8 = vsel %vm375_vm0, %v5637_v48, %v5643_v2  ;;  %v9549_v48 = vpack.c.bf16 %v8135_v63, %v8133_v62  ;;  %v9553_v2 = vpack.c.bf16 %v8139_v18, %v8137_v24  ;;  %v8173_v62 = vld [vmem:[%s13819_s4 + $0x460] sm:$0xff]  ;;  %v8175_v63 = vld [vmem:[%s13819_s4 + $0x470] sm:$0xff] }
0x1417   : > { %v5648_v9 = vmul.f32 %v5646_v43, %v5645_v8  ;;  %v5649_v10 = vmul.f32 %v5647_v0, %v5645_v8  ;;  %v8142_v43 = vld [vmem:[%s13819_s4 + $0x368] sm:$0xff]  ;;  %v8144_v0 = vld [vmem:[%s13819_s4 + $0x378] sm:$0xff]  ;;  %v8177_v24 = vld [vmem:[%s13819_s4 + $0x480] sm:$0xff] }
0x1418   : > { %v9555_v8 = vpack.c.bf16 %v8144_v0, %v8142_v43  ;;  %v8179_v18 = vld [vmem:[%s13819_s4 + $0x490] sm:$0xff]  ;;  %v8182_v43 = vld [vmem:[%s13819_s4 + $0x4a8] sm:$0xff]  ;;  %v8184_v0 = vld [vmem:[%s13819_s4 + $0x4b8] sm:$0xff] }
0x1419   : > { %v5652_v15 = vmul.f32 0.2, %v5648_v9  ;;  %v5653_v56 = vmul.f32 0.2, %v5649_v10  ;;  %vm5651_vm3 = vcmp.ge.f32.partialorder %v5649_v10, 0.0  ;;  %vm5650_vm4 = vcmp.ge.f32.partialorder %v5648_v9, 0.0 }
0x141b   : > { %v5655_v32 = vsel %vm5651_vm3, %v5649_v10, %v5653_v56  ;;  %v5654_v25 = vsel %vm5650_vm4, %v5648_v9, %v5652_v15  ;;  %v8141_v9 = vld [vmem:[%s13819_s4 + $0x360] sm:$0xff]  ;;  %v8143_v10 = vld [vmem:[%s13819_s4 + $0x370] sm:$0xff]  ;;  %v8146_v15 = vld [vmem:[%s13819_s4 + $0x388] sm:$0xff] }
0x141c   : > { %5660 = vrot.lane.b32.xlu1 %v5655_v32, %s10047_s18  ;;  %5658 = vrot.lane.b32.xlu0 %v5654_v25, %s10047_s18  ;;  %v8148_v56 = vld [vmem:[%s13819_s4 + $0x398] sm:$0xff]  ;;  %v9557_v32 = vpack.c.bf16 %v8143_v10, %v8141_v9  ;;  %v8181_v9 = vld [vmem:[%s13819_s4 + $0x4a0] sm:$0xff] }
0x141d   : > { %v9559_v25 = vpack.c.bf16 %v8148_v56, %v8146_v15  ;;  %v8183_v10 = vld [vmem:[%s13819_s4 + $0x4b0] sm:$0xff]  ;;  %v8186_v56 = vld [vmem:[%s13819_s4 + $0x4c8] sm:$0xff] }
0x141e   : > { %v9597_v15 = vpack.c.bf16 %v8183_v10, %v8181_v9 }
0x1420   : > { %5836 = vrot.lane.b32.xlu0 %v10139_v31, %s10054_s16  ;;  %6095 = vrot.lane.b32.xlu1 %v10149_v36, %s10054_s16 }
0x1424   : > { %6629 = vrot.lane.b32.xlu0 %v10159_v39, %s10054_s16 }
0x148e   : > { %v5661_v29 = vpop.permute.xlu1 %5660  ;;  %v5659_v7 = vpop.permute.xlu0 %5658 }
0x148f   : > { %v5662_v42 = vsel %vm375_vm0, %v5659_v7, %v5661_v29 }
0x1490   : > { %5682 = vmatprep.subr.mxu1 %v5662_v42  ;;  %v8149_v42 = vld [vmem:[%s13819_s4 + $0x3a0] sm:$0xff] }
0x1491   : > { %8113 = vmatpush1.msk.msra.mxu1 %vm8112_vm7, %v5659_v7 }
0x1492   : > { %8114 = vmatmul.mubr.msk.f32.vlgmr.msra.gmra.mrb[54].mxu1 %vm3493_vm12, %v5676_v28  ;;  %8770 = vmatprep.subr.msk.mxu1 %vm375_vm0, %v5661_v29  ;;  %v5837_v21 = vpop.permute.xlu0 %5836  ;;  %v6096_v12 = vpop.permute.xlu1 %6095 }
0x1493   : > { %8771 = vmatpush3.msk.msra.mxu1 %vm375_vm0, %v5661_v29  ;;  %5752 = vmatprep.mubr.f32.mxu1 %v10039_v20  ;;  %v5839_v19 = vsel %vm5834_vm6, 0.0, %v5837_v21  ;;  %vm10055_vm0 = vmmov 1   ;;  %v6098_v39 = vsel %vm5834_vm6, 0.0, %v6096_v12  ;;  %v9561_v29 = vpack.c.bf16 %v8147_v16, %v8145_v30  ;;  %v8154_v21 = vld [vmem:[%s13819_s4 + $0x3c8] sm:$0xff]  ;;  %v8185_v30 = vld [vmem:[%s13819_s4 + $0x4c0] sm:$0xff]  ;;  %v8187_v16 = vld [vmem:[%s13819_s4 + $0x4d0] sm:$0xff] }
0x1494   : > { %v5841_v6 = vrot.slane %v5839_v19, 6  ;;  %vm12729_vm10 = vmpackc.low %vm541_vm5, %vm10055_vm0  ;;  %v6100_v52 = vrot.slane %v6098_v39, 6  ;;  %v8153_v19 = vld [vmem:[%s13819_s4 + $0x3c0] sm:$0xff] }
0x1496   : > { %8115 = vmatmul.mubr.msk.f32.gmra.mrb[56].mxu1 %vm3493_vm12, %v5674_v23  ;;  %v6630_v5 = vpop.permute.xlu0 %6629  ;;  %v5843_v35 = vsel %vm363_vm1, %v5835_v37, %v5841_v6  ;;  %v6102_v36 = vsel %vm363_vm1, %v6094_v55, %v6100_v52  ;;  %v8160_v6 = vld [vmem:[%s13819_s4 + $0x3f8] sm:$0xff]  ;;  %v8162_v37 = vld [vmem:[%s13819_s4 + $0x408] sm:$0xff]  ;;  %v8165_v52 = vld [vmem:[%s13819_s4 + $0x420] sm:$0xff] }
0x1497   : > { %8772 = vmatprep.mubr.msk.f32.mxu1 %vm3493_vm12, %v5676_v28  ;;  %v6632_v38 = vsel %vm5834_vm6, 0.0, %v6630_v5  ;;  %v8151_v28 = vld [vmem:[%s13819_s4 + $0x3b0] sm:$0xff]  ;;  %v8156_v5 = vld [vmem:[%s13819_s4 + $0x3d8] sm:$0xff] }
0x1498   : > { %v6634_v3 = vrot.slane %v6632_v38, 6  ;;  %v8155_v38 = vld [vmem:[%s13819_s4 + $0x3d0] sm:$0xff] }
0x1499   : > { %v8167_v55 = vld [vmem:[%s13819_s4 + $0x430] sm:$0xff] }
0x149a   : > { %8773 = vmatmul.mubr.msk.f32.vlgmr.msra.gmra.mrb[58].mxu1 %vm3493_vm12, %v5674_v23  ;;  %v6636_v49 = vsel %vm363_vm1, %v6628_v41, %v6634_v3  ;;  %vm5844_vm12 = vcmask 97280   ;;  %v8150_v23 = vld [vmem:[%s13819_s4 + $0x3a8] sm:$0xff]  ;;  %v8157_v3 = vld [vmem:[%s13819_s4 + $0x3e0] sm:$0xff] }
0x149b   : > { %5921 = vmatprep.mubr.f32.mxu1 %v10039_v20  ;;  %v9563_v7 = vpack.c.bf16 %v8152_v27, %v8150_v23  ;;  %v9573_v41 = vpack.c.bf16 %v8159_v13, %v8157_v3  ;;  %v9601_v23 = vpack.c.bf16 %v8187_v16, %v8185_v30  ;;  %v8190_v27 = vld [vmem:[%s13819_s4 + $0x4e8] sm:$0xff]  ;;  %v8200_v13 = vld [vmem:[%s13819_s4 + $0x538] sm:$0xff] }
0x149c   : > { %v8198_v3 = vld [vmem:[%s13819_s4 + $0x528] sm:$0xff] }
0x1565   : > { %v5748_v17 = vpop.f32.mrb[54].mxu1 }
0x1566   : > { %v5750_v4 = vpop.f32.mrb[55].mxu1 }
0x1569   : > { %v5754_v46 = vpop.f32.mrb[56].mxu1 }
0x156a   : > { %v9526_v53 = vpack.c.bf16 %v5754_v46, %v5748_v17  ;;  %v5756_v51 = vpop.f32.mrb[57].mxu1  ;;  %v9565_v17 = vpack.c.bf16 %v8151_v28, %v8149_v42  ;;  %v8158_v46 = vld [vmem:[%s13819_s4 + $0x3e8] sm:$0xff]  ;;  %v8189_v42 = vld [vmem:[%s13819_s4 + $0x4e0] sm:$0xff]  ;;  %v8191_v28 = vld [vmem:[%s13819_s4 + $0x4f0] sm:$0xff] }
0x156b   : > { %v9523_v33 = vpack.c.bf16 %v5756_v51, %v5750_v4  ;;  %v9567_v4 = vpack.c.bf16 %v8156_v5, %v8154_v21  ;;  %v9571_v51 = vpack.c.bf16 %v8160_v6, %v8158_v46  ;;  %v9605_v21 = vpack.c.bf16 %v8191_v28, %v8189_v42  ;;  %v8194_v5 = vld [vmem:[%s13819_s4 + $0x508] sm:$0xff] }
0x156d   : > { %v8774_v34 = vpop.f32.mrb[58].mxu1  ;;  %9525 = vmatprep.subr.msk.bf16.mxu1 %vm12729_vm10, %v9523_v33  ;;  %9737 = vmatprep.subr.msk.bf16.mxu0 %vm12729_vm10, %v9523_v33 }
0x156e   : > { %v5825_v50 = vpop.f32.mrb[59].mxu1  ;;  %9528 = vmatpush1.bf16.msk.msra.mxu1 %vm12729_vm10, %v9526_v53  ;;  %9740 = vmatpush1.bf16.msk.msra.mxu0 %vm12729_vm10, %v9526_v53 }
0x156f   : > { %v9530_v31 = vpack.c.bf16 %v8774_v34, %v5825_v50  ;;  %9529 = vmatprep.subr.bf16.mxu1 %v10037_v1  ;;  %9741 = vmatprep.subr.bf16.mxu0 %v10037_v1  ;;  %v8161_v34 = vld [vmem:[%s13819_s4 + $0x400] sm:$0xff]  ;;  %v8168_v50 = vld [vmem:[%s13819_s4 + $0x438] sm:$0xff] }
0x1571   : > { %8121 = vmatmul.mubr.msk.f32.vlgmr.msra.gmra.mrb[60].mxu1 %vm5844_vm12, %v5843_v35  ;;  %8227 = vmatmul.mubr.msk.f32.vlgmr.msra.gmra.mrb[84].mxu0 %vm5844_vm12, %v6636_v49 }
0x1572   : > { %9532 = vmatpush3.bf16.msk.msra.mxu1 %vm12729_vm10, %v9530_v31  ;;  %9744 = vmatpush3.bf16.msk.msra.mxu0 %vm12729_vm10, %v9530_v31 }
0x1573   : > { %9535 = vmatprep.subr.msk.bf16.mxu1 %vm12729_vm10, %v9523_v33  ;;  %8779 = vmatprep.mubr.msk.f32.mxu1 %vm10040_vm2, %v10039_v20  ;;  %v8164_v33 = vld [vmem:[%s13819_s4 + $0x418] sm:$0xff] }
0x1574   : > { %8793 = vmatprep.mubr.msk.f32.mxu0 %vm10040_vm2, %v10039_v20  ;;  %v9575_v12 = vpack.c.bf16 %v8164_v33, %v8162_v37 }
0x1575   : > { %8780 = vmatmul.mubr.msk.f32.vlgmr.msra.gmra.mrb[62].mxu1 %vm5844_vm12, %v5843_v35  ;;  %8794 = vmatmul.mubr.msk.f32.vlgmr.msra.gmra.mrb[86].mxu0 %vm5844_vm12, %v6636_v49  ;;  %v8163_v35 = vld [vmem:[%s13819_s4 + $0x410] sm:$0xff]  ;;  %v8166_v49 = vld [vmem:[%s13819_s4 + $0x428] sm:$0xff] }
0x1576   : > { %9538 = vmatpush1.bf16.msk.msra.mxu1 %vm12729_vm10, %v9526_v53  ;;  %6170 = vmatprep.mubr.f32.mxu1 %v10039_v20  ;;  %v9569_v53 = vpack.c.bf16 %v8155_v38, %v8153_v19  ;;  %v9579_v39 = vpack.c.bf16 %v8168_v50, %v8166_v49  ;;  %v8202_v49 = vld [vmem:[%s13819_s4 + $0x548] sm:$0xff]  ;;  %v8204_v50 = vld [vmem:[%s13819_s4 + $0x558] sm:$0xff] }
0x1577   : > { %9539 = vmatprep.subr.bf16.mxu1 %v10037_v1  ;;  %7104 = vmatprep.mubr.f32.mxu0 %v10039_v20  ;;  %v9545_v1 = vpack.c.bf16 %v8131_v60, %v8129_v59  ;;  %v8169_v59 = vld [vmem:[%s13819_s4 + $0x440] sm:$0xff]  ;;  %v8171_v60 = vld [vmem:[%s13819_s4 + $0x450] sm:$0xff] }
0x1579   : > { %8126 = vmatmul.mubr.msk.f32.vlgmr.msra.gmra.mrb[64].mxu1 %vm5844_vm12, %v6102_v36 }
0x157a   : > { %9542 = vmatpush3.bf16.msk.msra.mxu1 %vm12729_vm10, %v9530_v31  ;;  %8786 = vmatprep.mubr.msk.f32.mxu1 %vm10040_vm2, %v10039_v20  ;;  %v9577_v31 = vpack.c.bf16 %v8163_v35, %v8161_v34  ;;  %v8197_v34 = vld [vmem:[%s13819_s4 + $0x520] sm:$0xff]  ;;  %v8199_v35 = vld [vmem:[%s13819_s4 + $0x530] sm:$0xff] }
0x157b   : > { %9544 = vmatprep.subr.bf16.mxu1 %v9543_v61  ;;  %v9583_v61 = vpack.c.bf16 %v8172_v58, %v8170_v57  ;;  %v8201_v57 = vld [vmem:[%s13819_s4 + $0x540] sm:$0xff]  ;;  %v8203_v58 = vld [vmem:[%s13819_s4 + $0x550] sm:$0xff] }
0x157d   : > { %8787 = vmatmul.mubr.msk.f32.vlgmr.msra.gmra.mrb[66].mxu1 %vm5844_vm12, %v6102_v36  ;;  %v9581_v36 = vpack.c.bf16 %v8167_v55, %v8165_v52  ;;  %v9615_v55 = vpack.c.bf16 %v8204_v50, %v8202_v49  ;;  %v6013_v49 = vld [vmem:[%s13819_s4 + $0x78] sm:$0xff] }
0x157e   : > { %9546 = vmatpush1.bf16.msra.mxu1 %v9545_v1  ;;  %v9585_v1 = vpack.c.bf16 %v8171_v60, %v8169_v59  ;;  %v9617_v59 = vpack.c.bf16 %v8203_v58, %v8201_v57 }
0x157f   : > { %9548 = vmatprep.subr.bf16.mxu1 %v9547_v22  ;;  %v9587_v22 = vpack.c.bf16 %v8176_v11, %v8174_v40  ;;  %v8205_v40 = vld [vmem:[%s13819_s4 + $0x560] sm:$0xff]  ;;  %v8207_v11 = vld [vmem:[%s13819_s4 + $0x570] sm:$0xff] }
0x1582   : > { %9550 = vmatpush1.bf16.msra.mxu1 %v9549_v48  ;;  %v9589_v48 = vpack.c.bf16 %v8175_v63, %v8173_v62  ;;  %v9621_v62 = vpack.c.bf16 %v8207_v11, %v8205_v40 }
0x1583   : > { %9552 = vmatprep.subr.bf16.mxu1 %v9551_v45  ;;  %v9591_v45 = vpack.c.bf16 %v8180_v47, %v8178_v44  ;;  %v8209_v44 = vld [vmem:[%s13819_s4 + $0x580] sm:$0xff]  ;;  %v8211_v47 = vld [vmem:[%s13819_s4 + $0x590] sm:$0xff] }
0x1586   : > { %9554 = vmatpush1.bf16.msra.mxu1 %v9553_v2  ;;  %v9593_v2 = vpack.c.bf16 %v8179_v18, %v8177_v24  ;;  %v9625_v24 = vpack.c.bf16 %v8211_v47, %v8209_v44 }
0x1587   : > { %9556 = vmatprep.subr.bf16.mxu1 %v9555_v8  ;;  %v9595_v8 = vpack.c.bf16 %v8184_v0, %v8182_v43  ;;  %v8213_v43 = vld [vmem:[%s13819_s4 + $0x5a0] sm:$0xff]  ;;  %v8215_v0 = vld [vmem:[%s13819_s4 + $0x5b0] sm:$0xff] }
0x1588   : > { %v9629_v9 = vpack.c.bf16 %v8215_v0, %v8213_v43 }
0x158a   : > { %9558 = vmatpush1.bf16.msra.mxu1 %v9557_v32  ;;  %v8188_v32 = vld [vmem:[%s13819_s4 + $0x4d8] sm:$0xff] }
0x158b   : > { %9560 = vmatprep.subr.bf16.mxu1 %v9559_v25  ;;  %v9599_v25 = vpack.c.bf16 %v8188_v32, %v8186_v56  ;;  %v8219_v56 = vld [vmem:[%s13819_s4 + $0x5d0] sm:$0xff]  ;;  %v8222_v32 = vld [vmem:[%s13819_s4 + $0x5e8] sm:$0xff] }
0x158e   : > { %9562 = vmatpush1.bf16.msra.mxu1 %v9561_v29  ;;  %v8192_v29 = vld [vmem:[%s13819_s4 + $0x4f8] sm:$0xff] }
0x158f   : > { %9564 = vmatprep.subr.bf16.mxu1 %v9563_v7  ;;  %v9603_v7 = vpack.c.bf16 %v8192_v29, %v8190_v27  ;;  %v8223_v27 = vld [vmem:[%s13819_s4 + $0x5f0] sm:$0xff]  ;;  %v5999_v29 = vld [vmem:[%s13819_s4 + $0x8] sm:$0xff] }
0x1592   : > { %9566 = vmatpush1.bf16.msra.mxu1 %v9565_v17  ;;  %v8196_v17 = vld [vmem:[%s13819_s4 + $0x518] sm:$0xff] }
0x1593   : > { %9568 = vmatprep.subr.bf16.mxu1 %v9567_v4  ;;  %v9607_v4 = vpack.c.bf16 %v8196_v17, %v8194_v5  ;;  %v6000_v5 = vld [vmem:[%s13819_s4 + $0x10] sm:$0xff]  ;;  %v6003_v17 = vld [vmem:[%s13819_s4 + $0x28] sm:$0xff] }
0x1596   : > { %9570 = vmatpush1.bf16.msra.mxu1 %v9569_v53  ;;  %v8193_v53 = vld [vmem:[%s13819_s4 + $0x500] sm:$0xff] }
0x1597   : > { %9572 = vmatprep.subr.bf16.mxu1 %v9571_v51  ;;  %v8195_v51 = vld [vmem:[%s13819_s4 + $0x510] sm:$0xff] }
0x1598   : > { %v9609_v33 = vpack.c.bf16 %v8195_v51, %v8193_v53  ;;  %v6002_v51 = vld [vmem:[%s13819_s4 + $0x20] sm:$0xff] }
0x159a   : > { %9574 = vmatpush1.bf16.msra.mxu1 %v9573_v41 }
0x159b   : > { %9576 = vmatprep.subr.bf16.mxu1 %v9575_v12  ;;  %v9611_v12 = vpack.c.bf16 %v8200_v13, %v8198_v3  ;;  %v6004_v3 = vld [vmem:[%s13819_s4 + $0x30] sm:$0xff]  ;;  %v6007_v13 = vld [vmem:[%s13819_s4 + $0x48] sm:$0xff] }
0x159e   : > { %9578 = vmatpush1.bf16.msra.mxu1 %v9577_v31 }
0x159f   : > { %9580 = vmatprep.subr.bf16.mxu1 %v9579_v39  ;;  %v9613_v39 = vpack.c.bf16 %v8199_v35, %v8197_v34  ;;  %v6008_v34 = vld [vmem:[%s13819_s4 + $0x50] sm:$0xff]  ;;  %v6011_v35 = vld [vmem:[%s13819_s4 + $0x68] sm:$0xff] }
0x15a0   : > { %v9651_v50 = vpack.c.bf16 %v6013_v49, %v6011_v35  ;;  %v6047_v35 = vld [vmem:[%s13819_s4 + $0x188] sm:$0xff]  ;;  %v6049_v49 = vld [vmem:[%s13819_s4 + $0x198] sm:$0xff] }
0x15a2   : > { %9582 = vmatpush1.bf16.msra.mxu1 %v9581_v36  ;;  %v8206_v36 = vld [vmem:[%s13819_s4 + $0x568] sm:$0xff] }
0x15a3   : > { %9584 = vmatprep.subr.bf16.mxu1 %v9583_v61  ;;  %v8208_v61 = vld [vmem:[%s13819_s4 + $0x578] sm:$0xff] }
0x15a4   : > { %v9619_v60 = vpack.c.bf16 %v8208_v61, %v8206_v36  ;;  %v6014_v36 = vld [vmem:[%s13819_s4 + $0x80] sm:$0xff]  ;;  %v6016_v61 = vld [vmem:[%s13819_s4 + $0x90] sm:$0xff] }
0x15a5   : > { %v9657_v40 = vpack.c.bf16 %v6016_v61, %v6014_v36  ;;  %v6050_v36 = vld [vmem:[%s13819_s4 + $0x1a0] sm:$0xff]  ;;  %v6052_v61 = vld [vmem:[%s13819_s4 + $0x1b0] sm:$0xff] }
0x15a6   : > { %9586 = vmatpush1.bf16.msra.mxu1 %v9585_v1  ;;  %v8210_v1 = vld [vmem:[%s13819_s4 + $0x588] sm:$0xff] }
0x15a7   : > { %9588 = vmatprep.subr.bf16.mxu1 %v9587_v22  ;;  %v8212_v22 = vld [vmem:[%s13819_s4 + $0x598] sm:$0xff] }
0x15a8   : > { %v9623_v63 = vpack.c.bf16 %v8212_v22, %v8210_v1  ;;  %v6018_v1 = vld [vmem:[%s13819_s4 + $0xa0] sm:$0xff]  ;;  %v6020_v22 = vld [vmem:[%s13819_s4 + $0xb0] sm:$0xff] }
0x15a9   : > { %v9661_v44 = vpack.c.bf16 %v6020_v22, %v6018_v1  ;;  %v6054_v1 = vld [vmem:[%s13819_s4 + $0x1c0] sm:$0xff]  ;;  %v6056_v22 = vld [vmem:[%s13819_s4 + $0x1d0] sm:$0xff] }
0x15aa   : > { %9590 = vmatpush1.bf16.msra.mxu1 %v9589_v48  ;;  %v8214_v48 = vld [vmem:[%s13819_s4 + $0x5a8] sm:$0xff] }
0x15ab   : > { %9592 = vmatprep.subr.bf16.mxu1 %v9591_v45  ;;  %v8216_v45 = vld [vmem:[%s13819_s4 + $0x5b8] sm:$0xff] }
0x15ac   : > { %v9627_v18 = vpack.c.bf16 %v8216_v45, %v8214_v48  ;;  %v6022_v48 = vld [vmem:[%s13819_s4 + $0xc0] sm:$0xff]  ;;  %v6024_v45 = vld [vmem:[%s13819_s4 + $0xd0] sm:$0xff] }
0x15ad   : > { %v9665_v43 = vpack.c.bf16 %v6024_v45, %v6022_v48  ;;  %v6058_v48 = vld [vmem:[%s13819_s4 + $0x1e0] sm:$0xff]  ;;  %v6060_v45 = vld [vmem:[%s13819_s4 + $0x1f0] sm:$0xff] }
0x15ae   : > { %9594 = vmatpush1.bf16.msra.mxu1 %v9593_v2  ;;  %v8218_v2 = vld [vmem:[%s13819_s4 + $0x5c8] sm:$0xff] }
0x15af   : > { %9596 = vmatprep.subr.bf16.mxu1 %v9595_v8  ;;  %v8220_v8 = vld [vmem:[%s13819_s4 + $0x5d8] sm:$0xff] }
0x15b0   : > { %v9631_v10 = vpack.c.bf16 %v8220_v8, %v8218_v2  ;;  %v6026_v2 = vld [vmem:[%s13819_s4 + $0xe0] sm:$0xff]  ;;  %v6028_v8 = vld [vmem:[%s13819_s4 + $0xf0] sm:$0xff] }
0x15b2   : > { %9598 = vmatpush1.bf16.msra.mxu1 %v9597_v15  ;;  %v8217_v15 = vld [vmem:[%s13819_s4 + $0x5c0] sm:$0xff] }
0x15b3   : > { %9600 = vmatprep.subr.bf16.mxu1 %v9599_v25  ;;  %v8224_v25 = vld [vmem:[%s13819_s4 + $0x5f8] sm:$0xff]  ;;  %v9633_v30 = vpack.c.bf16 %v8219_v56, %v8217_v15  ;;  %v9669_v15 = vpack.c.bf16 %v6028_v8, %v6026_v2  ;;  %v6062_v2 = vld [vmem:[%s13819_s4 + $0x200] sm:$0xff]  ;;  %v6064_v8 = vld [vmem:[%s13819_s4 + $0x210] sm:$0xff] }
0x15b4   : > { %v9635_v16 = vpack.c.bf16 %v8224_v25, %v8222_v32  ;;  %v6030_v32 = vld [vmem:[%s13819_s4 + $0x100] sm:$0xff]  ;;  %v6032_v25 = vld [vmem:[%s13819_s4 + $0x110] sm:$0xff] }
0x15b6   : > { %9602 = vmatpush1.bf16.msra.mxu1 %v9601_v23  ;;  %v8221_v23 = vld [vmem:[%s13819_s4 + $0x5e0] sm:$0xff] }
0x15b7   : > { %9604 = vmatprep.subr.bf16.mxu1 %v9603_v7  ;;  %v6001_v7 = vld [vmem:[%s13819_s4 + $0x18] sm:$0xff]  ;;  %v9637_v42 = vpack.c.bf16 %v8223_v27, %v8221_v23 }
0x15b8   : > { %v9639_v28 = vpack.c.bf16 %v6001_v7, %v5999_v29  ;;  %v9673_v29 = vpack.c.bf16 %v6032_v25, %v6030_v32  ;;  %v6066_v32 = vld [vmem:[%s13819_s4 + $0x220] sm:$0xff]  ;;  %v6068_v25 = vld [vmem:[%s13819_s4 + $0x230] sm:$0xff] }
0x15ba   : > { %9606 = vmatpush1.bf16.msra.mxu1 %v9605_v21  ;;  %v5998_v21 = vld [vmem:[%s13819_s4] sm:$0xff] }
0x15bb   : > { %9608 = vmatprep.subr.bf16.mxu1 %v9607_v4  ;;  %v6005_v4 = vld [vmem:[%s13819_s4 + $0x38] sm:$0xff] }
0x15bc   : > { %v9643_v53 = vpack.c.bf16 %v6005_v4, %v6003_v17  ;;  %v6039_v17 = vld [vmem:[%s13819_s4 + $0x148] sm:$0xff]  ;;  %v6041_v4 = vld [vmem:[%s13819_s4 + $0x158] sm:$0xff] }
0x1644   : > { %v12976_v19 = vpop.f32.mrb[60].mxu1  ;;  %v13191_v23 = vpop.f32.mrb[84].mxu0 }
0x1645   : > { %v12978_v38 = vpop.f32.mrb[61].mxu1  ;;  %v13193_v27 = vpop.f32.mrb[85].mxu0 }
0x1648   : > { %v12980_v46 = vpop.f32.mrb[62].mxu1  ;;  %v13195_v7 = vpop.f32.mrb[86].mxu0 }
0x1649   : > { %v8781_v6 = vpop.f32.mrb[63].mxu1 }
0x164a   : > { %v9641_v6 = vpack.c.bf16 %v6000_v5, %v5998_v21  ;;  %v6036_v21 = vld [vmem:[%s13819_s4 + $0x130] sm:$0xff]  ;;  %v8795_v5 = vpop.f32.mrb[87].mxu0 }
0x164b   : > { %v6075_v5 = vld [vmem:[%s13819_s4 + $0x268] sm:$0xff] }
0x164c   : > { %v6172_v37 = vpop.f32.mrb[64].mxu1 }
0x164d   : > { %v6174_v41 = vpop.f32.mrb[65].mxu1 }
0x164e   : > { %6408 = vmatprep.mubr.f32.mxu1 %v6174_v41 }
0x164f   : > { %6409 = vmatmul.mubr.f32.vlgmr.msra.gmra.mrb[68].mxu1 %v6172_v37  ;;  %v6009_v37 = vld [vmem:[%s13819_s4 + $0x58] sm:$0xff] }
0x1650   : > { %9610 = vmatpush1.bf16.msra.mxu1 %v9609_v33  ;;  %v13006_v31 = vpop.f32.mrb[66].mxu1  ;;  %6479 = vmatprep.mubr.f32.mxu1 %v10039_v20  ;;  %v9645_v33 = vpack.c.bf16 %v6004_v3, %v6002_v51  ;;  %v9647_v41 = vpack.c.bf16 %v6009_v37, %v6007_v13  ;;  %v6038_v51 = vld [vmem:[%s13819_s4 + $0x140] sm:$0xff]  ;;  %v6040_v3 = vld [vmem:[%s13819_s4 + $0x150] sm:$0xff]  ;;  %v6043_v13 = vld [vmem:[%s13819_s4 + $0x168] sm:$0xff] }
0x1651   : > { %v8788_v52 = vpop.f32.mrb[67].mxu1  ;;  %9612 = vmatprep.subr.bf16.mxu1 %v9611_v12  ;;  %v6006_v12 = vld [vmem:[%s13819_s4 + $0x40] sm:$0xff]  ;;  %v6045_v37 = vld [vmem:[%s13819_s4 + $0x178] sm:$0xff] }
0x1652   : > { %v6015_v52 = vld [vmem:[%s13819_s4 + $0x88] sm:$0xff] }
0x1654   : > { %9614 = vmatpush1.bf16.msra.mxu1 %v9613_v39  ;;  %v6012_v39 = vld [vmem:[%s13819_s4 + $0x70] sm:$0xff] }
0x1655   : > { %9616 = vmatprep.subr.bf16.mxu1 %v9615_v55  ;;  %v6017_v55 = vld [vmem:[%s13819_s4 + $0x98] sm:$0xff] }
0x1656   : > { %v9655_v58 = vpack.c.bf16 %v6017_v55, %v6015_v52  ;;  %v6051_v52 = vld [vmem:[%s13819_s4 + $0x1a8] sm:$0xff]  ;;  %v6053_v55 = vld [vmem:[%s13819_s4 + $0x1b8] sm:$0xff] }
0x1658   : > { %9618 = vmatpush1.bf16.msra.mxu1 %v9617_v59  ;;  %v6019_v59 = vld [vmem:[%s13819_s4 + $0xa8] sm:$0xff] }
0x1659   : > { %9620 = vmatprep.subr.bf16.mxu1 %v9619_v60  ;;  %v6021_v60 = vld [vmem:[%s13819_s4 + $0xb8] sm:$0xff] }
0x165a   : > { %v9659_v11 = vpack.c.bf16 %v6021_v60, %v6019_v59  ;;  %v6055_v59 = vld [vmem:[%s13819_s4 + $0x1c8] sm:$0xff]  ;;  %v6057_v60 = vld [vmem:[%s13819_s4 + $0x1d8] sm:$0xff] }
0x165c   : > { %9622 = vmatpush1.bf16.msra.mxu1 %v9621_v62  ;;  %v6023_v62 = vld [vmem:[%s13819_s4 + $0xc8] sm:$0xff] }
0x165d   : > { %9624 = vmatprep.subr.bf16.mxu1 %v9623_v63  ;;  %v6025_v63 = vld [vmem:[%s13819_s4 + $0xd8] sm:$0xff] }
0x165e   : > { %v9663_v47 = vpack.c.bf16 %v6025_v63, %v6023_v62  ;;  %v6059_v62 = vld [vmem:[%s13819_s4 + $0x1e8] sm:$0xff]  ;;  %v6061_v63 = vld [vmem:[%s13819_s4 + $0x1f8] sm:$0xff] }
0x1660   : > { %9626 = vmatpush1.bf16.msra.mxu1 %v9625_v24  ;;  %v6027_v24 = vld [vmem:[%s13819_s4 + $0xe8] sm:$0xff] }
0x1661   : > { %9628 = vmatprep.subr.bf16.mxu1 %v9627_v18  ;;  %v6029_v18 = vld [vmem:[%s13819_s4 + $0xf8] sm:$0xff] }
0x1662   : > { %v9667_v0 = vpack.c.bf16 %v6029_v18, %v6027_v24  ;;  %v6063_v24 = vld [vmem:[%s13819_s4 + $0x208] sm:$0xff]  ;;  %v6065_v18 = vld [vmem:[%s13819_s4 + $0x218] sm:$0xff] }
0x1664   : > { %9630 = vmatpush1.bf16.msra.mxu1 %v9629_v9  ;;  %v6031_v9 = vld [vmem:[%s13819_s4 + $0x108] sm:$0xff] }
0x1665   : > { %9632 = vmatprep.subr.bf16.mxu1 %v9631_v10  ;;  %v6033_v10 = vld [vmem:[%s13819_s4 + $0x118] sm:$0xff] }
0x1666   : > { %v9671_v56 = vpack.c.bf16 %v6033_v10, %v6031_v9  ;;  %v6067_v9 = vld [vmem:[%s13819_s4 + $0x228] sm:$0xff]  ;;  %v6069_v10 = vld [vmem:[%s13819_s4 + $0x238] sm:$0xff] }
0x1668   : > { %9634 = vmatpush1.bf16.msra.mxu1 %v9633_v30  ;;  %v6035_v30 = vld [vmem:[%s13819_s4 + $0x128] sm:$0xff] }
0x1669   : > { %9636 = vmatprep.subr.bf16.mxu1 %v9635_v16  ;;  %v6037_v16 = vld [vmem:[%s13819_s4 + $0x138] sm:$0xff] }
0x166c   : > { %9638 = vmatpush1.bf16.msra.mxu1 %v9637_v42  ;;  %v9675_v42 = vpack.c.bf16 %v6037_v16, %v6035_v30  ;;  %v6071_v30 = vld [vmem:[%s13819_s4 + $0x248] sm:$0xff]  ;;  %v6073_v16 = vld [vmem:[%s13819_s4 + $0x258] sm:$0xff] }
0x166d   : > { %9640 = vmatprep.subr.bf16.mxu1 %v9639_v28  ;;  %v6034_v28 = vld [vmem:[%s13819_s4 + $0x120] sm:$0xff] }
0x166f   : > { %6480 = vmatmul.mubr.f32.vlgmr.msra.gmra.mrb[68].mxu1 %v13006_v31  ;;  %v6010_v31 = vld [vmem:[%s13819_s4 + $0x60] sm:$0xff] }
0x1670   : > { %9642 = vmatpush1.bf16.msra.mxu1 %v9641_v6  ;;  %6550 = vmatprep.mubr.f32.mxu1 %v12978_v38  ;;  %v9649_v38 = vpack.c.bf16 %v6008_v34, %v6006_v12  ;;  %v9653_v57 = vpack.c.bf16 %v6012_v39, %v6010_v31  ;;  %v9677_v6 = vpack.c.bf16 %v6036_v21, %v6034_v28  ;;  %v6042_v12 = vld [vmem:[%s13819_s4 + $0x160] sm:$0xff]  ;;  %v6044_v34 = vld [vmem:[%s13819_s4 + $0x170] sm:$0xff] }
0x1671   : > { %9644 = vmatprep.subr.bf16.mxu1 %v9643_v53  ;;  %v9679_v53 = vpack.c.bf16 %v6041_v4, %v6039_v17  ;;  %v6046_v31 = vld [vmem:[%s13819_s4 + $0x180] sm:$0xff]  ;;  %v6048_v39 = vld [vmem:[%s13819_s4 + $0x190] sm:$0xff] }
0x1672   : > { %v6070_v28 = vld [vmem:[%s13819_s4 + $0x240] sm:$0xff]  ;;  %v6072_v21 = vld [vmem:[%s13819_s4 + $0x250] sm:$0xff] }
0x1673   : > { %v9713_v17 = vpack.c.bf16 %v6072_v21, %v6070_v28 }
0x1674   : > { %9646 = vmatpush1.bf16.msra.mxu1 %v9645_v33  ;;  %v9681_v33 = vpack.c.bf16 %v6040_v3, %v6038_v51  ;;  %v6079_v51 = vld [vmem:[%s13819_s4 + $0x288] sm:$0xff]  ;;  %v6081_v3 = vld [vmem:[%s13819_s4 + $0x298] sm:$0xff] }
0x1675   : > { %9648 = vmatprep.subr.bf16.mxu1 %v9647_v41  ;;  %v9683_v41 = vpack.c.bf16 %v6045_v37, %v6043_v13  ;;  %v9719_v37 = vpack.c.bf16 %v6081_v3, %v6079_v51  ;;  %v8250_v51 = vld [vmem:[%s13819_s4 + $0x6a0] sm:$0xff]  ;;  %v8252_v3 = vld [vmem:[%s13819_s4 + $0x6b0] sm:$0xff] }
0x1678   : > { %9650 = vmatpush1.bf16.msra.mxu1 %v9649_v38  ;;  %v9685_v38 = vpack.c.bf16 %v6044_v34, %v6042_v12  ;;  %v6083_v12 = vld [vmem:[%s13819_s4 + $0x2a8] sm:$0xff]  ;;  %v6085_v34 = vld [vmem:[%s13819_s4 + $0x2b8] sm:$0xff] }
0x1679   : > { %9652 = vmatprep.subr.bf16.mxu1 %v9651_v50  ;;  %v9687_v50 = vpack.c.bf16 %v6049_v49, %v6047_v35  ;;  %v9723_v49 = vpack.c.bf16 %v6085_v34, %v6083_v12  ;;  %v8254_v12 = vld [vmem:[%s13819_s4 + $0x6c0] sm:$0xff]  ;;  %v8256_v34 = vld [vmem:[%s13819_s4 + $0x6d0] sm:$0xff] }
0x167c   : > { %9654 = vmatpush1.bf16.msra.mxu1 %v9653_v57  ;;  %v9689_v57 = vpack.c.bf16 %v6048_v39, %v6046_v31  ;;  %v6087_v31 = vld [vmem:[%s13819_s4 + $0x2c8] sm:$0xff]  ;;  %v6089_v39 = vld [vmem:[%s13819_s4 + $0x2d8] sm:$0xff] }
0x167d   : > { %9656 = vmatprep.subr.bf16.mxu1 %v9655_v58  ;;  %v9691_v58 = vpack.c.bf16 %v6053_v55, %v6051_v52  ;;  %v9727_v55 = vpack.c.bf16 %v6089_v39, %v6087_v31  ;;  %v8258_v31 = vld [vmem:[%s13819_s4 + $0x6e0] sm:$0xff]  ;;  %v8260_v39 = vld [vmem:[%s13819_s4 + $0x6f0] sm:$0xff] }
0x1680   : > { %9658 = vmatpush1.bf16.msra.mxu1 %v9657_v40  ;;  %v9693_v40 = vpack.c.bf16 %v6052_v61, %v6050_v36  ;;  %v6091_v36 = vld [vmem:[%s13819_s4 + $0x2e8] sm:$0xff]  ;;  %v6093_v61 = vld [vmem:[%s13819_s4 + $0x2f8] sm:$0xff] }
0x1681   : > { %9660 = vmatprep.subr.bf16.mxu1 %v9659_v11  ;;  %v9695_v11 = vpack.c.bf16 %v6057_v60, %v6055_v59  ;;  %v9731_v60 = vpack.c.bf16 %v6093_v61, %v6091_v36  ;;  %v8262_v36 = vld [vmem:[%s13819_s4 + $0x700] sm:$0xff]  ;;  %v8264_v61 = vld [vmem:[%s13819_s4 + $0x710] sm:$0xff] }
0x1684   : > { %9662 = vmatpush1.bf16.msra.mxu1 %v9661_v44  ;;  %v9697_v44 = vpack.c.bf16 %v6056_v22, %v6054_v1  ;;  %v8231_v1 = vld [vmem:[%s13819_s4 + $0x608] sm:$0xff]  ;;  %v8233_v22 = vld [vmem:[%s13819_s4 + $0x618] sm:$0xff] }
0x1685   : > { %9664 = vmatprep.subr.bf16.mxu1 %v9663_v47  ;;  %v9699_v47 = vpack.c.bf16 %v6061_v63, %v6059_v62  ;;  %v9745_v63 = vpack.c.bf16 %v8233_v22, %v8231_v1  ;;  %v8266_v1 = vld [vmem:[%s13819_s4 + $0x720] sm:$0xff]  ;;  %v8268_v22 = vld [vmem:[%s13819_s4 + $0x730] sm:$0xff] }
0x1688   : > { %9666 = vmatpush1.bf16.msra.mxu1 %v9665_v43  ;;  %v9701_v43 = vpack.c.bf16 %v6060_v45, %v6058_v48  ;;  %v8235_v48 = vld [vmem:[%s13819_s4 + $0x628] sm:$0xff]  ;;  %v8237_v45 = vld [vmem:[%s13819_s4 + $0x638] sm:$0xff] }
0x1689   : > { %9668 = vmatprep.subr.bf16.mxu1 %v9667_v0  ;;  %v9703_v0 = vpack.c.bf16 %v6065_v18, %v6063_v24  ;;  %v9749_v18 = vpack.c.bf16 %v8237_v45, %v8235_v48  ;;  %v8270_v48 = vld [vmem:[%s13819_s4 + $0x740] sm:$0xff]  ;;  %v8272_v45 = vld [vmem:[%s13819_s4 + $0x750] sm:$0xff] }
0x168c   : > { %9670 = vmatpush1.bf16.msra.mxu1 %v9669_v15  ;;  %v9705_v15 = vpack.c.bf16 %v6064_v8, %v6062_v2  ;;  %v8239_v2 = vld [vmem:[%s13819_s4 + $0x648] sm:$0xff]  ;;  %v8241_v8 = vld [vmem:[%s13819_s4 + $0x658] sm:$0xff] }
0x168d   : > { %9672 = vmatprep.subr.bf16.mxu1 %v9671_v56  ;;  %v9707_v56 = vpack.c.bf16 %v6069_v10, %v6067_v9  ;;  %v9753_v10 = vpack.c.bf16 %v8241_v8, %v8239_v2  ;;  %v8274_v2 = vld [vmem:[%s13819_s4 + $0x760] sm:$0xff]  ;;  %v8276_v8 = vld [vmem:[%s13819_s4 + $0x770] sm:$0xff] }
0x1690   : > { %9674 = vmatpush1.bf16.msra.mxu1 %v9673_v29  ;;  %v9709_v29 = vpack.c.bf16 %v6068_v25, %v6066_v32  ;;  %v8243_v32 = vld [vmem:[%s13819_s4 + $0x668] sm:$0xff] }
0x1691   : > { %9676 = vmatprep.subr.bf16.mxu1 %v9675_v42  ;;  %v9711_v42 = vpack.c.bf16 %v6073_v16, %v6071_v30  ;;  %v8242_v30 = vld [vmem:[%s13819_s4 + $0x660] sm:$0xff]  ;;  %v8244_v16 = vld [vmem:[%s13819_s4 + $0x670] sm:$0xff] }
0x1692   : > { %v9759_v28 = vpack.c.bf16 %v8244_v16, %v8242_v30 }
0x1694   : > { %9678 = vmatpush1.bf16.msra.mxu1 %v9677_v6  ;;  %v6074_v6 = vld [vmem:[%s13819_s4 + $0x260] sm:$0xff] }
0x1695   : > { %9680 = vmatprep.subr.bf16.mxu1 %v9679_v53  ;;  %v6076_v53 = vld [vmem:[%s13819_s4 + $0x270] sm:$0xff] }
0x1696   : > { %v9717_v13 = vpack.c.bf16 %v6076_v53, %v6074_v6 }
0x1698   : > { %9682 = vmatpush1.bf16.msra.mxu1 %v9681_v33  ;;  %v6078_v33 = vld [vmem:[%s13819_s4 + $0x280] sm:$0xff] }
0x1699   : > { %9684 = vmatprep.subr.bf16.mxu1 %v9683_v41  ;;  %v6080_v41 = vld [vmem:[%s13819_s4 + $0x290] sm:$0xff] }
0x169a   : > { %v9721_v35 = vpack.c.bf16 %v6080_v41, %v6078_v33  ;;  %v9767_v33 = vpack.c.bf16 %v8252_v3, %v8250_v51 }
0x169c   : > { %9686 = vmatpush1.bf16.msra.mxu1 %v9685_v38  ;;  %v6082_v38 = vld [vmem:[%s13819_s4 + $0x2a0] sm:$0xff] }
0x169d   : > { %9688 = vmatprep.subr.bf16.mxu1 %v9687_v50  ;;  %v6084_v50 = vld [vmem:[%s13819_s4 + $0x2b0] sm:$0xff] }
0x169e   : > { %v9725_v52 = vpack.c.bf16 %v6084_v50, %v6082_v38  ;;  %v9771_v38 = vpack.c.bf16 %v8256_v34, %v8254_v12 }
0x16a0   : > { %9690 = vmatpush1.bf16.msra.mxu1 %v9689_v57  ;;  %v6086_v57 = vld [vmem:[%s13819_s4 + $0x2c0] sm:$0xff] }
0x16a1   : > { %9692 = vmatprep.subr.bf16.mxu1 %v9691_v58  ;;  %v6088_v58 = vld [vmem:[%s13819_s4 + $0x2d0] sm:$0xff] }
0x16a2   : > { %v9729_v59 = vpack.c.bf16 %v6088_v58, %v6086_v57  ;;  %v9775_v57 = vpack.c.bf16 %v8260_v39, %v8258_v31 }
0x16a4   : > { %9694 = vmatpush1.bf16.msra.mxu1 %v9693_v40  ;;  %v6090_v40 = vld [vmem:[%s13819_s4 + $0x2e0] sm:$0xff] }
0x16a5   : > { %9696 = vmatprep.subr.bf16.mxu1 %v9695_v11  ;;  %v6092_v11 = vld [vmem:[%s13819_s4 + $0x2f0] sm:$0xff] }
0x16a6   : > { %v9733_v62 = vpack.c.bf16 %v6092_v11, %v6090_v40  ;;  %v9779_v40 = vpack.c.bf16 %v8264_v61, %v8262_v36 }
0x16a8   : > { %9698 = vmatpush1.bf16.msra.mxu1 %v9697_v44  ;;  %v8230_v44 = vld [vmem:[%s13819_s4 + $0x600] sm:$0xff] }
0x16a9   : > { %9700 = vmatprep.subr.bf16.mxu1 %v9699_v47  ;;  %v8232_v47 = vld [vmem:[%s13819_s4 + $0x610] sm:$0xff] }
0x16aa   : > { %v9747_v24 = vpack.c.bf16 %v8232_v47, %v8230_v44  ;;  %v9783_v44 = vpack.c.bf16 %v8268_v22, %v8266_v1  ;;  %v8306_v22 = vld [vmem:[%s13819_s4 + $0x860] sm:$0xff] }
0x16ac   : > { %9702 = vmatpush1.bf16.msra.mxu1 %v9701_v43  ;;  %v8234_v43 = vld [vmem:[%s13819_s4 + $0x620] sm:$0xff] }
0x16ad   : > { %9704 = vmatprep.subr.bf16.mxu1 %v9703_v0  ;;  %v8236_v0 = vld [vmem:[%s13819_s4 + $0x630] sm:$0xff] }
0x16ae   : > { %v9751_v9 = vpack.c.bf16 %v8236_v0, %v8234_v43  ;;  %v9787_v43 = vpack.c.bf16 %v8272_v45, %v8270_v48  ;;  %v8310_v45 = vld [vmem:[%s13819_s4 + $0x880] sm:$0xff] }
0x16af   : > { %6551 = vmatmul.mubr.f32.vlgmr.msra.gmra.mrb[68].mxu1 %v12976_v19  ;;  %v6077_v19 = vld [vmem:[%s13819_s4 + $0x278] sm:$0xff] }
0x16b0   : > { %9706 = vmatpush1.bf16.msra.mxu1 %v9705_v15  ;;  %6621 = vmatprep.mubr.f32.mxu1 %v10039_v20  ;;  %v9715_v4 = vpack.c.bf16 %v6077_v19, %v6075_v5  ;;  %v8238_v15 = vld [vmem:[%s13819_s4 + $0x640] sm:$0xff]  ;;  %v8248_v19 = vld [vmem:[%s13819_s4 + $0x690] sm:$0xff] }
0x16b1   : > { %9708 = vmatprep.subr.bf16.mxu1 %v9707_v56  ;;  %v8240_v56 = vld [vmem:[%s13819_s4 + $0x650] sm:$0xff]  ;;  %v8246_v5 = vld [vmem:[%s13819_s4 + $0x680] sm:$0xff] }
0x16b2   : > { %v9763_v6 = vpack.c.bf16 %v8248_v19, %v8246_v5 }
0x16b4   : > { %9710 = vmatpush1.bf16.msra.mxu1 %v9709_v29  ;;  %v8247_v29 = vld [vmem:[%s13819_s4 + $0x688] sm:$0xff] }
0x16b5   : > { %9712 = vmatprep.subr.bf16.mxu1 %v9711_v42  ;;  %v8249_v42 = vld [vmem:[%s13819_s4 + $0x698] sm:$0xff] }
0x16b6   : > { %v9761_v21 = vpack.c.bf16 %v8249_v42, %v8247_v29  ;;  %v8282_v29 = vld [vmem:[%s13819_s4 + $0x7a0] sm:$0xff]  ;;  %v8284_v42 = vld [vmem:[%s13819_s4 + $0x7b0] sm:$0xff] }
0x16b7   : > { %v9799_v5 = vpack.c.bf16 %v8284_v42, %v8282_v29  ;;  %v8322_v42 = vld [vmem:[%s13819_s4 + $0x8e0] sm:$0xff] }
0x16b8   : > { %9714 = vmatpush1.bf16.msra.mxu1 %v9713_v17  ;;  %v8251_v17 = vld [vmem:[%s13819_s4 + $0x6a8] sm:$0xff] }
0x16b9   : > { %9716 = vmatprep.subr.bf16.mxu1 %v9715_v4  ;;  %v8253_v4 = vld [vmem:[%s13819_s4 + $0x6b8] sm:$0xff] }
0x16ba   : > { %v9765_v53 = vpack.c.bf16 %v8253_v4, %v8251_v17  ;;  %v8286_v17 = vld [vmem:[%s13819_s4 + $0x7c0] sm:$0xff]  ;;  %v8288_v4 = vld [vmem:[%s13819_s4 + $0x7d0] sm:$0xff] }
0x16bb   : > { %v9803_v51 = vpack.c.bf16 %v8288_v4, %v8286_v17  ;;  %v7022_v17 = vsel %vm1561_vm11, 1.0, %v10039_v20 }
0x16bc   : > { %9718 = vmatpush1.bf16.msra.mxu1 %v9717_v13  ;;  %v8255_v13 = vld [vmem:[%s13819_s4 + $0x6c8] sm:$0xff] }
0x16bd   : > { %9720 = vmatprep.subr.bf16.mxu1 %v9719_v37  ;;  %v8257_v37 = vld [vmem:[%s13819_s4 + $0x6d8] sm:$0xff] }
0x16be   : > { %v9769_v41 = vpack.c.bf16 %v8257_v37, %v8255_v13  ;;  %v8290_v13 = vld [vmem:[%s13819_s4 + $0x7e0] sm:$0xff]  ;;  %v8292_v37 = vld [vmem:[%s13819_s4 + $0x7f0] sm:$0xff] }
0x16bf   : > { %v9807_v12 = vpack.c.bf16 %v8292_v37, %v8290_v13  ;;  %v7028_v13 = vrot.slane %v10652_v26, 6 }
0x16c0   : > { %9722 = vmatpush1.bf16.msra.mxu1 %v9721_v35  ;;  %v8259_v35 = vld [vmem:[%s13819_s4 + $0x6e8] sm:$0xff] }
0x16c1   : > { %9724 = vmatprep.subr.bf16.mxu1 %v9723_v49  ;;  %v8261_v49 = vld [vmem:[%s13819_s4 + $0x6f8] sm:$0xff] }
0x16c2   : > { %v9773_v50 = vpack.c.bf16 %v8261_v49, %v8259_v35  ;;  %v8294_v35 = vld [vmem:[%s13819_s4 + $0x800] sm:$0xff]  ;;  %v8296_v49 = vld [vmem:[%s13819_s4 + $0x810] sm:$0xff] }
0x16c3   : > { %v9811_v31 = vpack.c.bf16 %v8296_v49, %v8294_v35 }
0x16c4   : > { %9726 = vmatpush1.bf16.msra.mxu1 %v9725_v52  ;;  %v8263_v52 = vld [vmem:[%s13819_s4 + $0x708] sm:$0xff] }
0x16c5   : > { %9728 = vmatprep.subr.bf16.mxu1 %v9727_v55  ;;  %v8265_v55 = vld [vmem:[%s13819_s4 + $0x718] sm:$0xff] }
0x16c6   : > { %v9777_v58 = vpack.c.bf16 %v8265_v55, %v8263_v52  ;;  %v8298_v52 = vld [vmem:[%s13819_s4 + $0x820] sm:$0xff]  ;;  %v8300_v55 = vld [vmem:[%s13819_s4 + $0x830] sm:$0xff] }
0x16c7   : > { %v9815_v36 = vpack.c.bf16 %v8300_v55, %v8298_v52  ;;  %v7359_v52 = vld [vmem:[%s13820_s5] sm:$0xff]  ;;  %v7360_v55 = vld [vmem:[%s13820_s5 + $0x8] sm:$0xff] }
0x16c8   : > { %9730 = vmatpush1.bf16.msra.mxu1 %v9729_v59  ;;  %v8267_v59 = vld [vmem:[%s13819_s4 + $0x728] sm:$0xff] }
0x16c9   : > { %9732 = vmatprep.subr.bf16.mxu1 %v9731_v60  ;;  %v8269_v60 = vld [vmem:[%s13819_s4 + $0x738] sm:$0xff] }
0x16ca   : > { %v9781_v11 = vpack.c.bf16 %v8269_v60, %v8267_v59  ;;  %v8302_v59 = vld [vmem:[%s13819_s4 + $0x840] sm:$0xff]  ;;  %v8304_v60 = vld [vmem:[%s13819_s4 + $0x850] sm:$0xff] }
0x16cc   : > { %9734 = vmatpush1.bf16.msra.mxu1 %v9733_v62  ;;  %v8271_v62 = vld [vmem:[%s13819_s4 + $0x748] sm:$0xff] }
0x16cd   : > { %9746 = vmatprep.subr.bf16.mxu1 %v9745_v63  ;;  %v8273_v63 = vld [vmem:[%s13819_s4 + $0x758] sm:$0xff] }
0x16ce   : > { %v9785_v47 = vpack.c.bf16 %v8273_v63, %v8271_v62  ;;  %v8308_v62 = vld [vmem:[%s13819_s4 + $0x870] sm:$0xff]  ;;  %v8311_v63 = vld [vmem:[%s13819_s4 + $0x888] sm:$0xff] }
0x16cf   : > { %6622 = vmatmul.mubr.f32.vlgmr.msra.gmra.mrb[68].mxu1 %v12980_v46  ;;  %v8245_v46 = vld [vmem:[%s13819_s4 + $0x678] sm:$0xff] }
0x16d0   : > { %9748 = vmatpush1.bf16.msra.mxu1 %v9747_v24  ;;  %6942 = vmatprep.mubr.f32.mxu1 %v13193_v27  ;;  %v9755_v27 = vpack.c.bf16 %v8240_v56, %v8238_v15  ;;  %v9757_v25 = vpack.c.bf16 %v8245_v46, %v8243_v32  ;;  %v8275_v24 = vld [vmem:[%s13819_s4 + $0x768] sm:$0xff]  ;;  %v9791_v15 = vpack.c.bf16 %v8276_v8, %v8274_v2  ;;  %v8278_v32 = vld [vmem:[%s13819_s4 + $0x780] sm:$0xff]  ;;  %v8280_v46 = vld [vmem:[%s13819_s4 + $0x790] sm:$0xff] }
0x16d1   : > { %9750 = vmatprep.subr.bf16.mxu1 %v9749_v18  ;;  %v8277_v18 = vld [vmem:[%s13819_s4 + $0x778] sm:$0xff]  ;;  %v9795_v30 = vpack.c.bf16 %v8280_v46, %v8278_v32  ;;  %v8314_v8 = vld [vmem:[%s13819_s4 + $0x8a0] sm:$0xff] }
0x16d2   : > { %v9789_v0 = vpack.c.bf16 %v8277_v18, %v8275_v24  ;;  %v8312_v24 = vld [vmem:[%s13819_s4 + $0x890] sm:$0xff]  ;;  %v8315_v18 = vld [vmem:[%s13819_s4 + $0x8a8] sm:$0xff]  ;;  %v8318_v46 = vld [vmem:[%s13819_s4 + $0x8c0] sm:$0xff] }
0x16d4   : > { %9752 = vmatpush1.bf16.msra.mxu1 %v9751_v9  ;;  %v8279_v9 = vld [vmem:[%s13819_s4 + $0x788] sm:$0xff] }
0x16d5   : > { %9754 = vmatprep.subr.bf16.mxu1 %v9753_v10  ;;  %v8281_v10 = vld [vmem:[%s13819_s4 + $0x798] sm:$0xff] }
0x16d6   : > { %v9793_v56 = vpack.c.bf16 %v8281_v10, %v8279_v9  ;;  %v8316_v9 = vld [vmem:[%s13819_s4 + $0x8b0] sm:$0xff]  ;;  %v8319_v10 = vld [vmem:[%s13819_s4 + $0x8c8] sm:$0xff] }
0x16d8   : > { %9756 = vmatpush1.bf16.msra.mxu1 %v9755_v27  ;;  %v8283_v27 = vld [vmem:[%s13819_s4 + $0x7a8] sm:$0xff] }
0x16d9   : > { %9758 = vmatprep.subr.bf16.mxu1 %v9757_v25  ;;  %v8285_v25 = vld [vmem:[%s13819_s4 + $0x7b8] sm:$0xff] }
0x16da   : > { %v9797_v16 = vpack.c.bf16 %v8285_v25, %v8283_v27  ;;  %v8320_v27 = vld [vmem:[%s13819_s4 + $0x8d0] sm:$0xff]  ;;  %v8323_v25 = vld [vmem:[%s13819_s4 + $0x8e8] sm:$0xff] }
0x16dc   : > { %9760 = vmatpush1.bf16.msra.mxu1 %v9759_v28  ;;  %v8287_v28 = vld [vmem:[%s13819_s4 + $0x7c8] sm:$0xff] }
0x16dd   : > { %9762 = vmatprep.subr.bf16.mxu1 %v9761_v21  ;;  %v8289_v21 = vld [vmem:[%s13819_s4 + $0x7d8] sm:$0xff] }
0x16de   : > { %v9801_v19 = vpack.c.bf16 %v8289_v21, %v8287_v28  ;;  %v8324_v28 = vld [vmem:[%s13819_s4 + $0x8f0] sm:$0xff] }
0x16df   : > { %v9839_v21 = vpack.c.bf16 %v8324_v28, %v8322_v42 }
0x16e0   : > { %9764 = vmatpush1.bf16.msra.mxu1 %v9763_v6  ;;  %v8291_v6 = vld [vmem:[%s13819_s4 + $0x7e8] sm:$0xff] }
0x16e1   : > { %9766 = vmatprep.subr.bf16.mxu1 %v9765_v53  ;;  %v8293_v53 = vld [vmem:[%s13819_s4 + $0x7f8] sm:$0xff] }
0x16e2   : > { %v9805_v3 = vpack.c.bf16 %v8293_v53, %v8291_v6 }
0x16e4   : > { %9768 = vmatpush1.bf16.msra.mxu1 %v9767_v33  ;;  %v8295_v33 = vld [vmem:[%s13819_s4 + $0x808] sm:$0xff] }
0x16e5   : > { %9770 = vmatprep.subr.bf16.mxu1 %v9769_v41  ;;  %v8297_v41 = vld [vmem:[%s13819_s4 + $0x818] sm:$0xff] }
0x16e6   : > { %v9809_v34 = vpack.c.bf16 %v8297_v41, %v8295_v33 }
0x16e8   : > { %9772 = vmatpush1.bf16.msra.mxu1 %v9771_v38  ;;  %v8299_v38 = vld [vmem:[%s13819_s4 + $0x828] sm:$0xff] }
0x16e9   : > { %9774 = vmatprep.subr.bf16.mxu1 %v9773_v50  ;;  %v8301_v50 = vld [vmem:[%s13819_s4 + $0x838] sm:$0xff] }
0x16ea   : > { %v9813_v39 = vpack.c.bf16 %v8301_v50, %v8299_v38 }
0x16ec   : > { %9776 = vmatpush1.bf16.msra.mxu1 %v9775_v57  ;;  %v8303_v57 = vld [vmem:[%s13819_s4 + $0x848] sm:$0xff] }
0x16ed   : > { %9778 = vmatprep.subr.bf16.mxu1 %v9777_v58  ;;  %v8305_v58 = vld [vmem:[%s13819_s4 + $0x858] sm:$0xff] }
0x16ee   : > { %v9817_v61 = vpack.c.bf16 %v8305_v58, %v8303_v57  ;;  %v7377_v57 = vld [vmem:[%s13820_s5 + $0x90] sm:$0xff]  ;;  %v7378_v58 = vld [vmem:[%s13820_s5 + $0x98] sm:$0xff] }
0x16f0   : > { %9780 = vmatpush1.bf16.msra.mxu1 %v9779_v40  ;;  %v8307_v40 = vld [vmem:[%s13819_s4 + $0x868] sm:$0xff] }
0x16f1   : > { %9782 = vmatprep.subr.bf16.mxu1 %v9781_v11  ;;  %v9819_v11 = vpack.c.bf16 %v8304_v60, %v8302_v59  ;;  %v9845_v60 = vpack.c.bf16 %v7378_v58, %v7377_v57 }
0x16f4   : > { %9784 = vmatpush1.bf16.msra.mxu1 %v9783_v44  ;;  %v8313_v44 = vld [vmem:[%s13819_s4 + $0x898] sm:$0xff] }
0x16f5   : > { %9786 = vmatprep.subr.bf16.mxu1 %v9785_v47  ;;  %v9823_v47 = vpack.c.bf16 %v8308_v62, %v8306_v22  ;;  %v9825_v48 = vpack.c.bf16 %v8313_v44, %v8311_v63  ;;  %v7380_v22 = vld [vmem:[%s13820_s5 + $0xa8] sm:$0xff]  ;;  %v7363_v63 = vld [vmem:[%s13820_s5 + $0x20] sm:$0xff] }
0x16f6   : > { %v7364_v44 = vld [vmem:[%s13820_s5 + $0x28] sm:$0xff] }
0x16f8   : > { %9788 = vmatpush1.bf16.msra.mxu1 %v9787_v43  ;;  %v8317_v43 = vld [vmem:[%s13819_s4 + $0x8b8] sm:$0xff] }
0x16f9   : > { %9790 = vmatprep.subr.bf16.mxu1 %v9789_v0  ;;  %v9827_v0 = vpack.c.bf16 %v8312_v24, %v8310_v45  ;;  %v9829_v2 = vpack.c.bf16 %v8317_v43, %v8315_v18  ;;  %v7382_v45 = vld [vmem:[%s13820_s5 + $0xb8] sm:$0xff]  ;;  %v7365_v24 = vld [vmem:[%s13820_s5 + $0x30] sm:$0xff] }
0x16fa   : > { %v7366_v43 = vld [vmem:[%s13820_s5 + $0x38] sm:$0xff] }
0x16fc   : > { %9792 = vmatpush1.bf16.msra.mxu1 %v9791_v15  ;;  %v8321_v15 = vld [vmem:[%s13819_s4 + $0x8d8] sm:$0xff] }
0x16fd   : > { %9794 = vmatprep.subr.bf16.mxu1 %v9793_v56  ;;  %v9831_v56 = vpack.c.bf16 %v8316_v9, %v8314_v8  ;;  %v9833_v32 = vpack.c.bf16 %v8321_v15, %v8319_v10  ;;  %v9855_v8 = vpack.c.bf16 %v7366_v43, %v7365_v24  ;;  %v7367_v10 = vld [vmem:[%s13820_s5 + $0x40] sm:$0xff]  ;;  %v7368_v15 = vld [vmem:[%s13820_s5 + $0x48] sm:$0xff] }
0x1700   : > { %9796 = vmatpush1.bf16.msra.mxu1 %v9795_v30  ;;  %v8325_v30 = vld [vmem:[%s13819_s4 + $0x8f8] sm:$0xff] }
0x1701   : > { %9798 = vmatprep.subr.bf16.mxu1 %v9797_v16  ;;  %v9835_v16 = vpack.c.bf16 %v8320_v27, %v8318_v46  ;;  %v9837_v29 = vpack.c.bf16 %v8325_v30, %v8323_v25  ;;  %v9859_v46 = vpack.c.bf16 %v7368_v15, %v7367_v10  ;;  %v7369_v25 = vld [vmem:[%s13820_s5 + $0x50] sm:$0xff]  ;;  %v7370_v30 = vld [vmem:[%s13820_s5 + $0x58] sm:$0xff] }
0x1702   : > { %v9863_v42 = vpack.c.bf16 %v7370_v30, %v7369_v25 }
0x1704   : > { %9800 = vmatpush1.bf16.msra.mxu1 %v9799_v5  ;;  %v7023_v5 = vsel %vm1561_vm11, 0.0, %v10043_v54 }
0x1705   : > { %9802 = vmatprep.subr.bf16.mxu1 %v9801_v19  ;;  %v7025_v19 = vrot.slane %v7023_v5, 7  ;;  %v7372_v5 = vld [vmem:[%s13820_s5 + $0x68] sm:$0xff] }
0x1707   : > { %v7027_v53 = vsel %vm1277_vm9, %v7022_v17, %v7025_v19  ;;  %v7389_v17 = vld [vmem:[%s13820_s5 + $0xf0] sm:$0xff] }
0x1708   : > { %9804 = vmatpush1.bf16.msra.mxu1 %v9803_v51 }
0x1709   : > { %9806 = vmatprep.subr.bf16.mxu1 %v9805_v3 }
0x170c   : > { %9808 = vmatpush1.bf16.msra.mxu1 %v9807_v12 }
0x170d   : > { %9810 = vmatprep.subr.bf16.mxu1 %v9809_v34  ;;  %v7030_v34 = vsel %vm363_vm1, %v10631_v14, %v7028_v13  ;;  %v7375_v14 = vld [vmem:[%s13820_s5 + $0x80] sm:$0xff] }
0x170f   : > { %6943 = vmatmul.mubr.f32.vlgmr.msra.gmra.mrb[68].mxu1 %v13191_v23  ;;  %v8309_v23 = vld [vmem:[%s13819_s4 + $0x878] sm:$0xff] }
0x1710   : > { %9812 = vmatpush1.bf16.msra.mxu1 %v9811_v31  ;;  %7013 = vmatprep.mubr.f32.mxu1 %v10039_v20  ;;  %v9821_v1 = vpack.c.bf16 %v8309_v23, %v8307_v40  ;;  %v7361_v40 = vld [vmem:[%s13820_s5 + $0x10] sm:$0xff]  ;;  %v7362_v23 = vld [vmem:[%s13820_s5 + $0x18] sm:$0xff] }
0x1711   : > { %9814 = vmatprep.subr.bf16.mxu1 %v9813_v39  ;;  %v7376_v39 = vld [vmem:[%s13820_s5 + $0x88] sm:$0xff] }
0x1714   : > { %9816 = vmatpush1.bf16.msra.mxu1 %v9815_v36  ;;  %v9841_v36 = vpack.c.bf16 %v7376_v39, %v7375_v14  ;;  %v7391_v39 = vld [vmem:[%s13820_s5 + $0x100] sm:$0x1] }
0x1715   : > { %9818 = vmatprep.subr.bf16.mxu1 %v9817_v61  ;;  %v9843_v61 = vpack.c.bf16 %v7360_v55, %v7359_v52 }
0x1718   : > { %9820 = vmatpush1.bf16.msra.mxu1 %v9819_v11  ;;  %v9847_v11 = vpack.c.bf16 %v7362_v23, %v7361_v40 }
0x1719   : > { %9822 = vmatprep.subr.bf16.mxu1 %v9821_v1  ;;  %v7379_v1 = vld [vmem:[%s13820_s5 + $0xa0] sm:$0xff] }
0x171a   : > { %v9849_v62 = vpack.c.bf16 %v7380_v22, %v7379_v1 }
0x171c   : > { %9824 = vmatpush1.bf16.msra.mxu1 %v9823_v47  ;;  %v9851_v47 = vpack.c.bf16 %v7364_v44, %v7363_v63 }
0x171d   : > { %9826 = vmatprep.subr.bf16.mxu1 %v9825_v48  ;;  %v7381_v48 = vld [vmem:[%s13820_s5 + $0xb0] sm:$0xff] }
0x171e   : > { %v9853_v18 = vpack.c.bf16 %v7382_v45, %v7381_v48 }
0x1720   : > { %9828 = vmatpush1.bf16.msra.mxu1 %v9827_v0  ;;  %v7383_v0 = vld [vmem:[%s13820_s5 + $0xc0] sm:$0xff] }
0x1721   : > { %9830 = vmatprep.subr.bf16.mxu1 %v9829_v2  ;;  %v7384_v2 = vld [vmem:[%s13820_s5 + $0xc8] sm:$0xff] }
0x1722   : > { %v9857_v9 = vpack.c.bf16 %v7384_v2, %v7383_v0 }
0x1724   : > { %9832 = vmatpush1.bf16.msra.mxu1 %v9831_v56  ;;  %v7385_v56 = vld [vmem:[%s13820_s5 + $0xd0] sm:$0xff] }
0x1725   : > { %9834 = vmatprep.subr.bf16.mxu1 %v9833_v32  ;;  %v7386_v32 = vld [vmem:[%s13820_s5 + $0xd8] sm:$0xff] }
0x1726   : > { %v9861_v27 = vpack.c.bf16 %v7386_v32, %v7385_v56 }
0x1728   : > { %9836 = vmatpush1.bf16.msra.mxu1 %v9835_v16  ;;  %v7387_v16 = vld [vmem:[%s13820_s5 + $0xe0] sm:$0xff] }
0x1729   : > { %9838 = vmatprep.subr.bf16.mxu1 %v9837_v29  ;;  %v7388_v29 = vld [vmem:[%s13820_s5 + $0xe8] sm:$0xff] }
0x172a   : > { %v9865_v28 = vpack.c.bf16 %v7388_v29, %v7387_v16 }
0x172c   : > { %9840 = vmatpush1.bf16.msra.mxu1 %v9839_v21  ;;  %v7371_v21 = vld [vmem:[%s13820_s5 + $0x60] sm:$0xff] }
0x172d   : > { %v9867_v19 = vpack.c.bf16 %v7372_v5, %v7371_v21 }
0x172f   : > { %7014 = vmatmul.mubr.f32.vlgmr.msra.gmra.mrb[68].mxu1 %v13195_v7 }
0x1802   : > { %v13670_v4 = vpop.f32.mrb[68].mxu1 }
0x1803   : > { %v13672_v6 = vpop.f32.mrb[69].mxu1  ;;  %v7111_v7 = vmul.f32 %v13670_v4, %v13670_v4 }
0x1804   : > { %v7112_v51 = vmul.f32 %v13672_v6, %v13672_v6  ;;  %8326 = vmatprep.subr.msk.mxu0 %vm541_vm5, %v13672_v6 }
0x1805   : > { %8327 = vmatpush1.msk.msra.mxu0 %vm541_vm5, %v13670_v4 }
0x1806   : > { %8328 = vmatmul.mubr.msk.f32.vlgmr.msra.gmra.mrb[88].mxu0 %vm5300_vm13, %v7027_v53  ;;  %8329 = vmatprep.subr.msk.mxu0 %vm541_vm5, %v7112_v51 }
0x1807   : > { %8330 = vmatpush1.msk.msra.mxu0 %vm541_vm5, %v7111_v7  ;;  %7183 = vmatprep.mubr.f32.mxu0 %v10039_v20  ;;  %v7373_v7 = vld [vmem:[%s13820_s5 + $0x70] sm:$0xff] }
0x1808   : > { %8796 = vmatprep.subr.mxu0 %v10039_v20 }
0x180a   : > { %8331 = vmatmul.mubr.msk.f32.vlgmr.msra.gmra.mrb[90].mxu0 %vm5300_vm13, %v7027_v53  ;;  %v7390_v53 = vld [vmem:[%s13820_s5 + $0xf8] sm:$0xff] }
0x180b   : > { %8798 = vmatprep.mubr.msk.f32.mxu0 %vm10040_vm2, %v10039_v20  ;;  %v9869_v51 = vpack.c.bf16 %v7390_v53, %v7389_v17 }
0x18d9   : > { %v7106_v3 = vpop.f32.mrb[88].mxu0 }
0x18da   : > { %v7108_v37 = vpop.f32.mrb[89].mxu0 }
0x18db   : > { %v7192_v33 = vadd.f32 %v7108_v37, %v7106_v3  ;;  %v7374_v3 = vld [vmem:[%s13820_s5 + $0x78] sm:$0xff] }
0x18dc   : > { %v9871_v13 = vpack.c.bf16 %v7374_v3, %v7373_v7 }
0x18dd   : > { %v7194_v41 = vmul.f32 0.25, %v7192_v33  ;;  %v7185_v12 = vpop.f32.mrb[90].mxu0 }
0x18de   : > { %v7187_v35 = vpop.f32.mrb[91].mxu0 }
0x18df   : > { %v7193_v49 = vadd.f32 %v7187_v35, %v7185_v12  ;;  %8797 = vmatpush3.msk.msra.mxu0 %vm363_vm1, %v7194_v41  ;;  %v7196_v38 = vmul.f32 %v7194_v41, %v7194_v41 }
0x18e0   : > { %8799 = vmatmul.mubr.msk.f32.vlgmr.msra.gmra.mrb[92].mxu0 %vm1561_vm11, %v7030_v34  ;;  %8801 = vmatprep.subr.mxu0 %v10039_v20 }
0x18e1   : > { %v7195_v50 = vmul.f32 0.25, %v7193_v49  ;;  %8803 = vmatprep.mubr.msk.f32.mxu0 %vm10040_vm2, %v10039_v20 }
0x18e3   : > { %v7197_v26 = vsub.f32 %v7195_v50, %v7196_v38 }
0x18e5   : > { %v7198_v31 = vadd.f32 1e-05, %v7197_v26 }
0x18e7   : > { %10027 = vrsqrt.f32 %v7198_v31 }
0x18f1   : > { %v10028_v59 = vpop.eup %10027 }
0x18f2   : > { %8802 = vmatpush3.msk.msra.mxu0 %vm363_vm1, %v10028_v59 }
0x18f3   : > { %8804 = vmatmul.mubr.msk.f32.vlgmr.msra.gmra.mrb[94].mxu0 %vm1561_vm11, %v7030_v34  ;;  %9842 = vmatprep.subr.bf16.mxu0 %v9841_v36  ;;  %vm13833_vm11 = vcmask 7168  }
0x18f4   : > { %9844 = vmatpush3.bf16.msra.mxu0 %v9843_v61 }
0x18f5   : > { %9846 = vmatprep.subr.bf16.mxu0 %v9845_v60 }
0x18f8   : > { %9848 = vmatpush3.bf16.msra.mxu0 %v9847_v11 }
0x18f9   : > { %9850 = vmatprep.subr.bf16.mxu0 %v9849_v62 }
0x18fc   : > { %9852 = vmatpush3.bf16.msra.mxu0 %v9851_v47 }
0x18fd   : > { %9854 = vmatprep.subr.bf16.mxu0 %v9853_v18 }
0x1900   : > { %9856 = vmatpush3.bf16.msra.mxu0 %v9855_v8 }
0x1901   : > { %9858 = vmatprep.subr.bf16.mxu0 %v9857_v9 }
0x1904   : > { %9860 = vmatpush3.bf16.msra.mxu0 %v9859_v46 }
0x1905   : > { %9862 = vmatprep.subr.bf16.mxu0 %v9861_v27 }
0x1908   : > { %9864 = vmatpush3.bf16.msra.mxu0 %v9863_v42 }
0x1909   : > { %9866 = vmatprep.subr.bf16.mxu0 %v9865_v28 }
0x190c   : > { %9868 = vmatpush3.bf16.msra.mxu0 %v9867_v19 }
0x190d   : > { %9870 = vmatprep.subr.bf16.mxu0 %v9869_v51 }
0x1910   : > { %9872 = vmatpush3.bf16.msra.mxu0 %v9871_v13 }
0x1911   : > { %8806 = vmatprep.subr.mxu0 %v10039_v20 }
0x19b3   : > { %v7272_v37 = vpop.f32.mrb[92].mxu0 }
0x19b4   : > { %v7349_v33 = vsub.f32 %v13670_v4, %v7272_v37  ;;  %v7350_v41 = vsub.f32 %v13672_v6, %v7272_v37  ;;  %v8800_v12 = vpop.f32.mrb[93].mxu0 }
0x19c6   : > { %v7345_v34 = vpop.f32.mrb[94].mxu0 }
0x19c7   : > { %v7351_v35 = vmul.f32 %v7349_v33, %v7345_v34  ;;  %v7352_v49 = vmul.f32 %v7350_v41, %v7345_v34  ;;  %v8805_v38 = vpop.f32.mrb[95].mxu0 }
0x19c9   : > { %v7355_v50 = vmul.f32 0.2, %v7351_v35  ;;  %vm7354_vm1 = vcmp.ge.f32.partialorder %v7352_v49, 0.0  ;;  %v7356_v26 = vmul.f32 0.2, %v7352_v49  ;;  %vm7353_vm5 = vcmp.ge.f32.partialorder %v7351_v35, 0.0 }
0x19cb   : > { %v7358_v31 = vsel %vm7354_vm1, %v7352_v49, %v7356_v26  ;;  %v7357_v14 = vsel %vm7353_vm5, %v7351_v35, %v7355_v50 }
0x19cc   : > { %7462 = vmatprep.mubr.f32.mxu0 %v7358_v31 }
0x19cd   : > { %7463 = vmatmul.mubr.f32.vlgmr.msra.gmra.mrb[96].mxu0 %v7357_v14 }
0x19ce   : > { %8807 = vmatpush3.msk.msra.mxu0 %vm1277_vm9, %v7391_v39  ;;  %8808 = vmatprep.mubr.msk.f32.mxu0 %vm10040_vm2, %v10039_v20 }
0x19d1   : > { %8809 = vmatmul.mubr.msk.f32.vlgmr.msra.gmra.mrb[98].mxu0 %vm13833_vm11, %v10043_v54 }
0x1aa0   : > { %v8512_v4 = vpop.f32.mrb[96].mxu0 }
0x1aa1   : > { %v8513_v6 = vpop.f32.mrb[97].mxu0 }
0x1aa2   : > { %v8514_v52 = vadd.f32 %v8513_v6, %v8512_v4 }
0x1aa4   : > { %v7534_v55 = vpop.f32.mrb[98].mxu0 }
0x1aa5   : > { %v7535_v57 = vadd.f32 %v8514_v52, %v7534_v55  ;;  %v8810_v58 = vpop.f32.mrb[99].mxu0 }
0x1aa7   : > { %7539 = vst.msk [vmem:[%s249_s24] sm:$0xf] %vm7538_vm15, %v7535_v57 }
0x1aa8 PF: > { %s16_s21 = sadd.s32 1, %s10035_s21  }
0x1aa9   : > { %p13_p4 = scmp.ge.s32.totalorder %s16_s21, 4  }
0x1aab   :  { %15 = sbr.rel (!%p13_p4) target bundleno = 1 (0x1), region = 82 }

</bundles_post_ra>
